<compile_context>
chip_gen: v7x
topology: tpu7x:2x2x1
jax: 0.10.0
libtpu: 0.0.40
codegen_flags: <defaults>
</compile_context>

<pallas_src>
import math
import functools

import jax
import jax.numpy as jnp
from jax.experimental import pallas as pl
from jax.experimental.pallas import tpu as pltpu


def sra3_fused_kernel(state_ref, w_ref, b_ref, n1_ref, aux_ref,
                      out_state_ref, drift1_ref, state_acc, *, dt, tchunk):
    """One grid point = TCHUNK SRA3 steps for one batch tile."""
    c = pl.program_id(1)                        # time-chunk index (sequential)
    sqrtdt = math.sqrt(dt)
    dz_coef = 0.5 * sqrtdt / math.sqrt(3.0)

    # Carry the state in VMEM across the (arbitrary / sequential) time axis.
    @pl.when(c == 0)
    def _():
        state_acc[...] = state_ref[...].astype(jnp.float32)

    w = w_ref[...]                               # bf16 (D, D), VMEM-resident
    bias = b_ref[...].astype(jnp.float32)        # (1, D): broadcast in the add

    def drift(x):
        # bf16 x bf16 -> f32 MXU matmul; bias & RK math stay in f32.
        return jnp.dot(x.astype(w.dtype), w,
                       preferred_element_type=jnp.float32) + bias

    def step(s, carry):
        state, _ = carry
        dW = n1_ref[s].astype(jnp.float32) * sqrtdt
        dZ = 0.5 * dW + aux_ref[s].astype(jnp.float32) * dz_coef
        d1 = drift(state)
        s2 = state + d1 * dt
        d2 = drift(s2)
        s3 = state + 1.5 * dZ + (0.25 * d1 + 0.25 * d2) * dt
        d3 = drift(s3)
        dtot = d1 * (1.0 / 6.0) + d2 * (1.0 / 6.0) + d3 * (2.0 / 3.0)
        return state + dW + dtot * dt, d1        # carry new state + this step's drift_1

    state0 = state_acc[...]
    init = (state0, jnp.zeros_like(state0))
    new_state, last_d1 = jax.lax.fori_loop(0, tchunk, step, init,
                                           unroll=min(tchunk, 8))
    state_acc[...] = new_state

    # HBM outputs written once per batch tile, on the last time chunk.
    @pl.when(c == pl.num_programs(1) - 1)
    def _():
        out_state_ref[...] = new_state.astype(out_state_ref.dtype)
        drift1_ref[...] = last_d1.astype(drift1_ref.dtype)


def _choose_tile_b(B, max_tile):
    """Largest multiple-of-8 divisor of B <= max_tile; keep >=2 tiles when
    possible so v7x's two TensorCores both get work via the 'parallel' axis."""
    divisors = [t for t in range(8, min(B, max_tile) + 1, 8) if B % t == 0]
    if not divisors:
        return B                                  # tiny batch: one full block
    at_least_two = [t for t in divisors if B // t >= 2]
    return max(at_least_two) if at_least_two else max(divisors)


def _choose_tchunk(T, max_chunk):
    for c in range(min(T, max_chunk), 0, -1):
        if T % c == 0:
            return c
    return 1


def prepare_noise(noise1, aux, strong):
    """Downcast the Brownian streams (the dominant HBM traffic):
    bf16 noise halves bytes; the +/-1 Rademacher aux is exact in int8.
    NOTE: int8 aux prefers tile_b % 32 == 0 (int8 sublane tiling)."""
    n1 = noise1.astype(jnp.bfloat16)
    a = aux.astype(jnp.bfloat16) if strong else aux.astype(jnp.int8)
    return n1, a


def sra3_fused(state, w, b, noise1, aux, dt, *, max_tile_b=1024, max_tchunk=8,
               matmul_dtype=jnp.bfloat16):
    """Run T fused SRA3 steps.

    Returns (state after T steps, drift_1 of the last step, dW of the last
    step) — the outputs of the module's forward on the final step.
    """
    T, B, D = noise1.shape
    assert state.shape == (B, D) and aux.shape == (T, B, D)
    assert w.shape == (D, D) and b.shape == (1, D)

    tile_b = _choose_tile_b(B, max_tile_b)
    nb = B // tile_b
    tchunk = _choose_tchunk(T, max_tchunk)
    n_chunks = T // tchunk

    w_mm = w.astype(matmul_dtype)                 # halves W's VMEM footprint
    kernel = functools.partial(sra3_fused_kernel, dt=float(dt), tchunk=tchunk)

    # Explicit VMEM budget (double-buffered ins/outs + scratch) with headroom;
    # clamp inside v7x's 64 MiB physical VMEM, above v5e's 16 MiB scoped default.
    isz = lambda a: jnp.dtype(a.dtype).itemsize
    blk_bytes = (2 * tile_b * D * 4                              # state
                 + 2 * D * D * isz(w_mm)                         # W
                 + 2 * D * 4                                     # b
                 + 2 * tchunk * tile_b * D * isz(noise1)         # noise
                 + 2 * tchunk * tile_b * D * isz(aux)            # aux
                 + 2 * 2 * tile_b * D * 4                        # 2 outputs
                 + tile_b * D * 4)                               # state carry
    vmem_limit = int(min(max(2 * blk_bytes, 32 << 20), 48 << 20))

    grid_spec = pltpu.PrefetchScalarGridSpec(
        num_scalar_prefetch=0,
        grid=(nb, n_chunks),
        in_specs=[
            pl.BlockSpec((tile_b, D), lambda i, c: (i, 0)),            # state (once/tile)
            pl.BlockSpec((D, D), lambda i, c: (0, 0)),                 # W (VMEM resident)
            pl.BlockSpec((1, D), lambda i, c: (0, 0)),                 # b (VMEM resident)
            pl.BlockSpec((tchunk, tile_b, D), lambda i, c: (c, i, 0)),  # noise slab
            pl.BlockSpec((tchunk, tile_b, D), lambda i, c: (c, i, 0)),  # aux slab
        ],
        out_specs=(
            pl.BlockSpec((tile_b, D), lambda i, c: (i, 0)),            # final state
            pl.BlockSpec((tile_b, D), lambda i, c: (i, 0)),            # drift_1 (last step)
        ),
        scratch_shapes=[pltpu.VMEM((tile_b, D), jnp.float32)],         # state carry
    )

    out_state, drift_1 = pl.pallas_call(
        kernel,
        out_shape=(jax.ShapeDtypeStruct((B, D), state.dtype),
                   jax.ShapeDtypeStruct((B, D), state.dtype)),
        grid_spec=grid_spec,
        compiler_params=pltpu.CompilerParams(
            dimension_semantics=("parallel", "arbitrary"),
            vmem_limit_bytes=vmem_limit),
    )(state, w_mm, b, noise1, aux)

    # dW of the last step: recomputed from the SAME downcast noise values with
    # the exact in-kernel formula, so the kernel needs no third output stream.
    dW = noise1[-1].astype(jnp.float32) * math.sqrt(float(dt))
    return out_state, drift_1, dW


def sra3_reference(state, w, b, noise1, aux, dt, matmul_dtype=jnp.bfloat16):
    """Pure-JAX reference: T sequential SRA3 steps on the same downcast inputs
    and the same bf16-weight matmul path."""
    sqrtdt = math.sqrt(dt)
    w_mm = w.astype(matmul_dtype)

    def drift(x):
        return jnp.dot(x.astype(matmul_dtype), w_mm,
                       preferred_element_type=jnp.float32) + b

    state = state.astype(jnp.float32)
    d1 = dW = None
    for t in range(noise1.shape[0]):
        dW = noise1[t].astype(jnp.float32) * sqrtdt
        dZ = 0.5 * dW + 0.5 * aux[t].astype(jnp.float32) * (sqrtdt / math.sqrt(3.0))
        d1 = drift(state)
        s2 = state + d1 * dt
        d2 = drift(s2)
        s3 = state + 1.5 * dZ + (0.25 * d1 + 0.25 * d2) * dt
        d3 = drift(s3)
        dtot = d1 / 6.0 + d2 / 6.0 + d3 * (2.0 / 3.0)
        state = state + dW + dtot * dt
    return state, d1, dW


if __name__ == "__main__":
    T, B, D = 16, 256, 128          # 2 batch tiles x 2 time chunks of 8 steps
    dt = 0.01
    strong = True                    # hparams.strong

    key = jax.random.PRNGKey(0)
    k_state, k_w, k_b, k_n1, k_n2 = jax.random.split(key, 5)

    state = jax.random.normal(k_state, (B, D), dtype=jnp.float32)
    # deterministic drift_fn parameters (synthetic affine drift x @ W + b)
    w = jax.random.normal(k_w, (D, D), dtype=jnp.float32) * (1.0 / math.sqrt(D))
    b = jax.random.normal(k_b, (1, D), dtype=jnp.float32) * 0.01

    noise1 = jax.random.normal(k_n1, (T, B, D), dtype=jnp.float32)
    if strong:
        aux = jax.random.normal(k_n2, (T, B, D), dtype=jnp.float32)
    else:
        # s = 2 * randint(0, 2) - 1  (Rademacher)
        aux = (2 * jax.random.randint(k_n2, (T, B, D), 0, 2) - 1).astype(jnp.float32)

    n1_lp, aux_lp = prepare_noise(noise1, aux, strong)

    out_state, drift_1, dW = sra3_fused(state, w, b, n1_lp, aux_lp, dt)
    jax.block_until_ready((out_state, drift_1, dW))

    ref_state, ref_d1, ref_dW = sra3_reference(state, w, b, n1_lp, aux_lp, dt)

    # dW is computed from identical downcast values with the identical formula.
    assert jnp.allclose(dW, ref_dW, atol=1e-6, rtol=1e-6)
    # bf16 weights + bf16 re-quantisation of the carried state make the kernel
    # and the XLA reference drift apart by a few 1e-3 over T steps (documented
    # perf choice); tolerances sized accordingly (values are O(1)).
    err_state = float(jnp.max(jnp.abs(out_state - ref_state)))
    err_drift = float(jnp.max(jnp.abs(drift_1 - ref_d1)))
    assert jnp.allclose(out_state, ref_state, atol=5e-2, rtol=5e-2), err_state
    assert jnp.allclose(drift_1, ref_d1, atol=5e-2, rtol=5e-2), err_drift

    print("KERNEL_OK")
</pallas_src>

<mosaic_0001>
module attributes {stable_mosaic.version = 11 : i64} {
  func.func @sra3_fused_kernel(%arg0: i32, %arg1: i32, %arg2: memref<128x128xf32, #tpu.memory_space<vmem>>, %arg3: memref<128x128xbf16, #tpu.memory_space<vmem>>, %arg4: memref<1x128xf32, #tpu.memory_space<vmem>>, %arg5: memref<8x128x128xbf16, #tpu.memory_space<vmem>>, %arg6: memref<8x128x128xbf16, #tpu.memory_space<vmem>>, %arg7: memref<128x128xf32, #tpu.memory_space<vmem>>, %arg8: memref<128x128xf32, #tpu.memory_space<vmem>>, %arg9: memref<128x128xf32, #tpu.memory_space<vmem>>) attributes {dimension_semantics = [#tpu.dimension_semantics<parallel>, #tpu.dimension_semantics<arbitrary>], iteration_bounds = array<i64: 2, 2>, scalar_prefetch = 0 : i64, scratch_operands = 1 : i64, tpu.core_type = #tpu.core_type<tc>, window_params = [{transform_indices = @transform_0, window_bounds = array<i64: 128, 128>}, {pipeline_mode = #tpu.pipeline_mode<synchronous>, transform_indices = @transform_1, window_bounds = array<i64: 128, 128>}, {pipeline_mode = #tpu.pipeline_mode<synchronous>, transform_indices = @transform_2, window_bounds = array<i64: 1, 128>}, {transform_indices = @transform_3, window_bounds = array<i64: 8, 128, 128>}, {transform_indices = @transform_4, window_bounds = array<i64: 8, 128, 128>}, {transform_indices = @transform_5, window_bounds = array<i64: 128, 128>}, {transform_indices = @transform_6, window_bounds = array<i64: 128, 128>}]} {
    %c0_i32 = arith.constant 0 : i32
    %0 = arith.cmpi eq, %arg1, %c0_i32 : i32
    %1 = arith.extui %0 : i1 to i32
    %c0_i32_0 = arith.constant 0 : i32
    %2 = arith.cmpi ne, %1, %c0_i32_0 : i32
    scf.if %2 {
      %c0_163 = arith.constant 0 : index
      %c0_164 = arith.constant 0 : index
      %435 = vector.load %arg2[%c0_163, %c0_164] : memref<128x128xf32, #tpu.memory_space<vmem>>, vector<128x128xf32>
      %c0_165 = arith.constant 0 : index
      %c0_166 = arith.constant 0 : index
      %436 = vector.load %arg9[%c0_165, %c0_166] : memref<128x128xf32, #tpu.memory_space<vmem>>, vector<128x128xf32>
      tpu.vector_store %arg9[%c0_165, %c0_166], %435 {strides = array<i32>} : memref<128x128xf32, #tpu.memory_space<vmem>>, vector<128x128xf32>,
    } else {
    }
    %c0 = arith.constant 0 : index
    %c0_1 = arith.constant 0 : index
    %3 = vector.load %arg3[%c0, %c0_1] : memref<128x128xbf16, #tpu.memory_space<vmem>>, vector<128x128xbf16>
    %c0_2 = arith.constant 0 : index
    %c0_3 = arith.constant 0 : index
    %4 = vector.load %arg4[%c0_2, %c0_3] : memref<1x128xf32, #tpu.memory_space<vmem>>, vector<1x128xf32>
    %c0_4 = arith.constant 0 : index
    %c0_5 = arith.constant 0 : index
    %5 = vector.load %arg9[%c0_4, %c0_5] : memref<128x128xf32, #tpu.memory_space<vmem>>, vector<128x128xf32>
    %cst = arith.constant 0.000000e+00 : f32
    %6 = vector.broadcast %cst : f32 to vector<128x128xf32>
    %c0_i32_6 = arith.constant 0 : i32
    %7 = arith.index_cast %c0_i32_6 : i32 to index
    %c0_7 = arith.constant 0 : index
    %c0_8 = arith.constant 0 : index
    %8 = vector.load %arg5[%7, %c0_7, %c0_8] : memref<8x128x128xbf16, #tpu.memory_space<vmem>>, vector<1x128x128xbf16>
    %9 = vector.shape_cast %8 : vector<1x128x128xbf16> to vector<128x128xbf16>
    %10 = arith.extf %9 : vector<128x128xbf16> to vector<128x128xf32>
    %cst_9 = arith.constant 1.000000e-01 : f32
    %11 = vector.broadcast %cst_9 : f32 to vector<128x128xf32>
    %12 = arith.mulf %10, %11 : vector<128x128xf32>
    %cst_10 = arith.constant 5.000000e-01 : f32
    %13 = vector.broadcast %cst_10 : f32 to vector<128x128xf32>
    %14 = arith.mulf %13, %12 : vector<128x128xf32>
    %15 = arith.index_cast %c0_i32_6 : i32 to index
    %c0_11 = arith.constant 0 : index
    %c0_12 = arith.constant 0 : index
    %16 = vector.load %arg6[%15, %c0_11, %c0_12] : memref<8x128x128xbf16, #tpu.memory_space<vmem>>, vector<1x128x128xbf16>
    %17 = vector.shape_cast %16 : vector<1x128x128xbf16> to vector<128x128xbf16>
    %18 = arith.extf %17 : vector<128x128xbf16> to vector<128x128xf32>
    %cst_13 = arith.constant 0.0288675129 : f32
    %19 = vector.broadcast %cst_13 : f32 to vector<128x128xf32>
    %20 = arith.mulf %18, %19 : vector<128x128xf32>
    %21 = arith.addf %14, %20 : vector<128x128xf32>
    %22 = arith.truncf %5 : vector<128x128xf32> to vector<128x128xbf16>
    %cst_14 = arith.constant dense<0.000000e+00> : vector<128x128xf32>
    %23 = tpu.matmul %22, %3, %cst_14 {dimension_numbers = #tpu.dot_dimension_numbers<[1], [0], [0], [1], [0, 0, 1, 1], [], []>} : vector<128x128xbf16>, vector<128x128xbf16>, vector<128x128xf32> -> vector<128x128xf32>
    %24 = vector.broadcast %4 : vector<1x128xf32> to vector<128x128xf32>
    %25 = arith.addf %23, %24 : vector<128x128xf32>
    %cst_15 = arith.constant 0.00999999977 : f32
    %26 = vector.broadcast %cst_15 : f32 to vector<128x128xf32>
    %27 = arith.mulf %25, %26 : vector<128x128xf32>
    %28 = arith.addf %5, %27 : vector<128x128xf32>
    %29 = arith.truncf %28 : vector<128x128xf32> to vector<128x128xbf16>
    %cst_16 = arith.constant dense<0.000000e+00> : vector<128x128xf32>
    %30 = tpu.matmul %29, %3, %cst_16 {dimension_numbers = #tpu.dot_dimension_numbers<[1], [0], [0], [1], [0, 0, 1, 1], [], []>} : vector<128x128xbf16>, vector<128x128xbf16>, vector<128x128xf32> -> vector<128x128xf32>
    %31 = vector.broadcast %4 : vector<1x128xf32> to vector<128x128xf32>
    %32 = arith.addf %30, %31 : vector<128x128xf32>
    %cst_17 = arith.constant 1.500000e+00 : f32
    %33 = vector.broadcast %cst_17 : f32 to vector<128x128xf32>
    %34 = arith.mulf %33, %21 : vector<128x128xf32>
    %35 = arith.addf %5, %34 : vector<128x128xf32>
    %cst_18 = arith.constant 2.500000e-01 : f32
    %36 = vector.broadcast %cst_18 : f32 to vector<128x128xf32>
    %37 = arith.mulf %36, %25 : vector<128x128xf32>
    %cst_19 = arith.constant 2.500000e-01 : f32
    %38 = vector.broadcast %cst_19 : f32 to vector<128x128xf32>
    %39 = arith.mulf %38, %32 : vector<128x128xf32>
    %40 = arith.addf %37, %39 : vector<128x128xf32>
    %cst_20 = arith.constant 0.00999999977 : f32
    %41 = vector.broadcast %cst_20 : f32 to vector<128x128xf32>
    %42 = arith.mulf %40, %41 : vector<128x128xf32>
    %43 = arith.addf %35, %42 : vector<128x128xf32>
    %44 = arith.truncf %43 : vector<128x128xf32> to vector<128x128xbf16>
    %cst_21 = arith.constant dense<0.000000e+00> : vector<128x128xf32>
    %45 = tpu.matmul %44, %3, %cst_21 {dimension_numbers = #tpu.dot_dimension_numbers<[1], [0], [0], [1], [0, 0, 1, 1], [], []>} : vector<128x128xbf16>, vector<128x128xbf16>, vector<128x128xf32> -> vector<128x128xf32>
    %46 = vector.broadcast %4 : vector<1x128xf32> to vector<128x128xf32>
    %47 = arith.addf %45, %46 : vector<128x128xf32>
    %cst_22 = arith.constant 0.166666672 : f32
    %48 = vector.broadcast %cst_22 : f32 to vector<128x128xf32>
    %49 = arith.mulf %25, %48 : vector<128x128xf32>
    %cst_23 = arith.constant 0.166666672 : f32
    %50 = vector.broadcast %cst_23 : f32 to vector<128x128xf32>
    %51 = arith.mulf %32, %50 : vector<128x128xf32>
    %52 = arith.addf %49, %51 : vector<128x128xf32>
    %cst_24 = arith.constant 0.666666686 : f32
    %53 = vector.broadcast %cst_24 : f32 to vector<128x128xf32>
    %54 = arith.mulf %47, %53 : vector<128x128xf32>
    %55 = arith.addf %52, %54 : vector<128x128xf32>
    %56 = arith.addf %5, %12 : vector<128x128xf32>
    %cst_25 = arith.constant 0.00999999977 : f32
    %57 = vector.broadcast %cst_25 : f32 to vector<128x128xf32>
    %58 = arith.mulf %55, %57 : vector<128x128xf32>
    %59 = arith.addf %56, %58 : vector<128x128xf32>
    %c1_i32 = arith.constant 1 : i32
    %60 = arith.index_cast %c1_i32 : i32 to index
    %c0_26 = arith.constant 0 : index
    %c0_27 = arith.constant 0 : index
    %61 = vector.load %arg5[%60, %c0_26, %c0_27] : memref<8x128x128xbf16, #tpu.memory_space<vmem>>, vector<1x128x128xbf16>
    %62 = vector.shape_cast %61 : vector<1x128x128xbf16> to vector<128x128xbf16>
    %63 = arith.extf %62 : vector<128x128xbf16> to vector<128x128xf32>
    %cst_28 = arith.constant 1.000000e-01 : f32
    %64 = vector.broadcast %cst_28 : f32 to vector<128x128xf32>
    %65 = arith.mulf %63, %64 : vector<128x128xf32>
    %cst_29 = arith.constant 5.000000e-01 : f32
    %66 = vector.broadcast %cst_29 : f32 to vector<128x128xf32>
    %67 = arith.mulf %66, %65 : vector<128x128xf32>
    %68 = arith.index_cast %c1_i32 : i32 to index
    %c0_30 = arith.constant 0 : index
    %c0_31 = arith.constant 0 : index
    %69 = vector.load %arg6[%68, %c0_30, %c0_31] : memref<8x128x128xbf16, #tpu.memory_space<vmem>>, vector<1x128x128xbf16>
    %70 = vector.shape_cast %69 : vector<1x128x128xbf16> to vector<128x128xbf16>
    %71 = arith.extf %70 : vector<128x128xbf16> to vector<128x128xf32>
    %cst_32 = arith.constant 0.0288675129 : f32
    %72 = vector.broadcast %cst_32 : f32 to vector<128x128xf32>
    %73 = arith.mulf %71, %72 : vector<128x128xf32>
    %74 = arith.addf %67, %73 : vector<128x128xf32>
    %75 = arith.truncf %59 : vector<128x128xf32> to vector<128x128xbf16>
    %cst_33 = arith.constant dense<0.000000e+00> : vector<128x128xf32>
    %76 = tpu.matmul %75, %3, %cst_33 {dimension_numbers = #tpu.dot_dimension_numbers<[1], [0], [0], [1], [0, 0, 1, 1], [], []>} : vector<128x128xbf16>, vector<128x128xbf16>, vector<128x128xf32> -> vector<128x128xf32>
    %77 = vector.broadcast %4 : vector<1x128xf32> to vector<128x128xf32>
    %78 = arith.addf %76, %77 : vector<128x128xf32>
    %cst_34 = arith.constant 0.00999999977 : f32
    %79 = vector.broadcast %cst_34 : f32 to vector<128x128xf32>
    %80 = arith.mulf %78, %79 : vector<128x128xf32>
    %81 = arith.addf %59, %80 : vector<128x128xf32>
    %82 = arith.truncf %81 : vector<128x128xf32> to vector<128x128xbf16>
    %cst_35 = arith.constant dense<0.000000e+00> : vector<128x128xf32>
    %83 = tpu.matmul %82, %3, %cst_35 {dimension_numbers = #tpu.dot_dimension_numbers<[1], [0], [0], [1], [0, 0, 1, 1], [], []>} : vector<128x128xbf16>, vector<128x128xbf16>, vector<128x128xf32> -> vector<128x128xf32>
    %84 = vector.broadcast %4 : vector<1x128xf32> to vector<128x128xf32>
    %85 = arith.addf %83, %84 : vector<128x128xf32>
    %cst_36 = arith.constant 1.500000e+00 : f32
    %86 = vector.broadcast %cst_36 : f32 to vector<128x128xf32>
    %87 = arith.mulf %86, %74 : vector<128x128xf32>
    %88 = arith.addf %59, %87 : vector<128x128xf32>
    %cst_37 = arith.constant 2.500000e-01 : f32
    %89 = vector.broadcast %cst_37 : f32 to vector<128x128xf32>
    %90 = arith.mulf %89, %78 : vector<128x128xf32>
    %cst_38 = arith.constant 2.500000e-01 : f32
    %91 = vector.broadcast %cst_38 : f32 to vector<128x128xf32>
    %92 = arith.mulf %91, %85 : vector<128x128xf32>
    %93 = arith.addf %90, %92 : vector<128x128xf32>
    %cst_39 = arith.constant 0.00999999977 : f32
    %94 = vector.broadcast %cst_39 : f32 to vector<128x128xf32>
    %95 = arith.mulf %93, %94 : vector<128x128xf32>
    %96 = arith.addf %88, %95 : vector<128x128xf32>
    %97 = arith.truncf %96 : vector<128x128xf32> to vector<128x128xbf16>
    %cst_40 = arith.constant dense<0.000000e+00> : vector<128x128xf32>
    %98 = tpu.matmul %97, %3, %cst_40 {dimension_numbers = #tpu.dot_dimension_numbers<[1], [0], [0], [1], [0, 0, 1, 1], [], []>} : vector<128x128xbf16>, vector<128x128xbf16>, vector<128x128xf32> -> vector<128x128xf32>
    %99 = vector.broadcast %4 : vector<1x128xf32> to vector<128x128xf32>
    %100 = arith.addf %98, %99 : vector<128x128xf32>
    %cst_41 = arith.constant 0.166666672 : f32
    %101 = vector.broadcast %cst_41 : f32 to vector<128x128xf32>
    %102 = arith.mulf %78, %101 : vector<128x128xf32>
    %cst_42 = arith.constant 0.166666672 : f32
    %103 = vector.broadcast %cst_42 : f32 to vector<128x128xf32>
    %104 = arith.mulf %85, %103 : vector<128x128xf32>
    %105 = arith.addf %102, %104 : vector<128x128xf32>
    %cst_43 = arith.constant 0.666666686 : f32
    %106 = vector.broadcast %cst_43 : f32 to vector<128x128xf32>
    %107 = arith.mulf %100, %106 : vector<128x128xf32>
    %108 = arith.addf %105, %107 : vector<128x128xf32>
    %109 = arith.addf %59, %65 : vector<128x128xf32>
    %cst_44 = arith.constant 0.00999999977 : f32
    %110 = vector.broadcast %cst_44 : f32 to vector<128x128xf32>
    %111 = arith.mulf %108, %110 : vector<128x128xf32>
    %112 = arith.addf %109, %111 : vector<128x128xf32>
    %c2_i32 = arith.constant 2 : i32
    %113 = arith.index_cast %c2_i32 : i32 to index
    %c0_45 = arith.constant 0 : index
    %c0_46 = arith.constant 0 : index
    %114 = vector.load %arg5[%113, %c0_45, %c0_46] : memref<8x128x128xbf16, #tpu.memory_space<vmem>>, vector<1x128x128xbf16>
    %115 = vector.shape_cast %114 : vector<1x128x128xbf16> to vector<128x128xbf16>
    %116 = arith.extf %115 : vector<128x128xbf16> to vector<128x128xf32>
    %cst_47 = arith.constant 1.000000e-01 : f32
    %117 = vector.broadcast %cst_47 : f32 to vector<128x128xf32>
    %118 = arith.mulf %116, %117 : vector<128x128xf32>
    %cst_48 = arith.constant 5.000000e-01 : f32
    %119 = vector.broadcast %cst_48 : f32 to vector<128x128xf32>
    %120 = arith.mulf %119, %118 : vector<128x128xf32>
    %121 = arith.index_cast %c2_i32 : i32 to index
    %c0_49 = arith.constant 0 : index
    %c0_50 = arith.constant 0 : index
    %122 = vector.load %arg6[%121, %c0_49, %c0_50] : memref<8x128x128xbf16, #tpu.memory_space<vmem>>, vector<1x128x128xbf16>
    %123 = vector.shape_cast %122 : vector<1x128x128xbf16> to vector<128x128xbf16>
    %124 = arith.extf %123 : vector<128x128xbf16> to vector<128x128xf32>
    %cst_51 = arith.constant 0.0288675129 : f32
    %125 = vector.broadcast %cst_51 : f32 to vector<128x128xf32>
    %126 = arith.mulf %124, %125 : vector<128x128xf32>
    %127 = arith.addf %120, %126 : vector<128x128xf32>
    %128 = arith.truncf %112 : vector<128x128xf32> to vector<128x128xbf16>
    %cst_52 = arith.constant dense<0.000000e+00> : vector<128x128xf32>
    %129 = tpu.matmul %128, %3, %cst_52 {dimension_numbers = #tpu.dot_dimension_numbers<[1], [0], [0], [1], [0, 0, 1, 1], [], []>} : vector<128x128xbf16>, vector<128x128xbf16>, vector<128x128xf32> -> vector<128x128xf32>
    %130 = vector.broadcast %4 : vector<1x128xf32> to vector<128x128xf32>
    %131 = arith.addf %129, %130 : vector<128x128xf32>
    %cst_53 = arith.constant 0.00999999977 : f32
    %132 = vector.broadcast %cst_53 : f32 to vector<128x128xf32>
    %133 = arith.mulf %131, %132 : vector<128x128xf32>
    %134 = arith.addf %112, %133 : vector<128x128xf32>
    %135 = arith.truncf %134 : vector<128x128xf32> to vector<128x128xbf16>
    %cst_54 = arith.constant dense<0.000000e+00> : vector<128x128xf32>
    %136 = tpu.matmul %135, %3, %cst_54 {dimension_numbers = #tpu.dot_dimension_numbers<[1], [0], [0], [1], [0, 0, 1, 1], [], []>} : vector<128x128xbf16>, vector<128x128xbf16>, vector<128x128xf32> -> vector<128x128xf32>
    %137 = vector.broadcast %4 : vector<1x128xf32> to vector<128x128xf32>
    %138 = arith.addf %136, %137 : vector<128x128xf32>
    %cst_55 = arith.constant 1.500000e+00 : f32
    %139 = vector.broadcast %cst_55 : f32 to vector<128x128xf32>
    %140 = arith.mulf %139, %127 : vector<128x128xf32>
    %141 = arith.addf %112, %140 : vector<128x128xf32>
    %cst_56 = arith.constant 2.500000e-01 : f32
    %142 = vector.broadcast %cst_56 : f32 to vector<128x128xf32>
    %143 = arith.mulf %142, %131 : vector<128x128xf32>
    %cst_57 = arith.constant 2.500000e-01 : f32
    %144 = vector.broadcast %cst_57 : f32 to vector<128x128xf32>
    %145 = arith.mulf %144, %138 : vector<128x128xf32>
    %146 = arith.addf %143, %145 : vector<128x128xf32>
    %cst_58 = arith.constant 0.00999999977 : f32
    %147 = vector.broadcast %cst_58 : f32 to vector<128x128xf32>
    %148 = arith.mulf %146, %147 : vector<128x128xf32>
    %149 = arith.addf %141, %148 : vector<128x128xf32>
    %150 = arith.truncf %149 : vector<128x128xf32> to vector<128x128xbf16>
    %cst_59 = arith.constant dense<0.000000e+00> : vector<128x128xf32>
    %151 = tpu.matmul %150, %3, %cst_59 {dimension_numbers = #tpu.dot_dimension_numbers<[1], [0], [0], [1], [0, 0, 1, 1], [], []>} : vector<128x128xbf16>, vector<128x128xbf16>, vector<128x128xf32> -> vector<128x128xf32>
    %152 = vector.broadcast %4 : vector<1x128xf32> to vector<128x128xf32>
    %153 = arith.addf %151, %152 : vector<128x128xf32>
    %cst_60 = arith.constant 0.166666672 : f32
    %154 = vector.broadcast %cst_60 : f32 to vector<128x128xf32>
    %155 = arith.mulf %131, %154 : vector<128x128xf32>
    %cst_61 = arith.constant 0.166666672 : f32
    %156 = vector.broadcast %cst_61 : f32 to vector<128x128xf32>
    %157 = arith.mulf %138, %156 : vector<128x128xf32>
    %158 = arith.addf %155, %157 : vector<128x128xf32>
    %cst_62 = arith.constant 0.666666686 : f32
    %159 = vector.broadcast %cst_62 : f32 to vector<128x128xf32>
    %160 = arith.mulf %153, %159 : vector<128x128xf32>
    %161 = arith.addf %158, %160 : vector<128x128xf32>
    %162 = arith.addf %112, %118 : vector<128x128xf32>
    %cst_63 = arith.constant 0.00999999977 : f32
    %163 = vector.broadcast %cst_63 : f32 to vector<128x128xf32>
    %164 = arith.mulf %161, %163 : vector<128x128xf32>
    %165 = arith.addf %162, %164 : vector<128x128xf32>
    %c3_i32 = arith.constant 3 : i32
    %166 = arith.index_cast %c3_i32 : i32 to index
    %c0_64 = arith.constant 0 : index
    %c0_65 = arith.constant 0 : index
    %167 = vector.load %arg5[%166, %c0_64, %c0_65] : memref<8x128x128xbf16, #tpu.memory_space<vmem>>, vector<1x128x128xbf16>
    %168 = vector.shape_cast %167 : vector<1x128x128xbf16> to vector<128x128xbf16>
    %169 = arith.extf %168 : vector<128x128xbf16> to vector<128x128xf32>
    %cst_66 = arith.constant 1.000000e-01 : f32
    %170 = vector.broadcast %cst_66 : f32 to vector<128x128xf32>
    %171 = arith.mulf %169, %170 : vector<128x128xf32>
    %cst_67 = arith.constant 5.000000e-01 : f32
    %172 = vector.broadcast %cst_67 : f32 to vector<128x128xf32>
    %173 = arith.mulf %172, %171 : vector<128x128xf32>
    %174 = arith.index_cast %c3_i32 : i32 to index
    %c0_68 = arith.constant 0 : index
    %c0_69 = arith.constant 0 : index
    %175 = vector.load %arg6[%174, %c0_68, %c0_69] : memref<8x128x128xbf16, #tpu.memory_space<vmem>>, vector<1x128x128xbf16>
    %176 = vector.shape_cast %175 : vector<1x128x128xbf16> to vector<128x128xbf16>
    %177 = arith.extf %176 : vector<128x128xbf16> to vector<128x128xf32>
    %cst_70 = arith.constant 0.0288675129 : f32
    %178 = vector.broadcast %cst_70 : f32 to vector<128x128xf32>
    %179 = arith.mulf %177, %178 : vector<128x128xf32>
    %180 = arith.addf %173, %179 : vector<128x128xf32>
    %181 = arith.truncf %165 : vector<128x128xf32> to vector<128x128xbf16>
    %cst_71 = arith.constant dense<0.000000e+00> : vector<128x128xf32>
    %182 = tpu.matmul %181, %3, %cst_71 {dimension_numbers = #tpu.dot_dimension_numbers<[1], [0], [0], [1], [0, 0, 1, 1], [], []>} : vector<128x128xbf16>, vector<128x128xbf16>, vector<128x128xf32> -> vector<128x128xf32>
    %183 = vector.broadcast %4 : vector<1x128xf32> to vector<128x128xf32>
    %184 = arith.addf %182, %183 : vector<128x128xf32>
    %cst_72 = arith.constant 0.00999999977 : f32
    %185 = vector.broadcast %cst_72 : f32 to vector<128x128xf32>
    %186 = arith.mulf %184, %185 : vector<128x128xf32>
    %187 = arith.addf %165, %186 : vector<128x128xf32>
    %188 = arith.truncf %187 : vector<128x128xf32> to vector<128x128xbf16>
    %cst_73 = arith.constant dense<0.000000e+00> : vector<128x128xf32>
    %189 = tpu.matmul %188, %3, %cst_73 {dimension_numbers = #tpu.dot_dimension_numbers<[1], [0], [0], [1], [0, 0, 1, 1], [], []>} : vector<128x128xbf16>, vector<128x128xbf16>, vector<128x128xf32> -> vector<128x128xf32>
    %190 = vector.broadcast %4 : vector<1x128xf32> to vector<128x128xf32>
    %191 = arith.addf %189, %190 : vector<128x128xf32>
    %cst_74 = arith.constant 1.500000e+00 : f32
    %192 = vector.broadcast %cst_74 : f32 to vector<128x128xf32>
    %193 = arith.mulf %192, %180 : vector<128x128xf32>
    %194 = arith.addf %165, %193 : vector<128x128xf32>
    %cst_75 = arith.constant 2.500000e-01 : f32
    %195 = vector.broadcast %cst_75 : f32 to vector<128x128xf32>
    %196 = arith.mulf %195, %184 : vector<128x128xf32>
    %cst_76 = arith.constant 2.500000e-01 : f32
    %197 = vector.broadcast %cst_76 : f32 to vector<128x128xf32>
    %198 = arith.mulf %197, %191 : vector<128x128xf32>
    %199 = arith.addf %196, %198 : vector<128x128xf32>
    %cst_77 = arith.constant 0.00999999977 : f32
    %200 = vector.broadcast %cst_77 : f32 to vector<128x128xf32>
    %201 = arith.mulf %199, %200 : vector<128x128xf32>
    %202 = arith.addf %194, %201 : vector<128x128xf32>
    %203 = arith.truncf %202 : vector<128x128xf32> to vector<128x128xbf16>
    %cst_78 = arith.constant dense<0.000000e+00> : vector<128x128xf32>
    %204 = tpu.matmul %203, %3, %cst_78 {dimension_numbers = #tpu.dot_dimension_numbers<[1], [0], [0], [1], [0, 0, 1, 1], [], []>} : vector<128x128xbf16>, vector<128x128xbf16>, vector<128x128xf32> -> vector<128x128xf32>
    %205 = vector.broadcast %4 : vector<1x128xf32> to vector<128x128xf32>
    %206 = arith.addf %204, %205 : vector<128x128xf32>
    %cst_79 = arith.constant 0.166666672 : f32
    %207 = vector.broadcast %cst_79 : f32 to vector<128x128xf32>
    %208 = arith.mulf %184, %207 : vector<128x128xf32>
    %cst_80 = arith.constant 0.166666672 : f32
    %209 = vector.broadcast %cst_80 : f32 to vector<128x128xf32>
    %210 = arith.mulf %191, %209 : vector<128x128xf32>
    %211 = arith.addf %208, %210 : vector<128x128xf32>
    %cst_81 = arith.constant 0.666666686 : f32
    %212 = vector.broadcast %cst_81 : f32 to vector<128x128xf32>
    %213 = arith.mulf %206, %212 : vector<128x128xf32>
    %214 = arith.addf %211, %213 : vector<128x128xf32>
    %215 = arith.addf %165, %171 : vector<128x128xf32>
    %cst_82 = arith.constant 0.00999999977 : f32
    %216 = vector.broadcast %cst_82 : f32 to vector<128x128xf32>
    %217 = arith.mulf %214, %216 : vector<128x128xf32>
    %218 = arith.addf %215, %217 : vector<128x128xf32>
    %c4_i32 = arith.constant 4 : i32
    %219 = arith.index_cast %c4_i32 : i32 to index
    %c0_83 = arith.constant 0 : index
    %c0_84 = arith.constant 0 : index
    %220 = vector.load %arg5[%219, %c0_83, %c0_84] : memref<8x128x128xbf16, #tpu.memory_space<vmem>>, vector<1x128x128xbf16>
    %221 = vector.shape_cast %220 : vector<1x128x128xbf16> to vector<128x128xbf16>
    %222 = arith.extf %221 : vector<128x128xbf16> to vector<128x128xf32>
    %cst_85 = arith.constant 1.000000e-01 : f32
    %223 = vector.broadcast %cst_85 : f32 to vector<128x128xf32>
    %224 = arith.mulf %222, %223 : vector<128x128xf32>
    %cst_86 = arith.constant 5.000000e-01 : f32
    %225 = vector.broadcast %cst_86 : f32 to vector<128x128xf32>
    %226 = arith.mulf %225, %224 : vector<128x128xf32>
    %227 = arith.index_cast %c4_i32 : i32 to index
    %c0_87 = arith.constant 0 : index
    %c0_88 = arith.constant 0 : index
    %228 = vector.load %arg6[%227, %c0_87, %c0_88] : memref<8x128x128xbf16, #tpu.memory_space<vmem>>, vector<1x128x128xbf16>
    %229 = vector.shape_cast %228 : vector<1x128x128xbf16> to vector<128x128xbf16>
    %230 = arith.extf %229 : vector<128x128xbf16> to vector<128x128xf32>
    %cst_89 = arith.constant 0.0288675129 : f32
    %231 = vector.broadcast %cst_89 : f32 to vector<128x128xf32>
    %232 = arith.mulf %230, %231 : vector<128x128xf32>
    %233 = arith.addf %226, %232 : vector<128x128xf32>
    %234 = arith.truncf %218 : vector<128x128xf32> to vector<128x128xbf16>
    %cst_90 = arith.constant dense<0.000000e+00> : vector<128x128xf32>
    %235 = tpu.matmul %234, %3, %cst_90 {dimension_numbers = #tpu.dot_dimension_numbers<[1], [0], [0], [1], [0, 0, 1, 1], [], []>} : vector<128x128xbf16>, vector<128x128xbf16>, vector<128x128xf32> -> vector<128x128xf32>
    %236 = vector.broadcast %4 : vector<1x128xf32> to vector<128x128xf32>
    %237 = arith.addf %235, %236 : vector<128x128xf32>
    %cst_91 = arith.constant 0.00999999977 : f32
    %238 = vector.broadcast %cst_91 : f32 to vector<128x128xf32>
    %239 = arith.mulf %237, %238 : vector<128x128xf32>
    %240 = arith.addf %218, %239 : vector<128x128xf32>
    %241 = arith.truncf %240 : vector<128x128xf32> to vector<128x128xbf16>
    %cst_92 = arith.constant dense<0.000000e+00> : vector<128x128xf32>
    %242 = tpu.matmul %241, %3, %cst_92 {dimension_numbers = #tpu.dot_dimension_numbers<[1], [0], [0], [1], [0, 0, 1, 1], [], []>} : vector<128x128xbf16>, vector<128x128xbf16>, vector<128x128xf32> -> vector<128x128xf32>
    %243 = vector.broadcast %4 : vector<1x128xf32> to vector<128x128xf32>
    %244 = arith.addf %242, %243 : vector<128x128xf32>
    %cst_93 = arith.constant 1.500000e+00 : f32
    %245 = vector.broadcast %cst_93 : f32 to vector<128x128xf32>
    %246 = arith.mulf %245, %233 : vector<128x128xf32>
    %247 = arith.addf %218, %246 : vector<128x128xf32>
    %cst_94 = arith.constant 2.500000e-01 : f32
    %248 = vector.broadcast %cst_94 : f32 to vector<128x128xf32>
    %249 = arith.mulf %248, %237 : vector<128x128xf32>
    %cst_95 = arith.constant 2.500000e-01 : f32
    %250 = vector.broadcast %cst_95 : f32 to vector<128x128xf32>
    %251 = arith.mulf %250, %244 : vector<128x128xf32>
    %252 = arith.addf %249, %251 : vector<128x128xf32>
    %cst_96 = arith.constant 0.00999999977 : f32
    %253 = vector.broadcast %cst_96 : f32 to vector<128x128xf32>
    %254 = arith.mulf %252, %253 : vector<128x128xf32>
    %255 = arith.addf %247, %254 : vector<128x128xf32>
    %256 = arith.truncf %255 : vector<128x128xf32> to vector<128x128xbf16>
    %cst_97 = arith.constant dense<0.000000e+00> : vector<128x128xf32>
    %257 = tpu.matmul %256, %3, %cst_97 {dimension_numbers = #tpu.dot_dimension_numbers<[1], [0], [0], [1], [0, 0, 1, 1], [], []>} : vector<128x128xbf16>, vector<128x128xbf16>, vector<128x128xf32> -> vector<128x128xf32>
    %258 = vector.broadcast %4 : vector<1x128xf32> to vector<128x128xf32>
    %259 = arith.addf %257, %258 : vector<128x128xf32>
    %cst_98 = arith.constant 0.166666672 : f32
    %260 = vector.broadcast %cst_98 : f32 to vector<128x128xf32>
    %261 = arith.mulf %237, %260 : vector<128x128xf32>
    %cst_99 = arith.constant 0.166666672 : f32
    %262 = vector.broadcast %cst_99 : f32 to vector<128x128xf32>
    %263 = arith.mulf %244, %262 : vector<128x128xf32>
    %264 = arith.addf %261, %263 : vector<128x128xf32>
    %cst_100 = arith.constant 0.666666686 : f32
    %265 = vector.broadcast %cst_100 : f32 to vector<128x128xf32>
    %266 = arith.mulf %259, %265 : vector<128x128xf32>
    %267 = arith.addf %264, %266 : vector<128x128xf32>
    %268 = arith.addf %218, %224 : vector<128x128xf32>
    %cst_101 = arith.constant 0.00999999977 : f32
    %269 = vector.broadcast %cst_101 : f32 to vector<128x128xf32>
    %270 = arith.mulf %267, %269 : vector<128x128xf32>
    %271 = arith.addf %268, %270 : vector<128x128xf32>
    %c5_i32 = arith.constant 5 : i32
    %272 = arith.index_cast %c5_i32 : i32 to index
    %c0_102 = arith.constant 0 : index
    %c0_103 = arith.constant 0 : index
    %273 = vector.load %arg5[%272, %c0_102, %c0_103] : memref<8x128x128xbf16, #tpu.memory_space<vmem>>, vector<1x128x128xbf16>
    %274 = vector.shape_cast %273 : vector<1x128x128xbf16> to vector<128x128xbf16>
    %275 = arith.extf %274 : vector<128x128xbf16> to vector<128x128xf32>
    %cst_104 = arith.constant 1.000000e-01 : f32
    %276 = vector.broadcast %cst_104 : f32 to vector<128x128xf32>
    %277 = arith.mulf %275, %276 : vector<128x128xf32>
    %cst_105 = arith.constant 5.000000e-01 : f32
    %278 = vector.broadcast %cst_105 : f32 to vector<128x128xf32>
    %279 = arith.mulf %278, %277 : vector<128x128xf32>
    %280 = arith.index_cast %c5_i32 : i32 to index
    %c0_106 = arith.constant 0 : index
    %c0_107 = arith.constant 0 : index
    %281 = vector.load %arg6[%280, %c0_106, %c0_107] : memref<8x128x128xbf16, #tpu.memory_space<vmem>>, vector<1x128x128xbf16>
    %282 = vector.shape_cast %281 : vector<1x128x128xbf16> to vector<128x128xbf16>
    %283 = arith.extf %282 : vector<128x128xbf16> to vector<128x128xf32>
    %cst_108 = arith.constant 0.0288675129 : f32
    %284 = vector.broadcast %cst_108 : f32 to vector<128x128xf32>
    %285 = arith.mulf %283, %284 : vector<128x128xf32>
    %286 = arith.addf %279, %285 : vector<128x128xf32>
    %287 = arith.truncf %271 : vector<128x128xf32> to vector<128x128xbf16>
    %cst_109 = arith.constant dense<0.000000e+00> : vector<128x128xf32>
    %288 = tpu.matmul %287, %3, %cst_109 {dimension_numbers = #tpu.dot_dimension_numbers<[1], [0], [0], [1], [0, 0, 1, 1], [], []>} : vector<128x128xbf16>, vector<128x128xbf16>, vector<128x128xf32> -> vector<128x128xf32>
    %289 = vector.broadcast %4 : vector<1x128xf32> to vector<128x128xf32>
    %290 = arith.addf %288, %289 : vector<128x128xf32>
    %cst_110 = arith.constant 0.00999999977 : f32
    %291 = vector.broadcast %cst_110 : f32 to vector<128x128xf32>
    %292 = arith.mulf %290, %291 : vector<128x128xf32>
    %293 = arith.addf %271, %292 : vector<128x128xf32>
    %294 = arith.truncf %293 : vector<128x128xf32> to vector<128x128xbf16>
    %cst_111 = arith.constant dense<0.000000e+00> : vector<128x128xf32>
    %295 = tpu.matmul %294, %3, %cst_111 {dimension_numbers = #tpu.dot_dimension_numbers<[1], [0], [0], [1], [0, 0, 1, 1], [], []>} : vector<128x128xbf16>, vector<128x128xbf16>, vector<128x128xf32> -> vector<128x128xf32>
    %296 = vector.broadcast %4 : vector<1x128xf32> to vector<128x128xf32>
    %297 = arith.addf %295, %296 : vector<128x128xf32>
    %cst_112 = arith.constant 1.500000e+00 : f32
    %298 = vector.broadcast %cst_112 : f32 to vector<128x128xf32>
    %299 = arith.mulf %298, %286 : vector<128x128xf32>
    %300 = arith.addf %271, %299 : vector<128x128xf32>
    %cst_113 = arith.constant 2.500000e-01 : f32
    %301 = vector.broadcast %cst_113 : f32 to vector<128x128xf32>
    %302 = arith.mulf %301, %290 : vector<128x128xf32>
    %cst_114 = arith.constant 2.500000e-01 : f32
    %303 = vector.broadcast %cst_114 : f32 to vector<128x128xf32>
    %304 = arith.mulf %303, %297 : vector<128x128xf32>
    %305 = arith.addf %302, %304 : vector<128x128xf32>
    %cst_115 = arith.constant 0.00999999977 : f32
    %306 = vector.broadcast %cst_115 : f32 to vector<128x128xf32>
    %307 = arith.mulf %305, %306 : vector<128x128xf32>
    %308 = arith.addf %300, %307 : vector<128x128xf32>
    %309 = arith.truncf %308 : vector<128x128xf32> to vector<128x128xbf16>
    %cst_116 = arith.constant dense<0.000000e+00> : vector<128x128xf32>
    %310 = tpu.matmul %309, %3, %cst_116 {dimension_numbers = #tpu.dot_dimension_numbers<[1], [0], [0], [1], [0, 0, 1, 1], [], []>} : vector<128x128xbf16>, vector<128x128xbf16>, vector<128x128xf32> -> vector<128x128xf32>
    %311 = vector.broadcast %4 : vector<1x128xf32> to vector<128x128xf32>
    %312 = arith.addf %310, %311 : vector<128x128xf32>
    %cst_117 = arith.constant 0.166666672 : f32
    %313 = vector.broadcast %cst_117 : f32 to vector<128x128xf32>
    %314 = arith.mulf %290, %313 : vector<128x128xf32>
    %cst_118 = arith.constant 0.166666672 : f32
    %315 = vector.broadcast %cst_118 : f32 to vector<128x128xf32>
    %316 = arith.mulf %297, %315 : vector<128x128xf32>
    %317 = arith.addf %314, %316 : vector<128x128xf32>
    %cst_119 = arith.constant 0.666666686 : f32
    %318 = vector.broadcast %cst_119 : f32 to vector<128x128xf32>
    %319 = arith.mulf %312, %318 : vector<128x128xf32>
    %320 = arith.addf %317, %319 : vector<128x128xf32>
    %321 = arith.addf %271, %277 : vector<128x128xf32>
    %cst_120 = arith.constant 0.00999999977 : f32
    %322 = vector.broadcast %cst_120 : f32 to vector<128x128xf32>
    %323 = arith.mulf %320, %322 : vector<128x128xf32>
    %324 = arith.addf %321, %323 : vector<128x128xf32>
    %c6_i32 = arith.constant 6 : i32
    %325 = arith.index_cast %c6_i32 : i32 to index
    %c0_121 = arith.constant 0 : index
    %c0_122 = arith.constant 0 : index
    %326 = vector.load %arg5[%325, %c0_121, %c0_122] : memref<8x128x128xbf16, #tpu.memory_space<vmem>>, vector<1x128x128xbf16>
    %327 = vector.shape_cast %326 : vector<1x128x128xbf16> to vector<128x128xbf16>
    %328 = arith.extf %327 : vector<128x128xbf16> to vector<128x128xf32>
    %cst_123 = arith.constant 1.000000e-01 : f32
    %329 = vector.broadcast %cst_123 : f32 to vector<128x128xf32>
    %330 = arith.mulf %328, %329 : vector<128x128xf32>
    %cst_124 = arith.constant 5.000000e-01 : f32
    %331 = vector.broadcast %cst_124 : f32 to vector<128x128xf32>
    %332 = arith.mulf %331, %330 : vector<128x128xf32>
    %333 = arith.index_cast %c6_i32 : i32 to index
    %c0_125 = arith.constant 0 : index
    %c0_126 = arith.constant 0 : index
    %334 = vector.load %arg6[%333, %c0_125, %c0_126] : memref<8x128x128xbf16, #tpu.memory_space<vmem>>, vector<1x128x128xbf16>
    %335 = vector.shape_cast %334 : vector<1x128x128xbf16> to vector<128x128xbf16>
    %336 = arith.extf %335 : vector<128x128xbf16> to vector<128x128xf32>
    %cst_127 = arith.constant 0.0288675129 : f32
    %337 = vector.broadcast %cst_127 : f32 to vector<128x128xf32>
    %338 = arith.mulf %336, %337 : vector<128x128xf32>
    %339 = arith.addf %332, %338 : vector<128x128xf32>
    %340 = arith.truncf %324 : vector<128x128xf32> to vector<128x128xbf16>
    %cst_128 = arith.constant dense<0.000000e+00> : vector<128x128xf32>
    %341 = tpu.matmul %340, %3, %cst_128 {dimension_numbers = #tpu.dot_dimension_numbers<[1], [0], [0], [1], [0, 0, 1, 1], [], []>} : vector<128x128xbf16>, vector<128x128xbf16>, vector<128x128xf32> -> vector<128x128xf32>
    %342 = vector.broadcast %4 : vector<1x128xf32> to vector<128x128xf32>
    %343 = arith.addf %341, %342 : vector<128x128xf32>
    %cst_129 = arith.constant 0.00999999977 : f32
    %344 = vector.broadcast %cst_129 : f32 to vector<128x128xf32>
    %345 = arith.mulf %343, %344 : vector<128x128xf32>
    %346 = arith.addf %324, %345 : vector<128x128xf32>
    %347 = arith.truncf %346 : vector<128x128xf32> to vector<128x128xbf16>
    %cst_130 = arith.constant dense<0.000000e+00> : vector<128x128xf32>
    %348 = tpu.matmul %347, %3, %cst_130 {dimension_numbers = #tpu.dot_dimension_numbers<[1], [0], [0], [1], [0, 0, 1, 1], [], []>} : vector<128x128xbf16>, vector<128x128xbf16>, vector<128x128xf32> -> vector<128x128xf32>
    %349 = vector.broadcast %4 : vector<1x128xf32> to vector<128x128xf32>
    %350 = arith.addf %348, %349 : vector<128x128xf32>
    %cst_131 = arith.constant 1.500000e+00 : f32
    %351 = vector.broadcast %cst_131 : f32 to vector<128x128xf32>
    %352 = arith.mulf %351, %339 : vector<128x128xf32>
    %353 = arith.addf %324, %352 : vector<128x128xf32>
    %cst_132 = arith.constant 2.500000e-01 : f32
    %354 = vector.broadcast %cst_132 : f32 to vector<128x128xf32>
    %355 = arith.mulf %354, %343 : vector<128x128xf32>
    %cst_133 = arith.constant 2.500000e-01 : f32
    %356 = vector.broadcast %cst_133 : f32 to vector<128x128xf32>
    %357 = arith.mulf %356, %350 : vector<128x128xf32>
    %358 = arith.addf %355, %357 : vector<128x128xf32>
    %cst_134 = arith.constant 0.00999999977 : f32
    %359 = vector.broadcast %cst_134 : f32 to vector<128x128xf32>
    %360 = arith.mulf %358, %359 : vector<128x128xf32>
    %361 = arith.addf %353, %360 : vector<128x128xf32>
    %362 = arith.truncf %361 : vector<128x128xf32> to vector<128x128xbf16>
    %cst_135 = arith.constant dense<0.000000e+00> : vector<128x128xf32>
    %363 = tpu.matmul %362, %3, %cst_135 {dimension_numbers = #tpu.dot_dimension_numbers<[1], [0], [0], [1], [0, 0, 1, 1], [], []>} : vector<128x128xbf16>, vector<128x128xbf16>, vector<128x128xf32> -> vector<128x128xf32>
    %364 = vector.broadcast %4 : vector<1x128xf32> to vector<128x128xf32>
    %365 = arith.addf %363, %364 : vector<128x128xf32>
    %cst_136 = arith.constant 0.166666672 : f32
    %366 = vector.broadcast %cst_136 : f32 to vector<128x128xf32>
    %367 = arith.mulf %343, %366 : vector<128x128xf32>
    %cst_137 = arith.constant 0.166666672 : f32
    %368 = vector.broadcast %cst_137 : f32 to vector<128x128xf32>
    %369 = arith.mulf %350, %368 : vector<128x128xf32>
    %370 = arith.addf %367, %369 : vector<128x128xf32>
    %cst_138 = arith.constant 0.666666686 : f32
    %371 = vector.broadcast %cst_138 : f32 to vector<128x128xf32>
    %372 = arith.mulf %365, %371 : vector<128x128xf32>
    %373 = arith.addf %370, %372 : vector<128x128xf32>
    %374 = arith.addf %324, %330 : vector<128x128xf32>
    %cst_139 = arith.constant 0.00999999977 : f32
    %375 = vector.broadcast %cst_139 : f32 to vector<128x128xf32>
    %376 = arith.mulf %373, %375 : vector<128x128xf32>
    %377 = arith.addf %374, %376 : vector<128x128xf32>
    %c7_i32 = arith.constant 7 : i32
    %378 = arith.index_cast %c7_i32 : i32 to index
    %c0_140 = arith.constant 0 : index
    %c0_141 = arith.constant 0 : index
    %379 = vector.load %arg5[%378, %c0_140, %c0_141] : memref<8x128x128xbf16, #tpu.memory_space<vmem>>, vector<1x128x128xbf16>
    %380 = vector.shape_cast %379 : vector<1x128x128xbf16> to vector<128x128xbf16>
    %381 = arith.extf %380 : vector<128x128xbf16> to vector<128x128xf32>
    %cst_142 = arith.constant 1.000000e-01 : f32
    %382 = vector.broadcast %cst_142 : f32 to vector<128x128xf32>
    %383 = arith.mulf %381, %382 : vector<128x128xf32>
    %cst_143 = arith.constant 5.000000e-01 : f32
    %384 = vector.broadcast %cst_143 : f32 to vector<128x128xf32>
    %385 = arith.mulf %384, %383 : vector<128x128xf32>
    %386 = arith.index_cast %c7_i32 : i32 to index
    %c0_144 = arith.constant 0 : index
    %c0_145 = arith.constant 0 : index
    %387 = vector.load %arg6[%386, %c0_144, %c0_145] : memref<8x128x128xbf16, #tpu.memory_space<vmem>>, vector<1x128x128xbf16>
    %388 = vector.shape_cast %387 : vector<1x128x128xbf16> to vector<128x128xbf16>
    %389 = arith.extf %388 : vector<128x128xbf16> to vector<128x128xf32>
    %cst_146 = arith.constant 0.0288675129 : f32
    %390 = vector.broadcast %cst_146 : f32 to vector<128x128xf32>
    %391 = arith.mulf %389, %390 : vector<128x128xf32>
    %392 = arith.addf %385, %391 : vector<128x128xf32>
    %393 = arith.truncf %377 : vector<128x128xf32> to vector<128x128xbf16>
    %cst_147 = arith.constant dense<0.000000e+00> : vector<128x128xf32>
    %394 = tpu.matmul %393, %3, %cst_147 {dimension_numbers = #tpu.dot_dimension_numbers<[1], [0], [0], [1], [0, 0, 1, 1], [], []>} : vector<128x128xbf16>, vector<128x128xbf16>, vector<128x128xf32> -> vector<128x128xf32>
    %395 = vector.broadcast %4 : vector<1x128xf32> to vector<128x128xf32>
    %396 = arith.addf %394, %395 : vector<128x128xf32>
    %cst_148 = arith.constant 0.00999999977 : f32
    %397 = vector.broadcast %cst_148 : f32 to vector<128x128xf32>
    %398 = arith.mulf %396, %397 : vector<128x128xf32>
    %399 = arith.addf %377, %398 : vector<128x128xf32>
    %400 = arith.truncf %399 : vector<128x128xf32> to vector<128x128xbf16>
    %cst_149 = arith.constant dense<0.000000e+00> : vector<128x128xf32>
    %401 = tpu.matmul %400, %3, %cst_149 {dimension_numbers = #tpu.dot_dimension_numbers<[1], [0], [0], [1], [0, 0, 1, 1], [], []>} : vector<128x128xbf16>, vector<128x128xbf16>, vector<128x128xf32> -> vector<128x128xf32>
    %402 = vector.broadcast %4 : vector<1x128xf32> to vector<128x128xf32>
    %403 = arith.addf %401, %402 : vector<128x128xf32>
    %cst_150 = arith.constant 1.500000e+00 : f32
    %404 = vector.broadcast %cst_150 : f32 to vector<128x128xf32>
    %405 = arith.mulf %404, %392 : vector<128x128xf32>
    %406 = arith.addf %377, %405 : vector<128x128xf32>
    %cst_151 = arith.constant 2.500000e-01 : f32
    %407 = vector.broadcast %cst_151 : f32 to vector<128x128xf32>
    %408 = arith.mulf %407, %396 : vector<128x128xf32>
    %cst_152 = arith.constant 2.500000e-01 : f32
    %409 = vector.broadcast %cst_152 : f32 to vector<128x128xf32>
    %410 = arith.mulf %409, %403 : vector<128x128xf32>
    %411 = arith.addf %408, %410 : vector<128x128xf32>
    %cst_153 = arith.constant 0.00999999977 : f32
    %412 = vector.broadcast %cst_153 : f32 to vector<128x128xf32>
    %413 = arith.mulf %411, %412 : vector<128x128xf32>
    %414 = arith.addf %406, %413 : vector<128x128xf32>
    %415 = arith.truncf %414 : vector<128x128xf32> to vector<128x128xbf16>
    %cst_154 = arith.constant dense<0.000000e+00> : vector<128x128xf32>
    %416 = tpu.matmul %415, %3, %cst_154 {dimension_numbers = #tpu.dot_dimension_numbers<[1], [0], [0], [1], [0, 0, 1, 1], [], []>} : vector<128x128xbf16>, vector<128x128xbf16>, vector<128x128xf32> -> vector<128x128xf32>
    %417 = vector.broadcast %4 : vector<1x128xf32> to vector<128x128xf32>
    %418 = arith.addf %416, %417 : vector<128x128xf32>
    %cst_155 = arith.constant 0.166666672 : f32
    %419 = vector.broadcast %cst_155 : f32 to vector<128x128xf32>
    %420 = arith.mulf %396, %419 : vector<128x128xf32>
    %cst_156 = arith.constant 0.166666672 : f32
    %421 = vector.broadcast %cst_156 : f32 to vector<128x128xf32>
    %422 = arith.mulf %403, %421 : vector<128x128xf32>
    %423 = arith.addf %420, %422 : vector<128x128xf32>
    %cst_157 = arith.constant 0.666666686 : f32
    %424 = vector.broadcast %cst_157 : f32 to vector<128x128xf32>
    %425 = arith.mulf %418, %424 : vector<128x128xf32>
    %426 = arith.addf %423, %425 : vector<128x128xf32>
    %427 = arith.addf %377, %383 : vector<128x128xf32>
    %cst_158 = arith.constant 0.00999999977 : f32
    %428 = vector.broadcast %cst_158 : f32 to vector<128x128xf32>
    %429 = arith.mulf %426, %428 : vector<128x128xf32>
    %430 = arith.addf %427, %429 : vector<128x128xf32>
    %c8_i32 = arith.constant 8 : i32
    %c0_159 = arith.constant 0 : index
    %c0_160 = arith.constant 0 : index
    %431 = vector.load %arg9[%c0_159, %c0_160] : memref<128x128xf32, #tpu.memory_space<vmem>>, vector<128x128xf32>
    tpu.vector_store %arg9[%c0_159, %c0_160], %430 {strides = array<i32>} : memref<128x128xf32, #tpu.memory_space<vmem>>, vector<128x128xf32>,
    %c1_i32_161 = arith.constant 1 : i32
    %432 = arith.cmpi eq, %arg1, %c1_i32_161 : i32
    %433 = arith.extui %432 : i1 to i32
    %c0_i32_162 = arith.constant 0 : i32
    %434 = arith.cmpi ne, %433, %c0_i32_162 : i32
    scf.if %434 {
      %c0_163 = arith.constant 0 : index
      %c0_164 = arith.constant 0 : index
      %435 = vector.load %arg7[%c0_163, %c0_164] : memref<128x128xf32, #tpu.memory_space<vmem>>, vector<128x128xf32>
      tpu.vector_store %arg7[%c0_163, %c0_164], %430 {strides = array<i32>} : memref<128x128xf32, #tpu.memory_space<vmem>>, vector<128x128xf32>,
      %c0_165 = arith.constant 0 : index
      %c0_166 = arith.constant 0 : index
      %436 = vector.load %arg8[%c0_165, %c0_166] : memref<128x128xf32, #tpu.memory_space<vmem>>, vector<128x128xf32>
      tpu.vector_store %arg8[%c0_165, %c0_166], %396 {strides = array<i32>} : memref<128x128xf32, #tpu.memory_space<vmem>>, vector<128x128xf32>,
    } else {
    }
    return
  }
  func.func @transform_0(%arg0: i32, %arg1: i32) -> (i32, i32) {
    %c0_i32 = arith.constant 0 : i32
    %c0_i32_0 = arith.constant 0 : i32
    return %arg0, %c0_i32 : i32, i32
  }
  func.func @transform_1(%arg0: i32, %arg1: i32) -> (i32, i32) {
    %c0_i32 = arith.constant 0 : i32
    %c0_i32_0 = arith.constant 0 : i32
    %c0_i32_1 = arith.constant 0 : i32
    return %c0_i32, %c0_i32_0 : i32, i32
  }
  func.func @transform_2(%arg0: i32, %arg1: i32) -> (i32, i32) {
    %c0_i32 = arith.constant 0 : i32
    %c0_i32_0 = arith.constant 0 : i32
    %c0_i32_1 = arith.constant 0 : i32
    return %c0_i32, %c0_i32_0 : i32, i32
  }
  func.func @transform_3(%arg0: i32, %arg1: i32) -> (i32, i32, i32) {
    %c0_i32 = arith.constant 0 : i32
    %c0_i32_0 = arith.constant 0 : i32
    return %arg1, %arg0, %c0_i32 : i32, i32, i32
  }
  func.func @transform_4(%arg0: i32, %arg1: i32) -> (i32, i32, i32) {
    %c0_i32 = arith.constant 0 : i32
    %c0_i32_0 = arith.constant 0 : i32
    return %arg1, %arg0, %c0_i32 : i32, i32, i32
  }
  func.func @transform_5(%arg0: i32, %arg1: i32) -> (i32, i32) {
    %c0_i32 = arith.constant 0 : i32
    %c0_i32_0 = arith.constant 0 : i32
    return %arg0, %c0_i32 : i32, i32
  }
  func.func @transform_6(%arg0: i32, %arg1: i32) -> (i32, i32) {
    %c0_i32 = arith.constant 0 : i32
    %c0_i32_0 = arith.constant 0 : i32
    return %arg0, %c0_i32 : i32, i32
  }
}

</mosaic_0001>

<bundles_post_ra>
// kernel: tpu_custom_call.1
= control target key start
LH: loop header
LB: loop body
LE: loop exit
PB: predicated region body
PF: predicated region fallthrough
CT: control target
= control target key end

     0   :  { %s14013_s0 = inlined_call_operand.hbm [shape: f32[256,128], index: 0, kind: input, shape index: {}]   ;;  %s14014_s1 = inlined_call_operand.hbm [shape: bf16[128,128], index: 1, kind: input, shape index: {}]   ;;  %s14015_s2 = inlined_call_operand.vmem [shape: f32[1,128], index: 2, kind: input, shape index: {}]   ;;  %s14016_s3 = inlined_call_operand.hbm [shape: bf16[16,256,128], index: 3, kind: input, shape index: {}]   ;;  %s14017_s4 = inlined_call_operand.hbm [shape: bf16[16,256,128], index: 4, kind: input, shape index: {}]   ;;  %s14018_s5 = inlined_call_operand.hbm [shape: f32[256,128], index: 5, kind: output, shape index: {0}]   ;;  %s14019_s6 = inlined_call_operand.hbm [shape: f32[256,128], index: 6, kind: output, shape index: {1}]  }
   0x1   :  { %14582 = sst [smem:[#allocation83_spill]] %s14013_s0 }
   0x2   :  { %14583 = sst [smem:[#allocation84_spill]] %s14015_s2 }
   0x3   :  { %14584 = sst [smem:[#allocation85_spill]] %s14018_s5 }
   0x4   :  { %14585 = sst [smem:[#allocation86_spill]] %s14019_s6 }
   0x5   :  { %12 = vsyncpa [#allocation4], 0 }
   0x6   :  { %14 = vsyncpa [#allocation4 + $0x1], 0 }
   0x7   :  { %15 = vsyncpa [#allocation7], 0 }
   0x8   :  { %16 = vsyncpa [#allocation5], 0 }
   0x9   :  { %18 = vsyncpa [#allocation5 + $0x1], 0 }
   0xa   :  { %19 = vsyncpa [#allocation12], 0 }
   0xb   :  { %21 = vsyncpa [#allocation12 + $0x1], 0  ;;  %s9145_s21 = smov 0   ;;  %s9147_s22 = smov 0  }
   0xc   :  { %s9149_s23 = smov 0   ;;  %s9151_s24 = smov 0  }
   0xd   :  { %s9153_s25 = smov 0   ;;  %s9155_s26 = smov 0  }
   0xe   :  { %s9157_s27 = smov 0   ;;  %s9159_s28 = smov 0  }
   0xf   :  { %s9161_s29 = smov 0   ;;  %s9163_s30 = smov 0  }
  0x10   :  { %s9165_s7 = smov 0  }
  0x11 LB: > { %14586 = sst [smem:[#allocation24_spill]] %s9058_s24  ;;  %s9201_s8 = sadd.s32 4294967295, %s9086_s7   ;;  %s9086_s7 = sphi %s9165_s7, %s27_s7   ;;  %s9082_s30 = sphi %s9163_s30, %s15442_s30   ;;  %s9078_s29 = sphi %s9161_s29, %s15441_s29   ;;  %s9074_s28 = sphi %s9159_s28, %s15440_s28   ;;  %s9070_s27 = sphi %s9157_s27, %s15439_s27   ;;  %s9066_s26 = sphi %s9155_s26, %s15438_s26   ;;  %s9062_s25 = sphi %s9153_s25, %s15437_s25   ;;  %s9058_s24 = sphi %s9151_s24, %s15436_s24   ;;  %s9054_s23 = sphi %s9149_s23, %s15435_s23   ;;  %s9050_s22 = sphi %s9147_s22, %s15434_s22   ;;  %s9046_s21 = sphi %s9145_s21, %s15433_s21  }
  0x12   : > { %14587 = sst [smem:[#allocation25_spill]] %s9074_s28  ;;  %s6567_s9 = sadd.s32 4294967294, %s9086_s7  }
  0x13   : > { %s36_s10 = sadd.s32 1, %s9078_s29  ;;  %s39_s11 = sadd.s32 1, %s9082_s30 }
  0x14   : > { %p37_p0 = scmp.ge.s32.totalorder %s36_s10, 2  ;;  %s46_s12 = sadd.s32 1, %s9066_s26 }
  0x15   : > { %p53_p1 = scmp.ne.s32.totalorder %s9066_s26, %s9062_s25  ;;  %p54_p2 = scmp.eq.s32.totalorder %s9086_s7, 0 }
  0x16   : > { %s15444_s10 = smov (%p37_p0, %s36_s10), 0  ;;  %s15446_s11 = smov (!%p37_p0, %s39_s11), %s9082_s30 }
  0x17   : > { %14588 = sst [smem:[#allocation26_spill]] %s15444_s10  ;;  %p9218_p3 = por %p54_p2, %p53_p1 }
  0x18   : > { %p14022_p4 = scmp.ne.s32.totalorder %s9062_s25, %s9058_s24  ;;  %p41_p5 = scmp.ge.s32.totalorder %s15446_s11, 2 }
  0x19   : > { %s14589_s13 = scalar_select %p9218_p3, 1, 0 }
  0x1a   : > { %p14029_p6 = scmp.eq.s32.totalorder %s9201_s8, 0  ;;  %s111_s14 = ssub.s32 %s9078_s29, %s15444_s10 }
  0x1b   : > { %s116_s15 = sadd.s32 1, %s9054_s23  ;;  %s15448_s11 = smov (%p41_p5, %s15446_s11), 0 }
  0x1c   : > { %14590 = sst [smem:[#allocation27_spill]] %s15448_s11  ;;  %p9235_p7 = por %p14029_p6, %p14022_p4 }
  0x1d   : > { %p123_p8 = scmp.ne.s32.totalorder %s9054_s23, %s9050_s22  ;;  %s43_s17 = ssub.s32 %s9082_s30, %s15448_s11 }
  0x1e   : > { %s14591_s16 = scalar_select %p9235_p7, 1, 0 }
  0x1f   : > { %p129_p9 = scmp.ne.s32.totalorder %s9050_s22, %s9046_s21  ;;  %p44_p10 = scmp.eq.s32.totalorder %s43_s17, 0 }
  0x20   : > { %s113_s18 = sor.u32 %s111_s14, %s43_s17  ;;  %p9247_p12 = por %p123_p8, %p54_p2 }
  0x21   : > { %p114_p11 = scmp.eq.s32.totalorder %s113_s18, 0  ;;  %p9259_p13 = por %p129_p9, %p14029_p6 }
  0x22   : > { %s14592_s19 = scalar_select %p9247_p12, 1, 0 }
  0x23   : > { %s9252_s20 = scalar_select %p44_p10, %s9066_s26, %s46_s12  }
  0x24   : > { %s9255_s10 = scalar_select %p114_p11, %s9054_s23, %s116_s15  }
  0x25   : > { %14593 = sst [smem:[#allocation28_spill]] %s9252_s20  ;;  %p181_p0 = scmp.eq.s32.totalorder %s9201_s8, 3 }
  0x26   : > { %14594 = sst [smem:[#allocation29_spill]] %s9255_s10  ;;  %p187_p5 = scmp.eq.s32.totalorder %s6567_s9, 3 }
  0x27   : > { %s14595_s6 = scalar_select %p9259_p13, 1, 0 }
  0x28   : > { %p6568_p4 = scmp.ge.s32.totalorder %s9086_s7, 1  ;;  %p9268_p7 = por %p181_p0, %p53_p1 }
  0x29   : > { %p220_p2 = scmp.lt.s32.totalorder %s9086_s7, 5  ;;  %p14598_p8 = scmp.ne.s32.totalorder %s9062_s25, %s9058_s24 }
  0x2a   : > { %s14596_s21 = scalar_select %p9268_p7, 1, 0 }
  0x2b   : > { %p9276_p12 = por %p187_p5, %p14598_p8  ;;  %p9280_p10 = pnand %p6568_p4, %p220_p2 }
  0x2c   : > { %14597 = sst [smem:[#allocation30_spill]] %s14596_s21  ;;  %s9088_s15 = smov [#allocation6]  }
  0x2d   : > { %s14599_s12 = scalar_select %p9276_p12, 1, 0 }
  0x2e   : > { %s14601_s14 = scalar_select %p9280_p10, 1, 0 }
  0x2f   : > { %14600 = sst [smem:[#allocation31_spill]] %s14599_s12  ;;  %s232_s17 = sshll.u32 %s9088_s15, 4  ;;  %s233_s17 = int_to_ptr.vmem [resolvable:$true] %s232_s17 }
  0x30   : > { %p8661_p9 = pneg %p9280_p10  ;;  %s8868_s20 = scalar_lea.hbm %s14014_s1, 1024 }
  0x31   : > { %p8869_p4 = scmp.ne.s32.totalorder %s14014_s1, %s8868_s20  ;;  %p8875_p2 = scmp.lt.u32.totalorder %s8868_s20, %s14014_s1 }
  0x32   : > { %p9288_p1 = pnand %p8661_p9, %p14029_p6 }
  0x34   : > { %p8870_p11 = pneg %p9288_p1 }
  0x36   : > { %p8871_p0 = pnand %p8870_p11, %p8869_p4 }
  0x38   : > { %p8872_p5 = pneg %p8871_p0 }
  0x3a   : > { %p8877_p8 = pnand %p8875_p2, %p8872_p5 }
  0x3c   : > { %8880 = shalt.err (!%p8877_p8)
}
  0x3d   : > { %s8881_s5 = scalar_lea.vmem %s233_s17, 1024  ;;  %p8889_p7 = scmp.lt.s32.totalorder %s233_s17, %s233_s17 }
  0x3e   : > { %p8882_p9 = scmp.ne.s32.totalorder %s233_s17, %s8881_s5  ;;  %p8890_p13 = scmp.lt.s32.totalorder %s8881_s5, %s8881_s5 }
  0x40   : > { %p8884_p6 = pnand %p8882_p9, %p8870_p11  ;;  %p8891_p10 = por %p8890_p13, %p8889_p7 }
  0x42   : > { %p8885_p12 = pneg %p8884_p6 }
  0x44   : > { %p8892_p3 = pnand %p8891_p10, %p8885_p12 }
  0x46   : > { %8895 = shalt.err (!%p8892_p3)
}
  0x47   : > { %s9089_s10 = smov 64   ;;  %s9090_s11 = smov 4  }
  0x48   : > { %8664 = dma.hbm_to_vmem [thread:$0]  (!%p9288_p1), %s14014_s1, 1024, %s233_s17, [#allocation7], %s9089_s10, %s9089_s10, %s9090_s11  }
  0x49   : > { %p6570_p4 = scmp.ge.s32.totalorder %s9086_s7, 4 }
  0x4a   : > { %s249_s24 = sand.u32 (!%p6570_p4), 1, %s9086_s7   ;;  %s251_s5 = sand.u32 (!%p6570_p4), 1, %s9066_s26  }
  0x4b   : > { %245 = sbr.rel (%p6570_p4) target bundleno = 134 (0x86), region = 24  ;;  %s6571_s20 = sshll.u32 (!%p6570_p4), %s251_s5, 7 }
  0x4c   : > { %s6838_s15 = sshll.u32 (!%p6570_p4), %s9082_s30, 11  ;;  %s14603_s0 = sld [smem:[#allocation83_spill]] (!%p6570_p4) }
  0x4d   : > { %s253_s17 = scalar_lea.vmem (!%p6570_p4), [#allocation3], %s6571_s20  ;;  %s9319_s10 = scalar_lea.sflag (!%p6570_p4), [#allocation4], %s249_s24 }
  0x4e   : > { %s260_s9 = sshll.u32 (!%p6570_p4), %s253_s17, 4  ;;  %p14604_p6 = scmp.ne.s32.totalorder (!%p6570_p4), %s14589_s13, 0  ;;  %s9317_s9 = int_to_ptr.vmem [resolvable:$true] %s260_s9 }
  0x52   : > { %s9315_s2 = scalar_lea.hbm %s14603_s0, %s6838_s15  ;;  %s8900_s28 = scalar_lea.hbm %s14603_s0, 4096 }
  0x53   : > { %s8896_s11 = scalar_lea.hbm %s9315_s2, 2048  ;;  %p8901_p13 = scmp.lt.u32.totalorder %s9315_s2, %s14603_s0 }
  0x54   : > { %p8897_p3 = scmp.ne.s32.totalorder %s9315_s2, %s8896_s11  ;;  %p8902_p10 = scmp.lt.u32.totalorder %s8900_s28, %s8896_s11 }
  0x55   : > { %p8904_p11 = scmp.lt.u32.totalorder %s8896_s11, %s9315_s2 }
  0x56   : > { %p8898_p7 = pnand %p8897_p3, %p14604_p6  ;;  %p8903_p1 = por %p8902_p10, %p8901_p13 }
  0x58   : > { %p8899_p12 = pneg %p8898_p7  ;;  %p8905_p0 = por %p8904_p11, %p8903_p1 }
  0x5a   : > { %p8906_p5 = pnand %p8905_p0, %p8899_p12 }
  0x5c   : > { %8909 = shalt.err (!%p8906_p5)
}
  0x5d   : > { %s8910_s24 = scalar_lea.vmem %s9317_s9, 2048  ;;  %s9091_s20 = smov [#allocation3]  }
  0x5e   : > { %p8911_p2 = scmp.ne.s32.totalorder %s9317_s9, %s8910_s24  ;;  %s8914_s15 = sshll.u32 %s9091_s20, 4  ;;  %s8915_s15 = int_to_ptr.vmem [resolvable:$false] %s8914_s15 }
  0x5f   : > { %s8916_s17 = scalar_lea.vmem %s8915_s15, 4096  ;;  %p8917_p4 = scmp.lt.s32.totalorder %s9317_s9, %s8915_s15 }
  0x60   : > { %p8912_p8 = pnand %p8911_p2, %p14604_p6  ;;  %p8918_p3 = scmp.lt.s32.totalorder %s8916_s17, %s8910_s24 }
  0x62   : > { %p8913_p9 = pneg %p8912_p8  ;;  %p8919_p7 = por %p8918_p3, %p8917_p4 }
  0x64   : > { %p8920_p13 = pnand %p8919_p7, %p8913_p9 }
  0x66   : > { %8923 = shalt.err (!%p8920_p13)
}
  0x67   : > { %s9092_s11 = smov 128   ;;  %s9093_s12 = smov 8  }
  0x68   : > { %8635 = dma.hbm_to_vmem [thread:$0]  (%p14604_p6), %s9315_s2, 2048, %s9317_s9, %s9319_s10, %s9092_s11, %s9092_s11, %s9093_s12  }
  0x69   : > { %s272_s18 = sand.u32 1, %s9054_s23   ;;  %s6576_s28 = sshll.u32 %s9082_s30, 4 }
  0x6a   : > { %s6574_s21 = sshll.u32 %s272_s18, 9  ;;  %s6839_s5 = sshll.u32 %s9078_s29, 8 }
  0x6b   : > { %s281_s24 = sadd.s32 %s6839_s5, %s6576_s28  ;;  %s274_s2 = scalar_lea.vmem [#allocation8], %s6574_s21 }
  0x6c   : > { %s6578_s20 = sshll.u32 %s281_s24, 6  ;;  %s296_s9 = sshll.u32 %s274_s2, 4  ;;  %s297_s9 = int_to_ptr.vmem [resolvable:$true] %s296_s9 }
  0x6d   : > { %s283_s13 = scalar_lea.hbm %s14016_s3, %s6578_s20  ;;  %p14605_p6 = scmp.ne.s32.totalorder %s14592_s19, 0 }
  0x6e   : > { %s9094_s0 = smov 2048   ;;  %s9095_s18 = smov 1024  }
  0x6f   : > { %s8636_s11 = scalar_select %p14605_p6, [#allocation0], [#allocation17] }
  0x70   : > { %8637 = sst [smem:[#allocation14]] (%p14605_p6), %s9094_s0  ;;  %s9096_s28 = smov 16  }
  0x71   : > { %s288_s12 = sld [smem:[%s8636_s11]]   ;;  %s9097_s5 = smov 64  }
  0x72   : > { %8638 = sst [smem:[#allocation14 + $0x1]] (%p14605_p6), %s9095_s18  ;;  %s9098_s24 = smov 4  }
  0x73   : > { %8639 = sst [smem:[#allocation14 + $0x2]] (%p14605_p6), %s9096_s28  ;;  %s9099_s2 = smov [#allocation13]  }
  0x74   : > { %8640 = sst [smem:[#allocation14 + $0x3]] (%p14605_p6), %s9097_s5 }
  0x75   : > { %8641 = sst [smem:[#allocation14 + $0x4]] (%p14605_p6), %s9097_s5 }
  0x76   : > { %8642 = sst [smem:[#allocation14 + $0x5]] (%p14605_p6), %s9098_s24 }
  0x77   : > { %s6579_s15 = sshll.u32 %s288_s12, 26 }
  0x78   : > { %s6580_s17 = sadd.s32 134217728, %s6579_s15 }
  0x79   : > { %8643 = dma.general (%p14605_p6), %s283_s13, 8192, %s297_s9, %s9319_s10, %s9099_s2, [#allocation14], %s6580_s17, 0  }
  0x7a   : > { %s332_s18 = scalar_lea.hbm %s14017_s4, %s6578_s20  ;;  %s323_s5 = scalar_lea.vmem [#allocation9], %s6574_s21 }
  0x7b   : > { %s8644_s28 = scalar_select %p14605_p6, [#allocation0], [#allocation18] }
  0x7c   : > { %s345_s24 = sshll.u32 %s323_s5, 4  ;;  %s9100_s13 = smov 2048   ;;  %s346_s24 = int_to_ptr.vmem [resolvable:$true] %s345_s24 }
  0x7d   : > { %s337_s12 = sld [smem:[%s8644_s28]]   ;;  %s9101_s9 = smov 1024  }
  0x7e   : > { %8645 = sst [smem:[#allocation16]] (%p14605_p6), %s9100_s13  ;;  %s9102_s15 = smov 16  }
  0x7f   : > { %8646 = sst [smem:[#allocation16 + $0x1]] (%p14605_p6), %s9101_s9  ;;  %s9103_s17 = smov 64  }
  0x80   : > { %8647 = sst [smem:[#allocation16 + $0x2]] (%p14605_p6), %s9102_s15  ;;  %s9104_s20 = smov 4  }
  0x81   : > { %8648 = sst [smem:[#allocation16 + $0x3]] (%p14605_p6), %s9103_s17  ;;  %s9105_s0 = smov [#allocation15]  }
  0x82   : > { %8649 = sst [smem:[#allocation16 + $0x4]] (%p14605_p6), %s9103_s17 }
  0x83   : > { %s6586_s21 = sshll.u32 %s337_s12, 26  ;;  %8650 = sst [smem:[#allocation16 + $0x5]] (%p14605_p6), %s9104_s20 }
  0x84   : > { %s6587_s2 = sadd.s32 134217728, %s6586_s21 }
  0x85   : > { %8651 = dma.general (%p14605_p6), %s332_s18, 8192, %s346_s24, %s9319_s10, %s9105_s0, [#allocation16], %s6587_s2, 0  }
  0x86 PF: > { %p14606_p12 = scmp.ne.s32.totalorder %s14601_s14, 0 }
  0x88   : > { %370 = sbr.rel (%p14606_p12) target bundleno = 5721 (0x1659), region = 40 }
  0x8f   : > { %s372_s11 = sand.u32 1, %s9201_s8   ;;  %s9390_s28 = sand.u32 1, %s9062_s25  }
  0x90   : > { %s6589_s5 = sshll.u32 %s9390_s28, 7  ;;  %s373_s12 = scalar_lea.sflag [#allocation4], %s372_s11 }
  0x91   : > { %s9393_s13 = scalar_lea.vmem [#allocation3], %s6589_s5  ;;  %p14607_p10 = scmp.ne.s32.totalorder %s14591_s16, 0 }
  0x93   : > { %9025 = dma.done.wait (%p14607_p10), %s373_s12, 2048  }
  0x94   : > { %9027 = vsyncadd (%p14607_p10), %s373_s12, 4294965248  ;;  %p14608_p1 = scmp.eq.s32.totalorder %s9201_s8, 0 }
  0x96   : > { %9029 = dma.done.wait (%p14608_p1), [#allocation7], 1024   ;;  %p14609_p11 = pmov %p14608_p1 }
  0x97   : > { %s387_s19 = sand.u32 1, %s9050_s22   ;;  %p14610_p0 = scmp.ne.s32.totalorder %s14595_s6, 0 }
  0x98   : > { %9031 = vsyncadd (%p14609_p11), [#allocation7], 4294966272  ;;  %s6591_s14 = sshll.u32 %s387_s19, 9 }
  0x99   : > { %s9404_s10 = scalar_lea.vmem [#allocation8], %s6591_s14 }
  0x9a   : > { %9033 = dma.done.wait (%p14610_p0), %s373_s12, 16384  }
  0x9b   : > { %9035 = vsyncadd (%p14610_p0), %s373_s12, 4294950912  ;;  %s9410_s18 = scalar_lea.vmem [#allocation9], %s6591_s14  ;;  %s9412_s16 = scalar_lea.vmem [#allocation10], %s6589_s5 }
  0x9c   : > { %s9414_s24 = scalar_lea.vmem [#allocation11], %s6589_s5  ;;  %p6595_p5 = scmp.ne.s32.totalorder %s9070_s27, 0 }
  0x9d   : > { %v454_v0 = vld [vmem:[%s9393_s13] sm:$0xff] (!%p6595_p5)  ;;  %v455_v1 = vld [vmem:[%s9393_s13 + $0x8] sm:$0xff] (!%p6595_p5)  ;;  %v456_v2 = vld [vmem:[%s9393_s13 + $0x10] sm:$0xff] (!%p6595_p5) }
  0x9e   : > { %453 = sbr.rel (%p6595_p5) target bundleno = 166 (0xa6), region = 60  ;;  %470 = vst [vmem:[#allocation2] sm:$0xff] (!%p6595_p5), %v454_v0  ;;  %471 = vst [vmem:[#allocation2 + $0x8] sm:$0xff] (!%p6595_p5), %v455_v1  ;;  %v457_v3 = vld [vmem:[%s9393_s13 + $0x18] sm:$0xff] (!%p6595_p5)  ;;  %v458_v4 = vld [vmem:[%s9393_s13 + $0x20] sm:$0xff] (!%p6595_p5) }
  0x9f   : > { %472 = vst [vmem:[#allocation2 + $0x10] sm:$0xff] (!%p6595_p5), %v456_v2  ;;  %v459_v5 = vld [vmem:[%s9393_s13 + $0x28] sm:$0xff] (!%p6595_p5)  ;;  %473 = vst [vmem:[#allocation2 + $0x18] sm:$0xff] (!%p6595_p5), %v457_v3  ;;  %v460_v6 = vld [vmem:[%s9393_s13 + $0x30] sm:$0xff] (!%p6595_p5) }
  0xa0   : > { %474 = vst [vmem:[#allocation2 + $0x20] sm:$0xff] (!%p6595_p5), %v458_v4  ;;  %475 = vst [vmem:[#allocation2 + $0x28] sm:$0xff] (!%p6595_p5), %v459_v5  ;;  %v461_v7 = vld [vmem:[%s9393_s13 + $0x38] sm:$0xff] (!%p6595_p5)  ;;  %v462_v8 = vld [vmem:[%s9393_s13 + $0x40] sm:$0xff] (!%p6595_p5) }
  0xa1   : > { %476 = vst [vmem:[#allocation2 + $0x30] sm:$0xff] (!%p6595_p5), %v460_v6  ;;  %477 = vst [vmem:[#allocation2 + $0x38] sm:$0xff] (!%p6595_p5), %v461_v7  ;;  %v463_v9 = vld [vmem:[%s9393_s13 + $0x48] sm:$0xff] (!%p6595_p5)  ;;  %v464_v10 = vld [vmem:[%s9393_s13 + $0x50] sm:$0xff] (!%p6595_p5) }
  0xa2   : > { %478 = vst [vmem:[#allocation2 + $0x40] sm:$0xff] (!%p6595_p5), %v462_v8  ;;  %v465_v11 = vld [vmem:[%s9393_s13 + $0x58] sm:$0xff] (!%p6595_p5)  ;;  %479 = vst [vmem:[#allocation2 + $0x48] sm:$0xff] (!%p6595_p5), %v463_v9  ;;  %v466_v12 = vld [vmem:[%s9393_s13 + $0x60] sm:$0xff] (!%p6595_p5) }
  0xa3   : > { %480 = vst [vmem:[#allocation2 + $0x50] sm:$0xff] (!%p6595_p5), %v464_v10  ;;  %481 = vst [vmem:[#allocation2 + $0x58] sm:$0xff] (!%p6595_p5), %v465_v11  ;;  %v467_v13 = vld [vmem:[%s9393_s13 + $0x68] sm:$0xff] (!%p6595_p5)  ;;  %v468_v14 = vld [vmem:[%s9393_s13 + $0x70] sm:$0xff] (!%p6595_p5) }
  0xa4   : > { %482 = vst [vmem:[#allocation2 + $0x60] sm:$0xff] (!%p6595_p5), %v466_v12  ;;  %483 = vst [vmem:[#allocation2 + $0x68] sm:$0xff] (!%p6595_p5), %v467_v13  ;;  %v469_v15 = vld [vmem:[%s9393_s13 + $0x78] sm:$0xff] (!%p6595_p5) }
  0xa5   : > { %484 = vst [vmem:[#allocation2 + $0x70] sm:$0xff] %v468_v14  ;;  %485 = vst [vmem:[#allocation2 + $0x78] sm:$0xff] %v469_v15 }
  0xa6 PF: > { %v9433_v16 = vld [vmem:[#allocation6] sm:$0xff]   ;;  %v9435_v17 = vld [vmem:[#allocation6 + $0x8] sm:$0xff]   ;;  %v9442_v18 = vld [vmem:[#allocation6 + $0x10] sm:$0xff]   ;;  %s14622_s9 = sld [smem:[#allocation84_spill]]  ;;  %p6829_p2 = scmp.ne.s32.totalorder %s9070_s27, 1 }
  0xa7   : > { %14611 = vst [vmem:[#allocation32_spill] sm:$0xff] %v9433_v16  ;;  %14612 = vst [vmem:[#allocation33_spill] sm:$0xff] %v9435_v17  ;;  %7865 = vmatprep.subr.bf16.mxu0 %v9433_v16  ;;  %7897 = vmatprep.subr.bf16.mxu1 %v9433_v16  ;;  %v9448_v19 = vld [vmem:[#allocation6 + $0x18] sm:$0xff]   ;;  %v9450_v20 = vld [vmem:[#allocation2] sm:$0xff] }
  0xa8   : > { %7866 = vmatpush3.bf16.msra.mxu0 %v9433_v16  ;;  %7898 = vmatpush3.bf16.msra.mxu1 %v9433_v16  ;;  %14613 = vst [vmem:[#allocation34_spill] sm:$0xff] %v9442_v18  ;;  %14614 = vst [vmem:[#allocation35_spill] sm:$0xff] %v9448_v19  ;;  %v9452_v21 = vld [vmem:[#allocation2 + $0x8] sm:$0xff]  ;;  %v9459_v23 = vld [vmem:[#allocation6 + $0x20] sm:$0xff]  }
  0xa9   : > { %7867 = vmatprep.subr.bf16.mxu0 %v9435_v17  ;;  %7899 = vmatprep.subr.bf16.mxu1 %v9435_v17  ;;  %v647_v22 = vpack.c.bf16 %v9452_v21, %v9450_v20  ;;  %14615 = vst [vmem:[#allocation36_spill] sm:$0xff] %v9459_v23  ;;  %v9465_v24 = vld [vmem:[#allocation6 + $0x28] sm:$0xff]   ;;  %v9471_v25 = vld [vmem:[#allocation6 + $0x30] sm:$0xff]   ;;  %v9477_v26 = vld [vmem:[#allocation6 + $0x38] sm:$0xff]  }
  0xaa   : > { %14616 = vst [vmem:[#allocation37_spill] sm:$0xff] %v9465_v24  ;;  %14617 = vst [vmem:[#allocation38_spill] sm:$0xff] %v9471_v25  ;;  %v9482_v27 = vld [vmem:[#allocation2 + $0x10] sm:$0xff]  ;;  %v9484_v28 = vld [vmem:[#allocation2 + $0x18] sm:$0xff] }
  0xab   : > { %7881 = vmatprep.mubr.bf16.mxu0 %v647_v22  ;;  %14618 = vst [vmem:[#allocation39_spill] sm:$0xff] %v9477_v26  ;;  %14619 = vst [vmem:[#allocation40_spill] sm:$0xff] %v9482_v27  ;;  %v9487_v29 = vld [vmem:[#allocation2 + $0x20] sm:$0xff]  ;;  %v9489_v30 = vld [vmem:[#allocation2 + $0x28] sm:$0xff]  ;;  %v648_v31 = vpack.c.bf16 %v9484_v28, %v9482_v27 }
  0xac   : > { %7868 = vmatpush3.bf16.msra.mxu0 %v9435_v17  ;;  %7900 = vmatpush3.bf16.msra.mxu1 %v9435_v17  ;;  %v649_v32 = vpack.c.bf16 %v9489_v30, %v9487_v29  ;;  %v9501_v33 = vld [vmem:[#allocation2 + $0x30] sm:$0xff]  ;;  %v9503_v34 = vld [vmem:[#allocation2 + $0x38] sm:$0xff]  ;;  %v9506_v35 = vld [vmem:[#allocation2 + $0x40] sm:$0xff] }
  0xad   : > { %7869 = vmatprep.subr.bf16.mxu0 %v9442_v18  ;;  %7901 = vmatprep.subr.bf16.mxu1 %v9442_v18  ;;  %v9508_v36 = vld [vmem:[#allocation2 + $0x48] sm:$0xff]  ;;  %v650_v37 = vpack.c.bf16 %v9503_v34, %v9501_v33  ;;  %v9517_v39 = vld [vmem:[#allocation2 + $0x50] sm:$0xff]  ;;  %v9519_v40 = vld [vmem:[#allocation2 + $0x58] sm:$0xff] }
  0xae   : > { %v651_v38 = vpack.c.bf16 %v9508_v36, %v9506_v35  ;;  %v9522_v41 = vld [vmem:[#allocation2 + $0x60] sm:$0xff]  ;;  %v9524_v42 = vld [vmem:[#allocation2 + $0x68] sm:$0xff]  ;;  %v652_v43 = vpack.c.bf16 %v9519_v40, %v9517_v39  ;;  %v9533_v45 = vld [vmem:[#allocation2 + $0x70] sm:$0xff] }
  0xaf   : > { %v653_v44 = vpack.c.bf16 %v9524_v42, %v9522_v41  ;;  %14620 = vst [vmem:[#allocation41_spill] sm:$0xff] %v9533_v45  ;;  %v9535_v46 = vld [vmem:[#allocation2 + $0x78] sm:$0xff]  ;;  %v9550_v48 = vld [vmem:[%s14622_s9] ss:$0 sm:$0xff] }
  0xb0   : > { %7870 = vmatpush3.bf16.msra.mxu0 %v9442_v18  ;;  %7902 = vmatpush3.bf16.msra.mxu1 %v9442_v18  ;;  %14621 = vst [vmem:[#allocation42_spill] sm:$0xff] %v9535_v46  ;;  %v654_v47 = vpack.c.bf16 %v9535_v46, %v9533_v45 }
  0xb1   : > { %7871 = vmatprep.subr.bf16.mxu0 %v9448_v19  ;;  %7903 = vmatprep.subr.bf16.mxu1 %v9448_v19 }
  0xb4   : > { %7872 = vmatpush3.bf16.msra.mxu0 %v9448_v19  ;;  %7904 = vmatpush3.bf16.msra.mxu1 %v9448_v19 }
  0xb5   : > { %7873 = vmatprep.subr.bf16.mxu0 %v9459_v23  ;;  %7905 = vmatprep.subr.bf16.mxu1 %v9459_v23 }
  0xb8   : > { %7874 = vmatpush3.bf16.msra.mxu0 %v9459_v23  ;;  %7906 = vmatpush3.bf16.msra.mxu1 %v9459_v23 }
  0xb9   : > { %7875 = vmatprep.subr.bf16.mxu0 %v9465_v24  ;;  %7907 = vmatprep.subr.bf16.mxu1 %v9465_v24 }
  0xbc   : > { %7876 = vmatpush3.bf16.msra.mxu0 %v9465_v24  ;;  %7908 = vmatpush3.bf16.msra.mxu1 %v9465_v24 }
  0xbd   : > { %7877 = vmatprep.subr.bf16.mxu0 %v9471_v25  ;;  %7909 = vmatprep.subr.bf16.mxu1 %v9471_v25 }
  0xc0   : > { %7878 = vmatpush3.bf16.msra.mxu0 %v9471_v25  ;;  %7910 = vmatpush3.bf16.msra.mxu1 %v9471_v25 }
  0xc1   : > { %7879 = vmatprep.subr.bf16.mxu0 %v9477_v26  ;;  %7911 = vmatprep.subr.bf16.mxu1 %v9477_v26 }
  0xc4   : > { %7880 = vmatpush3.bf16.msra.mxu0 %v9477_v26  ;;  %7912 = vmatpush3.bf16.msra.mxu1 %v9477_v26 }
  0xc5   : > { %7929 = vmatprep.subr.bf16.mxu0 %v9433_v16  ;;  %7961 = vmatprep.subr.bf16.mxu1 %v9433_v16 }
  0xc7   : > { %7882 = vmatmul.mubr.bf16.vlgmr.msra.gmra.mrb[0].mxu0 %v648_v31 }
  0xc8   : > { %7885 = vmatprep.mubr.bf16.mxu0 %v649_v32  ;;  %7930 = vmatpush3.bf16.msra.mxu0 %v9433_v16 }
  0xc9   : > { %7931 = vmatprep.subr.bf16.mxu0 %v9435_v17 }
  0xcc   : > { %7932 = vmatpush3.bf16.msra.mxu0 %v9435_v17 }
  0xcd   : > { %7933 = vmatprep.subr.bf16.mxu0 %v9442_v18 }
  0xcf   : > { %7886 = vmatmul.mubr.bf16.gmra.mrb[4].mxu0 %v650_v37 }
  0xd0   : > { %7889 = vmatprep.mubr.bf16.mxu0 %v651_v38  ;;  %7934 = vmatpush3.bf16.msra.mxu0 %v9442_v18 }
  0xd1   : > { %7935 = vmatprep.subr.bf16.mxu0 %v9448_v19 }
  0xd4   : > { %7936 = vmatpush3.bf16.msra.mxu0 %v9448_v19 }
  0xd5   : > { %7937 = vmatprep.subr.bf16.mxu0 %v9459_v23 }
  0xd7   : > { %7890 = vmatmul.mubr.bf16.gmra.mrb[8].mxu0 %v652_v43 }
  0xd8   : > { %7893 = vmatprep.mubr.bf16.mxu0 %v653_v44  ;;  %7938 = vmatpush3.bf16.msra.mxu0 %v9459_v23 }
  0xd9   : > { %7939 = vmatprep.subr.bf16.mxu0 %v9465_v24 }
  0xdc   : > { %7940 = vmatpush3.bf16.msra.mxu0 %v9465_v24 }
  0xdd   : > { %7941 = vmatprep.subr.bf16.mxu0 %v9471_v25 }
  0xdf   : > { %7894 = vmatmul.mubr.bf16.gmra.mrb[12].mxu0 %v654_v47 }
  0xe0   : > { %7942 = vmatpush3.bf16.msra.mxu0 %v9471_v25 }
  0xe1   : > { %7943 = vmatprep.subr.bf16.mxu0 %v9477_v26 }
  0xe4   : > { %7944 = vmatpush3.bf16.msra.mxu0 %v9477_v26 }
  0xe5   : > { %7993 = vmatprep.subr.bf16.mxu0 %v9433_v16 }
 0x19a   : > { %v7883_v49 = vpop.f32.mrb[0].mxu0 }
 0x19b   : > { %v9553_v50 = vadd.f32 %v7883_v49, %v9550_v48  ;;  %v743_v51 = vpop.f32.mrb[1].mxu0 }
 0x19c   : > { %v9556_v52 = vadd.f32 %v9550_v48, %v743_v51  ;;  %v7884_v53 = vpop.f32.mrb[2].mxu0 }
 0x19d   : > { %v808_v54 = vmul.f32 0.01, %v9553_v50  ;;  %v9560_v55 = vadd.f32 %v7884_v53, %v9550_v48  ;;  %v746_v56 = vpop.f32.mrb[3].mxu0 }
 0x19e   : > { %v9563_v57 = vadd.f32 %v9550_v48, %v746_v56  ;;  %v806_v58 = vmul.f32 0.01, %v9556_v52 }
 0x19f   : > { %v809_v59 = vmul.f32 0.01, %v9560_v55  ;;  %v824_v61 = vadd.f32 %v808_v54, %v9482_v27 }
 0x1a0   : > { %v807_v60 = vmul.f32 0.01, %v9563_v57  ;;  %v822_v0 = vadd.f32 %v806_v58, %v9450_v20 }
 0x1a1   : > { %v825_v62 = vadd.f32 %v809_v59, %v9484_v28 }
 0x1a2   : > { %v7887_v63 = vpop.f32.mrb[4].mxu0  ;;  %v823_v1 = vadd.f32 %v807_v60, %v9452_v21 }
 0x1a3   : > { %v9573_v2 = vadd.f32 %v7887_v63, %v9550_v48  ;;  %v759_v3 = vpop.f32.mrb[5].mxu0  ;;  %v839_v4 = vpack.c.bf16 %v825_v62, %v824_v61 }
 0x1a4   : > { %v9576_v5 = vadd.f32 %v9550_v48, %v759_v3  ;;  %v7888_v6 = vpop.f32.mrb[6].mxu0  ;;  %v838_v7 = vpack.c.bf16 %v823_v1, %v822_v0 }
 0x1a5   : > { %v812_v8 = vmul.f32 0.01, %v9573_v2  ;;  %v9580_v9 = vadd.f32 %v7888_v6, %v9550_v48  ;;  %v762_v10 = vpop.f32.mrb[7].mxu0 }
 0x1a6   : > { %v810_v11 = vmul.f32 0.01, %v9576_v5  ;;  %v9584_v12 = vadd.f32 %v9550_v48, %v762_v10  ;;  %7913 = vmatprep.mubr.bf16.mxu1 %v838_v7 }
 0x1a7   : > { %v813_v13 = vmul.f32 0.01, %v9580_v9  ;;  %7914 = vmatmul.mubr.bf16.vlgmr.msra.gmra.mrb[0].mxu1 %v839_v4  ;;  %v828_v15 = vadd.f32 %v812_v8, %v9501_v33 }
 0x1a8   : > { %v811_v14 = vmul.f32 0.01, %v9584_v12  ;;  %7962 = vmatpush3.bf16.msra.mxu1 %v9433_v16  ;;  %v826_v32 = vadd.f32 %v810_v11, %v9487_v29 }
 0x1a9   : > { %v829_v22 = vadd.f32 %v813_v13, %v9503_v34  ;;  %7963 = vmatprep.subr.bf16.mxu1 %v9435_v17 }
 0x1aa   : > { %v7891_v31 = vpop.f32.mrb[8].mxu0  ;;  %v827_v37 = vadd.f32 %v811_v14, %v9489_v30 }
 0x1ab   : > { %v9595_v38 = vadd.f32 %v7891_v31, %v9550_v48  ;;  %v775_v43 = vpop.f32.mrb[9].mxu0  ;;  %v841_v44 = vpack.c.bf16 %v829_v22, %v828_v15 }
 0x1ac   : > { %v9598_v47 = vadd.f32 %v9550_v48, %v775_v43  ;;  %v7892_v49 = vpop.f32.mrb[10].mxu0  ;;  %v840_v51 = vpack.c.bf16 %v827_v37, %v826_v32  ;;  %7964 = vmatpush3.bf16.msra.mxu1 %v9435_v17 }
 0x1ad   : > { %v816_v53 = vmul.f32 0.01, %v9595_v38  ;;  %v9603_v54 = vadd.f32 %v7892_v49, %v9550_v48  ;;  %v778_v56 = vpop.f32.mrb[11].mxu0  ;;  %7965 = vmatprep.subr.bf16.mxu1 %v9442_v18 }
 0x1ae   : > { %v814_v58 = vmul.f32 0.01, %v9598_v47  ;;  %v9608_v59 = vadd.f32 %v9550_v48, %v778_v56  ;;  %7917 = vmatprep.mubr.bf16.mxu1 %v840_v51 }
 0x1af   : > { %v817_v60 = vmul.f32 0.01, %v9603_v54  ;;  %7918 = vmatmul.mubr.bf16.gmra.mrb[4].mxu1 %v841_v44  ;;  %v832_v62 = vadd.f32 %v816_v53, %v9517_v39 }
 0x1b0   : > { %v815_v61 = vmul.f32 0.01, %v9608_v59  ;;  %7966 = vmatpush3.bf16.msra.mxu1 %v9442_v18  ;;  %v830_v1 = vadd.f32 %v814_v58, %v9506_v35  ;;  %v7355_v58 = vld [vmem:[%s9404_s10 + $0x8] sm:$0xff]   ;;  %v7358_v18 = vld [vmem:[%s9404_s10 + $0x20] sm:$0xff]  }
 0x1b1   : > { %v833_v63 = vadd.f32 %v817_v60, %v9519_v40  ;;  %7967 = vmatprep.subr.bf16.mxu1 %v9448_v19  ;;  %v6849_v60 = vunpack.c.l.bf16 %v7355_v58 }
 0x1b2   : > { %v7895_v0 = vpop.f32.mrb[12].mxu0  ;;  %v831_v3 = vadd.f32 %v815_v61, %v9508_v36  ;;  %v7362_v61 = vld [vmem:[%s9410_s18 + $0x8] sm:$0xff]  }
 0x1b3   : > { %v9619_v4 = vadd.f32 %v7895_v0, %v9550_v48  ;;  %v791_v6 = vpop.f32.mrb[13].mxu0  ;;  %v843_v7 = vpack.c.bf16 %v833_v63, %v832_v62  ;;  %v6881_v62 = vunpack.c.l.bf16 %v7362_v61  ;;  %v9650_v63 = vmul.f32 0.1, %v6849_v60 }
 0x1b4   : > { %v9622_v8 = vadd.f32 %v9550_v48, %v791_v6  ;;  %v7896_v10 = vpop.f32.mrb[14].mxu0  ;;  %v842_v11 = vpack.c.bf16 %v831_v3, %v830_v1  ;;  %7968 = vmatpush3.bf16.msra.mxu1 %v9448_v19  ;;  %v6850_v1 = vunpack.c.h.bf16 %v7355_v58  ;;  %v9653_v3 = vmul.f32 0.25, %v9553_v50 }
 0x1b5   : > { %v820_v13 = vmul.f32 0.01, %v9619_v4  ;;  %v9627_v14 = vadd.f32 %v7896_v10, %v9550_v48  ;;  %v794_v15 = vpop.f32.mrb[15].mxu0  ;;  %7969 = vmatprep.subr.bf16.mxu1 %v9459_v23  ;;  %14623 = vst [vmem:[#allocation43_spill] sm:$0xff] %v9650_v63  ;;  %v617_v0 = vmul.f32 0.028867513, %v6881_v62 }
 0x1b6   : > { %v818_v22 = vmul.f32 0.01, %v9622_v8  ;;  %v9632_v31 = vadd.f32 %v9550_v48, %v794_v15  ;;  %7921 = vmatprep.mubr.bf16.mxu1 %v842_v11  ;;  %v9656_v6 = vmul.f32 0.16666667, %v9553_v50  ;;  %v6844_v10 = vld [vmem:[%s9404_s10] sm:$0xff]   ;;  %v9661_v11 = vmul.f32 0.25, %v9556_v52 }
 0x1b7   : > { %v821_v32 = vmul.f32 0.01, %v9627_v14  ;;  %7922 = vmatmul.mubr.bf16.gmra.mrb[8].mxu1 %v843_v7  ;;  %v836_v43 = vadd.f32 %v820_v13, %v9533_v45  ;;  %v569_v7 = vmul.f32 0.5, %v9650_v63  ;;  %v9664_v13 = vmul.f32 0.16666667, %v9556_v52  ;;  %v7357_v62 = vld [vmem:[%s9404_s10 + $0x18] sm:$0xff]  }
 0x1b8   : > { %v819_v37 = vmul.f32 0.01, %v9632_v31  ;;  %7970 = vmatpush3.bf16.msra.mxu1 %v9459_v23  ;;  %v834_v49 = vadd.f32 %v818_v22, %v9522_v41  ;;  %v9667_v15 = vmul.f32 0.25, %v9560_v55  ;;  %v9670_v22 = vmul.f32 0.16666667, %v9560_v55 }
 0x1b9   : > { %v837_v44 = vadd.f32 %v821_v32, %v9535_v46  ;;  %7971 = vmatprep.subr.bf16.mxu1 %v9465_v24  ;;  %v9673_v32 = vmul.f32 0.25, %v9563_v57  ;;  %v9676_v50 = vmul.f32 0.16666667, %v9563_v57  ;;  %v9685_v52 = vmul.f32 0.16666667, %v9576_v5 }
 0x1ba   : > { %v835_v51 = vadd.f32 %v819_v37, %v9524_v42  ;;  %v9679_v37 = vmul.f32 0.25, %v9573_v2  ;;  %v6882_v55 = vunpack.c.h.bf16 %v7362_v61  ;;  %v9693_v57 = vmul.f32 0.25, %v9580_v9 }
 0x1bb   : > { %v845_v53 = vpack.c.bf16 %v837_v44, %v836_v43  ;;  %v9682_v43 = vmul.f32 0.16666667, %v9573_v2  ;;  %14625 = vst [vmem:[#allocation45_spill] sm:$0xff] %v9685_v52  ;;  %v9687_v44 = vmul.f32 0.1, %v6850_v1  ;;  %v9699_v2 = vmul.f32 0.25, %v9584_v12 }
 0x1bc   : > { %v844_v56 = vpack.c.bf16 %v835_v51, %v834_v49  ;;  %7972 = vmatpush3.bf16.msra.mxu1 %v9465_v24  ;;  %v6845_v49 = vunpack.c.l.bf16 %v6844_v10  ;;  %v9690_v51 = vmul.f32 0.25, %v9576_v5  ;;  %14628 = vst [vmem:[#allocation48_spill] sm:$0xff] %v9693_v57  ;;  %v9703_v58 = vmul.f32 0.16666667, %v9584_v12  ;;  %v7356_v12 = vld [vmem:[%s9404_s10 + $0x10] sm:$0xff]  }
 0x1bd   : > { %7973 = vmatprep.subr.bf16.mxu1 %v9471_v25  ;;  %14624 = vst [vmem:[#allocation44_spill] sm:$0xff] %v9682_v43  ;;  %14626 = vst [vmem:[#allocation46_spill] sm:$0xff] %v9687_v44  ;;  %v9706_v60 = vmul.f32 0.25, %v9595_v38  ;;  %v9709_v61 = vmul.f32 0.16666667, %v9595_v38  ;;  %v633_v5 = vadd.f32 %v617_v0, %v569_v7  ;;  %v9713_v1 = vmul.f32 0.25, %v9598_v47 }
 0x1be   : > { %7925 = vmatprep.mubr.bf16.mxu1 %v844_v56  ;;  %14627 = vst [vmem:[#allocation47_spill] sm:$0xff] %v9690_v51  ;;  %14630 = vst [vmem:[#allocation50_spill] sm:$0xff] %v9699_v2  ;;  %v6876_v56 = vld [vmem:[%s9410_s18] sm:$0xff]   ;;  %v9719_v63 = vmul.f32 0.25, %v9603_v54  ;;  %v618_v24 = vmul.f32 0.028867513, %v6882_v55  ;;  %v6857_v19 = vunpack.c.l.bf16 %v7357_v62 }
 0x1bf   : > { %7926 = vmatmul.mubr.bf16.gmra.mrb[12].mxu1 %v845_v53  ;;  %v9696_v53 = vmul.f32 0.16666667, %v9580_v9  ;;  %14631 = vst [vmem:[#allocation51_spill] sm:$0xff] %v9703_v58  ;;  %14632 = vst [vmem:[#allocation52_spill] sm:$0xff] %v9706_v60  ;;  %v9716_v9 = vmul.f32 0.16666667, %v9598_v47  ;;  %v6877_v38 = vunpack.c.l.bf16 %v6876_v56  ;;  %v6878_v45 = vunpack.c.h.bf16 %v6876_v56 }
 0x1c0   : > { %7974 = vmatpush3.bf16.msra.mxu1 %v9471_v25  ;;  %14633 = vst [vmem:[#allocation53_spill] sm:$0xff] %v9709_v61  ;;  %14634 = vst [vmem:[#allocation54_spill] sm:$0xff] %v9713_v1  ;;  %v570_v25 = vmul.f32 0.5, %v9687_v44  ;;  %v9723_v23 = vmul.f32 0.1, %v6845_v49  ;;  %v9729_v7 = vmul.f32 0.25, %v9608_v59 }
 0x1c1   : > { %7975 = vmatprep.subr.bf16.mxu1 %v9477_v26  ;;  %14629 = vst [vmem:[#allocation49_spill] sm:$0xff] %v9696_v53  ;;  %14635 = vst [vmem:[#allocation55_spill] sm:$0xff] %v9716_v9  ;;  %v9726_v0 = vmul.f32 0.16666667, %v9603_v54  ;;  %v9732_v47 = vmul.f32 0.16666667, %v9608_v59  ;;  %v6853_v54 = vunpack.c.l.bf16 %v7356_v12 }
 0x1c2   : > { %14636 = vst [vmem:[#allocation56_spill] sm:$0xff] %v9719_v63  ;;  %14637 = vst [vmem:[#allocation57_spill] sm:$0xff] %v9723_v23  ;;  %v9738_v44 = vmul.f32 0.16666667, %v9619_v4  ;;  %v9741_v55 = vmul.f32 0.25, %v9622_v8  ;;  %v9747_v46 = vmul.f32 0.25, %v9627_v14 }
 0x1c3   : > { %14638 = vst [vmem:[#allocation58_spill] sm:$0xff] %v9726_v0  ;;  %14639 = vst [vmem:[#allocation59_spill] sm:$0xff] %v9729_v7  ;;  %v9744_v49 = vmul.f32 0.16666667, %v9622_v8  ;;  %v9758_v7 = vmul.f32 0.25, %v9632_v31  ;;  %v6854_v8 = vunpack.c.h.bf16 %v7356_v12  ;;  %v7364_v0 = vld [vmem:[%s9410_s18 + $0x18] sm:$0xff]  }
 0x1c4   : > { %7976 = vmatpush3.bf16.msra.mxu1 %v9477_v26  ;;  %v6846_v26 = vunpack.c.h.bf16 %v6844_v10  ;;  %14640 = vst [vmem:[#allocation60_spill] sm:$0xff] %v9732_v47  ;;  %v9735_v10 = vmul.f32 0.25, %v9619_v4  ;;  %14642 = vst [vmem:[#allocation62_spill] sm:$0xff] %v9738_v44  ;;  %v634_v4 = vadd.f32 %v618_v24, %v570_v25  ;;  %v567_v44 = vmul.f32 0.5, %v9723_v23  ;;  %v7363_v47 = vld [vmem:[%s9410_s18 + $0x10] sm:$0xff]  }
 0x1c5   : > { %8025 = vmatprep.subr.bf16.mxu1 %v9433_v16  ;;  %14643 = vst [vmem:[#allocation63_spill] sm:$0xff] %v9741_v55  ;;  %14644 = vst [vmem:[#allocation64_spill] sm:$0xff] %v9744_v49  ;;  %v615_v55 = vmul.f32 0.028867513, %v6877_v38  ;;  %v6858_v49 = vunpack.c.h.bf16 %v7357_v62  ;;  %v9764_v56 = vmul.f32 0.16666667, %v9632_v31  ;;  %v6861_v24 = vunpack.c.l.bf16 %v7358_v18 }
 0x1c6   : > { %14641 = vst [vmem:[#allocation61_spill] sm:$0xff] %v9735_v10  ;;  %14645 = vst [vmem:[#allocation65_spill] sm:$0xff] %v9747_v46  ;;  %v9749_v59 = vmul.f32 0.1, %v6846_v26  ;;  %v9753_v10 = vmul.f32 0.16666667, %v9627_v14  ;;  %v6885_v23 = vunpack.c.l.bf16 %v7363_v47  ;;  %v6886_v31 = vunpack.c.h.bf16 %v7363_v47 }
 0x1c7   : > { %14648 = vst [vmem:[#allocation68_spill] sm:$0xff] %v9758_v7  ;;  %v9760_v46 = vmul.f32 0.1, %v6857_v19  ;;  %v7359_v26 = vld [vmem:[%s9404_s10 + $0x28] sm:$0xff]   ;;  %14650 = vst [vmem:[#allocation70_spill] sm:$0xff] %v9764_v56  ;;  %v945_v14 = vmul.f32 1.5, %v633_v5  ;;  %v6862_v7 = vunpack.c.h.bf16 %v7358_v18  ;;  %v631_v62 = vadd.f32 %v615_v55, %v567_v44 }
 0x1c8   : > { %14646 = vst [vmem:[#allocation66_spill] sm:$0xff] %v9749_v59  ;;  %14647 = vst [vmem:[#allocation67_spill] sm:$0xff] %v9753_v10  ;;  %v9766_v10 = vmul.f32 0.1, %v6853_v54  ;;  %v568_v25 = vmul.f32 0.5, %v9749_v59  ;;  %v946_v12 = vmul.f32 1.5, %v634_v4  ;;  %v6865_v63 = vunpack.c.l.bf16 %v7359_v26 }
 0x1c9   : > { %14649 = vst [vmem:[#allocation69_spill] sm:$0xff] %v9760_v46  ;;  %v616_v38 = vmul.f32 0.028867513, %v6878_v45  ;;  %v7365_v19 = vld [vmem:[%s9410_s18 + $0x20] sm:$0xff]   ;;  %v6866_v9 = vunpack.c.h.bf16 %v7359_v26  ;;  %v9771_v1 = vmul.f32 0.1, %v6854_v8  ;;  %v6889_v45 = vunpack.c.l.bf16 %v7364_v0 }
 0x1ca   : > { %14651 = vst [vmem:[#allocation71_spill] sm:$0xff] %v9766_v10  ;;  %v9773_v5 = vmul.f32 0.1, %v6858_v49  ;;  %v573_v54 = vmul.f32 0.5, %v9760_v46  ;;  %v7366_v56 = vld [vmem:[%s9410_s18 + $0x28] sm:$0xff]   ;;  %v571_v59 = vmul.f32 0.5, %v9766_v10  ;;  %v6890_v61 = vunpack.c.h.bf16 %v7364_v0 }
 0x1cb   : > { %14652 = vst [vmem:[#allocation72_spill] sm:$0xff] %v9771_v1  ;;  %v9778_v60 = vmul.f32 0.1, %v6861_v24  ;;  %v7360_v18 = vld [vmem:[%s9404_s10 + $0x30] sm:$0xff]   ;;  %v619_v4 = vmul.f32 0.028867513, %v6885_v23  ;;  %v6893_v55 = vunpack.c.l.bf16 %v7365_v19  ;;  %v6894_v8 = vunpack.c.h.bf16 %v7365_v19 }
 0x1cc   : > { %14653 = vst [vmem:[#allocation73_spill] sm:$0xff] %v9773_v5  ;;  %v9781_v44 = vmul.f32 0.1, %v6862_v7  ;;  %v9783_v26 = vmul.f32 0.1, %v6865_v63  ;;  %v6897_v49 = vunpack.c.l.bf16 %v7366_v56  ;;  %v6898_v46 = vunpack.c.h.bf16 %v7366_v56  ;;  %v7367_v63 = vld [vmem:[%s9410_s18 + $0x30] sm:$0xff]  }
 0x1cd   : > { %14654 = vst [vmem:[#allocation74_spill] sm:$0xff] %v9778_v60  ;;  %v9785_v47 = vmul.f32 0.1, %v6866_v9  ;;  %v572_v17 = vmul.f32 0.5, %v9771_v1  ;;  %v620_v10 = vmul.f32 0.028867513, %v6886_v31  ;;  %v6869_v24 = vunpack.c.l.bf16 %v7360_v18 }
 0x1ce   : > { %14655 = vst [vmem:[#allocation75_spill] sm:$0xff] %v9781_v44  ;;  %14656 = vst [vmem:[#allocation76_spill] sm:$0xff] %v9783_v26  ;;  %v574_v0 = vmul.f32 0.5, %v9773_v5  ;;  %v9790_v16 = vadd.f32 %v945_v14, %v9482_v27  ;;  %v621_v23 = vmul.f32 0.028867513, %v6889_v45  ;;  %v575_v19 = vmul.f32 0.5, %v9778_v60 }
 0x1cf   : > { %v622_v7 = vmul.f32 0.028867513, %v6890_v61  ;;  %v576_v9 = vmul.f32 0.5, %v9781_v44  ;;  %v623_v58 = vmul.f32 0.028867513, %v6893_v55  ;;  %v6870_v56 = vunpack.c.h.bf16 %v7360_v18  ;;  %v7361_v61 = vld [vmem:[%s9404_s10 + $0x38] sm:$0xff]  }
 0x1d0   : > { %v624_v2 = vmul.f32 0.028867513, %v6894_v8  ;;  %v577_v1 = vmul.f32 0.5, %v9783_v26  ;;  %v578_v31 = vmul.f32 0.5, %v9785_v47  ;;  %v625_v5 = vmul.f32 0.028867513, %v6897_v49 }
 0x1d1   : > { %v626_v53 = vmul.f32 0.028867513, %v6898_v46  ;;  %v632_v57 = vadd.f32 %v616_v38, %v568_v25  ;;  %v943_v14 = vmul.f32 1.5, %v631_v62  ;;  %v9797_v27 = vmul.f32 0.1, %v6869_v24 }
 0x1d2   : > { %v6901_v45 = vunpack.c.l.bf16 %v7367_v63  ;;  %v635_v52 = vadd.f32 %v619_v4, %v571_v59  ;;  %v636_v60 = vadd.f32 %v620_v10, %v572_v17  ;;  %v637_v51 = vadd.f32 %v621_v23, %v573_v54  ;;  %v7368_v4 = vld [vmem:[%s9410_s18 + $0x38] sm:$0xff]  }
 0x1d3   : > { %v638_v43 = vadd.f32 %v622_v7, %v574_v0  ;;  %v639_v44 = vadd.f32 %v623_v58, %v575_v19  ;;  %v640_v55 = vadd.f32 %v624_v2, %v576_v9  ;;  %v9800_v18 = vmul.f32 0.1, %v6870_v56 }
 0x1d4   : > { %v6902_v8 = vunpack.c.h.bf16 %v7367_v63  ;;  %v9803_v26 = vadd.f32 %v946_v12, %v9484_v28  ;;  %v641_v46 = vadd.f32 %v625_v5, %v577_v1  ;;  %v642_v25 = vadd.f32 %v626_v53, %v578_v31 }
 0x1d5   : > { %v6873_v38 = vunpack.c.l.bf16 %v7361_v61  ;;  %v944_v62 = vmul.f32 1.5, %v632_v57  ;;  %v579_v49 = vmul.f32 0.5, %v9797_v27  ;;  %v627_v24 = vmul.f32 0.028867513, %v6901_v45 }
 0x1d6   : > { %v6874_v59 = vunpack.c.h.bf16 %v7361_v61  ;;  %v947_v17 = vmul.f32 1.5, %v635_v52  ;;  %v948_v10 = vmul.f32 1.5, %v636_v60  ;;  %v949_v54 = vmul.f32 1.5, %v637_v51 }
 0x1d7   : > { %v950_v58 = vmul.f32 1.5, %v638_v43  ;;  %v951_v2 = vmul.f32 1.5, %v639_v44  ;;  %v952_v0 = vmul.f32 1.5, %v640_v55  ;;  %v580_v23 = vmul.f32 0.5, %v9800_v18 }
 0x1d8   : > { %v628_v7 = vmul.f32 0.028867513, %v6902_v8  ;;  %v959_v12 = vadd.f32 %v943_v14, %v9450_v20  ;;  %v953_v1 = vmul.f32 1.5, %v641_v46  ;;  %v954_v53 = vmul.f32 1.5, %v642_v25 }
 0x1d9   : > { %v9809_v5 = vmul.f32 0.1, %v6873_v38  ;;  %v9812_v57 = vadd.f32 %v944_v62, %v9452_v21  ;;  %v643_v19 = vadd.f32 %v627_v24, %v579_v49  ;;  %v9814_v52 = vmul.f32 0.1, %v6874_v59 }
 0x1da   : > { %v6905_v51 = vunpack.c.l.bf16 %v7368_v4  ;;  %v9817_v43 = vadd.f32 %v947_v17, %v9487_v29  ;;  %v9820_v60 = vadd.f32 %v948_v10, %v9489_v30  ;;  %v9823_v44 = vadd.f32 %v949_v54, %v9501_v33 }
 0x1db   : > { %v6906_v20 = vunpack.c.h.bf16 %v7368_v4  ;;  %v9826_v9 = vadd.f32 %v950_v58, %v9503_v34  ;;  %v9829_v21 = vadd.f32 %v951_v2, %v9506_v35  ;;  %v9832_v56 = vadd.f32 %v952_v0, %v9508_v36 }
 0x1dc   : > { %v644_v31 = vadd.f32 %v628_v7, %v580_v23  ;;  %v9836_v30 = vadd.f32 %v953_v1, %v9517_v39  ;;  %v9839_v33 = vadd.f32 %v954_v53, %v9519_v40  ;;  %v581_v45 = vmul.f32 0.5, %v9809_v5 }
 0x1dd   : > { %v955_v35 = vmul.f32 1.5, %v643_v19  ;;  %v582_v55 = vmul.f32 0.5, %v9814_v52  ;;  %v629_v36 = vmul.f32 0.028867513, %v6905_v51  ;;  %v630_v62 = vmul.f32 0.028867513, %v6906_v20 }
 0x1de   : > { %v956_v24 = vmul.f32 1.5, %v644_v31 }
 0x1df   : > { %v645_v53 = vadd.f32 %v629_v36, %v581_v45 }
 0x27a   : > { %v7915_v63 = vpop.f32.mrb[0].mxu1 }
 0x27b   : > { %v889_v29 = vadd.f32 %v7915_v63, %v9550_v48  ;;  %v880_v14 = vpop.f32.mrb[1].mxu1 }
 0x27c   : > { %v881_v34 = vadd.f32 %v9550_v48, %v880_v14  ;;  %v7916_v61 = vpop.f32.mrb[2].mxu1 }
 0x27d   : > { %v993_v8 = vmul.f32 0.25, %v889_v29  ;;  %v1178_v46 = vmul.f32 0.16666667, %v889_v29  ;;  %v892_v25 = vadd.f32 %v7916_v61, %v9550_v48  ;;  %v883_v38 = vpop.f32.mrb[3].mxu1 }
 0x27e   : > { %v991_v39 = vmul.f32 0.25, %v881_v34  ;;  %v1176_v49 = vmul.f32 0.16666667, %v881_v34  ;;  %v884_v40 = vadd.f32 %v9550_v48, %v883_v38 }
 0x27f   : > { %v1009_v59 = vadd.f32 %v993_v8, %v9653_v3  ;;  %v9848_v17 = vadd.f32 %v1178_v46, %v9656_v6  ;;  %v994_v10 = vmul.f32 0.25, %v892_v25  ;;  %v1179_v54 = vmul.f32 0.16666667, %v892_v25  ;;  %v14657_v25 = vld [vmem:[#allocation44_spill] sm:$0xff] }
 0x280   : > { %v1007_v58 = vadd.f32 %v991_v39, %v9661_v11  ;;  %v9852_v4 = vadd.f32 %v1176_v49, %v9664_v13  ;;  %v992_v2 = vmul.f32 0.25, %v884_v40  ;;  %v1177_v0 = vmul.f32 0.16666667, %v884_v40  ;;  %v14659_v39 = vld [vmem:[#allocation45_spill] sm:$0xff] }
 0x281   : > { %v1025_v23 = vmul.f32 0.01, %v1009_v59  ;;  %v1010_v7 = vadd.f32 %v994_v10, %v9667_v15  ;;  %v9856_v1 = vadd.f32 %v1179_v54, %v9670_v22  ;;  %v9863_v11 = vadd.f32 %v955_v35, %v9522_v41  ;;  %v14660_v10 = vld [vmem:[#allocation48_spill] sm:$0xff] }
 0x282   : > { %v1023_v3 = vmul.f32 0.01, %v1007_v58  ;;  %v1008_v6 = vadd.f32 %v992_v2, %v9673_v32  ;;  %v9860_v19 = vadd.f32 %v1177_v0, %v9676_v50  ;;  %v7919_v51 = vpop.f32.mrb[4].mxu1  ;;  %v9867_v15 = vadd.f32 %v956_v24, %v9524_v42  ;;  %v14661_v0 = vld [vmem:[#allocation49_spill] sm:$0xff] }
 0x283   : > { %v1026_v13 = vmul.f32 0.01, %v1010_v7  ;;  %v905_v20 = vadd.f32 %v7919_v51, %v9550_v48  ;;  %v896_v63 = vpop.f32.mrb[5].mxu1  ;;  %v646_v22 = vadd.f32 %v630_v62, %v582_v55  ;;  %v1041_v31 = vadd.f32 %v1025_v23, %v9790_v16  ;;  %v14658_v62 = vld [vmem:[#allocation47_spill] sm:$0xff] }
 0x284   : > { %v1024_v29 = vmul.f32 0.01, %v1008_v6  ;;  %v897_v32 = vadd.f32 %v9550_v48, %v896_v63  ;;  %v7920_v14 = vpop.f32.mrb[6].mxu1  ;;  %v1039_v50 = vadd.f32 %v1023_v3, %v959_v12  ;;  %v957_v6 = vmul.f32 1.5, %v645_v53 }
 0x285   : > { %v1042_v45 = vadd.f32 %v1026_v13, %v9803_v26  ;;  %v997_v34 = vmul.f32 0.25, %v905_v20  ;;  %v1182_v41 = vmul.f32 0.16666667, %v905_v20  ;;  %v908_v61 = vadd.f32 %v7920_v14, %v9550_v48  ;;  %v899_v35 = vpop.f32.mrb[7].mxu1  ;;  %v14663_v13 = vld [vmem:[#allocation51_spill] sm:$0xff] }
 0x286   : > { %v995_v36 = vmul.f32 0.25, %v897_v32  ;;  %v1180_v8 = vmul.f32 0.16666667, %v897_v32  ;;  %v900_v42 = vadd.f32 %v9550_v48, %v899_v35  ;;  %v1040_v55 = vadd.f32 %v1024_v29, %v9812_v57 }
 0x287   : > { %v1056_v46 = vpack.c.bf16 %v1042_v45, %v1041_v31  ;;  %v1013_v16 = vadd.f32 %v997_v34, %v9679_v37  ;;  %v9877_v38 = vadd.f32 %v1182_v41, %v14657_v25  ;;  %v998_v12 = vmul.f32 0.25, %v908_v61  ;;  %v14662_v37 = vld [vmem:[#allocation50_spill] sm:$0xff] }
 0x288   : > { %v1011_v26 = vadd.f32 %v995_v36, %v14658_v62  ;;  %v9881_v49 = vadd.f32 %v1180_v8, %v14659_v39  ;;  %v1183_v40 = vmul.f32 0.16666667, %v908_v61  ;;  %v996_v24 = vmul.f32 0.25, %v900_v42  ;;  %v14664_v8 = vld [vmem:[#allocation32_spill] sm:$0xff]  ;;  %v14668_v39 = vld [vmem:[#allocation54_spill] sm:$0xff] }
 0x289   : > { %v1029_v59 = vmul.f32 0.01, %v1013_v16  ;;  %v1014_v54 = vadd.f32 %v998_v12, %v14660_v10  ;;  %v1181_v58 = vmul.f32 0.16666667, %v900_v42  ;;  %v1055_v2 = vpack.c.bf16 %v1040_v55, %v1039_v50  ;;  %v14665_v16 = vld [vmem:[#allocation33_spill] sm:$0xff] }
 0x28a   : > { %v1027_v57 = vmul.f32 0.01, %v1011_v26  ;;  %v9885_v23 = vadd.f32 %v1183_v40, %v14661_v0  ;;  %v1012_v7 = vadd.f32 %v996_v24, %v14662_v37  ;;  %v7923_v3 = vpop.f32.mrb[8].mxu1  ;;  %v958_v29 = vmul.f32 1.5, %v646_v22 }
 0x28b   : > { %v1030_v51 = vmul.f32 0.01, %v1014_v54  ;;  %v9889_v20 = vadd.f32 %v1181_v58, %v14663_v13  ;;  %v921_v63 = vadd.f32 %v7923_v3, %v9550_v48  ;;  %7945 = vmatprep.mubr.bf16.mxu0 %v1055_v2  ;;  %v912_v31 = vpop.f32.mrb[9].mxu1  ;;  %v1045_v34 = vadd.f32 %v1029_v59, %v9823_v44  ;;  %v14667_v44 = vld [vmem:[#allocation53_spill] sm:$0xff]  ;;  %v14670_v58 = vld [vmem:[#allocation56_spill] sm:$0xff] }
 0x28c   : > { %v1028_v32 = vmul.f32 0.01, %v1012_v7  ;;  %v913_v14 = vadd.f32 %v9550_v48, %v912_v31  ;;  %7946 = vmatmul.mubr.bf16.vlgmr.msra.gmra.mrb[16].mxu0 %v1056_v46  ;;  %v7924_v50 = vpop.f32.mrb[10].mxu1  ;;  %v1043_v45 = vadd.f32 %v1027_v57, %v9817_v43  ;;  %v14666_v43 = vld [vmem:[#allocation52_spill] sm:$0xff]  ;;  %v14672_v7 = vld [vmem:[#allocation59_spill] sm:$0xff] }
 0x28d   : > { %v1001_v41 = vmul.f32 0.25, %v921_v63  ;;  %v1186_v53 = vmul.f32 0.16666667, %v921_v63  ;;  %v924_v61 = vadd.f32 %v7924_v50, %v9550_v48  ;;  %v915_v35 = vpop.f32.mrb[11].mxu1  ;;  %v1046_v36 = vadd.f32 %v1030_v51, %v9826_v9  ;;  %7994 = vmatpush3.bf16.msra.mxu0 %v14664_v8  ;;  %v14669_v9 = vld [vmem:[#allocation55_spill] sm:$0xff]  ;;  %v14673_v51 = vld [vmem:[#allocation60_spill] sm:$0xff] }
 0x28e   : > { %v999_v42 = vmul.f32 0.25, %v913_v14  ;;  %v1184_v22 = vmul.f32 0.16666667, %v913_v14  ;;  %v916_v55 = vadd.f32 %v9550_v48, %v915_v35  ;;  %v1044_v46 = vadd.f32 %v1028_v32, %v9820_v60  ;;  %7995 = vmatprep.subr.bf16.mxu0 %v14665_v16  ;;  %v14671_v60 = vld [vmem:[#allocation58_spill] sm:$0xff] }
 0x28f   : > { %v1017_v25 = vadd.f32 %v1001_v41, %v14666_v43  ;;  %v9903_v12 = vadd.f32 %v1186_v53, %v14667_v44  ;;  %v1002_v62 = vmul.f32 0.25, %v924_v61  ;;  %v1187_v26 = vmul.f32 0.16666667, %v924_v61  ;;  %v14674_v32 = vld [vmem:[#allocation34_spill] sm:$0xff]  ;;  %v14675_v53 = vld [vmem:[#allocation41_spill] sm:$0xff] }
 0x290   : > { %v1015_v40 = vadd.f32 %v999_v42, %v14668_v39  ;;  %v9907_v24 = vadd.f32 %v1184_v22, %v14669_v9  ;;  %v1000_v59 = vmul.f32 0.25, %v916_v55  ;;  %v1185_v10 = vmul.f32 0.16666667, %v916_v55 }
 0x291   : > { %v1033_v54 = vmul.f32 0.01, %v1017_v25  ;;  %v1018_v2 = vadd.f32 %v1002_v62, %v14670_v58  ;;  %v9911_v57 = vadd.f32 %v1187_v26, %v14671_v60  ;;  %v1057_v0 = vpack.c.bf16 %v1044_v46, %v1043_v45  ;;  %7996 = vmatpush3.bf16.msra.mxu0 %v14665_v16  ;;  %v14676_v45 = vld [vmem:[#allocation42_spill] sm:$0xff]  ;;  %v14677_v26 = vld [vmem:[#allocation35_spill] sm:$0xff] }
 0x292   : > { %v1031_v37 = vmul.f32 0.01, %v1015_v40  ;;  %v1016_v3 = vadd.f32 %v1000_v59, %v14672_v7  ;;  %v9916_v13 = vadd.f32 %v1185_v10, %v14673_v51  ;;  %v7927_v63 = vpop.f32.mrb[12].mxu1  ;;  %v1058_v31 = vpack.c.bf16 %v1046_v36, %v1045_v34  ;;  %7997 = vmatprep.subr.bf16.mxu0 %v14674_v32  ;;  %v14680_v10 = vld [vmem:[#allocation63_spill] sm:$0xff] }
 0x293   : > { %v1034_v14 = vmul.f32 0.01, %v1018_v2  ;;  %v937_v50 = vadd.f32 %v7927_v63, %v9550_v48  ;;  %7949 = vmatprep.mubr.bf16.mxu0 %v1057_v0  ;;  %v928_v41 = vpop.f32.mrb[13].mxu1  ;;  %v973_v61 = vadd.f32 %v957_v6, %v14675_v53  ;;  %v974_v35 = vadd.f32 %v958_v29, %v14676_v45  ;;  %v14686_v53 = vld [vmem:[#allocation36_spill] sm:$0xff] }
 0x294   : > { %v1032_v8 = vmul.f32 0.01, %v1016_v3  ;;  %v929_v42 = vadd.f32 %v9550_v48, %v928_v41  ;;  %7950 = vmatmul.mubr.bf16.gmra.mrb[20].mxu0 %v1058_v31  ;;  %v7928_v22 = vpop.f32.mrb[14].mxu1  ;;  %v1047_v55 = vadd.f32 %v1031_v37, %v9829_v21  ;;  %v1049_v34 = vadd.f32 %v1033_v54, %v9836_v30  ;;  %v14678_v21 = vld [vmem:[#allocation61_spill] sm:$0xff]  ;;  %v14679_v30 = vld [vmem:[#allocation62_spill] sm:$0xff]  ;;  %v14684_v31 = vld [vmem:[#allocation68_spill] sm:$0xff] }
 0x295   : > { %v1005_v36 = vmul.f32 0.25, %v937_v50  ;;  %v1190_v46 = vmul.f32 0.16666667, %v937_v50  ;;  %v940_v16 = vadd.f32 %v7928_v22, %v9550_v48  ;;  %v931_v43 = vpop.f32.mrb[15].mxu1  ;;  %v1050_v25 = vadd.f32 %v1034_v14, %v9839_v33  ;;  %7998 = vmatpush3.bf16.msra.mxu0 %v14674_v32  ;;  %v14681_v33 = vld [vmem:[#allocation64_spill] sm:$0xff]  ;;  %v14682_v37 = vld [vmem:[#allocation65_spill] sm:$0xff] }
 0x296   : > { %v1003_v6 = vmul.f32 0.25, %v929_v42  ;;  %v1188_v29 = vmul.f32 0.16666667, %v929_v42  ;;  %v932_v44 = vadd.f32 %v9550_v48, %v931_v43  ;;  %v1048_v62 = vadd.f32 %v1032_v8, %v9832_v56  ;;  %7999 = vmatprep.subr.bf16.mxu0 %v14677_v26  ;;  %v14683_v56 = vld [vmem:[#allocation67_spill] sm:$0xff]  ;;  %v14685_v14 = vld [vmem:[#allocation70_spill] sm:$0xff] }
 0x297   : > { %v1021_v39 = vadd.f32 %v1005_v36, %v14678_v21  ;;  %v9933_v40 = vadd.f32 %v1190_v46, %v14679_v30  ;;  %v1006_v9 = vmul.f32 0.25, %v940_v16  ;;  %v1191_v59 = vmul.f32 0.16666667, %v940_v16  ;;  %v14687_v46 = vld [vmem:[#allocation37_spill] sm:$0xff] }
 0x298   : > { %v1019_v54 = vadd.f32 %v1003_v6, %v14680_v10  ;;  %v9937_v58 = vadd.f32 %v1188_v29, %v14681_v33  ;;  %v1004_v2 = vmul.f32 0.25, %v932_v44  ;;  %v1189_v60 = vmul.f32 0.16666667, %v932_v44  ;;  %v14691_v33 = vld [vmem:[#allocation46_spill] sm:$0xff] }
 0x299   : > { %v1037_v0 = vmul.f32 0.01, %v1021_v39  ;;  %v1022_v7 = vadd.f32 %v1006_v9, %v14682_v37  ;;  %v9941_v3 = vadd.f32 %v1191_v59, %v14683_v56  ;;  %v1059_v51 = vpack.c.bf16 %v1048_v62, %v1047_v55  ;;  %8000 = vmatpush3.bf16.msra.mxu0 %v14677_v26 }
 0x29a   : > { %v1035_v63 = vmul.f32 0.01, %v1019_v54  ;;  %v1020_v32 = vadd.f32 %v1004_v2, %v14684_v31  ;;  %v9946_v50 = vadd.f32 %v1189_v60, %v14685_v14  ;;  %v1060_v41 = vpack.c.bf16 %v1050_v25, %v1049_v34  ;;  %8001 = vmatprep.subr.bf16.mxu0 %v14686_v53  ;;  %v14688_v34 = vld [vmem:[#allocation38_spill] sm:$0xff]  ;;  %v8791_v60 = vld [vmem:[#allocation2] sm:$0xff]  ;;  %v14695_v14 = vld [vmem:[#allocation43_spill] sm:$0xff] }
 0x29b   : > { %v1038_v45 = vmul.f32 0.01, %v1022_v7  ;;  %7953 = vmatprep.mubr.bf16.mxu0 %v1059_v51  ;;  %v1053_v42 = vadd.f32 %v1037_v0, %v973_v61  ;;  %v14689_v61 = vld [vmem:[#allocation39_spill] sm:$0xff]  ;;  %v1243_v2 = vadd.f32 %v14691_v33, %v9484_v28  ;;  %v14692_v0 = vld [vmem:[#allocation57_spill] sm:$0xff] }
 0x29c   : > { %v1036_v8 = vmul.f32 0.01, %v1020_v32  ;;  %7954 = vmatmul.mubr.bf16.gmra.mrb[24].mxu0 %v1060_v41  ;;  %v1051_v55 = vadd.f32 %v1035_v63, %v9863_v11  ;;  %v1240_v37 = vadd.f32 %v8791_v60, %v14692_v0  ;;  %v8792_v51 = vld [vmem:[#allocation2 + $0x8] sm:$0xff]  ;;  %v14693_v63 = vld [vmem:[#allocation66_spill] sm:$0xff] }
 0x29d   : > { %v1054_v22 = vadd.f32 %v1038_v45, %v974_v35  ;;  %8002 = vmatpush3.bf16.msra.mxu0 %v14686_v53  ;;  %v9958_v35 = vld [vmem:[#allocation6] sm:$0xff]   ;;  %v1241_v31 = vadd.f32 %v8792_v51, %v14693_v63  ;;  %v8796_v60 = vld [vmem:[#allocation2 + $0x30] sm:$0xff]  ;;  %v14701_v0 = vld [vmem:[#allocation69_spill] sm:$0xff] }
 0x29e   : > { %v1052_v36 = vadd.f32 %v1036_v8, %v9867_v15  ;;  %8003 = vmatprep.subr.bf16.mxu0 %v14687_v46  ;;  %14690 = vst [vmem:[#allocation44_spill] sm:$0xff] %v9958_v35 }
 0x29f   : > { %v1062_v16 = vpack.c.bf16 %v1054_v22, %v1053_v42 }
 0x2a0   : > { %v1061_v43 = vpack.c.bf16 %v1052_v36, %v1051_v55 }
 0x2a1   : > { %8004 = vmatpush3.bf16.msra.mxu0 %v14687_v46 }
 0x2a2   : > { %7957 = vmatprep.mubr.bf16.mxu0 %v1061_v43  ;;  %8005 = vmatprep.subr.bf16.mxu0 %v14688_v34 }
 0x2a4   : > { %7958 = vmatmul.mubr.bf16.gmra.mrb[28].mxu0 %v1062_v16 }
 0x2a5   : > { %8006 = vmatpush3.bf16.msra.mxu0 %v14688_v34 }
 0x2a6   : > { %8007 = vmatprep.subr.bf16.mxu0 %v14689_v61 }
 0x2a9   : > { %8008 = vmatpush3.bf16.msra.mxu0 %v14689_v61 }
 0x2aa   : > { %8057 = vmatprep.subr.bf16.mxu0 %v9958_v35 }
 0x35f   : > { %v7947_v11 = vpop.f32.mrb[16].mxu0 }
 0x360   : > { %v1106_v15 = vadd.f32 %v7947_v11, %v9550_v48  ;;  %v1097_v25 = vpop.f32.mrb[17].mxu0 }
 0x361   : > { %v1098_v6 = vadd.f32 %v9550_v48, %v1097_v25  ;;  %v7948_v29 = vpop.f32.mrb[18].mxu0 }
 0x362   : > { %v1210_v44 = vmul.f32 0.6666667, %v1106_v15  ;;  %v1109_v62 = vadd.f32 %v7948_v29, %v9550_v48  ;;  %v1100_v26 = vpop.f32.mrb[19].mxu0 }
 0x363   : > { %v1208_v21 = vmul.f32 0.6666667, %v1098_v6  ;;  %v1101_v39 = vadd.f32 %v9550_v48, %v1100_v26  ;;  %v14698_v26 = vld [vmem:[#allocation73_spill] sm:$0xff] }
 0x364   : > { %v1226_v30 = vadd.f32 %v1210_v44, %v9848_v17  ;;  %v1211_v9 = vmul.f32 0.6666667, %v1109_v62  ;;  %v14694_v17 = vld [vmem:[#allocation40_spill] sm:$0xff]  ;;  %v8793_v62 = vld [vmem:[#allocation2 + $0x38] sm:$0xff] }
 0x365   : > { %v1224_v59 = vadd.f32 %v1208_v21, %v9852_v4  ;;  %v1209_v10 = vmul.f32 0.6666667, %v1101_v39  ;;  %v1242_v41 = vadd.f32 %v14695_v14, %v14694_v17  ;;  %v1247_v21 = vadd.f32 %v8793_v62, %v14698_v26  ;;  %v8801_v62 = vld [vmem:[#allocation2 + $0x48] sm:$0xff]  ;;  %v14709_v26 = vld [vmem:[#allocation75_spill] sm:$0xff] }
 0x366   : > { %v1227_v54 = vadd.f32 %v1211_v9, %v9856_v1  ;;  %v1258_v4 = vmul.f32 0.01, %v1226_v30  ;;  %v8794_v30 = vld [vmem:[#allocation2 + $0x20] sm:$0xff]  ;;  %v14699_v9 = vld [vmem:[#allocation71_spill] sm:$0xff] }
 0x367   : > { %v1256_v7 = vmul.f32 0.01, %v1224_v59  ;;  %v1225_v56 = vadd.f32 %v1209_v10, %v9860_v19  ;;  %v7951_v32 = vpop.f32.mrb[20].mxu0  ;;  %v1244_v59 = vadd.f32 %v8794_v30, %v14699_v9 }
 0x368   : > { %v1259_v53 = vmul.f32 0.01, %v1227_v54  ;;  %v1122_v1 = vadd.f32 %v7951_v32, %v9550_v48  ;;  %v1113_v45 = vpop.f32.mrb[21].mxu0  ;;  %v9985_v61 = vadd.f32 %v1258_v4, %v1242_v41  ;;  %v8795_v54 = vld [vmem:[#allocation2 + $0x28] sm:$0xff] }
 0x369   : > { %v1257_v8 = vmul.f32 0.01, %v1225_v56  ;;  %v1114_v28 = vadd.f32 %v9550_v48, %v1113_v45  ;;  %v7952_v42 = vpop.f32.mrb[22].mxu0  ;;  %v9980_v46 = vadd.f32 %v1256_v7, %v1240_v37  ;;  %v10005_v4 = vld [vmem:[#allocation6 + $0x8] sm:$0xff]  }
 0x36a   : > { %v9977_v22 = vadd.f32 %v1259_v53, %v1243_v2  ;;  %v1214_v55 = vmul.f32 0.6666667, %v1122_v1  ;;  %v1125_v19 = vadd.f32 %v7952_v42, %v9550_v48  ;;  %v1116_v36 = vpop.f32.mrb[23].mxu0  ;;  %14697 = vst [vmem:[#allocation45_spill] sm:$0xff] %v9985_v61  ;;  %14703 = vst [vmem:[#allocation49_spill] sm:$0xff] %v10005_v4 }
 0x36b   : > { %v9982_v16 = vadd.f32 %v1257_v8, %v1241_v31  ;;  %v1212_v43 = vmul.f32 0.6666667, %v1114_v28  ;;  %v1117_v34 = vadd.f32 %v9550_v48, %v1116_v36 }
 0x36c   : > { %v1230_v11 = vadd.f32 %v1214_v55, %v9877_v38  ;;  %v1215_v15 = vmul.f32 0.6666667, %v1125_v19  ;;  %v1419_v39 = vpack.c.bf16 %v9977_v22, %v9985_v61 }
 0x36d   : > { %14696 = vst [vmem:[#allocation47_spill] sm:$0xff] %v9982_v16  ;;  %v1228_v25 = vadd.f32 %v1212_v43, %v9881_v49  ;;  %v1213_v6 = vmul.f32 0.6666667, %v1117_v34  ;;  %v1418_v29 = vpack.c.bf16 %v9982_v16, %v9980_v46  ;;  %v14700_v49 = vld [vmem:[#allocation72_spill] sm:$0xff] }
 0x36e   : > { %v1231_v44 = vadd.f32 %v1215_v15, %v9885_v23  ;;  %v1245_v33 = vadd.f32 %v8795_v54, %v14700_v49  ;;  %v1246_v23 = vadd.f32 %v8796_v60, %v14701_v0  ;;  %v1262_v37 = vmul.f32 0.01, %v1230_v11  ;;  %v8798_v11 = vld [vmem:[#allocation2 + $0x58] sm:$0xff] }
 0x36f   : > { %v1260_v10 = vmul.f32 0.01, %v1228_v25  ;;  %v1229_v38 = vadd.f32 %v1213_v6, %v9889_v20  ;;  %v7955_v2 = vpop.f32.mrb[24].mxu0  ;;  %7977 = vmatprep.mubr.bf16.mxu1 %v1418_v29  ;;  %v1251_v15 = vadd.f32 %v8798_v11, %v9785_v47  ;;  %v10024_v25 = vld [vmem:[#allocation6 + $0x10] sm:$0xff]   ;;  %v14710_v47 = vld [vmem:[#allocation76_spill] sm:$0xff]  ;;  %v8808_v11 = vld [vmem:[#allocation2 + $0x68] sm:$0xff] }
 0x370   : > { %v1263_v7 = vmul.f32 0.01, %v1231_v44  ;;  %v1138_v56 = vadd.f32 %v7955_v2, %v9550_v48  ;;  %v1129_v51 = vpop.f32.mrb[25].mxu0  ;;  %7978 = vmatmul.mubr.bf16.vlgmr.msra.gmra.mrb[16].mxu1 %v1419_v39  ;;  %v10013_v28 = vadd.f32 %v1262_v37, %v1246_v23  ;;  %14707 = vst [vmem:[#allocation33_spill] sm:$0xff] %v10024_v25  ;;  %v8802_v39 = vld [vmem:[#allocation2 + $0x50] sm:$0xff]  ;;  %v10042_v37 = vld [vmem:[#allocation6 + $0x18] sm:$0xff]  }
 0x371   : > { %v1261_v63 = vmul.f32 0.01, %v1229_v38  ;;  %v1130_v31 = vadd.f32 %v9550_v48, %v1129_v51  ;;  %v7956_v32 = vpop.f32.mrb[26].mxu0  ;;  %8026 = vmatpush3.bf16.msra.mxu1 %v9958_v35  ;;  %v10008_v53 = vadd.f32 %v1260_v10, %v1244_v59  ;;  %v1250_v30 = vadd.f32 %v8802_v39, %v14710_v47  ;;  %v10034_v10 = vld [vmem:[%s14622_s9] ss:$0 sm:$0xff]  ;;  %14713 = vst [vmem:[#allocation54_spill] sm:$0xff] %v10042_v37 }
 0x372   : > { %v10002_v20 = vadd.f32 %v1263_v7, %v1247_v21  ;;  %v1218_v17 = vmul.f32 0.6666667, %v1138_v56  ;;  %v1141_v14 = vadd.f32 %v7956_v32, %v9550_v48  ;;  %v1132_v41 = vpop.f32.mrb[27].mxu0  ;;  %8027 = vmatprep.subr.bf16.mxu1 %v10005_v4  ;;  %14706 = vst [vmem:[#allocation32_spill] sm:$0xff] %v10013_v28  ;;  %v1249_v21 = vadd.f32 %v8801_v62, %v14709_v26  ;;  %v10085_v62 = vld [vmem:[#allocation6 + $0x30] sm:$0xff]   ;;  %v10089_v26 = vld [vmem:[#allocation6 + $0x38] sm:$0xff]  }
 0x373   : > { %14704 = vst [vmem:[#allocation50_spill] sm:$0xff] %v10008_v53  ;;  %v10010_v1 = vadd.f32 %v1261_v63, %v1245_v33  ;;  %v1216_v45 = vmul.f32 0.6666667, %v1130_v31  ;;  %v1133_v8 = vadd.f32 %v9550_v48, %v1132_v41  ;;  %14711 = vst [vmem:[#allocation52_spill] sm:$0xff] %v10034_v10 }
 0x374   : > { %14702 = vst [vmem:[#allocation48_spill] sm:$0xff] %v10002_v20  ;;  %v1234_v42 = vadd.f32 %v1218_v17, %v9903_v12  ;;  %v1219_v55 = vmul.f32 0.6666667, %v1141_v14  ;;  %v1421_v48 = vpack.c.bf16 %v10002_v20, %v10013_v28  ;;  %v8800_v12 = vld [vmem:[#allocation2 + $0x40] sm:$0xff]  ;;  %14723 = vst [vmem:[#allocation61_spill] sm:$0xff] %v10085_v62 }
 0x375   : > { %14705 = vst [vmem:[#allocation51_spill] sm:$0xff] %v10010_v1  ;;  %v1232_v19 = vadd.f32 %v1216_v45, %v9907_v24  ;;  %v1217_v36 = vmul.f32 0.6666667, %v1133_v8  ;;  %v1420_v43 = vpack.c.bf16 %v10010_v1, %v10008_v53  ;;  %8028 = vmatpush3.bf16.msra.mxu1 %v10005_v4  ;;  %v14708_v24 = vld [vmem:[#allocation74_spill] sm:$0xff]  ;;  %14724 = vst [vmem:[#allocation62_spill] sm:$0xff] %v10089_v26 }
 0x376   : > { %v1235_v34 = vadd.f32 %v1219_v55, %v9911_v57  ;;  %8029 = vmatprep.subr.bf16.mxu1 %v10024_v25  ;;  %v1248_v6 = vadd.f32 %v8800_v12, %v14708_v24  ;;  %v1266_v9 = vmul.f32 0.01, %v1234_v42  ;;  %v8805_v42 = vld [vmem:[#allocation2 + $0x78] sm:$0xff] }
 0x377   : > { %v1264_v29 = vmul.f32 0.01, %v1232_v19  ;;  %v1233_v44 = vadd.f32 %v1217_v36, %v9916_v13  ;;  %v7959_v57 = vpop.f32.mrb[28].mxu0  ;;  %7981 = vmatprep.mubr.bf16.mxu1 %v1420_v43  ;;  %v1255_v55 = vadd.f32 %v8805_v42, %v9814_v52  ;;  %v10061_v36 = vld [vmem:[#allocation6 + $0x20] sm:$0xff]  }
 0x378   : > { %v1267_v59 = vmul.f32 0.01, %v1235_v34  ;;  %v1154_v38 = vadd.f32 %v10034_v10, %v7959_v57  ;;  %v1145_v54 = vpop.f32.mrb[29].mxu0  ;;  %7982 = vmatmul.mubr.bf16.gmra.mrb[20].mxu1 %v1421_v48  ;;  %v10050_v31 = vadd.f32 %v1266_v9, %v1250_v30  ;;  %14717 = vst [vmem:[#allocation59_spill] sm:$0xff] %v10061_v36 }
 0x379   : > { %v1265_v13 = vmul.f32 0.01, %v1233_v44  ;;  %v1146_v49 = vadd.f32 %v10034_v10, %v1145_v54  ;;  %v7960_v33 = vpop.f32.mrb[30].mxu0  ;;  %8030 = vmatpush3.bf16.msra.mxu1 %v10024_v25  ;;  %v10045_v7 = vadd.f32 %v1264_v29, %v1248_v6  ;;  %v10071_v29 = vld [vmem:[#allocation6 + $0x28] sm:$0xff]  }
 0x37a   : > { %v10039_v2 = vadd.f32 %v1267_v59, %v1251_v15  ;;  %v1222_v60 = vmul.f32 0.6666667, %v1154_v38  ;;  %v1157_v0 = vadd.f32 %v10034_v10, %v7960_v33  ;;  %v1148_v23 = vpop.f32.mrb[31].mxu0  ;;  %8031 = vmatprep.subr.bf16.mxu1 %v10042_v37  ;;  %14716 = vst [vmem:[#allocation58_spill] sm:$0xff] %v10050_v31  ;;  %v1253_v15 = vadd.f32 %v8808_v11, %v9800_v18 }
 0x37b   : > { %14714 = vst [vmem:[#allocation55_spill] sm:$0xff] %v10045_v7  ;;  %v10047_v56 = vadd.f32 %v1265_v13, %v1249_v21  ;;  %v1220_v51 = vmul.f32 0.6666667, %v1146_v49  ;;  %v1149_v63 = vadd.f32 %v10034_v10, %v1148_v23  ;;  %14719 = vst [vmem:[#allocation34_spill] sm:$0xff] %v10071_v29 }
 0x37c   : > { %14712 = vst [vmem:[#allocation53_spill] sm:$0xff] %v10039_v2  ;;  %v1238_v32 = vadd.f32 %v1222_v60, %v9933_v40  ;;  %v1223_v17 = vmul.f32 0.6666667, %v1157_v0  ;;  %v1423_v19 = vpack.c.bf16 %v10039_v2, %v10050_v31  ;;  %v8807_v40 = vld [vmem:[#allocation2 + $0x60] sm:$0xff] }
 0x37d   : > { %14715 = vst [vmem:[#allocation56_spill] sm:$0xff] %v10047_v56  ;;  %v1236_v14 = vadd.f32 %v1220_v51, %v9937_v58  ;;  %v1221_v41 = vmul.f32 0.6666667, %v1149_v63  ;;  %v1422_v45 = vpack.c.bf16 %v10047_v56, %v10045_v7  ;;  %8032 = vmatpush3.bf16.msra.mxu1 %v10042_v37  ;;  %v1252_v58 = vadd.f32 %v8807_v40, %v9797_v27 }
 0x37e   : > { %v1239_v8 = vadd.f32 %v1223_v17, %v9941_v3  ;;  %8033 = vmatprep.subr.bf16.mxu1 %v10061_v36  ;;  %v8809_v3 = vld [vmem:[#allocation2 + $0x70] sm:$0xff]  ;;  %v1270_v48 = vmul.f32 0.01, %v1238_v32 }
 0x37f   : > { %v1268_v43 = vmul.f32 0.01, %v1236_v14  ;;  %v1237_v34 = vadd.f32 %v1221_v41, %v9946_v50  ;;  %7985 = vmatprep.mubr.bf16.mxu1 %v1422_v45  ;;  %v1254_v52 = vadd.f32 %v8809_v3, %v9809_v5 }
 0x380   : > { %v1271_v12 = vmul.f32 0.01, %v1239_v8  ;;  %7986 = vmatmul.mubr.bf16.gmra.mrb[24].mxu1 %v1423_v19 }
 0x381   : > { %v1269_v24 = vmul.f32 0.01, %v1237_v34  ;;  %8034 = vmatpush3.bf16.msra.mxu1 %v10061_v36  ;;  %v10074_v27 = vadd.f32 %v1268_v43, %v1252_v58  ;;  %v10078_v18 = vadd.f32 %v1270_v48, %v1254_v52 }
 0x382   : > { %v10069_v6 = vadd.f32 %v1271_v12, %v1255_v55  ;;  %8035 = vmatprep.subr.bf16.mxu1 %v10071_v29 }
 0x383   : > { %14720 = vst [vmem:[#allocation41_spill] sm:$0xff] %v10074_v27  ;;  %v10076_v50 = vadd.f32 %v1269_v24, %v1253_v15  ;;  %14722 = vst [vmem:[#allocation35_spill] sm:$0xff] %v10078_v18 }
 0x384   : > { %14718 = vst [vmem:[#allocation60_spill] sm:$0xff] %v10069_v6  ;;  %v1425_v44 = vpack.c.bf16 %v10069_v6, %v10078_v18 }
 0x385   : > { %14721 = vst [vmem:[#allocation42_spill] sm:$0xff] %v10076_v50  ;;  %v1424_v5 = vpack.c.bf16 %v10076_v50, %v10074_v27  ;;  %8036 = vmatpush3.bf16.msra.mxu1 %v10071_v29 }
 0x386   : > { %8037 = vmatprep.subr.bf16.mxu1 %v10085_v62 }
 0x387   : > { %7989 = vmatprep.mubr.bf16.mxu1 %v1424_v5 }
 0x388   : > { %7990 = vmatmul.mubr.bf16.gmra.mrb[28].mxu1 %v1425_v44 }
 0x389   : > { %8038 = vmatpush3.bf16.msra.mxu1 %v10085_v62 }
 0x38a   : > { %8039 = vmatprep.subr.bf16.mxu1 %v10089_v26 }
 0x38d   : > { %8040 = vmatpush3.bf16.msra.mxu1 %v10089_v26 }
 0x38e   : > { %8089 = vmatprep.subr.bf16.mxu1 %v9958_v35 }
 0x443   : > { %v7979_v21 = vpop.f32.mrb[16].mxu1 }
 0x444   : > { %v10095_v57 = vadd.f32 %v10034_v10, %v7979_v21  ;;  %v1460_v39 = vpop.f32.mrb[17].mxu1 }
 0x445   : > { %v10098_v47 = vadd.f32 %v10034_v10, %v1460_v39  ;;  %v7980_v30 = vpop.f32.mrb[18].mxu1 }
 0x446   : > { %v1525_v9 = vmul.f32 0.01, %v10095_v57  ;;  %v10102_v59 = vadd.f32 %v10034_v10, %v7980_v30  ;;  %v1463_v38 = vpop.f32.mrb[19].mxu1 }
 0x447   : > { %v1523_v54 = vmul.f32 0.01, %v10098_v47  ;;  %v10106_v13 = vadd.f32 %v10034_v10, %v1463_v38 }
 0x448   : > { %v1526_v49 = vmul.f32 0.01, %v10102_v59  ;;  %v1541_v60 = vadd.f32 %v1525_v9, %v9985_v61 }
 0x449   : > { %v1524_v33 = vmul.f32 0.01, %v10106_v13  ;;  %v1539_v51 = vadd.f32 %v1523_v54, %v9980_v46 }
 0x44a   : > { %v1542_v0 = vadd.f32 %v1526_v49, %v9977_v22 }
 0x44b   : > { %v7983_v23 = vpop.f32.mrb[20].mxu1  ;;  %v1540_v63 = vadd.f32 %v1524_v33, %v9982_v16 }
 0x44c   : > { %v1556_v32 = vpack.c.bf16 %v1542_v0, %v1541_v60  ;;  %v10115_v17 = vadd.f32 %v10034_v10, %v7983_v23  ;;  %v1476_v14 = vpop.f32.mrb[21].mxu1 }
 0x44d   : > { %v10118_v41 = vadd.f32 %v10034_v10, %v1476_v14  ;;  %v7984_v45 = vpop.f32.mrb[22].mxu1  ;;  %v1555_v8 = vpack.c.bf16 %v1540_v63, %v1539_v51 }
 0x44e   : > { %14725 = vst [vmem:[#allocation63_spill] sm:$0xff] %v10115_v17  ;;  %v1529_v42 = vmul.f32 0.01, %v10115_v17  ;;  %v10122_v55 = vadd.f32 %v10034_v10, %v7984_v45  ;;  %v1479_v19 = vpop.f32.mrb[23].mxu1 }
 0x44f   : > { %14726 = vst [vmem:[#allocation64_spill] sm:$0xff] %v10118_v41  ;;  %v1527_v40 = vmul.f32 0.01, %v10118_v41  ;;  %v10126_v58 = vadd.f32 %v10034_v10, %v1479_v19  ;;  %8009 = vmatprep.mubr.bf16.mxu0 %v1555_v8 }
 0x450   : > { %14727 = vst [vmem:[#allocation65_spill] sm:$0xff] %v10122_v55  ;;  %v1530_v43 = vmul.f32 0.01, %v10122_v55  ;;  %8010 = vmatmul.mubr.bf16.vlgmr.msra.gmra.mrb[32].mxu0 %v1556_v32  ;;  %v1545_v11 = vadd.f32 %v1529_v42, %v10013_v28 }
 0x451   : > { %14728 = vst [vmem:[#allocation67_spill] sm:$0xff] %v10126_v58  ;;  %v1528_v34 = vmul.f32 0.01, %v10126_v58  ;;  %8058 = vmatpush3.bf16.msra.mxu0 %v9958_v35  ;;  %v1543_v52 = vadd.f32 %v1527_v40, %v10008_v53 }
 0x452   : > { %v1546_v15 = vadd.f32 %v1530_v43, %v10002_v20  ;;  %8059 = vmatprep.subr.bf16.mxu0 %v10005_v4 }
 0x453   : > { %v7987_v3 = vpop.f32.mrb[24].mxu1  ;;  %v1544_v48 = vadd.f32 %v1528_v34, %v10010_v1 }
 0x454   : > { %v10137_v12 = vadd.f32 %v10034_v10, %v7987_v3  ;;  %v1492_v24 = vpop.f32.mrb[25].mxu1  ;;  %v1558_v5 = vpack.c.bf16 %v1546_v15, %v1545_v11 }
 0x455   : > { %v10140_v44 = vadd.f32 %v10034_v10, %v1492_v24  ;;  %v7988_v21 = vpop.f32.mrb[26].mxu1  ;;  %v1557_v39 = vpack.c.bf16 %v1544_v48, %v1543_v52  ;;  %8060 = vmatpush3.bf16.msra.mxu0 %v10005_v4 }
 0x456   : > { %14729 = vst [vmem:[#allocation68_spill] sm:$0xff] %v10137_v12  ;;  %v1533_v30 = vmul.f32 0.01, %v10137_v12  ;;  %v10145_v9 = vadd.f32 %v10034_v10, %v7988_v21  ;;  %v1495_v38 = vpop.f32.mrb[27].mxu1  ;;  %8061 = vmatprep.subr.bf16.mxu0 %v10024_v25 }
 0x457   : > { %14730 = vst [vmem:[#allocation70_spill] sm:$0xff] %v10140_v44  ;;  %v1531_v54 = vmul.f32 0.01, %v10140_v44  ;;  %v10150_v49 = vadd.f32 %v10034_v10, %v1495_v38  ;;  %8013 = vmatprep.mubr.bf16.mxu0 %v1557_v39 }
 0x458   : > { %14731 = vst [vmem:[#allocation36_spill] sm:$0xff] %v10145_v9  ;;  %v1534_v33 = vmul.f32 0.01, %v10145_v9  ;;  %8014 = vmatmul.mubr.bf16.gmra.mrb[36].mxu0 %v1558_v5  ;;  %v1549_v0 = vadd.f32 %v1533_v30, %v10050_v31 }
 0x459   : > { %14732 = vst [vmem:[#allocation37_spill] sm:$0xff] %v10150_v49  ;;  %v1532_v60 = vmul.f32 0.01, %v10150_v49  ;;  %8062 = vmatpush3.bf16.msra.mxu0 %v10024_v25  ;;  %v1547_v63 = vadd.f32 %v1531_v54, %v10045_v7  ;;  %v7370_v54 = vld [vmem:[%s9404_s10 + $0x48] sm:$0xff]  }
 0x45a   : > { %v1550_v23 = vadd.f32 %v1534_v33, %v10039_v2  ;;  %8063 = vmatprep.subr.bf16.mxu0 %v10042_v37  ;;  %v7369_v33 = vld [vmem:[%s9404_s10 + $0x40] sm:$0xff]  }
 0x45b   : > { %v7991_v51 = vpop.f32.mrb[28].mxu1  ;;  %v1548_v32 = vadd.f32 %v1532_v60, %v10047_v56  ;;  %v6913_v60 = vunpack.c.l.bf16 %v7370_v54 }
 0x45c   : > { %v10161_v14 = vadd.f32 %v10034_v10, %v7991_v51  ;;  %v1508_v45 = vpop.f32.mrb[29].mxu1  ;;  %v1560_v8 = vpack.c.bf16 %v1550_v23, %v1549_v0  ;;  %v7378_v0 = vld [vmem:[%s9410_s18 + $0x48] sm:$0xff]   ;;  %v6914_v23 = vunpack.c.h.bf16 %v7370_v54  ;;  %v6909_v51 = vunpack.c.l.bf16 %v7369_v33 }
 0x45d   : > { %v10164_v42 = vadd.f32 %v10034_v10, %v1508_v45  ;;  %v7992_v19 = vpop.f32.mrb[30].mxu1  ;;  %v1559_v40 = vpack.c.bf16 %v1548_v32, %v1547_v63  ;;  %8064 = vmatpush3.bf16.msra.mxu0 %v10042_v37  ;;  %v7377_v63 = vld [vmem:[%s9410_s18 + $0x40] sm:$0xff]   ;;  %v7371_v32 = vld [vmem:[%s9404_s10 + $0x50] sm:$0xff]   ;;  %v7372_v45 = vld [vmem:[%s9404_s10 + $0x58] sm:$0xff]  }
 0x45e   : > { %14733 = vst [vmem:[#allocation38_spill] sm:$0xff] %v10161_v14  ;;  %v1537_v43 = vmul.f32 0.01, %v10161_v14  ;;  %v10169_v34 = vadd.f32 %v10034_v10, %v7992_v19  ;;  %v1511_v11 = vpop.f32.mrb[31].mxu1  ;;  %8065 = vmatprep.subr.bf16.mxu0 %v10061_v36  ;;  %v10196_v19 = vmul.f32 0.1, %v6913_v60  ;;  %v6942_v54 = vunpack.c.h.bf16 %v7377_v63 }
 0x45f   : > { %14734 = vst [vmem:[#allocation39_spill] sm:$0xff] %v10164_v42  ;;  %v1535_v15 = vmul.f32 0.01, %v10164_v42  ;;  %v10174_v3 = vadd.f32 %v10034_v10, %v1511_v11  ;;  %8017 = vmatprep.mubr.bf16.mxu0 %v1559_v40  ;;  %v6945_v40 = vunpack.c.l.bf16 %v7378_v0  ;;  %v6917_v11 = vunpack.c.l.bf16 %v7371_v32  ;;  %v7380_v60 = vld [vmem:[%s9410_s18 + $0x58] sm:$0xff]   ;;  %v7381_v37 = vld [vmem:[%s9410_s18 + $0x60] sm:$0xff]  }
 0x460   : > { %14735 = vst [vmem:[#allocation46_spill] sm:$0xff] %v10169_v34  ;;  %v1538_v52 = vmul.f32 0.01, %v10169_v34  ;;  %8018 = vmatmul.mubr.bf16.gmra.mrb[40].mxu0 %v1560_v8  ;;  %v1553_v24 = vadd.f32 %v1537_v43, %v10078_v18  ;;  %v6910_v8 = vunpack.c.h.bf16 %v7369_v33  ;;  %14737 = vst [vmem:[#allocation66_spill] sm:$0xff] %v10196_v19  ;;  %v6941_v43 = vunpack.c.l.bf16 %v7377_v63  ;;  %v7373_v63 = vld [vmem:[%s9404_s10 + $0x60] sm:$0xff]   ;;  %v7384_v42 = vld [vmem:[%s9410_s18 + $0x78] sm:$0xff]  }
 0x461   : > { %14736 = vst [vmem:[#allocation57_spill] sm:$0xff] %v10174_v3  ;;  %v1536_v48 = vmul.f32 0.01, %v10174_v3  ;;  %8066 = vmatpush3.bf16.msra.mxu0 %v10061_v36  ;;  %v1551_v21 = vadd.f32 %v1535_v15, %v10074_v27  ;;  %v6921_v15 = vunpack.c.l.bf16 %v7372_v45  ;;  %v6918_v33 = vunpack.c.h.bf16 %v7371_v32  ;;  %v7374_v32 = vld [vmem:[%s9404_s10 + $0x68] sm:$0xff]  }
 0x462   : > { %v1554_v5 = vadd.f32 %v1538_v52, %v10069_v6  ;;  %8067 = vmatprep.subr.bf16.mxu0 %v10071_v29  ;;  %v10198_v52 = vmul.f32 0.1, %v6914_v23  ;;  %v10213_v23 = vmul.f32 0.1, %v6917_v11  ;;  %v6953_v11 = vunpack.c.l.bf16 %v7380_v60 }
 0x463   : > { %v1552_v39 = vadd.f32 %v1536_v48, %v10076_v50  ;;  %v10200_v48 = vmul.f32 0.1, %v6909_v51  ;;  %v10215_v51 = vmul.f32 0.1, %v6921_v15  ;;  %v6954_v15 = vunpack.c.h.bf16 %v7380_v60  ;;  %v7375_v50 = vld [vmem:[%s9404_s10 + $0x70] sm:$0xff]  }
 0x464   : > { %v1562_v30 = vpack.c.bf16 %v1554_v5, %v1553_v24  ;;  %14738 = vst [vmem:[#allocation40_spill] sm:$0xff] %v10198_v52  ;;  %v6922_v24 = vunpack.c.h.bf16 %v7372_v45  ;;  %v6946_v5 = vunpack.c.h.bf16 %v7378_v0  ;;  %14741 = vst [vmem:[#allocation71_spill] sm:$0xff] %v10213_v23  ;;  %v10218_v0 = vmul.f32 0.5, %v10198_v52 }
 0x465   : > { %v1561_v38 = vpack.c.bf16 %v1552_v39, %v1551_v21  ;;  %8068 = vmatpush3.bf16.msra.mxu0 %v10071_v29  ;;  %14739 = vst [vmem:[#allocation43_spill] sm:$0xff] %v10200_v48  ;;  %v10202_v21 = vmul.f32 0.1, %v6910_v8  ;;  %v7379_v39 = vld [vmem:[%s9410_s18 + $0x50] sm:$0xff]   ;;  %14742 = vst [vmem:[#allocation72_spill] sm:$0xff] %v10215_v51  ;;  %v10221_v45 = vmul.f32 0.5, %v10200_v48  ;;  %v6925_v6 = vunpack.c.l.bf16 %v7373_v63 }
 0x466   : > { %8069 = vmatprep.subr.bf16.mxu0 %v10085_v62  ;;  %v6949_v8 = vunpack.c.l.bf16 %v7379_v39  ;;  %v10230_v29 = vmul.f32 0.1, %v6918_v33  ;;  %v6950_v52 = vunpack.c.h.bf16 %v7379_v39  ;;  %v7376_v48 = vld [vmem:[%s9404_s10 + $0x78] sm:$0xff]   ;;  %v1341_v27 = vmul.f32 0.5, %v10213_v23 }
 0x467   : > { %8021 = vmatprep.mubr.bf16.mxu0 %v1561_v38  ;;  %14740 = vst [vmem:[#allocation73_spill] sm:$0xff] %v10202_v21  ;;  %v10208_v38 = vmul.f32 0.028867513, %v6945_v40  ;;  %v10223_v40 = vmul.f32 0.1, %v6922_v24  ;;  %v1343_v24 = vmul.f32 0.5, %v10215_v51  ;;  %v6926_v36 = vunpack.c.h.bf16 %v7373_v63 }
 0x468   : > { %8022 = vmatmul.mubr.bf16.gmra.mrb[44].mxu0 %v1562_v30  ;;  %v10206_v30 = vmul.f32 0.5, %v10196_v19  ;;  %v1389_v19 = vmul.f32 0.028867513, %v6946_v5  ;;  %14744 = vst [vmem:[#allocation74_spill] sm:$0xff] %v10230_v29  ;;  %v6929_v5 = vunpack.c.l.bf16 %v7374_v32  ;;  %v1390_v18 = vmul.f32 0.028867513, %v6949_v8 }
 0x469   : > { %8070 = vmatpush3.bf16.msra.mxu0 %v10085_v62  ;;  %14743 = vst [vmem:[#allocation69_spill] sm:$0xff] %v10223_v40  ;;  %v1387_v62 = vmul.f32 0.028867513, %v6942_v54  ;;  %v6930_v60 = vunpack.c.h.bf16 %v7374_v32  ;;  %v7382_v54 = vld [vmem:[%s9410_s18 + $0x68] sm:$0xff]   ;;  %v1392_v33 = vmul.f32 0.028867513, %v6953_v11  ;;  %v6933_v39 = vunpack.c.l.bf16 %v7375_v50 }
 0x46a   : > { %8071 = vmatprep.subr.bf16.mxu0 %v10089_v26  ;;  %v1393_v3 = vmul.f32 0.028867513, %v6954_v15  ;;  %v6937_v25 = vunpack.c.l.bf16 %v7376_v48  ;;  %v1342_v4 = vmul.f32 0.5, %v10230_v29  ;;  %v1391_v23 = vmul.f32 0.028867513, %v6950_v52  ;;  %v7383_v51 = vld [vmem:[%s9410_s18 + $0x70] sm:$0xff]  }
 0x46b   : > { %v6938_v34 = vunpack.c.h.bf16 %v7376_v48  ;;  %v10242_v14 = vmul.f32 0.1, %v6925_v6  ;;  %v6957_v8 = vunpack.c.l.bf16 %v7381_v37  ;;  %v10244_v49 = vmul.f32 0.1, %v6929_v5 }
 0x46c   : > { %v6961_v63 = vunpack.c.l.bf16 %v7382_v54  ;;  %v6958_v32 = vunpack.c.h.bf16 %v7381_v37  ;;  %v10248_v11 = vmul.f32 0.1, %v6930_v60  ;;  %v6962_v15 = vunpack.c.h.bf16 %v7382_v54 }
 0x46d   : > { %8072 = vmatpush3.bf16.msra.mxu0 %v10089_v26  ;;  %v10211_v26 = vmul.f32 0.028867513, %v6941_v43  ;;  %v10228_v43 = vmul.f32 0.5, %v10202_v21  ;;  %v1344_v21 = vmul.f32 0.5, %v10223_v40  ;;  %14745 = vst [vmem:[#allocation75_spill] sm:$0xff] %v10242_v14  ;;  %14746 = vst [vmem:[#allocation76_spill] sm:$0xff] %v10244_v49  ;;  %v6965_v29 = vunpack.c.l.bf16 %v7383_v51 }
 0x46e   : > { %8121 = vmatprep.subr.bf16.mxu0 %v9958_v35  ;;  %v6934_v35 = vunpack.c.h.bf16 %v7375_v50  ;;  %v10246_v40 = vmul.f32 0.1, %v6926_v36  ;;  %14748 = vst [vmem:[#allocation78_spill] sm:$0xff] %v10248_v11  ;;  %v10250_v9 = vmul.f32 0.1, %v6933_v39  ;;  %v6969_v50 = vunpack.c.l.bf16 %v7384_v42 }
 0x46f   : > { %v10252_v52 = vmul.f32 0.1, %v6937_v25  ;;  %v6966_v6 = vunpack.c.h.bf16 %v7383_v51  ;;  %v10256_v10 = vmul.f32 0.1, %v6938_v34  ;;  %v6970_v5 = vunpack.c.h.bf16 %v7384_v42 }
 0x470   : > { %14747 = vst [vmem:[#allocation77_spill] sm:$0xff] %v10246_v40  ;;  %14749 = vst [vmem:[#allocation79_spill] sm:$0xff] %v10250_v9  ;;  %v10254_v48 = vmul.f32 0.1, %v6934_v35  ;;  %v1345_v44 = vmul.f32 0.5, %v10242_v14  ;;  %v1347_v37 = vmul.f32 0.5, %v10244_v49  ;;  %v1407_v49 = vadd.f32 %v1391_v23, %v1342_v4 }
 0x471   : > { %14750 = vst [vmem:[#allocation80_spill] sm:$0xff] %v10252_v52  ;;  %14752 = vst [vmem:[#allocation82_spill] sm:$0xff] %v10256_v10  ;;  %v1394_v36 = vmul.f32 0.028867513, %v6957_v8  ;;  %v1396_v60 = vmul.f32 0.028867513, %v6961_v63  ;;  %v1404_v63 = vadd.f32 %v10208_v38, %v10206_v30 }
 0x472   : > { %14751 = vst [vmem:[#allocation81_spill] sm:$0xff] %v10254_v48  ;;  %v1346_v54 = vmul.f32 0.5, %v10246_v40  ;;  %v1395_v39 = vmul.f32 0.028867513, %v6958_v32  ;;  %v1348_v12 = vmul.f32 0.5, %v10248_v11  ;;  %v1349_v56 = vmul.f32 0.5, %v10250_v9 }
 0x473   : > { %v1397_v25 = vmul.f32 0.028867513, %v6962_v15  ;;  %v1398_v35 = vmul.f32 0.028867513, %v6965_v29  ;;  %v1351_v51 = vmul.f32 0.5, %v10252_v52  ;;  %v1350_v42 = vmul.f32 0.5, %v10254_v48 }
 0x474   : > { %v1400_v34 = vmul.f32 0.028867513, %v6969_v50  ;;  %v1399_v58 = vmul.f32 0.028867513, %v6966_v6  ;;  %v1352_v8 = vmul.f32 0.5, %v10256_v10  ;;  %v1405_v32 = vadd.f32 %v1389_v19, %v10218_v0 }
 0x475   : > { %v1401_v14 = vmul.f32 0.028867513, %v6970_v5  ;;  %v1402_v15 = vadd.f32 %v10211_v26, %v10221_v45  ;;  %v1403_v9 = vadd.f32 %v1387_v62, %v10228_v43  ;;  %v1406_v29 = vadd.f32 %v1390_v18, %v1341_v27 }
 0x476   : > { %v1408_v52 = vadd.f32 %v1392_v33, %v1343_v24  ;;  %v1409_v50 = vadd.f32 %v1393_v3, %v1344_v21  ;;  %v1410_v40 = vadd.f32 %v1394_v36, %v1345_v44  ;;  %v1411_v48 = vadd.f32 %v1395_v39, %v1346_v54  ;;  %v14753_v54 = vld [vmem:[#allocation63_spill] sm:$0xff] }
 0x477   : > { %v1412_v6 = vadd.f32 %v1396_v60, %v1347_v37  ;;  %v1413_v11 = vadd.f32 %v1397_v25, %v1348_v12  ;;  %v1414_v10 = vadd.f32 %v1398_v35, %v1349_v56  ;;  %v1415_v5 = vadd.f32 %v1399_v58, %v1350_v42  ;;  %v14754_v35 = vld [vmem:[#allocation64_spill] sm:$0xff]  ;;  %v14756_v42 = vld [vmem:[#allocation67_spill] sm:$0xff] }
 0x478   : > { %v1416_v55 = vadd.f32 %v1400_v34, %v1351_v51  ;;  %v1417_v41 = vadd.f32 %v1401_v14, %v1352_v8  ;;  %v1662_v30 = vmul.f32 1.5, %v1404_v63  ;;  %v1663_v38 = vmul.f32 1.5, %v1405_v32  ;;  %v14757_v32 = vld [vmem:[#allocation56_spill] sm:$0xff] }
 0x479   : > { %v1660_v19 = vmul.f32 1.5, %v1402_v15  ;;  %v1661_v0 = vmul.f32 1.5, %v1403_v9  ;;  %v1664_v17 = vmul.f32 1.5, %v1406_v29  ;;  %v1665_v26 = vmul.f32 1.5, %v1407_v49  ;;  %v14758_v29 = vld [vmem:[#allocation68_spill] sm:$0xff] }
 0x47a   : > { %v1666_v45 = vmul.f32 1.5, %v1408_v52  ;;  %v1667_v62 = vmul.f32 1.5, %v1409_v50  ;;  %v1668_v27 = vmul.f32 1.5, %v1410_v40  ;;  %v1669_v4 = vmul.f32 1.5, %v1411_v48 }
 0x47b   : > { %v1670_v18 = vmul.f32 1.5, %v1412_v6  ;;  %v1671_v3 = vmul.f32 1.5, %v1413_v11  ;;  %v10272_v44 = vmul.f32 1.5, %v1414_v10  ;;  %v10274_v21 = vmul.f32 1.5, %v1415_v5  ;;  %v14759_v5 = vld [vmem:[#allocation70_spill] sm:$0xff] }
 0x47c   : > { %v10276_v56 = vmul.f32 1.5, %v1416_v55  ;;  %v10278_v58 = vmul.f32 1.5, %v1417_v41  ;;  %v10281_v12 = vadd.f32 %v1662_v30, %v9985_v61  ;;  %v10284_v9 = vadd.f32 %v1663_v38, %v9977_v22  ;;  %v14760_v38 = vld [vmem:[#allocation52_spill] sm:$0xff] }
 0x47d   : > { %v10287_v49 = vadd.f32 %v1660_v19, %v9980_v46  ;;  %v10290_v14 = vadd.f32 %v1661_v0, %v9982_v16  ;;  %v10293_v10 = vadd.f32 %v1664_v17, %v10008_v53  ;;  %v10296_v55 = vadd.f32 %v1665_v26, %v10010_v1 }
 0x47e   : > { %v10299_v41 = vadd.f32 %v1666_v45, %v10013_v28  ;;  %v10302_v23 = vadd.f32 %v1667_v62, %v10002_v20  ;;  %v1694_v40 = vmul.f32 0.25, %v10095_v57  ;;  %v10306_v43 = vadd.f32 %v1668_v27, %v10045_v7  ;;  %v14761_v45 = vld [vmem:[#allocation36_spill] sm:$0xff]  ;;  %v14763_v20 = vld [vmem:[#allocation38_spill] sm:$0xff] }
 0x47f   : > { %v10309_v24 = vadd.f32 %v1670_v18, %v10050_v31  ;;  %v10312_v17 = vadd.f32 %v1671_v3, %v10039_v2  ;;  %v1879_v33 = vmul.f32 0.16666667, %v10095_v57  ;;  %v1692_v11 = vmul.f32 0.25, %v10098_v47  ;;  %v14762_v3 = vld [vmem:[#allocation37_spill] sm:$0xff] }
 0x480   : > { %v1877_v52 = vmul.f32 0.16666667, %v10098_v47  ;;  %v1695_v48 = vmul.f32 0.25, %v10102_v59  ;;  %v1880_v36 = vmul.f32 0.16666667, %v10102_v59  ;;  %v1693_v37 = vmul.f32 0.25, %v10106_v13 }
 0x481   : > { %v1878_v60 = vmul.f32 0.16666667, %v10106_v13  ;;  %v10322_v39 = vmul.f32 0.25, %v14753_v54  ;;  %v10325_v25 = vmul.f32 0.16666667, %v14753_v54  ;;  %v10328_v57 = vmul.f32 0.25, %v14754_v35 }
 0x482   : > { %v10331_v51 = vmul.f32 0.16666667, %v14754_v35  ;;  %v14755_v47 = vld [vmem:[#allocation65_spill] sm:$0xff]  ;;  %v10340_v13 = vmul.f32 0.25, %v14756_v42  ;;  %v10343_v8 = vmul.f32 0.16666667, %v14756_v42  ;;  %v10346_v15 = vadd.f32 %v1669_v4, %v14757_v32 }
 0x483   : > { %v10334_v34 = vmul.f32 0.25, %v14755_v47  ;;  %v10337_v59 = vmul.f32 0.16666667, %v14755_v47  ;;  %v10349_v50 = vmul.f32 0.25, %v14758_v29  ;;  %v10352_v6 = vmul.f32 0.16666667, %v14758_v29 }
 0x484   : > { %v10355_v30 = vmul.f32 0.25, %v14759_v5  ;;  %v10359_v26 = vmul.f32 0.16666667, %v14759_v5  ;;  %v10362_v62 = vmul.f32 0.25, %v14761_v45  ;;  %v10365_v27 = vmul.f32 0.16666667, %v14761_v45 }
 0x485   : > { %v10369_v54 = vmul.f32 0.25, %v14762_v3  ;;  %v10373_v29 = vmul.f32 0.16666667, %v14762_v3 }
 0x523   : > { %v8011_v63 = vpop.f32.mrb[32].mxu0 }
 0x524   : > { %v1606_v19 = vadd.f32 %v14760_v38, %v8011_v63  ;;  %v1597_v0 = vpop.f32.mrb[33].mxu0 }
 0x525   : > { %v1598_v4 = vadd.f32 %v14760_v38, %v1597_v0  ;;  %v8012_v18 = vpop.f32.mrb[34].mxu0 }
 0x526   : > { %v1710_v35 = vmul.f32 0.25, %v1606_v19  ;;  %v1895_v47 = vmul.f32 0.16666667, %v1606_v19  ;;  %v1609_v42 = vadd.f32 %v14760_v38, %v8012_v18  ;;  %v1600_v63 = vpop.f32.mrb[35].mxu0  ;;  %v10381_v18 = vmul.f32 0.25, %v14763_v20 }
 0x527   : > { %v1708_v5 = vmul.f32 0.25, %v1598_v4  ;;  %v1893_v31 = vmul.f32 0.16666667, %v1598_v4  ;;  %v1601_v32 = vadd.f32 %v14760_v38, %v1600_v63  ;;  %v10386_v4 = vmul.f32 0.16666667, %v14763_v20 }
 0x528   : > { %v1726_v45 = vadd.f32 %v1710_v35, %v1694_v40  ;;  %v10376_v7 = vadd.f32 %v1895_v47, %v1879_v33  ;;  %v1711_v0 = vmul.f32 0.25, %v1609_v42  ;;  %v1896_v2 = vmul.f32 0.16666667, %v1609_v42 }
 0x529   : > { %v1724_v28 = vadd.f32 %v1708_v5, %v1692_v11  ;;  %v10378_v1 = vadd.f32 %v1893_v31, %v1877_v52  ;;  %v1709_v53 = vmul.f32 0.25, %v1601_v32  ;;  %v1894_v19 = vmul.f32 0.16666667, %v1601_v32  ;;  %v14764_v11 = vld [vmem:[#allocation39_spill] sm:$0xff] }
 0x52a   : > { %v1742_v61 = vmul.f32 0.01, %v1726_v45  ;;  %v1727_v3 = vadd.f32 %v1711_v0, %v1695_v48  ;;  %v10383_v16 = vadd.f32 %v1896_v2, %v1880_v36  ;;  %v10391_v31 = vmul.f32 0.25, %v14764_v11 }
 0x52b   : > { %v1740_v40 = vmul.f32 0.01, %v1724_v28  ;;  %v1725_v33 = vadd.f32 %v1709_v53, %v1693_v37  ;;  %v10388_v35 = vadd.f32 %v1894_v19, %v1878_v60  ;;  %v8015_v47 = vpop.f32.mrb[36].mxu0  ;;  %v10394_v52 = vmul.f32 0.16666667, %v14764_v11 }
 0x52c   : > { %v1743_v32 = vmul.f32 0.01, %v1727_v3  ;;  %v1622_v42 = vadd.f32 %v14760_v38, %v8015_v47  ;;  %v1613_v48 = vpop.f32.mrb[37].mxu0  ;;  %v1758_v2 = vadd.f32 %v1742_v61, %v10281_v12 }
 0x52d   : > { %v1741_v36 = vmul.f32 0.01, %v1725_v33  ;;  %v1614_v20 = vadd.f32 %v14760_v38, %v1613_v48  ;;  %v8016_v28 = vpop.f32.mrb[38].mxu0  ;;  %v1756_v53 = vadd.f32 %v1740_v40, %v10287_v49 }
 0x52e   : > { %v1759_v37 = vadd.f32 %v1743_v32, %v10284_v9  ;;  %v1714_v60 = vmul.f32 0.25, %v1622_v42  ;;  %v1899_v63 = vmul.f32 0.16666667, %v1622_v42  ;;  %v1625_v5 = vadd.f32 %v14760_v38, %v8016_v28  ;;  %v1616_v45 = vpop.f32.mrb[39].mxu0 }
 0x52f   : > { %v1712_v0 = vmul.f32 0.25, %v1614_v20  ;;  %v1897_v19 = vmul.f32 0.16666667, %v1614_v20  ;;  %v1617_v3 = vadd.f32 %v14760_v38, %v1616_v45  ;;  %v1757_v47 = vadd.f32 %v1741_v36, %v10290_v14  ;;  %v14765_v14 = vld [vmem:[#allocation46_spill] sm:$0xff] }
 0x530   : > { %v1773_v61 = vpack.c.bf16 %v1759_v37, %v1758_v2  ;;  %v1730_v12 = vadd.f32 %v1714_v60, %v10322_v39  ;;  %v10406_v33 = vadd.f32 %v1899_v63, %v10325_v25  ;;  %v1715_v49 = vmul.f32 0.25, %v1625_v5 }
 0x531   : > { %v1728_v9 = vadd.f32 %v1712_v0, %v10328_v57  ;;  %v10410_v40 = vadd.f32 %v1897_v19, %v10331_v51  ;;  %v1900_v11 = vmul.f32 0.16666667, %v1625_v5  ;;  %v1713_v32 = vmul.f32 0.25, %v1617_v3 }
 0x532   : > { %v1746_v42 = vmul.f32 0.01, %v1730_v12  ;;  %v1731_v48 = vadd.f32 %v1715_v49, %v10334_v34  ;;  %v1898_v20 = vmul.f32 0.16666667, %v1617_v3  ;;  %v1772_v28 = vpack.c.bf16 %v1757_v47, %v1756_v53  ;;  %v14766_v12 = vld [vmem:[#allocation44_spill] sm:$0xff] }
 0x533   : > { %v10414_v2 = vmul.f32 0.25, %v14765_v14  ;;  %v1744_v39 = vmul.f32 0.01, %v1728_v9  ;;  %v10417_v25 = vadd.f32 %v1900_v11, %v10337_v59  ;;  %v1729_v36 = vadd.f32 %v1713_v32, %v10340_v13  ;;  %v8019_v57 = vpop.f32.mrb[40].mxu0  ;;  %v14767_v32 = vld [vmem:[#allocation49_spill] sm:$0xff] }
 0x534   : > { %v10421_v51 = vmul.f32 0.16666667, %v14765_v14  ;;  %v1747_v37 = vmul.f32 0.01, %v1731_v48  ;;  %v10424_v60 = vadd.f32 %v1898_v20, %v10343_v8  ;;  %v1638_v34 = vadd.f32 %v14760_v38, %v8019_v57  ;;  %8041 = vmatprep.mubr.bf16.mxu1 %v1772_v28  ;;  %v1629_v53 = vpop.f32.mrb[41].mxu0 }
 0x535   : > { %v1745_v63 = vmul.f32 0.01, %v1729_v36  ;;  %v1630_v5 = vadd.f32 %v14760_v38, %v1629_v53  ;;  %8042 = vmatmul.mubr.bf16.vlgmr.msra.gmra.mrb[32].mxu1 %v1773_v61  ;;  %v8020_v59 = vpop.f32.mrb[42].mxu0  ;;  %v1760_v45 = vadd.f32 %v1744_v39, %v10293_v10  ;;  %v1762_v13 = vadd.f32 %v1746_v42, %v10299_v41  ;;  %v14769_v53 = vld [vmem:[#allocation57_spill] sm:$0xff] }
 0x536   : > { %v1718_v0 = vmul.f32 0.25, %v1638_v34  ;;  %v1903_v19 = vmul.f32 0.16666667, %v1638_v34  ;;  %v1641_v3 = vadd.f32 %v14760_v38, %v8020_v59  ;;  %v1632_v47 = vpop.f32.mrb[43].mxu0  ;;  %v1763_v8 = vadd.f32 %v1747_v37, %v10302_v23  ;;  %8090 = vmatpush3.bf16.msra.mxu1 %v14766_v12  ;;  %v14768_v34 = vld [vmem:[#allocation33_spill] sm:$0xff] }
 0x537   : > { %v1716_v49 = vmul.f32 0.25, %v1630_v5  ;;  %v1901_v9 = vmul.f32 0.16666667, %v1630_v5  ;;  %v1633_v11 = vadd.f32 %v14760_v38, %v1632_v47  ;;  %v1761_v61 = vadd.f32 %v1745_v63, %v10296_v55  ;;  %8091 = vmatprep.subr.bf16.mxu1 %v14767_v32 }
 0x538   : > { %v1734_v10 = vadd.f32 %v1718_v0, %v10349_v50  ;;  %v10438_v41 = vadd.f32 %v1903_v19, %v10352_v6  ;;  %v1719_v42 = vmul.f32 0.25, %v1641_v3  ;;  %v1904_v48 = vmul.f32 0.16666667, %v1641_v3 }
 0x539   : > { %v1732_v20 = vadd.f32 %v1716_v49, %v10355_v30  ;;  %v10442_v23 = vadd.f32 %v1901_v9, %v10359_v26  ;;  %v1717_v28 = vmul.f32 0.25, %v1633_v11  ;;  %v1902_v14 = vmul.f32 0.16666667, %v1633_v11 }
 0x53a   : > { %v1750_v39 = vmul.f32 0.01, %v1734_v10  ;;  %v1735_v36 = vadd.f32 %v1719_v42, %v10362_v62  ;;  %v10446_v55 = vadd.f32 %v1904_v48, %v10365_v27  ;;  %v1774_v57 = vpack.c.bf16 %v1761_v61, %v1760_v45  ;;  %8092 = vmatpush3.bf16.msra.mxu1 %v14767_v32  ;;  %v14770_v32 = vld [vmem:[#allocation54_spill] sm:$0xff] }
 0x53b   : > { %v1748_v50 = vmul.f32 0.01, %v1732_v20  ;;  %v1733_v6 = vadd.f32 %v1717_v28, %v10369_v54  ;;  %v10451_v37 = vadd.f32 %v1902_v14, %v10373_v29  ;;  %v8023_v30 = vpop.f32.mrb[44].mxu0  ;;  %v1775_v26 = vpack.c.bf16 %v1763_v8, %v1762_v13  ;;  %8093 = vmatprep.subr.bf16.mxu1 %v14768_v34 }
 0x53c   : > { %v1705_v63 = vmul.f32 0.25, %v14769_v53  ;;  %v1890_v62 = vmul.f32 0.16666667, %v14769_v53  ;;  %v1751_v5 = vmul.f32 0.01, %v1735_v36  ;;  %v1654_v27 = vadd.f32 %v14760_v38, %v8023_v30  ;;  %8045 = vmatprep.mubr.bf16.mxu1 %v1774_v57  ;;  %v1645_v59 = vpop.f32.mrb[45].mxu0 }
 0x53d   : > { %v1749_v45 = vmul.f32 0.01, %v1733_v6  ;;  %v1646_v0 = vadd.f32 %v14760_v38, %v1645_v59  ;;  %8046 = vmatmul.mubr.bf16.gmra.mrb[36].mxu1 %v1775_v26  ;;  %v8024_v54 = vpop.f32.mrb[46].mxu0  ;;  %v1764_v29 = vadd.f32 %v1748_v50, %v10306_v43  ;;  %v1766_v13 = vadd.f32 %v1750_v39, %v10309_v24  ;;  %v14772_v6 = vld [vmem:[#allocation35_spill] sm:$0xff]  ;;  %v14773_v26 = vld [vmem:[#allocation60_spill] sm:$0xff] }
 0x53e   : > { %v1722_v19 = vmul.f32 0.25, %v1654_v27  ;;  %v1907_v3 = vmul.f32 0.16666667, %v1654_v27  ;;  %v1657_v47 = vadd.f32 %v14760_v38, %v8024_v54  ;;  %v1648_v8 = vpop.f32.mrb[47].mxu0  ;;  %v1767_v12 = vadd.f32 %v1751_v5, %v10312_v17  ;;  %8094 = vmatpush3.bf16.msra.mxu1 %v14768_v34  ;;  %v14774_v34 = vld [vmem:[#allocation41_spill] sm:$0xff]  ;;  %v14775_v5 = vld [vmem:[#allocation42_spill] sm:$0xff] }
 0x53f   : > { %v1720_v49 = vmul.f32 0.25, %v1646_v0  ;;  %v1905_v9 = vmul.f32 0.16666667, %v1646_v0  ;;  %v1649_v11 = vadd.f32 %v14760_v38, %v1648_v8  ;;  %v1765_v61 = vadd.f32 %v1749_v45, %v10346_v15  ;;  %8095 = vmatprep.subr.bf16.mxu1 %v14770_v32  ;;  %v14776_v0 = vld [vmem:[#allocation34_spill] sm:$0xff] }
 0x540   : > { %v1738_v43 = vadd.f32 %v1722_v19, %v10381_v18  ;;  %v10468_v24 = vadd.f32 %v1907_v3, %v10386_v4  ;;  %v1723_v10 = vmul.f32 0.25, %v1657_v47  ;;  %v1908_v42 = vmul.f32 0.16666667, %v1657_v47 }
 0x541   : > { %v1736_v48 = vadd.f32 %v1720_v49, %v10391_v31  ;;  %v10472_v17 = vadd.f32 %v1905_v9, %v10394_v52  ;;  %v1721_v20 = vmul.f32 0.25, %v1649_v11  ;;  %v1906_v28 = vmul.f32 0.16666667, %v1649_v11  ;;  %v14771_v31 = vld [vmem:[#allocation59_spill] sm:$0xff] }
 0x542   : > { %v1754_v14 = vmul.f32 0.01, %v1738_v43  ;;  %v1739_v39 = vadd.f32 %v1723_v10, %v10414_v2  ;;  %v10476_v15 = vadd.f32 %v1908_v42, %v10421_v51  ;;  %v1776_v36 = vpack.c.bf16 %v1765_v61, %v1764_v29  ;;  %8096 = vmatpush3.bf16.msra.mxu1 %v14770_v32 }
 0x543   : > { %v1752_v18 = vmul.f32 0.01, %v1736_v48  ;;  %v1737_v4 = vadd.f32 %v1721_v20, %v1705_v63  ;;  %v10479_v57 = vadd.f32 %v1906_v28, %v1890_v62  ;;  %v1777_v50 = vpack.c.bf16 %v1767_v12, %v1766_v13  ;;  %8097 = vmatprep.subr.bf16.mxu1 %v14771_v31 }
 0x544   : > { %v1755_v52 = vmul.f32 0.01, %v1739_v39  ;;  %8049 = vmatprep.mubr.bf16.mxu1 %v1776_v36  ;;  %v1690_v30 = vadd.f32 %v10276_v56, %v14772_v6  ;;  %v1691_v2 = vadd.f32 %v10278_v58, %v14773_v26  ;;  %v1688_v53 = vadd.f32 %v10272_v44, %v14774_v34  ;;  %v14777_v58 = vld [vmem:[#allocation61_spill] sm:$0xff]  ;;  %v14778_v44 = vld [vmem:[#allocation62_spill] sm:$0xff]  ;;  %v14780_v39 = vld [vmem:[#allocation40_spill] sm:$0xff] }
 0x545   : > { %v1753_v51 = vmul.f32 0.01, %v1737_v4  ;;  %8050 = vmatmul.mubr.bf16.gmra.mrb[40].mxu1 %v1777_v50  ;;  %v1689_v63 = vadd.f32 %v10274_v21, %v14775_v5  ;;  %v10497_v21 = vld [vmem:[#allocation6] sm:$0xff]   ;;  %v1960_v36 = vadd.f32 %v14780_v39, %v9977_v22 }
 0x546   : > { %v1770_v62 = vadd.f32 %v1754_v14, %v1690_v30  ;;  %v1771_v27 = vadd.f32 %v1755_v52, %v1691_v2  ;;  %8098 = vmatpush3.bf16.msra.mxu1 %v14771_v31  ;;  %v1768_v59 = vadd.f32 %v1752_v18, %v1688_v53  ;;  %14779 = vst [vmem:[#allocation63_spill] sm:$0xff] %v10497_v21  ;;  %v14782_v52 = vld [vmem:[#allocation47_spill] sm:$0xff]  ;;  %v14785_v53 = vld [vmem:[#allocation66_spill] sm:$0xff] }
 0x547   : > { %v1769_v45 = vadd.f32 %v1753_v51, %v1689_v63  ;;  %8099 = vmatprep.subr.bf16.mxu1 %v14776_v0 }
 0x548   : > { %v1779_v56 = vpack.c.bf16 %v1771_v27, %v1770_v62  ;;  %v10523_v27 = vld [vmem:[%s14622_s9] ss:$0 sm:$0xff] }
 0x549   : > { %v1778_v54 = vpack.c.bf16 %v1769_v45, %v1768_v59  ;;  %14786 = vst [vmem:[#allocation64_spill] sm:$0xff] %v10523_v27 }
 0x54a   : > { %8100 = vmatpush3.bf16.msra.mxu1 %v14776_v0 }
 0x54b   : > { %8053 = vmatprep.mubr.bf16.mxu1 %v1778_v54  ;;  %8101 = vmatprep.subr.bf16.mxu1 %v14777_v58 }
 0x54d   : > { %8054 = vmatmul.mubr.bf16.gmra.mrb[44].mxu1 %v1779_v56 }
 0x54e   : > { %8102 = vmatpush3.bf16.msra.mxu1 %v14777_v58 }
 0x54f   : > { %8103 = vmatprep.subr.bf16.mxu1 %v14778_v44 }
 0x552   : > { %8104 = vmatpush3.bf16.msra.mxu1 %v14778_v44 }
 0x553   : > { %8153 = vmatprep.subr.bf16.mxu1 %v10497_v21 }
 0x608   : > { %v8043_v29 = vpop.f32.mrb[32].mxu1 }
 0x609   : > { %v1823_v13 = vadd.f32 %v14760_v38, %v8043_v29  ;;  %v1814_v19 = vpop.f32.mrb[33].mxu1 }
 0x60a   : > { %v1815_v3 = vadd.f32 %v14760_v38, %v1814_v19  ;;  %v8044_v47 = vpop.f32.mrb[34].mxu1 }
 0x60b   : > { %v1927_v8 = vmul.f32 0.6666667, %v1823_v13  ;;  %v1826_v12 = vadd.f32 %v14760_v38, %v8044_v47  ;;  %v1817_v49 = vpop.f32.mrb[35].mxu1 }
 0x60c   : > { %v1925_v9 = vmul.f32 0.6666667, %v1815_v3  ;;  %v1818_v11 = vadd.f32 %v14760_v38, %v1817_v49 }
 0x60d   : > { %v1943_v61 = vadd.f32 %v1927_v8, %v10376_v7  ;;  %v1928_v32 = vmul.f32 0.6666667, %v1826_v12  ;;  %v14781_v7 = vld [vmem:[#allocation43_spill] sm:$0xff] }
 0x60e   : > { %v1941_v43 = vadd.f32 %v1925_v9, %v10378_v1  ;;  %v1926_v10 = vmul.f32 0.6666667, %v1818_v11  ;;  %v1957_v31 = vadd.f32 %v14781_v7, %v9980_v46  ;;  %v14783_v1 = vld [vmem:[#allocation73_spill] sm:$0xff]  ;;  %v14789_v11 = vld [vmem:[#allocation48_spill] sm:$0xff] }
 0x60f   : > { %v1944_v42 = vadd.f32 %v1928_v32, %v10383_v16  ;;  %v1975_v14 = vmul.f32 0.01, %v1943_v61  ;;  %v1958_v30 = vadd.f32 %v14783_v1, %v14782_v52  ;;  %v10555_v1 = vld [vmem:[#allocation6 + $0x8] sm:$0xff]  }
 0x610   : > { %v1973_v48 = vmul.f32 0.01, %v1941_v43  ;;  %v1942_v20 = vadd.f32 %v1926_v10, %v10388_v35  ;;  %v8047_v28 = vpop.f32.mrb[36].mxu1  ;;  %v14784_v35 = vld [vmem:[#allocation45_spill] sm:$0xff]  ;;  %v14791_v10 = vld [vmem:[#allocation50_spill] sm:$0xff]  ;;  %14798 = vst [vmem:[#allocation70_spill] sm:$0xff] %v10555_v1 }
 0x611   : > { %v1976_v18 = vmul.f32 0.01, %v1944_v42  ;;  %v1839_v4 = vadd.f32 %v14760_v38, %v8047_v28  ;;  %v1830_v50 = vpop.f32.mrb[37].mxu1  ;;  %v1959_v63 = vadd.f32 %v14785_v53, %v14784_v35  ;;  %v14792_v42 = vld [vmem:[#allocation71_spill] sm:$0xff] }
 0x612   : > { %v1974_v2 = vmul.f32 0.01, %v1942_v20  ;;  %v1831_v16 = vadd.f32 %v14760_v38, %v1830_v50  ;;  %v8048_v51 = vpop.f32.mrb[38].mxu1  ;;  %v10526_v45 = vadd.f32 %v1973_v48, %v1957_v31  ;;  %v14793_v48 = vld [vmem:[#allocation51_spill] sm:$0xff]  ;;  %v14794_v20 = vld [vmem:[#allocation74_spill] sm:$0xff] }
 0x613   : > { %v10518_v62 = vadd.f32 %v1976_v18, %v1960_v36  ;;  %v1931_v22 = vmul.f32 0.6666667, %v1839_v4  ;;  %v1842_v46 = vadd.f32 %v10523_v27, %v8048_v51  ;;  %v1833_v59 = vpop.f32.mrb[39].mxu1  ;;  %v10531_v54 = vadd.f32 %v1975_v14, %v1959_v63  ;;  %v14795_v36 = vld [vmem:[#allocation32_spill] sm:$0xff] }
 0x614   : > { %v10528_v0 = vadd.f32 %v1974_v2, %v1958_v30  ;;  %v1929_v38 = vmul.f32 0.6666667, %v1831_v16  ;;  %v1834_v56 = vadd.f32 %v10523_v27, %v1833_v59  ;;  %v1962_v28 = vadd.f32 %v14794_v20, %v14793_v48  ;;  %v14796_v18 = vld [vmem:[#allocation72_spill] sm:$0xff] }
 0x615   : > { %14788 = vst [vmem:[#allocation67_spill] sm:$0xff] %v10531_v54  ;;  %v1947_v58 = vadd.f32 %v1931_v22, %v10406_v33  ;;  %v1932_v44 = vmul.f32 0.6666667, %v1842_v46  ;;  %v2136_v47 = vpack.c.bf16 %v10518_v62, %v10531_v54  ;;  %v14790_v33 = vld [vmem:[#allocation69_spill] sm:$0xff]  ;;  %v1963_v4 = vadd.f32 %v14796_v18, %v14795_v36 }
 0x616   : > { %14787 = vst [vmem:[#allocation65_spill] sm:$0xff] %v10528_v0  ;;  %v1945_v29 = vadd.f32 %v1929_v38, %v10410_v40  ;;  %v1930_v13 = vmul.f32 0.6666667, %v1834_v56  ;;  %v2135_v19 = vpack.c.bf16 %v10528_v0, %v10526_v45  ;;  %v1964_v61 = vadd.f32 %v14790_v33, %v14789_v11  ;;  %v14807_v11 = vld [vmem:[#allocation56_spill] sm:$0xff]  ;;  %v14808_v33 = vld [vmem:[#allocation77_spill] sm:$0xff] }
 0x617   : > { %v1948_v3 = vadd.f32 %v1932_v44, %v10417_v25  ;;  %v1979_v9 = vmul.f32 0.01, %v1947_v58  ;;  %v1961_v25 = vadd.f32 %v14792_v42, %v14791_v10  ;;  %v10573_v58 = vld [vmem:[#allocation6 + $0x10] sm:$0xff]   ;;  %v14810_v10 = vld [vmem:[#allocation76_spill] sm:$0xff] }
 0x618   : > { %v1977_v8 = vmul.f32 0.01, %v1945_v29  ;;  %v1946_v12 = vadd.f32 %v1930_v13, %v10424_v60  ;;  %v8051_v49 = vpop.f32.mrb[40].mxu1  ;;  %8073 = vmatprep.mubr.bf16.mxu0 %v2135_v19  ;;  %14802 = vst [vmem:[#allocation38_spill] sm:$0xff] %v10573_v58  ;;  %v14803_v13 = vld [vmem:[#allocation53_spill] sm:$0xff]  ;;  %v14804_v19 = vld [vmem:[#allocation78_spill] sm:$0xff] }
 0x619   : > { %v1980_v32 = vmul.f32 0.01, %v1948_v3  ;;  %v1855_v40 = vadd.f32 %v10523_v27, %v8051_v49  ;;  %v1846_v43 = vpop.f32.mrb[41].mxu1  ;;  %8074 = vmatmul.mubr.bf16.vlgmr.msra.gmra.mrb[48].mxu0 %v2136_v47  ;;  %v10563_v35 = vadd.f32 %v1979_v9, %v1963_v4  ;;  %v1968_v3 = vadd.f32 %v14804_v19, %v14803_v13  ;;  %v14806_v49 = vld [vmem:[#allocation75_spill] sm:$0xff]  ;;  %v14820_v13 = vld [vmem:[#allocation80_spill] sm:$0xff] }
 0x61a   : > { %v1978_v14 = vmul.f32 0.01, %v1946_v12  ;;  %v1847_v60 = vadd.f32 %v10523_v27, %v1846_v43  ;;  %v8052_v39 = vpop.f32.mrb[42].mxu1  ;;  %8122 = vmatpush3.bf16.msra.mxu0 %v10497_v21  ;;  %v10558_v30 = vadd.f32 %v1977_v8, %v1961_v25  ;;  %v14805_v12 = vld [vmem:[#allocation55_spill] sm:$0xff]  ;;  %v14809_v43 = vld [vmem:[#allocation58_spill] sm:$0xff]  ;;  %v1971_v19 = vadd.f32 %v14820_v13, %v14772_v6 }
 0x61b   : > { %v10552_v50 = vadd.f32 %v1980_v32, %v1964_v61  ;;  %v1935_v7 = vmul.f32 0.6666667, %v1855_v40  ;;  %v1858_v31 = vadd.f32 %v10523_v27, %v8052_v39  ;;  %v1849_v52 = vpop.f32.mrb[43].mxu1  ;;  %8123 = vmatprep.subr.bf16.mxu0 %v10555_v1  ;;  %14801 = vst [vmem:[#allocation37_spill] sm:$0xff] %v10563_v35  ;;  %v1965_v9 = vadd.f32 %v14806_v49, %v14805_v12 }
 0x61c   : > { %14799 = vst [vmem:[#allocation52_spill] sm:$0xff] %v10558_v30  ;;  %v10560_v2 = vadd.f32 %v1978_v14, %v1962_v28  ;;  %v1933_v16 = vmul.f32 0.6666667, %v1847_v60  ;;  %v1850_v51 = vadd.f32 %v10523_v27, %v1849_v52  ;;  %v1966_v61 = vadd.f32 %v14808_v33, %v14807_v11  ;;  %v10591_v14 = vld [vmem:[#allocation6 + $0x18] sm:$0xff]  }
 0x61d   : > { %14797 = vst [vmem:[#allocation68_spill] sm:$0xff] %v10552_v50  ;;  %v1951_v53 = vadd.f32 %v1935_v7, %v10438_v41  ;;  %v1936_v63 = vmul.f32 0.6666667, %v1858_v31  ;;  %v2138_v56 = vpack.c.bf16 %v10552_v50, %v10563_v35  ;;  %v1967_v42 = vadd.f32 %v14810_v10, %v14809_v43  ;;  %14812 = vst [vmem:[#allocation46_spill] sm:$0xff] %v10591_v14 }
 0x61e   : > { %14800 = vst [vmem:[#allocation36_spill] sm:$0xff] %v10560_v2  ;;  %v1949_v22 = vadd.f32 %v1933_v16, %v10442_v23  ;;  %v1934_v46 = vmul.f32 0.6666667, %v1850_v51  ;;  %v2137_v59 = vpack.c.bf16 %v10560_v2, %v10558_v30  ;;  %8124 = vmatpush3.bf16.msra.mxu0 %v10555_v1 }
 0x61f   : > { %v1952_v38 = vadd.f32 %v1936_v63, %v10446_v55  ;;  %8125 = vmatprep.subr.bf16.mxu0 %v10573_v58  ;;  %v1983_v23 = vmul.f32 0.01, %v1951_v53 }
 0x620   : > { %v1981_v44 = vmul.f32 0.01, %v1949_v22  ;;  %v1950_v41 = vadd.f32 %v1934_v46, %v10451_v37  ;;  %v8055_v29 = vpop.f32.mrb[44].mxu1  ;;  %8077 = vmatprep.mubr.bf16.mxu0 %v2137_v59  ;;  %v10609_v22 = vld [vmem:[#allocation6 + $0x20] sm:$0xff]   ;;  %v14817_v59 = vld [vmem:[#allocation82_spill] sm:$0xff] }
 0x621   : > { %v1984_v47 = vmul.f32 0.01, %v1952_v38  ;;  %v1871_v8 = vadd.f32 %v10523_v27, %v8055_v29  ;;  %v1862_v55 = vpop.f32.mrb[45].mxu1  ;;  %8078 = vmatmul.mubr.bf16.gmra.mrb[52].mxu0 %v2138_v56  ;;  %v10599_v4 = vadd.f32 %v1983_v23, %v1967_v42  ;;  %14816 = vst [vmem:[#allocation57_spill] sm:$0xff] %v10609_v22  ;;  %v1972_v38 = vadd.f32 %v14817_v59, %v14773_v26 }
 0x622   : > { %v1982_v32 = vmul.f32 0.01, %v1950_v41  ;;  %v1863_v37 = vadd.f32 %v10523_v27, %v1862_v55  ;;  %v8056_v40 = vpop.f32.mrb[46].mxu1  ;;  %8126 = vmatpush3.bf16.msra.mxu0 %v10573_v58  ;;  %v10594_v60 = vadd.f32 %v1981_v44, %v1965_v9  ;;  %v14818_v44 = vld [vmem:[#allocation79_spill] sm:$0xff]  ;;  %v14819_v41 = vld [vmem:[#allocation81_spill] sm:$0xff] }
 0x623   : > { %v10588_v25 = vadd.f32 %v1984_v47, %v1968_v3  ;;  %v1939_v48 = vmul.f32 0.6666667, %v1871_v8  ;;  %v1874_v20 = vadd.f32 %v10523_v27, %v8056_v40  ;;  %v1865_v28 = vpop.f32.mrb[47].mxu1  ;;  %8127 = vmatprep.subr.bf16.mxu0 %v10591_v14  ;;  %14815 = vst [vmem:[#allocation33_spill] sm:$0xff] %v10599_v4  ;;  %v1970_v29 = vadd.f32 %v14819_v41, %v14775_v5  ;;  %v10624_v3 = vld [vmem:[#allocation6 + $0x28] sm:$0xff]   ;;  %v10638_v8 = vld [vmem:[#allocation6 + $0x30] sm:$0xff]  }
 0x624   : > { %14813 = vst [vmem:[#allocation44_spill] sm:$0xff] %v10594_v60  ;;  %v10596_v39 = vadd.f32 %v1982_v32, %v1966_v61  ;;  %v1937_v36 = vmul.f32 0.6666667, %v1863_v37  ;;  %v1866_v18 = vadd.f32 %v10523_v27, %v1865_v28  ;;  %14822 = vst [vmem:[#allocation59_spill] sm:$0xff] %v10624_v3  ;;  %v10642_v55 = vld [vmem:[#allocation6 + $0x38] sm:$0xff]  }
 0x625   : > { %14811 = vst [vmem:[#allocation39_spill] sm:$0xff] %v10588_v25  ;;  %v1955_v7 = vadd.f32 %v1939_v48, %v10468_v24  ;;  %v1940_v31 = vmul.f32 0.6666667, %v1874_v20  ;;  %v2140_v63 = vpack.c.bf16 %v10588_v25, %v10599_v4  ;;  %14826 = vst [vmem:[#allocation42_spill] sm:$0xff] %v10638_v8 }
 0x626   : > { %14814 = vst [vmem:[#allocation49_spill] sm:$0xff] %v10596_v39  ;;  %v1953_v52 = vadd.f32 %v1937_v36, %v10472_v17  ;;  %v1938_v16 = vmul.f32 0.6666667, %v1866_v18  ;;  %v2139_v51 = vpack.c.bf16 %v10596_v39, %v10594_v60  ;;  %8128 = vmatpush3.bf16.msra.mxu0 %v10591_v14  ;;  %14827 = vst [vmem:[#allocation34_spill] sm:$0xff] %v10642_v55 }
 0x627   : > { %v1956_v53 = vadd.f32 %v1940_v31, %v10476_v15  ;;  %8129 = vmatprep.subr.bf16.mxu0 %v10609_v22  ;;  %v1987_v17 = vmul.f32 0.01, %v1955_v7  ;;  %v1969_v15 = vadd.f32 %v14818_v44, %v14774_v34 }
 0x628   : > { %v1985_v46 = vmul.f32 0.01, %v1953_v52  ;;  %v1954_v24 = vadd.f32 %v1938_v16, %v10479_v57  ;;  %8081 = vmatprep.mubr.bf16.mxu0 %v2139_v51 }
 0x629   : > { %v1988_v56 = vmul.f32 0.01, %v1956_v53  ;;  %8082 = vmatmul.mubr.bf16.gmra.mrb[56].mxu0 %v2140_v63  ;;  %v10631_v34 = vadd.f32 %v1987_v17, %v1971_v19 }
 0x62a   : > { %v1986_v23 = vmul.f32 0.01, %v1954_v24  ;;  %8130 = vmatpush3.bf16.msra.mxu0 %v10609_v22  ;;  %v10627_v26 = vadd.f32 %v1985_v46, %v1969_v15 }
 0x62b   : > { %v10622_v57 = vadd.f32 %v1988_v56, %v1972_v38  ;;  %8131 = vmatprep.subr.bf16.mxu0 %v10624_v3  ;;  %14825 = vst [vmem:[#allocation41_spill] sm:$0xff] %v10631_v34 }
 0x62c   : > { %14823 = vst [vmem:[#allocation35_spill] sm:$0xff] %v10627_v26  ;;  %v10629_v47 = vadd.f32 %v1986_v23, %v1970_v29 }
 0x62d   : > { %14821 = vst [vmem:[#allocation54_spill] sm:$0xff] %v10622_v57  ;;  %v2142_v6 = vpack.c.bf16 %v10622_v57, %v10631_v34 }
 0x62e   : > { %14824 = vst [vmem:[#allocation60_spill] sm:$0xff] %v10629_v47  ;;  %v2141_v5 = vpack.c.bf16 %v10629_v47, %v10627_v26  ;;  %8132 = vmatpush3.bf16.msra.mxu0 %v10624_v3 }
 0x62f   : > { %8133 = vmatprep.subr.bf16.mxu0 %v10638_v8 }
 0x630   : > { %8085 = vmatprep.mubr.bf16.mxu0 %v2141_v5 }
 0x631   : > { %8086 = vmatmul.mubr.bf16.gmra.mrb[60].mxu0 %v2142_v6 }
 0x632   : > { %8134 = vmatpush3.bf16.msra.mxu0 %v10638_v8 }
 0x633   : > { %8135 = vmatprep.subr.bf16.mxu0 %v10642_v55 }
 0x636   : > { %8136 = vmatpush3.bf16.msra.mxu0 %v10642_v55 }
 0x637   : > { %8185 = vmatprep.subr.bf16.mxu0 %v10497_v21 }
 0x6ec   : > { %v8075_v12 = vpop.f32.mrb[48].mxu0 }
 0x6ed   : > { %v10648_v49 = vadd.f32 %v10523_v27, %v8075_v12  ;;  %v2177_v9 = vpop.f32.mrb[49].mxu0 }
 0x6ee   : > { %v10651_v11 = vadd.f32 %v10523_v27, %v2177_v9  ;;  %v8076_v33 = vpop.f32.mrb[50].mxu0 }
 0x6ef   : > { %v2242_v61 = vmul.f32 0.01, %v10648_v49  ;;  %v10655_v32 = vadd.f32 %v10523_v27, %v8076_v33  ;;  %v2180_v37 = vpop.f32.mrb[51].mxu0 }
 0x6f0   : > { %v2240_v40 = vmul.f32 0.01, %v10651_v11  ;;  %v10659_v43 = vadd.f32 %v10523_v27, %v2180_v37 }
 0x6f1   : > { %v2243_v10 = vmul.f32 0.01, %v10655_v32  ;;  %v2258_v48 = vadd.f32 %v2242_v61, %v10531_v54 }
 0x6f2   : > { %v2241_v42 = vmul.f32 0.01, %v10659_v43  ;;  %v2256_v36 = vadd.f32 %v2240_v40, %v10526_v45 }
 0x6f3   : > { %v2259_v20 = vadd.f32 %v2243_v10, %v10518_v62 }
 0x6f4   : > { %v8079_v28 = vpop.f32.mrb[52].mxu0  ;;  %v2257_v18 = vadd.f32 %v2241_v42, %v10528_v0 }
 0x6f5   : > { %v2273_v7 = vpack.c.bf16 %v2259_v20, %v2258_v48  ;;  %v10668_v31 = vadd.f32 %v10523_v27, %v8079_v28  ;;  %v2193_v52 = vpop.f32.mrb[53].mxu0 }
 0x6f6   : > { %v10671_v16 = vadd.f32 %v10523_v27, %v2193_v52  ;;  %v8080_v51 = vpop.f32.mrb[54].mxu0  ;;  %v2272_v53 = vpack.c.bf16 %v2257_v18, %v2256_v36 }
 0x6f7   : > { %14828 = vst [vmem:[#allocation61_spill] sm:$0xff] %v10668_v31  ;;  %v2246_v63 = vmul.f32 0.01, %v10668_v31  ;;  %v10675_v46 = vadd.f32 %v10523_v27, %v8080_v51  ;;  %v2196_v24 = vpop.f32.mrb[55].mxu0 }
 0x6f8   : > { %14829 = vst [vmem:[#allocation62_spill] sm:$0xff] %v10671_v16  ;;  %v2244_v17 = vmul.f32 0.01, %v10671_v16  ;;  %v10679_v59 = vadd.f32 %v10523_v27, %v2196_v24  ;;  %8105 = vmatprep.mubr.bf16.mxu1 %v2272_v53 }
 0x6f9   : > { %14830 = vst [vmem:[#allocation40_spill] sm:$0xff] %v10675_v46  ;;  %v2247_v38 = vmul.f32 0.01, %v10675_v46  ;;  %8106 = vmatmul.mubr.bf16.vlgmr.msra.gmra.mrb[48].mxu1 %v2273_v7  ;;  %v2262_v44 = vadd.f32 %v2246_v63, %v10563_v35 }
 0x6fa   : > { %14831 = vst [vmem:[#allocation43_spill] sm:$0xff] %v10679_v59  ;;  %v2245_v56 = vmul.f32 0.01, %v10679_v59  ;;  %8154 = vmatpush3.bf16.msra.mxu1 %v10497_v21  ;;  %v2260_v29 = vadd.f32 %v2244_v17, %v10558_v30 }
 0x6fb   : > { %v2263_v15 = vadd.f32 %v2247_v38, %v10552_v50  ;;  %8155 = vmatprep.subr.bf16.mxu1 %v10555_v1 }
 0x6fc   : > { %v8083_v41 = vpop.f32.mrb[56].mxu0  ;;  %v2261_v23 = vadd.f32 %v2245_v56, %v10560_v2 }
 0x6fd   : > { %v10690_v13 = vadd.f32 %v10523_v27, %v8083_v41  ;;  %v2209_v19 = vpop.f32.mrb[57].mxu0  ;;  %v2275_v5 = vpack.c.bf16 %v2263_v15, %v2262_v44 }
 0x6fe   : > { %v10693_v6 = vadd.f32 %v10523_v27, %v2209_v19  ;;  %v8084_v12 = vpop.f32.mrb[58].mxu0  ;;  %v2274_v9 = vpack.c.bf16 %v2261_v23, %v2260_v29  ;;  %8156 = vmatpush3.bf16.msra.mxu1 %v10555_v1 }
 0x6ff   : > { %14832 = vst [vmem:[#allocation47_spill] sm:$0xff] %v10690_v13  ;;  %v2250_v33 = vmul.f32 0.01, %v10690_v13  ;;  %v10698_v61 = vadd.f32 %v10523_v27, %v8084_v12  ;;  %v2212_v37 = vpop.f32.mrb[59].mxu0  ;;  %8157 = vmatprep.subr.bf16.mxu1 %v10573_v58 }
 0x700   : > { %14833 = vst [vmem:[#allocation73_spill] sm:$0xff] %v10693_v6  ;;  %v2248_v40 = vmul.f32 0.01, %v10693_v6  ;;  %v10703_v10 = vadd.f32 %v10523_v27, %v2212_v37  ;;  %8109 = vmatprep.mubr.bf16.mxu1 %v2274_v9 }
 0x701   : > { %14834 = vst [vmem:[#allocation45_spill] sm:$0xff] %v10698_v61  ;;  %v2251_v42 = vmul.f32 0.01, %v10698_v61  ;;  %8110 = vmatmul.mubr.bf16.gmra.mrb[52].mxu1 %v2275_v5  ;;  %v2266_v20 = vadd.f32 %v2250_v33, %v10599_v4 }
 0x702   : > { %14835 = vst [vmem:[#allocation66_spill] sm:$0xff] %v10703_v10  ;;  %v2249_v48 = vmul.f32 0.01, %v10703_v10  ;;  %8158 = vmatpush3.bf16.msra.mxu1 %v10573_v58  ;;  %v2264_v18 = vadd.f32 %v2248_v40, %v10594_v60  ;;  %v7386_v40 = vld [vmem:[%s9404_s10 + $0x88] sm:$0xff]  }
 0x703   : > { %v2267_v28 = vadd.f32 %v2251_v42, %v10588_v25  ;;  %8159 = vmatprep.subr.bf16.mxu1 %v10591_v14  ;;  %v7385_v42 = vld [vmem:[%s9404_s10 + $0x80] sm:$0xff]  }
 0x704   : > { %v8087_v36 = vpop.f32.mrb[60].mxu0  ;;  %v2265_v7 = vadd.f32 %v2249_v48, %v10596_v39  ;;  %v6977_v48 = vunpack.c.l.bf16 %v7386_v40 }
 0x705   : > { %v10714_v52 = vadd.f32 %v10523_v27, %v8087_v36  ;;  %v2225_v51 = vpop.f32.mrb[61].mxu0  ;;  %v2277_v53 = vpack.c.bf16 %v2267_v28, %v2266_v20  ;;  %v7394_v20 = vld [vmem:[%s9410_s18 + $0x88] sm:$0xff]   ;;  %v6978_v28 = vunpack.c.h.bf16 %v7386_v40  ;;  %v6973_v36 = vunpack.c.l.bf16 %v7385_v42 }
 0x706   : > { %v10717_v63 = vadd.f32 %v10523_v27, %v2225_v51  ;;  %v8088_v24 = vpop.f32.mrb[62].mxu0  ;;  %v2276_v17 = vpack.c.bf16 %v2265_v7, %v2264_v18  ;;  %8160 = vmatpush3.bf16.msra.mxu1 %v10591_v14  ;;  %v7393_v18 = vld [vmem:[%s9410_s18 + $0x80] sm:$0xff]   ;;  %v7388_v7 = vld [vmem:[%s9404_s10 + $0x98] sm:$0xff]   ;;  %v6974_v51 = vunpack.c.h.bf16 %v7385_v42 }
 0x707   : > { %14836 = vst [vmem:[#allocation48_spill] sm:$0xff] %v10714_v52  ;;  %v2254_v38 = vmul.f32 0.01, %v10714_v52  ;;  %v10722_v56 = vadd.f32 %v10523_v27, %v8088_v24  ;;  %v2228_v44 = vpop.f32.mrb[63].mxu0  ;;  %8161 = vmatprep.subr.bf16.mxu1 %v10609_v22  ;;  %v10749_v24 = vmul.f32 0.1, %v6977_v48  ;;  %v7006_v40 = vunpack.c.h.bf16 %v7393_v18 }
 0x708   : > { %14837 = vst [vmem:[#allocation69_spill] sm:$0xff] %v10717_v63  ;;  %v2252_v15 = vmul.f32 0.01, %v10717_v63  ;;  %v10727_v41 = vadd.f32 %v10523_v27, %v2228_v44  ;;  %8113 = vmatprep.mubr.bf16.mxu1 %v2276_v17  ;;  %v7009_v17 = vunpack.c.l.bf16 %v7394_v20  ;;  %v6985_v44 = vunpack.c.l.bf16 %v7388_v7  ;;  %v7397_v14 = vld [vmem:[%s9410_s18 + $0xa0] sm:$0xff]   ;;  %v7400_v63 = vld [vmem:[%s9410_s18 + $0xb8] sm:$0xff]  }
 0x709   : > { %14838 = vst [vmem:[#allocation50_spill] sm:$0xff] %v10722_v56  ;;  %v2255_v29 = vmul.f32 0.01, %v10722_v56  ;;  %8114 = vmatmul.mubr.bf16.gmra.mrb[56].mxu1 %v2277_v53  ;;  %v2270_v19 = vadd.f32 %v2254_v38, %v10631_v34  ;;  %v7387_v53 = vld [vmem:[%s9404_s10 + $0x90] sm:$0xff]   ;;  %14840 = vst [vmem:[#allocation51_spill] sm:$0xff] %v10749_v24  ;;  %v7005_v38 = vunpack.c.l.bf16 %v7393_v18  ;;  %v7389_v18 = vld [vmem:[%s9404_s10 + $0xa0] sm:$0xff]   ;;  %v7022_v10 = vunpack.c.h.bf16 %v7397_v14 }
 0x70a   : > { %14839 = vst [vmem:[#allocation71_spill] sm:$0xff] %v10727_v41  ;;  %v2253_v23 = vmul.f32 0.01, %v10727_v41  ;;  %8162 = vmatpush3.bf16.msra.mxu1 %v10609_v22  ;;  %v2268_v12 = vadd.f32 %v2252_v15, %v10627_v26  ;;  %v10751_v15 = vmul.f32 0.1, %v6978_v28  ;;  %v6982_v42 = vunpack.c.h.bf16 %v7387_v53  ;;  %v7392_v26 = vld [vmem:[%s9404_s10 + $0xb8] sm:$0xff]  }
 0x70b   : > { %v2271_v5 = vadd.f32 %v2255_v29, %v10622_v57  ;;  %8163 = vmatprep.subr.bf16.mxu1 %v10624_v3  ;;  %v10753_v29 = vmul.f32 0.1, %v6973_v36  ;;  %v10762_v48 = vmul.f32 0.028867513, %v7009_v17  ;;  %v10764_v28 = vmul.f32 0.028867513, %v7005_v38 }
 0x70c   : > { %v2269_v9 = vadd.f32 %v2253_v23, %v10629_v47  ;;  %14841 = vst [vmem:[#allocation74_spill] sm:$0xff] %v10751_v15  ;;  %v6981_v23 = vunpack.c.l.bf16 %v7387_v53  ;;  %v10766_v36 = vmul.f32 0.1, %v6985_v44  ;;  %v7390_v53 = vld [vmem:[%s9404_s10 + $0xa8] sm:$0xff]   ;;  %v6989_v34 = vunpack.c.l.bf16 %v7389_v18 }
 0x70d   : > { %v2279_v33 = vpack.c.bf16 %v2271_v5, %v2270_v19  ;;  %14842 = vst [vmem:[#allocation32_spill] sm:$0xff] %v10753_v29  ;;  %v7396_v19 = vld [vmem:[%s9410_s18 + $0x98] sm:$0xff]   ;;  %v7010_v5 = vunpack.c.h.bf16 %v7394_v20  ;;  %v10769_v20 = vmul.f32 0.5, %v10751_v15  ;;  %v10783_v15 = vmul.f32 0.1, %v6982_v42 }
 0x70e   : > { %v2278_v37 = vpack.c.bf16 %v2269_v9, %v2268_v12  ;;  %8164 = vmatpush3.bf16.msra.mxu1 %v10624_v3  ;;  %v10756_v12 = vmul.f32 0.1, %v6974_v51  ;;  %v7395_v9 = vld [vmem:[%s9410_s18 + $0x90] sm:$0xff]   ;;  %14844 = vst [vmem:[#allocation53_spill] sm:$0xff] %v10766_v36  ;;  %v10772_v51 = vmul.f32 0.5, %v10753_v29  ;;  %v6994_v41 = vunpack.c.h.bf16 %v7390_v53 }
 0x70f   : > { %8165 = vmatprep.subr.bf16.mxu1 %v10638_v8  ;;  %v2106_v17 = vmul.f32 0.028867513, %v7010_v5  ;;  %v2104_v3 = vmul.f32 0.028867513, %v7006_v40  ;;  %14847 = vst [vmem:[#allocation75_spill] sm:$0xff] %v10783_v15  ;;  %v7014_v47 = vunpack.c.h.bf16 %v7395_v9  ;;  %v7391_v29 = vld [vmem:[%s9404_s10 + $0xb0] sm:$0xff]   ;;  %v6993_v5 = vunpack.c.l.bf16 %v7390_v53 }
 0x710   : > { %8117 = vmatprep.mubr.bf16.mxu1 %v2278_v37  ;;  %14843 = vst [vmem:[#allocation72_spill] sm:$0xff] %v10756_v12  ;;  %v10760_v37 = vmul.f32 0.5, %v10749_v24  ;;  %v7013_v24 = vunpack.c.l.bf16 %v7395_v9  ;;  %v10779_v38 = vmul.f32 0.5, %v10756_v12  ;;  %v6997_v9 = vunpack.c.l.bf16 %v7391_v29 }
 0x711   : > { %8118 = vmatmul.mubr.bf16.gmra.mrb[60].mxu1 %v2279_v33  ;;  %v6986_v33 = vunpack.c.h.bf16 %v7388_v7  ;;  %v10774_v7 = vmul.f32 0.1, %v6981_v23  ;;  %v2060_v23 = vmul.f32 0.5, %v10766_v36  ;;  %v7001_v58 = vunpack.c.l.bf16 %v7392_v26 }
 0x712   : > { %8166 = vmatpush3.bf16.msra.mxu1 %v10638_v8  ;;  %v7018_v8 = vunpack.c.h.bf16 %v7396_v19  ;;  %v2107_v22 = vmul.f32 0.028867513, %v7013_v24  ;;  %v2059_v1 = vmul.f32 0.5, %v10783_v15  ;;  %v2108_v36 = vmul.f32 0.028867513, %v7014_v47 }
 0x713   : > { %8167 = vmatprep.subr.bf16.mxu1 %v10642_v55  ;;  %14845 = vst [vmem:[#allocation78_spill] sm:$0xff] %v10774_v7  ;;  %v10781_v44 = vmul.f32 0.1, %v6986_v33  ;;  %v2058_v12 = vmul.f32 0.5, %v10774_v7  ;;  %v6990_v33 = vunpack.c.h.bf16 %v7389_v18  ;;  %v7002_v56 = vunpack.c.h.bf16 %v7392_v26 }
 0x714   : > { %v2110_v42 = vmul.f32 0.028867513, %v7018_v8  ;;  %v10795_v52 = vmul.f32 0.1, %v6989_v34  ;;  %v7021_v7 = vunpack.c.l.bf16 %v7397_v14  ;;  %v10797_v24 = vmul.f32 0.1, %v6993_v5 }
 0x715   : > { %14846 = vst [vmem:[#allocation55_spill] sm:$0xff] %v10781_v44  ;;  %v2061_v40 = vmul.f32 0.5, %v10781_v44  ;;  %v10799_v53 = vmul.f32 0.1, %v6990_v33  ;;  %v10801_v44 = vmul.f32 0.1, %v6994_v41  ;;  %v7034_v5 = vunpack.c.h.bf16 %v7400_v63 }
 0x716   : > { %8168 = vmatpush3.bf16.msra.mxu1 %v10642_v55  ;;  %v7017_v55 = vunpack.c.l.bf16 %v7396_v19  ;;  %v7398_v19 = vld [vmem:[%s9410_s18 + $0xa8] sm:$0xff]   ;;  %14848 = vst [vmem:[#allocation56_spill] sm:$0xff] %v10795_v52  ;;  %14849 = vst [vmem:[#allocation77_spill] sm:$0xff] %v10797_v24  ;;  %v10803_v61 = vmul.f32 0.1, %v6997_v9  ;;  %v2062_v6 = vmul.f32 0.5, %v10795_v52 }
 0x717   : > { %8217 = vmatprep.subr.bf16.mxu1 %v10497_v21  ;;  %v7399_v21 = vld [vmem:[%s9410_s18 + $0xb0] sm:$0xff]   ;;  %v7025_v18 = vunpack.c.l.bf16 %v7398_v19  ;;  %14850 = vst [vmem:[#allocation58_spill] sm:$0xff] %v10799_v53  ;;  %14851 = vst [vmem:[#allocation76_spill] sm:$0xff] %v10801_v44  ;;  %v7026_v8 = vunpack.c.h.bf16 %v7398_v19  ;;  %v10805_v47 = vmul.f32 0.1, %v7001_v58  ;;  %v2064_v14 = vmul.f32 0.5, %v10797_v24 }
 0x718   : > { %v2109_v57 = vmul.f32 0.028867513, %v7017_v55  ;;  %v6998_v55 = vunpack.c.h.bf16 %v7391_v29  ;;  %14852 = vst [vmem:[#allocation82_spill] sm:$0xff] %v10803_v61  ;;  %v7029_v15 = vunpack.c.l.bf16 %v7399_v21  ;;  %v7033_v29 = vunpack.c.l.bf16 %v7400_v63 }
 0x719   : > { %14853 = vst [vmem:[#allocation79_spill] sm:$0xff] %v10805_v47  ;;  %v7030_v34 = vunpack.c.h.bf16 %v7399_v21  ;;  %v10809_v27 = vmul.f32 0.1, %v7002_v56  ;;  %v2111_v33 = vmul.f32 0.028867513, %v7021_v7  ;;  %v2063_v19 = vmul.f32 0.5, %v10799_v53 }
 0x71a   : > { %v10807_v26 = vmul.f32 0.1, %v6998_v55  ;;  %v2113_v41 = vmul.f32 0.028867513, %v7025_v18  ;;  %v2112_v9 = vmul.f32 0.028867513, %v7022_v10  ;;  %v2121_v18 = vadd.f32 %v10762_v48, %v10760_v37 }
 0x71b   : > { %14855 = vst [vmem:[#allocation80_spill] sm:$0xff] %v10809_v27  ;;  %v2065_v13 = vmul.f32 0.5, %v10801_v44  ;;  %v2114_v58 = vmul.f32 0.028867513, %v7026_v8  ;;  %v2066_v39 = vmul.f32 0.5, %v10803_v61  ;;  %v2068_v21 = vmul.f32 0.5, %v10805_v47 }
 0x71c   : > { %14854 = vst [vmem:[#allocation81_spill] sm:$0xff] %v10807_v26  ;;  %v2115_v55 = vmul.f32 0.028867513, %v7029_v15  ;;  %v2117_v56 = vmul.f32 0.028867513, %v7033_v29  ;;  %v2067_v63 = vmul.f32 0.5, %v10807_v26  ;;  %v2122_v10 = vadd.f32 %v2106_v17, %v10769_v20 }
 0x71d   : > { %v2116_v59 = vmul.f32 0.028867513, %v7030_v34  ;;  %v2069_v7 = vmul.f32 0.5, %v10809_v27  ;;  %v2118_v52 = vmul.f32 0.028867513, %v7034_v5  ;;  %v2119_v8 = vadd.f32 %v10764_v28, %v10772_v51 }
 0x71e   : > { %v2120_v61 = vadd.f32 %v2104_v3, %v10779_v38  ;;  %v2123_v15 = vadd.f32 %v2107_v22, %v2058_v12  ;;  %v2124_v24 = vadd.f32 %v2108_v36, %v2059_v1  ;;  %v2125_v47 = vadd.f32 %v2109_v57, %v2060_v23 }
 0x71f   : > { %v2126_v29 = vadd.f32 %v2110_v42, %v2061_v40  ;;  %v2127_v53 = vadd.f32 %v2111_v33, %v2062_v6  ;;  %v2128_v26 = vadd.f32 %v2112_v9, %v2063_v19  ;;  %v2129_v34 = vadd.f32 %v2113_v41, %v2064_v14  ;;  %v14856_v19 = vld [vmem:[#allocation61_spill] sm:$0xff] }
 0x720   : > { %v2130_v44 = vadd.f32 %v2114_v58, %v2065_v13  ;;  %v2131_v27 = vadd.f32 %v2115_v55, %v2066_v39  ;;  %v2132_v5 = vadd.f32 %v2116_v59, %v2067_v63  ;;  %v2133_v46 = vadd.f32 %v2117_v56, %v2068_v21  ;;  %v14857_v55 = vld [vmem:[#allocation62_spill] sm:$0xff]  ;;  %v14859_v63 = vld [vmem:[#allocation43_spill] sm:$0xff] }
 0x721   : > { %v2134_v16 = vadd.f32 %v2118_v52, %v2069_v7  ;;  %v2379_v37 = vmul.f32 1.5, %v2121_v18  ;;  %v2380_v48 = vmul.f32 1.5, %v2122_v10  ;;  %v2377_v20 = vmul.f32 1.5, %v2119_v8  ;;  %v14860_v10 = vld [vmem:[#allocation49_spill] sm:$0xff] }
 0x722   : > { %v2378_v17 = vmul.f32 1.5, %v2120_v61  ;;  %v2381_v31 = vmul.f32 1.5, %v2123_v15  ;;  %v2382_v28 = vmul.f32 1.5, %v2124_v24  ;;  %v2383_v51 = vmul.f32 1.5, %v2125_v47  ;;  %v14861_v15 = vld [vmem:[#allocation47_spill] sm:$0xff] }
 0x723   : > { %v2384_v3 = vmul.f32 1.5, %v2126_v29  ;;  %v2385_v22 = vmul.f32 1.5, %v2127_v53  ;;  %v2386_v1 = vmul.f32 1.5, %v2128_v26  ;;  %v2387_v57 = vmul.f32 1.5, %v2129_v34 }
 0x724   : > { %v2388_v12 = vmul.f32 1.5, %v2130_v44  ;;  %v10825_v6 = vmul.f32 1.5, %v2131_v27  ;;  %v10827_v36 = vmul.f32 1.5, %v2132_v5  ;;  %v10829_v39 = vmul.f32 1.5, %v2133_v46  ;;  %v14862_v5 = vld [vmem:[#allocation73_spill] sm:$0xff] }
 0x725   : > { %v10831_v59 = vmul.f32 1.5, %v2134_v16  ;;  %v10834_v13 = vadd.f32 %v2379_v37, %v10531_v54  ;;  %v10837_v61 = vadd.f32 %v2380_v48, %v10518_v62  ;;  %v10840_v52 = vadd.f32 %v2377_v20, %v10526_v45  ;;  %v14863_v48 = vld [vmem:[#allocation64_spill] sm:$0xff] }
 0x726   : > { %v10843_v38 = vadd.f32 %v2378_v17, %v10528_v0  ;;  %v10846_v27 = vadd.f32 %v2381_v31, %v10558_v30  ;;  %v10849_v46 = vadd.f32 %v2382_v28, %v10560_v2  ;;  %v10852_v16 = vadd.f32 %v2383_v51, %v10563_v35  ;;  %v14864_v51 = vld [vmem:[#allocation45_spill] sm:$0xff] }
 0x727   : > { %v10855_v44 = vadd.f32 %v2384_v3, %v10552_v50  ;;  %v2411_v23 = vmul.f32 0.25, %v10648_v49  ;;  %v10859_v40 = vadd.f32 %v2385_v22, %v10594_v60  ;;  %v10862_v42 = vadd.f32 %v2387_v57, %v10599_v4  ;;  %v14866_v50 = vld [vmem:[#allocation48_spill] sm:$0xff] }
 0x728   : > { %v10865_v31 = vadd.f32 %v2388_v12, %v10588_v25  ;;  %v2596_v24 = vmul.f32 0.16666667, %v10648_v49  ;;  %v2409_v53 = vmul.f32 0.25, %v10651_v11  ;;  %v2594_v47 = vmul.f32 0.16666667, %v10651_v11  ;;  %v14858_v11 = vld [vmem:[#allocation40_spill] sm:$0xff] }
 0x729   : > { %v2412_v26 = vmul.f32 0.25, %v10655_v32  ;;  %v2597_v33 = vmul.f32 0.16666667, %v10655_v32  ;;  %v2410_v14 = vmul.f32 0.25, %v10659_v43  ;;  %v2595_v41 = vmul.f32 0.16666667, %v10659_v43 }
 0x72a   : > { %v10875_v9 = vmul.f32 0.25, %v14856_v19  ;;  %v10878_v58 = vmul.f32 0.16666667, %v14856_v19  ;;  %v10881_v49 = vmul.f32 0.25, %v14857_v55  ;;  %v10884_v21 = vmul.f32 0.16666667, %v14857_v55 }
 0x72b   : > { %v10887_v56 = vmul.f32 0.25, %v14858_v11  ;;  %v10890_v32 = vmul.f32 0.16666667, %v14858_v11  ;;  %v10893_v43 = vmul.f32 0.25, %v14859_v63  ;;  %v10896_v7 = vmul.f32 0.16666667, %v14859_v63 }
 0x72c   : > { %v10899_v8 = vadd.f32 %v2386_v1, %v14860_v10  ;;  %v10902_v29 = vmul.f32 0.25, %v14861_v15  ;;  %v10905_v34 = vmul.f32 0.16666667, %v14861_v15  ;;  %v10908_v37 = vmul.f32 0.25, %v14862_v5  ;;  %v14865_v12 = vld [vmem:[#allocation66_spill] sm:$0xff] }
 0x72d   : > { %v10912_v28 = vmul.f32 0.16666667, %v14862_v5  ;;  %v10915_v3 = vmul.f32 0.25, %v14864_v51  ;;  %v10918_v22 = vmul.f32 0.16666667, %v14864_v51  ;;  %v10922_v19 = vmul.f32 0.25, %v14865_v12 }
 0x72e   : > { %v10926_v15 = vmul.f32 0.16666667, %v14865_v12 }
 0x7cc   : > { %v8107_v18 = vpop.f32.mrb[48].mxu1 }
 0x7cd   : > { %v2323_v20 = vadd.f32 %v14863_v48, %v8107_v18  ;;  %v2314_v17 = vpop.f32.mrb[49].mxu1 }
 0x7ce   : > { %v2315_v1 = vadd.f32 %v14863_v48, %v2314_v17  ;;  %v8108_v57 = vpop.f32.mrb[50].mxu1 }
 0x7cf   : > { %v2427_v55 = vmul.f32 0.25, %v2323_v20  ;;  %v2612_v11 = vmul.f32 0.16666667, %v2323_v20  ;;  %v2326_v63 = vadd.f32 %v14863_v48, %v8108_v57  ;;  %v2317_v18 = vpop.f32.mrb[51].mxu1  ;;  %v10934_v57 = vmul.f32 0.25, %v14866_v50 }
 0x7d0   : > { %v2425_v5 = vmul.f32 0.25, %v2315_v1  ;;  %v2610_v4 = vmul.f32 0.16666667, %v2315_v1  ;;  %v2318_v10 = vadd.f32 %v14863_v48, %v2317_v18  ;;  %v10939_v1 = vmul.f32 0.16666667, %v14866_v50 }
 0x7d1   : > { %v2443_v51 = vadd.f32 %v2427_v55, %v2411_v23  ;;  %v10929_v60 = vadd.f32 %v2612_v11, %v2596_v24  ;;  %v2428_v17 = vmul.f32 0.25, %v2326_v63  ;;  %v2613_v25 = vmul.f32 0.16666667, %v2326_v63 }
 0x7d2   : > { %v2441_v35 = vadd.f32 %v2425_v5, %v2409_v53  ;;  %v10931_v2 = vadd.f32 %v2610_v4, %v2594_v47  ;;  %v2426_v30 = vmul.f32 0.25, %v2318_v10  ;;  %v2611_v20 = vmul.f32 0.16666667, %v2318_v10  ;;  %v14867_v53 = vld [vmem:[#allocation69_spill] sm:$0xff] }
 0x7d3   : > { %v2459_v54 = vmul.f32 0.01, %v2443_v51  ;;  %v2444_v12 = vadd.f32 %v2428_v17, %v2412_v26  ;;  %v10936_v0 = vadd.f32 %v2613_v25, %v2597_v33  ;;  %v10944_v4 = vmul.f32 0.25, %v14867_v53 }
 0x7d4   : > { %v2457_v23 = vmul.f32 0.01, %v2441_v35  ;;  %v2442_v24 = vadd.f32 %v2426_v30, %v2410_v14  ;;  %v10941_v55 = vadd.f32 %v2611_v20, %v2595_v41  ;;  %v8111_v11 = vpop.f32.mrb[52].mxu1  ;;  %v10947_v47 = vmul.f32 0.16666667, %v14867_v53 }
 0x7d5   : > { %v2460_v10 = vmul.f32 0.01, %v2444_v12  ;;  %v2339_v63 = vadd.f32 %v14863_v48, %v8111_v11  ;;  %v2330_v26 = vpop.f32.mrb[53].mxu1  ;;  %v2475_v25 = vadd.f32 %v2459_v54, %v10834_v13 }
 0x7d6   : > { %v2458_v33 = vmul.f32 0.01, %v2442_v24  ;;  %v2331_v50 = vadd.f32 %v14863_v48, %v2330_v26  ;;  %v8112_v35 = vpop.f32.mrb[54].mxu1  ;;  %v2473_v30 = vadd.f32 %v2457_v23, %v10840_v52 }
 0x7d7   : > { %v2476_v14 = vadd.f32 %v2460_v10, %v10837_v61  ;;  %v2431_v41 = vmul.f32 0.25, %v2339_v63  ;;  %v2616_v18 = vmul.f32 0.16666667, %v2339_v63  ;;  %v2342_v5 = vadd.f32 %v14863_v48, %v8112_v35  ;;  %v2333_v51 = vpop.f32.mrb[55].mxu1 }
 0x7d8   : > { %v2429_v17 = vmul.f32 0.25, %v2331_v50  ;;  %v2614_v20 = vmul.f32 0.16666667, %v2331_v50  ;;  %v2334_v12 = vadd.f32 %v14863_v48, %v2333_v51  ;;  %v2474_v11 = vadd.f32 %v2458_v33, %v10843_v38  ;;  %v14868_v38 = vld [vmem:[#allocation50_spill] sm:$0xff] }
 0x7d9   : > { %v2490_v54 = vpack.c.bf16 %v2476_v14, %v2475_v25  ;;  %v2447_v13 = vadd.f32 %v2431_v41, %v10875_v9  ;;  %v10959_v24 = vadd.f32 %v2616_v18, %v10878_v58  ;;  %v2432_v52 = vmul.f32 0.25, %v2342_v5 }
 0x7da   : > { %v2445_v61 = vadd.f32 %v2429_v17, %v10881_v49  ;;  %v10963_v23 = vadd.f32 %v2614_v20, %v10884_v21  ;;  %v2617_v53 = vmul.f32 0.16666667, %v2342_v5  ;;  %v2430_v10 = vmul.f32 0.25, %v2334_v12 }
 0x7db   : > { %v2463_v63 = vmul.f32 0.01, %v2447_v13  ;;  %v2448_v26 = vadd.f32 %v2432_v52, %v10887_v56  ;;  %v2615_v50 = vmul.f32 0.16666667, %v2334_v12  ;;  %v2489_v35 = vpack.c.bf16 %v2474_v11, %v2473_v30  ;;  %v14869_v13 = vld [vmem:[#allocation63_spill] sm:$0xff] }
 0x7dc   : > { %v10967_v25 = vmul.f32 0.25, %v14868_v38  ;;  %v2461_v9 = vmul.f32 0.01, %v2445_v61  ;;  %v10970_v58 = vadd.f32 %v2617_v53, %v10890_v32  ;;  %v2446_v33 = vadd.f32 %v2430_v10, %v10893_v43  ;;  %v8115_v49 = vpop.f32.mrb[56].mxu1  ;;  %v14870_v10 = vld [vmem:[#allocation70_spill] sm:$0xff] }
 0x7dd   : > { %v10974_v21 = vmul.f32 0.16666667, %v14868_v38  ;;  %v2464_v14 = vmul.f32 0.01, %v2448_v26  ;;  %v10977_v41 = vadd.f32 %v2615_v50, %v10896_v7  ;;  %v2355_v56 = vadd.f32 %v14863_v48, %v8115_v49  ;;  %8137 = vmatprep.mubr.bf16.mxu0 %v2489_v35  ;;  %v2346_v30 = vpop.f32.mrb[57].mxu1 }
 0x7de   : > { %v2462_v18 = vmul.f32 0.01, %v2446_v33  ;;  %v2347_v5 = vadd.f32 %v14863_v48, %v2346_v30  ;;  %8138 = vmatmul.mubr.bf16.vlgmr.msra.gmra.mrb[64].mxu0 %v2490_v54  ;;  %v8116_v32 = vpop.f32.mrb[58].mxu1  ;;  %v2477_v51 = vadd.f32 %v2461_v9, %v10846_v27  ;;  %v2479_v43 = vadd.f32 %v2463_v63, %v10852_v16  ;;  %v14872_v30 = vld [vmem:[#allocation71_spill] sm:$0xff] }
 0x7df   : > { %v2435_v17 = vmul.f32 0.25, %v2355_v56  ;;  %v2620_v20 = vmul.f32 0.16666667, %v2355_v56  ;;  %v2358_v12 = vadd.f32 %v14863_v48, %v8116_v32  ;;  %v2349_v11 = vpop.f32.mrb[59].mxu1  ;;  %v2480_v7 = vadd.f32 %v2464_v14, %v10855_v44  ;;  %8186 = vmatpush3.bf16.msra.mxu0 %v14869_v13  ;;  %v14871_v56 = vld [vmem:[#allocation38_spill] sm:$0xff] }
 0x7e0   : > { %v2433_v52 = vmul.f32 0.25, %v2347_v5  ;;  %v2618_v61 = vmul.f32 0.16666667, %v2347_v5  ;;  %v2350_v53 = vadd.f32 %v14863_v48, %v2349_v11  ;;  %v2478_v54 = vadd.f32 %v2462_v18, %v10849_v46  ;;  %8187 = vmatprep.subr.bf16.mxu0 %v14870_v10 }
 0x7e1   : > { %v2451_v27 = vadd.f32 %v2435_v17, %v10902_v29  ;;  %v10991_v16 = vadd.f32 %v2620_v20, %v10905_v34  ;;  %v2436_v63 = vmul.f32 0.25, %v2358_v12  ;;  %v2621_v26 = vmul.f32 0.16666667, %v2358_v12 }
 0x7e2   : > { %v2449_v50 = vadd.f32 %v2433_v52, %v10908_v37  ;;  %v10995_v44 = vadd.f32 %v2618_v61, %v10912_v28  ;;  %v2434_v35 = vmul.f32 0.25, %v2350_v53  ;;  %v2619_v38 = vmul.f32 0.16666667, %v2350_v53 }
 0x7e3   : > { %v2467_v9 = vmul.f32 0.01, %v2451_v27  ;;  %v2452_v33 = vadd.f32 %v2436_v63, %v10915_v3  ;;  %v10999_v46 = vadd.f32 %v2621_v26, %v10918_v22  ;;  %v2491_v49 = vpack.c.bf16 %v2478_v54, %v2477_v51  ;;  %8188 = vmatpush3.bf16.msra.mxu0 %v14870_v10  ;;  %v14873_v10 = vld [vmem:[#allocation46_spill] sm:$0xff] }
 0x7e4   : > { %v2465_v29 = vmul.f32 0.01, %v2449_v50  ;;  %v2450_v34 = vadd.f32 %v2434_v35, %v10922_v19  ;;  %v11004_v14 = vadd.f32 %v2619_v38, %v10926_v15  ;;  %v8119_v37 = vpop.f32.mrb[60].mxu1  ;;  %v2492_v28 = vpack.c.bf16 %v2480_v7, %v2479_v43  ;;  %8189 = vmatprep.subr.bf16.mxu0 %v14871_v56 }
 0x7e5   : > { %v2422_v18 = vmul.f32 0.25, %v14872_v30  ;;  %v2607_v3 = vmul.f32 0.16666667, %v14872_v30  ;;  %v2468_v5 = vmul.f32 0.01, %v2452_v33  ;;  %v2371_v22 = vadd.f32 %v14863_v48, %v8119_v37  ;;  %8141 = vmatprep.mubr.bf16.mxu0 %v2491_v49  ;;  %v2362_v32 = vpop.f32.mrb[61].mxu1 }
 0x7e6   : > { %v2466_v51 = vmul.f32 0.01, %v2450_v34  ;;  %v2363_v17 = vadd.f32 %v14863_v48, %v2362_v32  ;;  %8142 = vmatmul.mubr.bf16.gmra.mrb[68].mxu0 %v2492_v28  ;;  %v8120_v19 = vpop.f32.mrb[62].mxu1  ;;  %v2481_v15 = vadd.f32 %v2465_v29, %v10859_v40  ;;  %v2483_v43 = vadd.f32 %v2467_v9, %v10862_v42  ;;  %v14875_v29 = vld [vmem:[#allocation41_spill] sm:$0xff]  ;;  %v14876_v37 = vld [vmem:[#allocation54_spill] sm:$0xff]  ;;  %v14877_v28 = vld [vmem:[#allocation35_spill] sm:$0xff] }
 0x7e7   : > { %v2439_v20 = vmul.f32 0.25, %v2371_v22  ;;  %v2624_v12 = vmul.f32 0.16666667, %v2371_v22  ;;  %v2374_v11 = vadd.f32 %v14863_v48, %v8120_v19  ;;  %v2365_v7 = vpop.f32.mrb[63].mxu1  ;;  %v2484_v13 = vadd.f32 %v2468_v5, %v10865_v31  ;;  %8190 = vmatpush3.bf16.msra.mxu0 %v14871_v56  ;;  %v14878_v30 = vld [vmem:[#allocation60_spill] sm:$0xff] }
 0x7e8   : > { %v2437_v52 = vmul.f32 0.25, %v2363_v17  ;;  %v2622_v61 = vmul.f32 0.16666667, %v2363_v17  ;;  %v2366_v53 = vadd.f32 %v14863_v48, %v2365_v7  ;;  %v2482_v54 = vadd.f32 %v2466_v51, %v10899_v8  ;;  %8191 = vmatprep.subr.bf16.mxu0 %v14873_v10  ;;  %v14879_v51 = vld [vmem:[#allocation59_spill] sm:$0xff] }
 0x7e9   : > { %v2455_v40 = vadd.f32 %v2439_v20, %v10934_v57  ;;  %v11021_v42 = vadd.f32 %v2624_v12, %v10939_v1  ;;  %v2440_v27 = vmul.f32 0.25, %v2374_v11  ;;  %v2625_v63 = vmul.f32 0.16666667, %v2374_v11 }
 0x7ea   : > { %v2453_v26 = vadd.f32 %v2437_v52, %v10944_v4  ;;  %v11025_v31 = vadd.f32 %v2622_v61, %v10947_v47  ;;  %v2438_v50 = vmul.f32 0.25, %v2366_v53  ;;  %v2623_v35 = vmul.f32 0.16666667, %v2366_v53  ;;  %v14874_v4 = vld [vmem:[#allocation57_spill] sm:$0xff] }
 0x7eb   : > { %v2471_v38 = vmul.f32 0.01, %v2455_v40  ;;  %v2456_v48 = vadd.f32 %v2440_v27, %v10967_v25  ;;  %v11029_v8 = vadd.f32 %v2625_v63, %v10974_v21  ;;  %v2493_v9 = vpack.c.bf16 %v2482_v54, %v2481_v15  ;;  %8192 = vmatpush3.bf16.msra.mxu0 %v14873_v10  ;;  %v11056_v15 = vld [vmem:[%s14622_s9] ss:$0 sm:$0xff] }
 0x7ec   : > { %v2469_v57 = vmul.f32 0.01, %v2453_v26  ;;  %v2454_v1 = vadd.f32 %v2438_v50, %v2422_v18  ;;  %v11032_v33 = vadd.f32 %v2623_v35, %v2607_v3  ;;  %v2494_v49 = vpack.c.bf16 %v2484_v13, %v2483_v43  ;;  %8193 = vmatprep.subr.bf16.mxu0 %v14874_v4  ;;  %14883 = vst [vmem:[#allocation62_spill] sm:$0xff] %v11056_v15 }
 0x7ed   : > { %v2472_v47 = vmul.f32 0.01, %v2456_v48  ;;  %8145 = vmatprep.mubr.bf16.mxu0 %v2493_v9  ;;  %v2407_v34 = vadd.f32 %v10829_v39, %v14875_v29  ;;  %v2408_v25 = vadd.f32 %v10831_v59, %v14876_v37  ;;  %v2405_v56 = vadd.f32 %v10825_v6, %v14877_v28  ;;  %v14880_v59 = vld [vmem:[#allocation42_spill] sm:$0xff] }
 0x7ee   : > { %v2470_v21 = vmul.f32 0.01, %v2454_v1  ;;  %8146 = vmatmul.mubr.bf16.gmra.mrb[72].mxu0 %v2494_v49  ;;  %v2406_v18 = vadd.f32 %v10827_v36, %v14878_v30  ;;  %v14881_v6 = vld [vmem:[#allocation34_spill] sm:$0xff]  ;;  %v11050_v36 = vld [vmem:[#allocation6] sm:$0xff]  }
 0x7ef   : > { %v2487_v3 = vadd.f32 %v2471_v38, %v2407_v34  ;;  %v2488_v5 = vadd.f32 %v2472_v47, %v2408_v25  ;;  %8194 = vmatpush3.bf16.msra.mxu0 %v14874_v4  ;;  %v2485_v22 = vadd.f32 %v2469_v57, %v2405_v56  ;;  %14882 = vst [vmem:[#allocation61_spill] sm:$0xff] %v11050_v36  ;;  %v14884_v48 = vld [vmem:[#allocation74_spill] sm:$0xff]  ;;  %v14886_v47 = vld [vmem:[#allocation65_spill] sm:$0xff]  ;;  %v14889_v56 = vld [vmem:[#allocation51_spill] sm:$0xff] }
 0x7f0   : > { %v2486_v32 = vadd.f32 %v2470_v21, %v2406_v18  ;;  %8195 = vmatprep.subr.bf16.mxu0 %v14879_v51  ;;  %v2677_v9 = vadd.f32 %v14884_v48, %v10518_v62 }
 0x7f1   : > { %v2496_v39 = vpack.c.bf16 %v2488_v5, %v2487_v3 }
 0x7f2   : > { %v2495_v17 = vpack.c.bf16 %v2486_v32, %v2485_v22 }
 0x7f3   : > { %8196 = vmatpush3.bf16.msra.mxu0 %v14879_v51 }
 0x7f4   : > { %8149 = vmatprep.mubr.bf16.mxu0 %v2495_v17  ;;  %8197 = vmatprep.subr.bf16.mxu0 %v14880_v59 }
 0x7f6   : > { %8150 = vmatmul.mubr.bf16.gmra.mrb[76].mxu0 %v2496_v39 }
 0x7f7   : > { %8198 = vmatpush3.bf16.msra.mxu0 %v14880_v59 }
 0x7f8   : > { %8199 = vmatprep.subr.bf16.mxu0 %v14881_v6 }
 0x7fb   : > { %8200 = vmatpush3.bf16.msra.mxu0 %v14881_v6 }
 0x7fc   : > { %8249 = vmatprep.subr.bf16.mxu0 %v11050_v36 }
 0x8b1   : > { %v8139_v19 = vpop.f32.mrb[64].mxu0 }
 0x8b2   : > { %v2540_v43 = vadd.f32 %v11056_v15, %v8139_v19  ;;  %v2531_v20 = vpop.f32.mrb[65].mxu0 }
 0x8b3   : > { %v2532_v12 = vadd.f32 %v11056_v15, %v2531_v20  ;;  %v8140_v11 = vpop.f32.mrb[66].mxu0 }
 0x8b4   : > { %v2644_v7 = vmul.f32 0.6666667, %v2540_v43  ;;  %v2543_v13 = vadd.f32 %v11056_v15, %v8140_v11  ;;  %v2534_v52 = vpop.f32.mrb[67].mxu0 }
 0x8b5   : > { %v2642_v61 = vmul.f32 0.6666667, %v2532_v12  ;;  %v2535_v53 = vadd.f32 %v11056_v15, %v2534_v52 }
 0x8b6   : > { %v2660_v54 = vadd.f32 %v2644_v7, %v10929_v60  ;;  %v2645_v10 = vmul.f32 0.6666667, %v2543_v13  ;;  %v14885_v60 = vld [vmem:[#allocation32_spill] sm:$0xff] }
 0x8b7   : > { %v2658_v40 = vadd.f32 %v2642_v61, %v10931_v2  ;;  %v2643_v27 = vmul.f32 0.6666667, %v2535_v53  ;;  %v2674_v4 = vadd.f32 %v14885_v60, %v10526_v45  ;;  %v14887_v2 = vld [vmem:[#allocation72_spill] sm:$0xff] }
 0x8b8   : > { %v2661_v63 = vadd.f32 %v2645_v10, %v10936_v0  ;;  %v2692_v38 = vmul.f32 0.01, %v2660_v54  ;;  %v2675_v34 = vadd.f32 %v14887_v2, %v14886_v47  ;;  %v14892_v53 = vld [vmem:[#allocation68_spill] sm:$0xff]  ;;  %v11108_v2 = vld [vmem:[#allocation6 + $0x8] sm:$0xff]  }
 0x8b9   : > { %v2690_v26 = vmul.f32 0.01, %v2658_v40  ;;  %v2659_v50 = vadd.f32 %v2643_v27, %v10941_v55  ;;  %v8143_v35 = vpop.f32.mrb[68].mxu0  ;;  %v14888_v55 = vld [vmem:[#allocation67_spill] sm:$0xff]  ;;  %v14894_v27 = vld [vmem:[#allocation52_spill] sm:$0xff]  ;;  %14901 = vst [vmem:[#allocation73_spill] sm:$0xff] %v11108_v2 }
 0x8ba   : > { %v2693_v57 = vmul.f32 0.01, %v2661_v63  ;;  %v2556_v1 = vadd.f32 %v11056_v15, %v8143_v35  ;;  %v2547_v49 = vpop.f32.mrb[69].mxu0  ;;  %v2676_v18 = vadd.f32 %v14889_v56, %v14888_v55  ;;  %v14895_v63 = vld [vmem:[#allocation78_spill] sm:$0xff] }
 0x8bb   : > { %v2691_v25 = vmul.f32 0.01, %v2659_v50  ;;  %v2548_v0 = vadd.f32 %v11056_v15, %v2547_v49  ;;  %v8144_v21 = vpop.f32.mrb[70].mxu0  ;;  %v11079_v32 = vadd.f32 %v2690_v26, %v2674_v4  ;;  %v14896_v26 = vld [vmem:[#allocation36_spill] sm:$0xff]  ;;  %v14897_v50 = vld [vmem:[#allocation75_spill] sm:$0xff] }
 0x8bc   : > { %v11076_v3 = vadd.f32 %v2693_v57, %v2677_v9  ;;  %v2648_v62 = vmul.f32 0.6666667, %v2556_v1  ;;  %v2559_v5 = vadd.f32 %v11056_v15, %v8144_v21  ;;  %v2550_v22 = vpop.f32.mrb[71].mxu0  ;;  %v11084_v17 = vadd.f32 %v2692_v38, %v2676_v18  ;;  %v14898_v9 = vld [vmem:[#allocation37_spill] sm:$0xff] }
 0x8bd   : > { %v11081_v51 = vadd.f32 %v2691_v25, %v2675_v34  ;;  %v2646_v45 = vmul.f32 0.6666667, %v2548_v0  ;;  %v2551_v39 = vadd.f32 %v11056_v15, %v2550_v22  ;;  %v2679_v35 = vadd.f32 %v14897_v50, %v14896_v26  ;;  %v14899_v57 = vld [vmem:[#allocation53_spill] sm:$0xff] }
 0x8be   : > { %14891 = vst [vmem:[#allocation43_spill] sm:$0xff] %v11084_v17  ;;  %v2664_v59 = vadd.f32 %v2648_v62, %v10959_v24  ;;  %v2649_v6 = vmul.f32 0.6666667, %v2559_v5  ;;  %v2853_v11 = vpack.c.bf16 %v11076_v3, %v11084_v17  ;;  %v14893_v24 = vld [vmem:[#allocation55_spill] sm:$0xff]  ;;  %v2680_v1 = vadd.f32 %v14899_v57, %v14898_v9 }
 0x8bf   : > { %14890 = vst [vmem:[#allocation40_spill] sm:$0xff] %v11081_v51  ;;  %v2662_v19 = vadd.f32 %v2646_v45, %v10963_v23  ;;  %v2647_v43 = vmul.f32 0.6666667, %v2551_v39  ;;  %v2852_v20 = vpack.c.bf16 %v11081_v51, %v11079_v32  ;;  %v2681_v54 = vadd.f32 %v14893_v24, %v14892_v53  ;;  %v14910_v53 = vld [vmem:[#allocation49_spill] sm:$0xff]  ;;  %v14911_v24 = vld [vmem:[#allocation58_spill] sm:$0xff] }
 0x8c0   : > { %v2665_v12 = vadd.f32 %v2649_v6, %v10970_v58  ;;  %v2696_v61 = vmul.f32 0.01, %v2664_v59  ;;  %v2678_v58 = vadd.f32 %v14895_v63, %v14894_v27  ;;  %v11126_v59 = vld [vmem:[#allocation6 + $0x10] sm:$0xff]   ;;  %v14913_v27 = vld [vmem:[#allocation77_spill] sm:$0xff] }
 0x8c1   : > { %v2694_v7 = vmul.f32 0.01, %v2662_v19  ;;  %v2663_v13 = vadd.f32 %v2647_v43, %v10977_v41  ;;  %v8147_v52 = vpop.f32.mrb[72].mxu0  ;;  %8169 = vmatprep.mubr.bf16.mxu1 %v2852_v20  ;;  %14905 = vst [vmem:[#allocation48_spill] sm:$0xff] %v11126_v59  ;;  %v14906_v43 = vld [vmem:[#allocation39_spill] sm:$0xff]  ;;  %v14907_v20 = vld [vmem:[#allocation76_spill] sm:$0xff] }
 0x8c2   : > { %v2697_v10 = vmul.f32 0.01, %v2665_v12  ;;  %v2572_v23 = vadd.f32 %v11056_v15, %v8147_v52  ;;  %v2563_v40 = vpop.f32.mrb[73].mxu0  ;;  %8170 = vmatmul.mubr.bf16.vlgmr.msra.gmra.mrb[64].mxu1 %v2853_v11  ;;  %v11116_v55 = vadd.f32 %v2696_v61, %v2680_v1  ;;  %v2685_v12 = vadd.f32 %v14907_v20, %v14906_v43  ;;  %v14909_v52 = vld [vmem:[#allocation56_spill] sm:$0xff]  ;;  %v14923_v43 = vld [vmem:[#allocation79_spill] sm:$0xff] }
 0x8c3   : > { %v2695_v38 = vmul.f32 0.01, %v2663_v13  ;;  %v2564_v41 = vadd.f32 %v11056_v15, %v2563_v40  ;;  %v8148_v48 = vpop.f32.mrb[74].mxu0  ;;  %8218 = vmatpush3.bf16.msra.mxu1 %v11050_v36  ;;  %v11111_v34 = vadd.f32 %v2694_v7, %v2678_v58  ;;  %v14908_v13 = vld [vmem:[#allocation44_spill] sm:$0xff]  ;;  %v14912_v40 = vld [vmem:[#allocation33_spill] sm:$0xff]  ;;  %v2688_v20 = vadd.f32 %v14923_v43, %v14875_v29 }
 0x8c4   : > { %v11105_v49 = vadd.f32 %v2697_v10, %v2681_v54  ;;  %v2652_v60 = vmul.f32 0.6666667, %v2572_v23  ;;  %v2575_v4 = vadd.f32 %v11056_v15, %v8148_v48  ;;  %v2566_v47 = vpop.f32.mrb[75].mxu0  ;;  %8219 = vmatprep.subr.bf16.mxu1 %v11108_v2  ;;  %14904 = vst [vmem:[#allocation66_spill] sm:$0xff] %v11116_v55  ;;  %v2682_v61 = vadd.f32 %v14909_v52, %v14908_v13 }
 0x8c5   : > { %14902 = vst [vmem:[#allocation64_spill] sm:$0xff] %v11111_v34  ;;  %v11113_v25 = vadd.f32 %v2695_v38, %v2679_v35  ;;  %v2650_v0 = vmul.f32 0.6666667, %v2564_v41  ;;  %v2567_v21 = vadd.f32 %v11056_v15, %v2566_v47  ;;  %v2683_v54 = vadd.f32 %v14911_v24, %v14910_v53  ;;  %v11144_v38 = vld [vmem:[#allocation6 + $0x18] sm:$0xff]  }
 0x8c6   : > { %14900 = vst [vmem:[#allocation47_spill] sm:$0xff] %v11105_v49  ;;  %v2668_v56 = vadd.f32 %v2652_v60, %v10991_v16  ;;  %v2653_v18 = vmul.f32 0.6666667, %v2575_v4  ;;  %v2855_v39 = vpack.c.bf16 %v11105_v49, %v11116_v55  ;;  %v2684_v63 = vadd.f32 %v14913_v27, %v14912_v40  ;;  %14915 = vst [vmem:[#allocation50_spill] sm:$0xff] %v11144_v38 }
 0x8c7   : > { %14903 = vst [vmem:[#allocation45_spill] sm:$0xff] %v11113_v25  ;;  %v2666_v62 = vadd.f32 %v2650_v0, %v10995_v44  ;;  %v2651_v5 = vmul.f32 0.6666667, %v2567_v21  ;;  %v2854_v22 = vpack.c.bf16 %v11113_v25, %v11111_v34  ;;  %8220 = vmatpush3.bf16.msra.mxu1 %v11108_v2 }
 0x8c8   : > { %v2669_v45 = vadd.f32 %v2653_v18, %v10999_v46  ;;  %8221 = vmatprep.subr.bf16.mxu1 %v11126_v59  ;;  %v2700_v44 = vmul.f32 0.01, %v2668_v56 }
 0x8c9   : > { %v2698_v6 = vmul.f32 0.01, %v2666_v62  ;;  %v2667_v16 = vadd.f32 %v2651_v5, %v11004_v14  ;;  %v8151_v19 = vpop.f32.mrb[76].mxu0  ;;  %8173 = vmatprep.mubr.bf16.mxu1 %v2854_v22  ;;  %v11162_v62 = vld [vmem:[#allocation6 + $0x20] sm:$0xff]  }
 0x8ca   : > { %v2701_v11 = vmul.f32 0.01, %v2669_v45  ;;  %v2588_v7 = vadd.f32 %v11056_v15, %v8151_v19  ;;  %v2579_v46 = vpop.f32.mrb[77].mxu0  ;;  %8174 = vmatmul.mubr.bf16.gmra.mrb[68].mxu1 %v2855_v39  ;;  %v11152_v1 = vadd.f32 %v2700_v44, %v2684_v63  ;;  %14919 = vst [vmem:[#allocation71_spill] sm:$0xff] %v11162_v62  ;;  %v14920_v22 = vld [vmem:[#allocation80_spill] sm:$0xff] }
 0x8cb   : > { %v2699_v10 = vmul.f32 0.01, %v2667_v16  ;;  %v2580_v14 = vadd.f32 %v11056_v15, %v2579_v46  ;;  %v8152_v23 = vpop.f32.mrb[78].mxu0  ;;  %8222 = vmatpush3.bf16.msra.mxu1 %v11126_v59  ;;  %v11147_v41 = vadd.f32 %v2698_v6, %v2682_v61  ;;  %v2689_v45 = vadd.f32 %v14920_v22, %v14876_v37  ;;  %v14921_v6 = vld [vmem:[#allocation82_spill] sm:$0xff]  ;;  %v14922_v16 = vld [vmem:[#allocation81_spill] sm:$0xff]  ;;  %v11195_v46 = vld [vmem:[#allocation6 + $0x38] sm:$0xff]  }
 0x8cc   : > { %v11141_v58 = vadd.f32 %v2701_v11, %v2685_v12  ;;  %v2656_v26 = vmul.f32 0.6666667, %v2588_v7  ;;  %v2591_v50 = vadd.f32 %v11056_v15, %v8152_v23  ;;  %v2582_v35 = vpop.f32.mrb[79].mxu0  ;;  %8223 = vmatprep.subr.bf16.mxu1 %v11144_v38  ;;  %14918 = vst [vmem:[#allocation38_spill] sm:$0xff] %v11152_v1  ;;  %v2687_v19 = vadd.f32 %v14922_v16, %v14878_v30  ;;  %v11177_v12 = vld [vmem:[#allocation6 + $0x28] sm:$0xff]   ;;  %v11191_v7 = vld [vmem:[#allocation6 + $0x30] sm:$0xff]  }
 0x8cd   : > { %14916 = vst [vmem:[#allocation63_spill] sm:$0xff] %v11147_v41  ;;  %v11149_v48 = vadd.f32 %v2699_v10, %v2683_v54  ;;  %v2654_v9 = vmul.f32 0.6666667, %v2580_v14  ;;  %v2583_v57 = vadd.f32 %v11056_v15, %v2582_v35  ;;  %14925 = vst [vmem:[#allocation57_spill] sm:$0xff] %v11177_v12 }
 0x8ce   : > { %14914 = vst [vmem:[#allocation69_spill] sm:$0xff] %v11141_v58  ;;  %v2672_v60 = vadd.f32 %v2656_v26, %v11021_v42  ;;  %v2657_v4 = vmul.f32 0.6666667, %v2591_v50  ;;  %v2857_v18 = vpack.c.bf16 %v11141_v58, %v11152_v1  ;;  %14929 = vst [vmem:[#allocation60_spill] sm:$0xff] %v11191_v7 }
 0x8cf   : > { %14917 = vst [vmem:[#allocation70_spill] sm:$0xff] %v11149_v48  ;;  %v2670_v47 = vadd.f32 %v2654_v9, %v11025_v31  ;;  %v2655_v0 = vmul.f32 0.6666667, %v2583_v57  ;;  %v2856_v21 = vpack.c.bf16 %v11149_v48, %v11147_v41  ;;  %8224 = vmatpush3.bf16.msra.mxu1 %v11144_v38  ;;  %14930 = vst [vmem:[#allocation59_spill] sm:$0xff] %v11195_v46 }
 0x8d0   : > { %v2673_v56 = vadd.f32 %v2657_v4, %v11029_v8  ;;  %8225 = vmatprep.subr.bf16.mxu1 %v11162_v62  ;;  %v2704_v31 = vmul.f32 0.01, %v2672_v60  ;;  %v2686_v8 = vadd.f32 %v14921_v6, %v14877_v28 }
 0x8d1   : > { %v2702_v5 = vmul.f32 0.01, %v2670_v47  ;;  %v2671_v42 = vadd.f32 %v2655_v0, %v11032_v33  ;;  %8177 = vmatprep.mubr.bf16.mxu1 %v2856_v21 }
 0x8d2   : > { %v2705_v39 = vmul.f32 0.01, %v2673_v56  ;;  %8178 = vmatmul.mubr.bf16.gmra.mrb[72].mxu1 %v2857_v18  ;;  %v11184_v28 = vadd.f32 %v2704_v31, %v2688_v20 }
 0x8d3   : > { %v2703_v44 = vmul.f32 0.01, %v2671_v42  ;;  %8226 = vmatpush3.bf16.msra.mxu1 %v11162_v62  ;;  %v11180_v37 = vadd.f32 %v2702_v5, %v2686_v8 }
 0x8d4   : > { %v11175_v33 = vadd.f32 %v2705_v39, %v2689_v45  ;;  %8227 = vmatprep.subr.bf16.mxu1 %v11177_v12  ;;  %14928 = vst [vmem:[#allocation35_spill] sm:$0xff] %v11184_v28 }
 0x8d5   : > { %14926 = vst [vmem:[#allocation41_spill] sm:$0xff] %v11180_v37  ;;  %v11182_v11 = vadd.f32 %v2703_v44, %v2687_v19 }
 0x8d6   : > { %14924 = vst [vmem:[#allocation46_spill] sm:$0xff] %v11175_v33  ;;  %v2859_v29 = vpack.c.bf16 %v11175_v33, %v11184_v28 }
 0x8d7   : > { %14927 = vst [vmem:[#allocation54_spill] sm:$0xff] %v11182_v11  ;;  %v2858_v30 = vpack.c.bf16 %v11182_v11, %v11180_v37  ;;  %8228 = vmatpush3.bf16.msra.mxu1 %v11177_v12 }
 0x8d8   : > { %8229 = vmatprep.subr.bf16.mxu1 %v11191_v7 }
 0x8d9   : > { %8181 = vmatprep.mubr.bf16.mxu1 %v2858_v30 }
 0x8da   : > { %8182 = vmatmul.mubr.bf16.gmra.mrb[76].mxu1 %v2859_v29 }
 0x8db   : > { %8230 = vmatpush3.bf16.msra.mxu1 %v11191_v7 }
 0x8dc   : > { %8231 = vmatprep.subr.bf16.mxu1 %v11195_v46 }
 0x8df   : > { %8232 = vmatpush3.bf16.msra.mxu1 %v11195_v46 }
 0x8e0   : > { %8281 = vmatprep.subr.bf16.mxu1 %v11050_v36 }
 0x995   : > { %v8171_v13 = vpop.f32.mrb[64].mxu1 }
 0x996   : > { %v11201_v52 = vadd.f32 %v11056_v15, %v8171_v13  ;;  %v2894_v61 = vpop.f32.mrb[65].mxu1 }
 0x997   : > { %v11204_v53 = vadd.f32 %v11056_v15, %v2894_v61  ;;  %v8172_v24 = vpop.f32.mrb[66].mxu1 }
 0x998   : > { %v2959_v54 = vmul.f32 0.01, %v11201_v52  ;;  %v11208_v10 = vadd.f32 %v11056_v15, %v8172_v24  ;;  %v2897_v14 = vpop.f32.mrb[67].mxu1 }
 0x999   : > { %v2957_v23 = vmul.f32 0.01, %v11204_v53  ;;  %v11212_v40 = vadd.f32 %v11056_v15, %v2897_v14 }
 0x99a   : > { %v2960_v27 = vmul.f32 0.01, %v11208_v10  ;;  %v2975_v26 = vadd.f32 %v2959_v54, %v11084_v17 }
 0x99b   : > { %v2958_v63 = vmul.f32 0.01, %v11212_v40  ;;  %v2973_v9 = vadd.f32 %v2957_v23, %v11079_v32 }
 0x99c   : > { %v2976_v50 = vadd.f32 %v2960_v27, %v11076_v3 }
 0x99d   : > { %v8175_v35 = vpop.f32.mrb[68].mxu1  ;;  %v2974_v57 = vadd.f32 %v2958_v63, %v11081_v51 }
 0x99e   : > { %v2990_v60 = vpack.c.bf16 %v2976_v50, %v2975_v26  ;;  %v11221_v4 = vadd.f32 %v11056_v15, %v8175_v35  ;;  %v2910_v47 = vpop.f32.mrb[69].mxu1 }
 0x99f   : > { %v11224_v0 = vadd.f32 %v11056_v15, %v2910_v47  ;;  %v8176_v21 = vpop.f32.mrb[70].mxu1  ;;  %v2989_v56 = vpack.c.bf16 %v2974_v57, %v2973_v9 }
 0x9a0   : > { %14931 = vst [vmem:[#allocation42_spill] sm:$0xff] %v11221_v4  ;;  %v2963_v18 = vmul.f32 0.01, %v11221_v4  ;;  %v11228_v5 = vadd.f32 %v11056_v15, %v8176_v21  ;;  %v2913_v42 = vpop.f32.mrb[71].mxu1 }
 0x9a1   : > { %14932 = vst [vmem:[#allocation34_spill] sm:$0xff] %v11224_v0  ;;  %v2961_v31 = vmul.f32 0.01, %v11224_v0  ;;  %v11232_v22 = vadd.f32 %v11056_v15, %v2913_v42  ;;  %8201 = vmatprep.mubr.bf16.mxu0 %v2989_v56 }
 0x9a2   : > { %14933 = vst [vmem:[#allocation74_spill] sm:$0xff] %v11228_v5  ;;  %v2964_v45 = vmul.f32 0.01, %v11228_v5  ;;  %8202 = vmatmul.mubr.bf16.vlgmr.msra.gmra.mrb[80].mxu0 %v2990_v60  ;;  %v2979_v6 = vadd.f32 %v2963_v18, %v11116_v55 }
 0x9a3   : > { %14934 = vst [vmem:[#allocation32_spill] sm:$0xff] %v11232_v22  ;;  %v2962_v39 = vmul.f32 0.01, %v11232_v22  ;;  %8250 = vmatpush3.bf16.msra.mxu0 %v11050_v36  ;;  %v2977_v19 = vadd.f32 %v2961_v31, %v11111_v34 }
 0x9a4   : > { %v2980_v8 = vadd.f32 %v2964_v45, %v11105_v49  ;;  %8251 = vmatprep.subr.bf16.mxu0 %v11108_v2 }
 0x9a5   : > { %v8179_v16 = vpop.f32.mrb[72].mxu1  ;;  %v2978_v44 = vadd.f32 %v2962_v39, %v11113_v25 }
 0x9a6   : > { %v11243_v43 = vadd.f32 %v11056_v15, %v8179_v16  ;;  %v2926_v20 = vpop.f32.mrb[73].mxu1  ;;  %v2992_v30 = vpack.c.bf16 %v2980_v8, %v2979_v6 }
 0x9a7   : > { %v11246_v29 = vadd.f32 %v11056_v15, %v2926_v20  ;;  %v8180_v13 = vpop.f32.mrb[74].mxu1  ;;  %v2991_v61 = vpack.c.bf16 %v2978_v44, %v2977_v19  ;;  %8252 = vmatpush3.bf16.msra.mxu0 %v11108_v2 }
 0x9a8   : > { %14935 = vst [vmem:[#allocation65_spill] sm:$0xff] %v11243_v43  ;;  %v2967_v24 = vmul.f32 0.01, %v11243_v43  ;;  %v11251_v54 = vadd.f32 %v11056_v15, %v8180_v13  ;;  %v2929_v14 = vpop.f32.mrb[75].mxu1  ;;  %8253 = vmatprep.subr.bf16.mxu0 %v11126_v59 }
 0x9a9   : > { %14936 = vst [vmem:[#allocation72_spill] sm:$0xff] %v11246_v29  ;;  %v2965_v23 = vmul.f32 0.01, %v11246_v29  ;;  %v11256_v27 = vadd.f32 %v11056_v15, %v2929_v14  ;;  %8205 = vmatprep.mubr.bf16.mxu0 %v2991_v61 }
 0x9aa   : > { %14937 = vst [vmem:[#allocation67_spill] sm:$0xff] %v11251_v54  ;;  %v2968_v63 = vmul.f32 0.01, %v11251_v54  ;;  %8206 = vmatmul.mubr.bf16.gmra.mrb[84].mxu0 %v2992_v30  ;;  %v2983_v50 = vadd.f32 %v2967_v24, %v11152_v1 }
 0x9ab   : > { %14938 = vst [vmem:[#allocation51_spill] sm:$0xff] %v11256_v27  ;;  %v2966_v26 = vmul.f32 0.01, %v11256_v27  ;;  %8254 = vmatpush3.bf16.msra.mxu0 %v11126_v59  ;;  %v2981_v57 = vadd.f32 %v2965_v23, %v11147_v41  ;;  %v7402_v23 = vld [vmem:[%s9404_s10 + $0xc8] sm:$0xff]  }
 0x9ac   : > { %v2984_v35 = vadd.f32 %v2968_v63, %v11141_v58  ;;  %8255 = vmatprep.subr.bf16.mxu0 %v11144_v38  ;;  %v7401_v63 = vld [vmem:[%s9404_s10 + $0xc0] sm:$0xff]  }
 0x9ad   : > { %v8183_v9 = vpop.f32.mrb[76].mxu1  ;;  %v2982_v60 = vadd.f32 %v2966_v26, %v11149_v48  ;;  %v7041_v26 = vunpack.c.l.bf16 %v7402_v23 }
 0x9ae   : > { %v11267_v47 = vadd.f32 %v11056_v15, %v8183_v9  ;;  %v2942_v21 = vpop.f32.mrb[77].mxu1  ;;  %v2994_v56 = vpack.c.bf16 %v2984_v35, %v2983_v50  ;;  %v7410_v50 = vld [vmem:[%s9410_s18 + $0xc8] sm:$0xff]   ;;  %v7042_v35 = vunpack.c.h.bf16 %v7402_v23  ;;  %v7037_v9 = vunpack.c.l.bf16 %v7401_v63 }
 0x9af   : > { %v11270_v18 = vadd.f32 %v11056_v15, %v2942_v21  ;;  %v8184_v42 = vpop.f32.mrb[78].mxu1  ;;  %v2993_v31 = vpack.c.bf16 %v2982_v60, %v2981_v57  ;;  %8256 = vmatpush3.bf16.msra.mxu0 %v11144_v38  ;;  %v7409_v57 = vld [vmem:[%s9410_s18 + $0xc0] sm:$0xff]   ;;  %v7404_v60 = vld [vmem:[%s9404_s10 + $0xd8] sm:$0xff]   ;;  %v7038_v21 = vunpack.c.h.bf16 %v7401_v63 }
 0x9b0   : > { %14939 = vst [vmem:[#allocation68_spill] sm:$0xff] %v11267_v47  ;;  %v2971_v45 = vmul.f32 0.01, %v11267_v47  ;;  %v11275_v39 = vadd.f32 %v11056_v15, %v8184_v42  ;;  %v2945_v6 = vpop.f32.mrb[79].mxu1  ;;  %8257 = vmatprep.subr.bf16.mxu0 %v11162_v62  ;;  %v11302_v42 = vmul.f32 0.1, %v7041_v26  ;;  %v7070_v23 = vunpack.c.h.bf16 %v7409_v57 }
 0x9b1   : > { %14940 = vst [vmem:[#allocation55_spill] sm:$0xff] %v11270_v18  ;;  %v2969_v8 = vmul.f32 0.01, %v11270_v18  ;;  %v11280_v16 = vadd.f32 %v11056_v15, %v2945_v6  ;;  %8209 = vmatprep.mubr.bf16.mxu0 %v2993_v31  ;;  %v7073_v31 = vunpack.c.l.bf16 %v7410_v50  ;;  %v7049_v6 = vunpack.c.l.bf16 %v7404_v60  ;;  %v7413_v38 = vld [vmem:[%s9410_s18 + $0xe0] sm:$0xff]   ;;  %v7416_v18 = vld [vmem:[%s9410_s18 + $0xf8] sm:$0xff]  }
 0x9b2   : > { %14941 = vst [vmem:[#allocation52_spill] sm:$0xff] %v11275_v39  ;;  %v2972_v19 = vmul.f32 0.01, %v11275_v39  ;;  %8210 = vmatmul.mubr.bf16.gmra.mrb[88].mxu0 %v2994_v56  ;;  %v2987_v20 = vadd.f32 %v2971_v45, %v11184_v28  ;;  %v7403_v56 = vld [vmem:[%s9404_s10 + $0xd0] sm:$0xff]   ;;  %14943 = vst [vmem:[#allocation36_spill] sm:$0xff] %v11302_v42  ;;  %v7069_v45 = vunpack.c.l.bf16 %v7409_v57  ;;  %v7405_v57 = vld [vmem:[%s9404_s10 + $0xe0] sm:$0xff]   ;;  %v7086_v27 = vunpack.c.h.bf16 %v7413_v38 }
 0x9b3   : > { %14942 = vst [vmem:[#allocation78_spill] sm:$0xff] %v11280_v16  ;;  %v2970_v44 = vmul.f32 0.01, %v11280_v16  ;;  %8258 = vmatpush3.bf16.msra.mxu0 %v11162_v62  ;;  %v2985_v13 = vadd.f32 %v2969_v8, %v11180_v37  ;;  %v11304_v8 = vmul.f32 0.1, %v7042_v35  ;;  %v7046_v63 = vunpack.c.h.bf16 %v7403_v56  ;;  %v7408_v37 = vld [vmem:[%s9404_s10 + $0xf8] sm:$0xff]  }
 0x9b4   : > { %v2988_v30 = vadd.f32 %v2972_v19, %v11175_v33  ;;  %8259 = vmatprep.subr.bf16.mxu0 %v11177_v12  ;;  %v11306_v19 = vmul.f32 0.1, %v7037_v9  ;;  %v11315_v26 = vmul.f32 0.028867513, %v7073_v31  ;;  %v11317_v35 = vmul.f32 0.028867513, %v7069_v45 }
 0x9b5   : > { %v2986_v61 = vadd.f32 %v2970_v44, %v11182_v11  ;;  %14944 = vst [vmem:[#allocation75_spill] sm:$0xff] %v11304_v8  ;;  %v7045_v44 = vunpack.c.l.bf16 %v7403_v56  ;;  %v11319_v9 = vmul.f32 0.1, %v7049_v6  ;;  %v7406_v56 = vld [vmem:[%s9404_s10 + $0xe8] sm:$0xff]   ;;  %v7053_v28 = vunpack.c.l.bf16 %v7405_v57 }
 0x9b6   : > { %v2996_v24 = vpack.c.bf16 %v2988_v30, %v2987_v20  ;;  %14945 = vst [vmem:[#allocation37_spill] sm:$0xff] %v11306_v19  ;;  %v7412_v20 = vld [vmem:[%s9410_s18 + $0xd8] sm:$0xff]   ;;  %v7074_v30 = vunpack.c.h.bf16 %v7410_v50  ;;  %v11322_v50 = vmul.f32 0.5, %v11304_v8  ;;  %v11336_v8 = vmul.f32 0.1, %v7046_v63 }
 0x9b7   : > { %v2995_v14 = vpack.c.bf16 %v2986_v61, %v2985_v13  ;;  %8260 = vmatpush3.bf16.msra.mxu0 %v11177_v12  ;;  %v11309_v13 = vmul.f32 0.1, %v7038_v21  ;;  %v7411_v61 = vld [vmem:[%s9410_s18 + $0xd0] sm:$0xff]   ;;  %14947 = vst [vmem:[#allocation39_spill] sm:$0xff] %v11319_v9  ;;  %v11325_v21 = vmul.f32 0.5, %v11306_v19  ;;  %v7058_v16 = vunpack.c.h.bf16 %v7406_v56 }
 0x9b8   : > { %8261 = vmatprep.subr.bf16.mxu0 %v11191_v7  ;;  %v2823_v31 = vmul.f32 0.028867513, %v7074_v30  ;;  %v2821_v12 = vmul.f32 0.028867513, %v7070_v23  ;;  %14950 = vst [vmem:[#allocation56_spill] sm:$0xff] %v11336_v8  ;;  %v7078_v11 = vunpack.c.h.bf16 %v7411_v61  ;;  %v7407_v19 = vld [vmem:[%s9404_s10 + $0xf0] sm:$0xff]   ;;  %v7057_v30 = vunpack.c.l.bf16 %v7406_v56 }
 0x9b9   : > { %8213 = vmatprep.mubr.bf16.mxu0 %v2995_v14  ;;  %14946 = vst [vmem:[#allocation53_spill] sm:$0xff] %v11309_v13  ;;  %v11313_v14 = vmul.f32 0.5, %v11302_v42  ;;  %v7077_v42 = vunpack.c.l.bf16 %v7411_v61  ;;  %v11332_v45 = vmul.f32 0.5, %v11309_v13  ;;  %v7061_v61 = vunpack.c.l.bf16 %v7407_v19 }
 0x9ba   : > { %8214 = vmatmul.mubr.bf16.gmra.mrb[92].mxu0 %v2996_v24  ;;  %v7050_v24 = vunpack.c.h.bf16 %v7404_v60  ;;  %v11327_v60 = vmul.f32 0.1, %v7045_v44  ;;  %v2777_v44 = vmul.f32 0.5, %v11319_v9  ;;  %v7065_v59 = vunpack.c.l.bf16 %v7408_v37 }
 0x9bb   : > { %8262 = vmatpush3.bf16.msra.mxu0 %v11191_v7  ;;  %v7082_v7 = vunpack.c.h.bf16 %v7412_v20  ;;  %v2824_v62 = vmul.f32 0.028867513, %v7077_v42  ;;  %v2776_v2 = vmul.f32 0.5, %v11336_v8  ;;  %v2825_v9 = vmul.f32 0.028867513, %v7078_v11 }
 0x9bc   : > { %8263 = vmatprep.subr.bf16.mxu0 %v11195_v46  ;;  %14948 = vst [vmem:[#allocation76_spill] sm:$0xff] %v11327_v60  ;;  %v11334_v6 = vmul.f32 0.1, %v7050_v24  ;;  %v2775_v13 = vmul.f32 0.5, %v11327_v60  ;;  %v7054_v24 = vunpack.c.h.bf16 %v7405_v57  ;;  %v7066_v39 = vunpack.c.h.bf16 %v7408_v37 }
 0x9bd   : > { %v2827_v63 = vmul.f32 0.028867513, %v7082_v7  ;;  %v11348_v47 = vmul.f32 0.1, %v7053_v28  ;;  %v7085_v60 = vunpack.c.l.bf16 %v7413_v38  ;;  %v11350_v42 = vmul.f32 0.1, %v7057_v30 }
 0x9be   : > { %14949 = vst [vmem:[#allocation44_spill] sm:$0xff] %v11334_v6  ;;  %v2778_v23 = vmul.f32 0.5, %v11334_v6  ;;  %v11352_v56 = vmul.f32 0.1, %v7054_v24  ;;  %v11354_v6 = vmul.f32 0.1, %v7058_v16  ;;  %v7098_v30 = vunpack.c.h.bf16 %v7416_v18 }
 0x9bf   : > { %8264 = vmatpush3.bf16.msra.mxu0 %v11195_v46  ;;  %v7081_v46 = vunpack.c.l.bf16 %v7412_v20  ;;  %v7414_v20 = vld [vmem:[%s9410_s18 + $0xe8] sm:$0xff]   ;;  %14951 = vst [vmem:[#allocation49_spill] sm:$0xff] %v11348_v47  ;;  %14952 = vst [vmem:[#allocation58_spill] sm:$0xff] %v11350_v42  ;;  %v11356_v54 = vmul.f32 0.1, %v7061_v61  ;;  %v2779_v29 = vmul.f32 0.5, %v11348_v47 }
 0x9c0   : > { %8313 = vmatprep.subr.bf16.mxu0 %v11050_v36  ;;  %v7415_v36 = vld [vmem:[%s9410_s18 + $0xf0] sm:$0xff]   ;;  %v7089_v57 = vunpack.c.l.bf16 %v7414_v20  ;;  %14953 = vst [vmem:[#allocation33_spill] sm:$0xff] %v11352_v56  ;;  %14954 = vst [vmem:[#allocation77_spill] sm:$0xff] %v11354_v6  ;;  %v7090_v7 = vunpack.c.h.bf16 %v7414_v20  ;;  %v11358_v11 = vmul.f32 0.1, %v7065_v59  ;;  %v2781_v38 = vmul.f32 0.5, %v11350_v42 }
 0x9c1   : > { %v2826_v33 = vmul.f32 0.028867513, %v7081_v46  ;;  %v7062_v46 = vunpack.c.h.bf16 %v7407_v19  ;;  %14955 = vst [vmem:[#allocation80_spill] sm:$0xff] %v11356_v54  ;;  %v7093_v8 = vunpack.c.l.bf16 %v7415_v36  ;;  %v7097_v19 = vunpack.c.l.bf16 %v7416_v18 }
 0x9c2   : > { %14956 = vst [vmem:[#allocation82_spill] sm:$0xff] %v11358_v11  ;;  %v7094_v28 = vunpack.c.h.bf16 %v7415_v36  ;;  %v11362_v15 = vmul.f32 0.1, %v7066_v39  ;;  %v2828_v24 = vmul.f32 0.028867513, %v7085_v60  ;;  %v2780_v20 = vmul.f32 0.5, %v11352_v56 }
 0x9c3   : > { %v11360_v37 = vmul.f32 0.1, %v7062_v46  ;;  %v2830_v16 = vmul.f32 0.028867513, %v7089_v57  ;;  %v2829_v61 = vmul.f32 0.028867513, %v7086_v27  ;;  %v2838_v57 = vadd.f32 %v11315_v26, %v11313_v14 }
 0x9c4   : > { %14958 = vst [vmem:[#allocation79_spill] sm:$0xff] %v11362_v15  ;;  %v2782_v43 = vmul.f32 0.5, %v11354_v6  ;;  %v2831_v59 = vmul.f32 0.028867513, %v7090_v7  ;;  %v2783_v48 = vmul.f32 0.5, %v11356_v54  ;;  %v2785_v36 = vmul.f32 0.5, %v11358_v11 }
 0x9c5   : > { %14957 = vst [vmem:[#allocation81_spill] sm:$0xff] %v11360_v37  ;;  %v2832_v46 = vmul.f32 0.028867513, %v7093_v8  ;;  %v2834_v39 = vmul.f32 0.028867513, %v7097_v19  ;;  %v2784_v18 = vmul.f32 0.5, %v11360_v37  ;;  %v2839_v27 = vadd.f32 %v2823_v31, %v11322_v50 }
 0x9c6   : > { %v2833_v22 = vmul.f32 0.028867513, %v7094_v28  ;;  %v2786_v60 = vmul.f32 0.5, %v11362_v15  ;;  %v2835_v47 = vmul.f32 0.028867513, %v7098_v30  ;;  %v2836_v7 = vadd.f32 %v11317_v35, %v11325_v21 }
 0x9c7   : > { %v2837_v54 = vadd.f32 %v2821_v12, %v11332_v45  ;;  %v2840_v8 = vadd.f32 %v2824_v62, %v2775_v13  ;;  %v2841_v42 = vadd.f32 %v2825_v9, %v2776_v2  ;;  %v2842_v11 = vadd.f32 %v2826_v33, %v2777_v44 }
 0x9c8   : > { %v2843_v19 = vadd.f32 %v2827_v63, %v2778_v23  ;;  %v2844_v56 = vadd.f32 %v2828_v24, %v2779_v29  ;;  %v2845_v37 = vadd.f32 %v2829_v61, %v2780_v20  ;;  %v2846_v28 = vadd.f32 %v2830_v16, %v2781_v38  ;;  %v14959_v20 = vld [vmem:[#allocation42_spill] sm:$0xff] }
 0x9c9   : > { %v2847_v6 = vadd.f32 %v2831_v59, %v2782_v43  ;;  %v2848_v15 = vadd.f32 %v2832_v46, %v2783_v48  ;;  %v2849_v30 = vadd.f32 %v2833_v22, %v2784_v18  ;;  %v2850_v5 = vadd.f32 %v2834_v39, %v2785_v36  ;;  %v14960_v46 = vld [vmem:[#allocation34_spill] sm:$0xff]  ;;  %v14962_v18 = vld [vmem:[#allocation32_spill] sm:$0xff] }
 0x9ca   : > { %v2851_v0 = vadd.f32 %v2835_v47, %v2786_v60  ;;  %v3096_v14 = vmul.f32 1.5, %v2838_v57  ;;  %v3097_v26 = vmul.f32 1.5, %v2839_v27  ;;  %v3094_v50 = vmul.f32 1.5, %v2836_v7  ;;  %v14963_v27 = vld [vmem:[#allocation70_spill] sm:$0xff] }
 0x9cb   : > { %v3095_v31 = vmul.f32 1.5, %v2837_v54  ;;  %v3098_v4 = vmul.f32 1.5, %v2840_v8  ;;  %v3099_v35 = vmul.f32 1.5, %v2841_v42  ;;  %v3100_v21 = vmul.f32 1.5, %v2842_v11  ;;  %v14964_v8 = vld [vmem:[#allocation65_spill] sm:$0xff] }
 0x9cc   : > { %v3101_v12 = vmul.f32 1.5, %v2843_v19  ;;  %v3102_v62 = vmul.f32 1.5, %v2844_v56  ;;  %v3103_v2 = vmul.f32 1.5, %v2845_v37  ;;  %v3104_v33 = vmul.f32 1.5, %v2846_v28 }
 0x9cd   : > { %v3105_v13 = vmul.f32 1.5, %v2847_v6  ;;  %v11378_v29 = vmul.f32 1.5, %v2848_v15  ;;  %v11380_v9 = vmul.f32 1.5, %v2849_v30  ;;  %v11382_v48 = vmul.f32 1.5, %v2850_v5  ;;  %v14965_v30 = vld [vmem:[#allocation72_spill] sm:$0xff] }
 0x9ce   : > { %v11384_v22 = vmul.f32 1.5, %v2851_v0  ;;  %v11387_v43 = vadd.f32 %v3096_v14, %v11084_v17  ;;  %v11390_v54 = vadd.f32 %v3097_v26, %v11076_v3  ;;  %v11393_v47 = vadd.f32 %v3094_v50, %v11079_v32  ;;  %v14966_v26 = vld [vmem:[#allocation62_spill] sm:$0xff] }
 0x9cf   : > { %v11396_v45 = vadd.f32 %v3095_v31, %v11081_v51  ;;  %v11399_v15 = vadd.f32 %v3098_v4, %v11111_v34  ;;  %v11402_v5 = vadd.f32 %v3099_v35, %v11113_v25  ;;  %v11405_v0 = vadd.f32 %v3100_v21, %v11116_v55  ;;  %v14967_v21 = vld [vmem:[#allocation67_spill] sm:$0xff] }
 0x9d0   : > { %v11408_v6 = vadd.f32 %v3101_v12, %v11105_v49  ;;  %v3128_v44 = vmul.f32 0.25, %v11201_v52  ;;  %v11412_v23 = vadd.f32 %v3102_v62, %v11147_v41  ;;  %v11415_v63 = vadd.f32 %v3104_v33, %v11152_v1  ;;  %v14969_v49 = vld [vmem:[#allocation68_spill] sm:$0xff] }
 0x9d1   : > { %v11418_v4 = vadd.f32 %v3105_v13, %v11141_v58  ;;  %v3313_v42 = vmul.f32 0.16666667, %v11201_v52  ;;  %v3126_v56 = vmul.f32 0.25, %v11204_v53  ;;  %v3311_v11 = vmul.f32 0.16666667, %v11204_v53  ;;  %v14961_v53 = vld [vmem:[#allocation74_spill] sm:$0xff] }
 0x9d2   : > { %v3129_v37 = vmul.f32 0.25, %v11208_v10  ;;  %v3314_v24 = vmul.f32 0.16666667, %v11208_v10  ;;  %v3127_v38 = vmul.f32 0.25, %v11212_v40  ;;  %v3312_v16 = vmul.f32 0.16666667, %v11212_v40 }
 0x9d3   : > { %v11428_v61 = vmul.f32 0.25, %v14959_v20  ;;  %v11431_v59 = vmul.f32 0.16666667, %v14959_v20  ;;  %v11434_v52 = vmul.f32 0.25, %v14960_v46  ;;  %v11437_v36 = vmul.f32 0.16666667, %v14960_v46 }
 0x9d4   : > { %v11440_v39 = vmul.f32 0.25, %v14961_v53  ;;  %v11443_v10 = vmul.f32 0.16666667, %v14961_v53  ;;  %v11446_v40 = vmul.f32 0.25, %v14962_v18  ;;  %v11449_v60 = vmul.f32 0.16666667, %v14962_v18 }
 0x9d5   : > { %v11452_v7 = vadd.f32 %v3103_v2, %v14963_v27  ;;  %v11455_v19 = vmul.f32 0.25, %v14964_v8  ;;  %v11458_v28 = vmul.f32 0.16666667, %v14964_v8  ;;  %v11461_v14 = vmul.f32 0.25, %v14965_v30  ;;  %v14968_v13 = vld [vmem:[#allocation51_spill] sm:$0xff] }
 0x9d6   : > { %v11465_v35 = vmul.f32 0.16666667, %v14965_v30  ;;  %v11468_v12 = vmul.f32 0.25, %v14967_v21  ;;  %v11471_v62 = vmul.f32 0.16666667, %v14967_v21  ;;  %v11475_v20 = vmul.f32 0.25, %v14968_v13 }
 0x9d7   : > { %v11479_v8 = vmul.f32 0.16666667, %v14968_v13 }
 0xa75   : > { %v8203_v57 = vpop.f32.mrb[80].mxu0 }
 0xa76   : > { %v3040_v50 = vadd.f32 %v14966_v26, %v8203_v57  ;;  %v3031_v31 = vpop.f32.mrb[81].mxu0 }
 0xa77   : > { %v3032_v2 = vadd.f32 %v14966_v26, %v3031_v31  ;;  %v8204_v33 = vpop.f32.mrb[82].mxu0 }
 0xa78   : > { %v3144_v46 = vmul.f32 0.25, %v3040_v50  ;;  %v3329_v53 = vmul.f32 0.16666667, %v3040_v50  ;;  %v3043_v18 = vadd.f32 %v14966_v26, %v8204_v33  ;;  %v3034_v57 = vpop.f32.mrb[83].mxu0  ;;  %v11487_v33 = vmul.f32 0.25, %v14969_v49 }
 0xa79   : > { %v3142_v30 = vmul.f32 0.25, %v3032_v2  ;;  %v3327_v1 = vmul.f32 0.16666667, %v3032_v2  ;;  %v3035_v27 = vadd.f32 %v14966_v26, %v3034_v57  ;;  %v11492_v2 = vmul.f32 0.16666667, %v14969_v49 }
 0xa7a   : > { %v3160_v21 = vadd.f32 %v3144_v46, %v3128_v44  ;;  %v11482_v41 = vadd.f32 %v3329_v53, %v3313_v42  ;;  %v3145_v31 = vmul.f32 0.25, %v3043_v18  ;;  %v3330_v58 = vmul.f32 0.16666667, %v3043_v18 }
 0xa7b   : > { %v3158_v55 = vadd.f32 %v3142_v30, %v3126_v56  ;;  %v11484_v25 = vadd.f32 %v3327_v1, %v3311_v11  ;;  %v3143_v34 = vmul.f32 0.25, %v3035_v27  ;;  %v3328_v50 = vmul.f32 0.16666667, %v3035_v27  ;;  %v14970_v56 = vld [vmem:[#allocation55_spill] sm:$0xff] }
 0xa7c   : > { %v3176_v17 = vmul.f32 0.01, %v3160_v21  ;;  %v3161_v13 = vadd.f32 %v3145_v31, %v3129_v37  ;;  %v11489_v51 = vadd.f32 %v3330_v58, %v3314_v24  ;;  %v11497_v1 = vmul.f32 0.25, %v14970_v56 }
 0xa7d   : > { %v3174_v44 = vmul.f32 0.01, %v3158_v55  ;;  %v3159_v42 = vadd.f32 %v3143_v34, %v3127_v38  ;;  %v11494_v46 = vadd.f32 %v3328_v50, %v3312_v16  ;;  %v8207_v53 = vpop.f32.mrb[84].mxu0  ;;  %v11500_v11 = vmul.f32 0.16666667, %v14970_v56 }
 0xa7e   : > { %v3177_v27 = vmul.f32 0.01, %v3161_v13  ;;  %v3056_v18 = vadd.f32 %v14966_v26, %v8207_v53  ;;  %v3047_v37 = vpop.f32.mrb[85].mxu0  ;;  %v3192_v58 = vadd.f32 %v3176_v17, %v11387_v43 }
 0xa7f   : > { %v3175_v24 = vmul.f32 0.01, %v3159_v42  ;;  %v3048_v49 = vadd.f32 %v14966_v26, %v3047_v37  ;;  %v8208_v55 = vpop.f32.mrb[86].mxu0  ;;  %v3190_v34 = vadd.f32 %v3174_v44, %v11393_v47 }
 0xa80   : > { %v3193_v38 = vadd.f32 %v3177_v27, %v11390_v54  ;;  %v3148_v16 = vmul.f32 0.25, %v3056_v18  ;;  %v3333_v57 = vmul.f32 0.16666667, %v3056_v18  ;;  %v3059_v30 = vadd.f32 %v14966_v26, %v8208_v55  ;;  %v3050_v21 = vpop.f32.mrb[87].mxu0 }
 0xa81   : > { %v3146_v31 = vmul.f32 0.25, %v3048_v49  ;;  %v3331_v50 = vmul.f32 0.16666667, %v3048_v49  ;;  %v3051_v13 = vadd.f32 %v14966_v26, %v3050_v21  ;;  %v3191_v53 = vadd.f32 %v3175_v24, %v11396_v45  ;;  %v14971_v45 = vld [vmem:[#allocation52_spill] sm:$0xff] }
 0xa82   : > { %v3207_v17 = vpack.c.bf16 %v3193_v38, %v3192_v58  ;;  %v3164_v43 = vadd.f32 %v3148_v16, %v11428_v61  ;;  %v11512_v42 = vadd.f32 %v3333_v57, %v11431_v59  ;;  %v3149_v47 = vmul.f32 0.25, %v3059_v30 }
 0xa83   : > { %v3162_v54 = vadd.f32 %v3146_v31, %v11434_v52  ;;  %v11516_v44 = vadd.f32 %v3331_v50, %v11437_v36  ;;  %v3334_v56 = vmul.f32 0.16666667, %v3059_v30  ;;  %v3147_v27 = vmul.f32 0.25, %v3051_v13 }
 0xa84   : > { %v3180_v18 = vmul.f32 0.01, %v3164_v43  ;;  %v3165_v37 = vadd.f32 %v3149_v47, %v11440_v39  ;;  %v3332_v49 = vmul.f32 0.16666667, %v3051_v13  ;;  %v3206_v55 = vpack.c.bf16 %v3191_v53, %v3190_v34  ;;  %v14972_v43 = vld [vmem:[#allocation61_spill] sm:$0xff] }
 0xa85   : > { %v11520_v58 = vmul.f32 0.25, %v14971_v45  ;;  %v3178_v61 = vmul.f32 0.01, %v3162_v54  ;;  %v11523_v59 = vadd.f32 %v3334_v56, %v11443_v10  ;;  %v3163_v24 = vadd.f32 %v3147_v27, %v11446_v40  ;;  %v8211_v52 = vpop.f32.mrb[88].mxu0  ;;  %v14973_v27 = vld [vmem:[#allocation73_spill] sm:$0xff] }
 0xa86   : > { %v11527_v36 = vmul.f32 0.16666667, %v14971_v45  ;;  %v3181_v38 = vmul.f32 0.01, %v3165_v37  ;;  %v11530_v16 = vadd.f32 %v3332_v49, %v11449_v60  ;;  %v3072_v39 = vadd.f32 %v14966_v26, %v8211_v52  ;;  %8233 = vmatprep.mubr.bf16.mxu1 %v3206_v55  ;;  %v3063_v34 = vpop.f32.mrb[89].mxu0 }
 0xa87   : > { %v3179_v57 = vmul.f32 0.01, %v3163_v24  ;;  %v3064_v30 = vadd.f32 %v14966_v26, %v3063_v34  ;;  %8234 = vmatmul.mubr.bf16.vlgmr.msra.gmra.mrb[80].mxu1 %v3207_v17  ;;  %v8212_v10 = vpop.f32.mrb[90].mxu0  ;;  %v3194_v21 = vadd.f32 %v3178_v61, %v11399_v15  ;;  %v3196_v40 = vadd.f32 %v3180_v18, %v11405_v0 }
 0xa88   : > { %v3152_v31 = vmul.f32 0.25, %v3072_v39  ;;  %v3337_v50 = vmul.f32 0.16666667, %v3072_v39  ;;  %v3075_v13 = vadd.f32 %v14966_v26, %v8212_v10  ;;  %v3066_v53 = vpop.f32.mrb[91].mxu0  ;;  %v3197_v60 = vadd.f32 %v3181_v38, %v11408_v6  ;;  %8282 = vmatpush3.bf16.msra.mxu1 %v14972_v43  ;;  %v14974_v38 = vld [vmem:[#allocation48_spill] sm:$0xff]  ;;  %v14975_v39 = vld [vmem:[#allocation78_spill] sm:$0xff] }
 0xa89   : > { %v3150_v47 = vmul.f32 0.25, %v3064_v30  ;;  %v3335_v54 = vmul.f32 0.16666667, %v3064_v30  ;;  %v3067_v56 = vadd.f32 %v14966_v26, %v3066_v53  ;;  %v3195_v17 = vadd.f32 %v3179_v57, %v11402_v5  ;;  %8283 = vmatprep.subr.bf16.mxu1 %v14973_v27 }
 0xa8a   : > { %v3168_v15 = vadd.f32 %v3152_v31, %v11455_v19  ;;  %v11544_v0 = vadd.f32 %v3337_v50, %v11458_v28  ;;  %v3153_v18 = vmul.f32 0.25, %v3075_v13  ;;  %v3338_v37 = vmul.f32 0.16666667, %v3075_v13 }
 0xa8b   : > { %v3166_v49 = vadd.f32 %v3150_v47, %v11461_v14  ;;  %v11548_v6 = vadd.f32 %v3335_v54, %v11465_v35  ;;  %v3151_v55 = vmul.f32 0.25, %v3067_v56  ;;  %v3336_v45 = vmul.f32 0.16666667, %v3067_v56 }
 0xa8c   : > { %v3184_v61 = vmul.f32 0.01, %v3168_v15  ;;  %v3169_v26 = vadd.f32 %v3153_v18, %v11468_v12  ;;  %v11552_v5 = vadd.f32 %v3338_v37, %v11471_v62  ;;  %v3208_v24 = vpack.c.bf16 %v3195_v17, %v3194_v21  ;;  %8284 = vmatpush3.bf16.msra.mxu1 %v14973_v27  ;;  %v11565_v62 = vld [vmem:[%s14622_s9] ss:$0 sm:$0xff]  ;;  %v14977_v27 = vld [vmem:[#allocation50_spill] sm:$0xff] }
 0xa8d   : > { %v3182_v19 = vmul.f32 0.01, %v3166_v49  ;;  %v3167_v28 = vadd.f32 %v3151_v55, %v11475_v20  ;;  %v11557_v52 = vadd.f32 %v3336_v45, %v11479_v8  ;;  %v8215_v14 = vpop.f32.mrb[92].mxu0  ;;  %v3209_v35 = vpack.c.bf16 %v3197_v60, %v3196_v40  ;;  %8285 = vmatprep.subr.bf16.mxu1 %v14974_v38  ;;  %14976 = vst [vmem:[#allocation42_spill] sm:$0xff] %v11565_v62 }
 0xa8e   : > { %v3139_v34 = vmul.f32 0.25, %v14975_v39  ;;  %v3324_v12 = vmul.f32 0.16666667, %v14975_v39  ;;  %v3185_v57 = vmul.f32 0.01, %v3169_v26  ;;  %v3088_v30 = vadd.f32 %v11565_v62, %v8215_v14  ;;  %8237 = vmatprep.mubr.bf16.mxu1 %v3208_v24  ;;  %v3079_v20 = vpop.f32.mrb[93].mxu0 }
 0xa8f   : > { %v3183_v8 = vmul.f32 0.01, %v3167_v28  ;;  %v3080_v10 = vadd.f32 %v11565_v62, %v3079_v20  ;;  %8238 = vmatmul.mubr.bf16.gmra.mrb[84].mxu1 %v3209_v35  ;;  %v8216_v21 = vpop.f32.mrb[94].mxu0  ;;  %v3198_v40 = vadd.f32 %v3182_v19, %v11412_v23  ;;  %v3200_v31 = vadd.f32 %v3184_v61, %v11415_v63  ;;  %v14979_v28 = vld [vmem:[#allocation35_spill] sm:$0xff]  ;;  %v14980_v35 = vld [vmem:[#allocation46_spill] sm:$0xff] }
 0xa90   : > { %v3156_v50 = vmul.f32 0.25, %v3088_v30  ;;  %v3341_v13 = vmul.f32 0.16666667, %v3088_v30  ;;  %v3091_v53 = vadd.f32 %v11565_v62, %v8216_v21  ;;  %v3082_v60 = vpop.f32.mrb[95].mxu0  ;;  %v3201_v43 = vadd.f32 %v3185_v57, %v11418_v4  ;;  %8286 = vmatpush3.bf16.msra.mxu1 %v14974_v38  ;;  %v14981_v38 = vld [vmem:[#allocation41_spill] sm:$0xff]  ;;  %v14982_v57 = vld [vmem:[#allocation54_spill] sm:$0xff] }
 0xa91   : > { %v3154_v47 = vmul.f32 0.25, %v3080_v10  ;;  %v3339_v54 = vmul.f32 0.16666667, %v3080_v10  ;;  %v3083_v56 = vadd.f32 %v11565_v62, %v3082_v60  ;;  %v3199_v17 = vadd.f32 %v3183_v8, %v11452_v7  ;;  %8287 = vmatprep.subr.bf16.mxu1 %v14977_v27  ;;  %v14983_v10 = vld [vmem:[#allocation57_spill] sm:$0xff] }
 0xa92   : > { %v3172_v23 = vadd.f32 %v3156_v50, %v11487_v33  ;;  %v11579_v63 = vadd.f32 %v3341_v13, %v11492_v2  ;;  %v3157_v15 = vmul.f32 0.25, %v3091_v53  ;;  %v3342_v18 = vmul.f32 0.16666667, %v3091_v53 }
 0xa93   : > { %v3170_v37 = vadd.f32 %v3154_v47, %v11497_v1  ;;  %v11583_v4 = vadd.f32 %v3339_v54, %v11500_v11  ;;  %v3155_v49 = vmul.f32 0.25, %v3083_v56  ;;  %v3340_v55 = vmul.f32 0.16666667, %v3083_v56  ;;  %v14978_v1 = vld [vmem:[#allocation71_spill] sm:$0xff] }
 0xa94   : > { %v3188_v45 = vmul.f32 0.01, %v3172_v23  ;;  %v3173_v61 = vadd.f32 %v3157_v15, %v11520_v58  ;;  %v11587_v7 = vadd.f32 %v3342_v18, %v11527_v36  ;;  %v3210_v26 = vpack.c.bf16 %v3199_v17, %v3198_v40  ;;  %8288 = vmatpush3.bf16.msra.mxu1 %v14977_v27 }
 0xa95   : > { %v3186_v33 = vmul.f32 0.01, %v3170_v37  ;;  %v3171_v2 = vadd.f32 %v3155_v49, %v3139_v34  ;;  %v11590_v24 = vadd.f32 %v3340_v55, %v3324_v12  ;;  %v3211_v19 = vpack.c.bf16 %v3201_v43, %v3200_v31  ;;  %8289 = vmatprep.subr.bf16.mxu1 %v14978_v1 }
 0xa96   : > { %v3189_v11 = vmul.f32 0.01, %v3173_v61  ;;  %8241 = vmatprep.mubr.bf16.mxu1 %v3210_v26  ;;  %v3124_v14 = vadd.f32 %v11382_v48, %v14979_v28  ;;  %v3125_v58 = vadd.f32 %v11384_v22, %v14980_v35  ;;  %v3122_v39 = vadd.f32 %v11378_v29, %v14981_v38  ;;  %v14984_v22 = vld [vmem:[#allocation60_spill] sm:$0xff]  ;;  %v14985_v29 = vld [vmem:[#allocation59_spill] sm:$0xff] }
 0xa97   : > { %v3187_v36 = vmul.f32 0.01, %v3171_v2  ;;  %8242 = vmatmul.mubr.bf16.gmra.mrb[88].mxu1 %v3211_v19  ;;  %v3123_v34 = vadd.f32 %v11380_v9, %v14982_v57  ;;  %v11608_v9 = vld [vmem:[#allocation6] sm:$0xff]   ;;  %v14987_v61 = vld [vmem:[#allocation75_spill] sm:$0xff] }
 0xa98   : > { %v3204_v12 = vadd.f32 %v3188_v45, %v3124_v14  ;;  %v3205_v30 = vadd.f32 %v3189_v11, %v3125_v58  ;;  %8290 = vmatpush3.bf16.msra.mxu1 %v14978_v1  ;;  %v3202_v20 = vadd.f32 %v3186_v33, %v3122_v39  ;;  %14986 = vst [vmem:[#allocation34_spill] sm:$0xff] %v11608_v9  ;;  %v14989_v11 = vld [vmem:[#allocation40_spill] sm:$0xff] }
 0xa99   : > { %v3203_v8 = vadd.f32 %v3187_v36, %v3123_v34  ;;  %8291 = vmatprep.subr.bf16.mxu1 %v14983_v10  ;;  %v3394_v26 = vadd.f32 %v14987_v61, %v11076_v3  ;;  %v14992_v39 = vld [vmem:[#allocation36_spill] sm:$0xff] }
 0xa9a   : > { %v3213_v48 = vpack.c.bf16 %v3205_v30, %v3204_v12 }
 0xa9b   : > { %v3212_v21 = vpack.c.bf16 %v3203_v8, %v3202_v20 }
 0xa9c   : > { %8292 = vmatpush3.bf16.msra.mxu1 %v14983_v10 }
 0xa9d   : > { %8245 = vmatprep.mubr.bf16.mxu1 %v3212_v21  ;;  %8293 = vmatprep.subr.bf16.mxu1 %v14984_v22 }
 0xa9f   : > { %8246 = vmatmul.mubr.bf16.gmra.mrb[92].mxu1 %v3213_v48 }
 0xaa0   : > { %8294 = vmatpush3.bf16.msra.mxu1 %v14984_v22 }
 0xaa1   : > { %8295 = vmatprep.subr.bf16.mxu1 %v14985_v29 }
 0xaa4   : > { %8296 = vmatpush3.bf16.msra.mxu1 %v14985_v29 }
 0xaa5   : > { %8345 = vmatprep.subr.bf16.mxu1 %v11608_v9 }
 0xb5a   : > { %v8235_v40 = vpop.f32.mrb[80].mxu1 }
 0xb5b   : > { %v3257_v31 = vadd.f32 %v11565_v62, %v8235_v40  ;;  %v3248_v50 = vpop.f32.mrb[81].mxu1 }
 0xb5c   : > { %v3249_v13 = vadd.f32 %v11565_v62, %v3248_v50  ;;  %v8236_v53 = vpop.f32.mrb[82].mxu1 }
 0xb5d   : > { %v3361_v60 = vmul.f32 0.6666667, %v3257_v31  ;;  %v3260_v43 = vadd.f32 %v11565_v62, %v8236_v53  ;;  %v3251_v47 = vpop.f32.mrb[83].mxu1 }
 0xb5e   : > { %v3359_v54 = vmul.f32 0.6666667, %v3249_v13  ;;  %v3252_v56 = vadd.f32 %v11565_v62, %v3251_v47 }
 0xb5f   : > { %v3377_v17 = vadd.f32 %v3361_v60, %v11482_v41  ;;  %v3362_v27 = vmul.f32 0.6666667, %v3260_v43  ;;  %v14988_v41 = vld [vmem:[#allocation37_spill] sm:$0xff] }
 0xb60   : > { %v3375_v23 = vadd.f32 %v3359_v54, %v11484_v25  ;;  %v3360_v15 = vmul.f32 0.6666667, %v3252_v56  ;;  %v3391_v1 = vadd.f32 %v14988_v41, %v11079_v32  ;;  %v14990_v25 = vld [vmem:[#allocation53_spill] sm:$0xff]  ;;  %v14995_v56 = vld [vmem:[#allocation47_spill] sm:$0xff] }
 0xb61   : > { %v3378_v18 = vadd.f32 %v3362_v27, %v11489_v51  ;;  %v3409_v45 = vmul.f32 0.01, %v3377_v17  ;;  %v3392_v14 = vadd.f32 %v14990_v25, %v14989_v11  ;;  %v11661_v25 = vld [vmem:[#allocation6 + $0x8] sm:$0xff]  }
 0xb62   : > { %v3407_v37 = vmul.f32 0.01, %v3375_v23  ;;  %v3376_v49 = vadd.f32 %v3360_v15, %v11494_v46  ;;  %v8239_v55 = vpop.f32.mrb[84].mxu1  ;;  %v14991_v46 = vld [vmem:[#allocation43_spill] sm:$0xff]  ;;  %v14997_v15 = vld [vmem:[#allocation64_spill] sm:$0xff]  ;;  %15004 = vst [vmem:[#allocation72_spill] sm:$0xff] %v11661_v25 }
 0xb63   : > { %v3410_v33 = vmul.f32 0.01, %v3378_v18  ;;  %v3273_v2 = vadd.f32 %v11565_v62, %v8239_v55  ;;  %v3264_v19 = vpop.f32.mrb[85].mxu1  ;;  %v3393_v34 = vadd.f32 %v14992_v39, %v14991_v46  ;;  %v14998_v18 = vld [vmem:[#allocation76_spill] sm:$0xff] }
 0xb64   : > { %v3408_v58 = vmul.f32 0.01, %v3376_v49  ;;  %v3265_v51 = vadd.f32 %v11565_v62, %v3264_v19  ;;  %v8240_v36 = vpop.f32.mrb[86].mxu1  ;;  %v11632_v8 = vadd.f32 %v3407_v37, %v3391_v1  ;;  %v14999_v37 = vld [vmem:[#allocation45_spill] sm:$0xff]  ;;  %v15000_v49 = vld [vmem:[#allocation56_spill] sm:$0xff] }
 0xb65   : > { %v11629_v12 = vadd.f32 %v3410_v33, %v3394_v26  ;;  %v3365_v3 = vmul.f32 0.6666667, %v3273_v2  ;;  %v3276_v30 = vadd.f32 %v11565_v62, %v8240_v36  ;;  %v3267_v20 = vpop.f32.mrb[87].mxu1  ;;  %v11637_v21 = vadd.f32 %v3409_v45, %v3393_v34  ;;  %v15001_v26 = vld [vmem:[#allocation66_spill] sm:$0xff]  ;;  %v15002_v33 = vld [vmem:[#allocation39_spill] sm:$0xff] }
 0xb66   : > { %v11634_v10 = vadd.f32 %v3408_v58, %v3392_v14  ;;  %v3363_v32 = vmul.f32 0.6666667, %v3265_v51  ;;  %v3268_v48 = vadd.f32 %v11565_v62, %v3267_v20  ;;  %v3396_v55 = vadd.f32 %v15000_v49, %v14999_v37 }
 0xb67   : > { %14994 = vst [vmem:[#allocation32_spill] sm:$0xff] %v11637_v21  ;;  %v3381_v22 = vadd.f32 %v3365_v3, %v11512_v42  ;;  %v3366_v29 = vmul.f32 0.6666667, %v3276_v30  ;;  %v3570_v53 = vpack.c.bf16 %v11629_v12, %v11637_v21  ;;  %v14996_v42 = vld [vmem:[#allocation44_spill] sm:$0xff]  ;;  %v3397_v2 = vadd.f32 %v15002_v33, %v15001_v26 }
 0xb68   : > { %14993 = vst [vmem:[#allocation74_spill] sm:$0xff] %v11634_v10  ;;  %v3379_v40 = vadd.f32 %v3363_v32, %v11516_v44  ;;  %v3364_v31 = vmul.f32 0.6666667, %v3268_v48  ;;  %v3569_v50 = vpack.c.bf16 %v11634_v10, %v11632_v8  ;;  %v3398_v17 = vadd.f32 %v14996_v42, %v14995_v56  ;;  %v15013_v56 = vld [vmem:[#allocation70_spill] sm:$0xff]  ;;  %v15014_v42 = vld [vmem:[#allocation33_spill] sm:$0xff] }
 0xb69   : > { %v3382_v13 = vadd.f32 %v3366_v29, %v11523_v59  ;;  %v3413_v54 = vmul.f32 0.01, %v3381_v22  ;;  %v3395_v59 = vadd.f32 %v14998_v18, %v14997_v15  ;;  %v11679_v22 = vld [vmem:[#allocation6 + $0x10] sm:$0xff]  }
 0xb6a   : > { %v3411_v60 = vmul.f32 0.01, %v3379_v40  ;;  %v3380_v43 = vadd.f32 %v3364_v31, %v11530_v16  ;;  %v8243_v47 = vpop.f32.mrb[88].mxu1  ;;  %8265 = vmatprep.mubr.bf16.mxu0 %v3569_v50  ;;  %15008 = vst [vmem:[#allocation68_spill] sm:$0xff] %v11679_v22  ;;  %v15009_v31 = vld [vmem:[#allocation69_spill] sm:$0xff]  ;;  %v15016_v15 = vld [vmem:[#allocation58_spill] sm:$0xff] }
 0xb6b   : > { %v3414_v27 = vmul.f32 0.01, %v3382_v13  ;;  %v3289_v44 = vadd.f32 %v11565_v62, %v8243_v47  ;;  %v3280_v23 = vpop.f32.mrb[89].mxu1  ;;  %8266 = vmatmul.mubr.bf16.vlgmr.msra.gmra.mrb[96].mxu0 %v3570_v53  ;;  %v11669_v46 = vadd.f32 %v3413_v54, %v3397_v2  ;;  %v15010_v50 = vld [vmem:[#allocation77_spill] sm:$0xff] }
 0xb6c   : > { %v3412_v45 = vmul.f32 0.01, %v3380_v43  ;;  %v3281_v16 = vadd.f32 %v11565_v62, %v3280_v23  ;;  %v8244_v61 = vpop.f32.mrb[90].mxu1  ;;  %8314 = vmatpush3.bf16.msra.mxu0 %v11608_v9  ;;  %v11664_v14 = vadd.f32 %v3411_v60, %v3395_v59  ;;  %v3402_v13 = vadd.f32 %v15010_v50, %v15009_v31  ;;  %v15011_v43 = vld [vmem:[#allocation63_spill] sm:$0xff]  ;;  %v15012_v47 = vld [vmem:[#allocation49_spill] sm:$0xff]  ;;  %v15015_v23 = vld [vmem:[#allocation38_spill] sm:$0xff] }
 0xb6d   : > { %v11658_v19 = vadd.f32 %v3414_v27, %v3398_v17  ;;  %v3369_v41 = vmul.f32 0.6666667, %v3289_v44  ;;  %v3292_v1 = vadd.f32 %v11565_v62, %v8244_v61  ;;  %v3283_v11 = vpop.f32.mrb[91].mxu1  ;;  %8315 = vmatprep.subr.bf16.mxu0 %v11661_v25  ;;  %15007 = vst [vmem:[#allocation51_spill] sm:$0xff] %v11669_v46  ;;  %v3399_v54 = vadd.f32 %v15012_v47, %v15011_v43  ;;  %v15026_v31 = vld [vmem:[#allocation82_spill] sm:$0xff] }
 0xb6e   : > { %15005 = vst [vmem:[#allocation62_spill] sm:$0xff] %v11664_v14  ;;  %v11666_v58 = vadd.f32 %v3412_v45, %v3396_v55  ;;  %v3367_v51 = vmul.f32 0.6666667, %v3281_v16  ;;  %v3284_v36 = vadd.f32 %v11565_v62, %v3283_v11  ;;  %v3400_v17 = vadd.f32 %v15014_v42, %v15013_v56  ;;  %v11697_v45 = vld [vmem:[#allocation6 + $0x18] sm:$0xff]  }
 0xb6f   : > { %15003 = vst [vmem:[#allocation65_spill] sm:$0xff] %v11658_v19  ;;  %v3385_v39 = vadd.f32 %v3369_v41, %v11544_v0  ;;  %v3370_v34 = vmul.f32 0.6666667, %v3292_v1  ;;  %v3572_v48 = vpack.c.bf16 %v11658_v19, %v11669_v46  ;;  %v3401_v18 = vadd.f32 %v15016_v15, %v15015_v23  ;;  %15018 = vst [vmem:[#allocation52_spill] sm:$0xff] %v11697_v45 }
 0xb70   : > { %15006 = vst [vmem:[#allocation67_spill] sm:$0xff] %v11666_v58  ;;  %v3383_v3 = vadd.f32 %v3367_v51, %v11548_v6  ;;  %v3368_v30 = vmul.f32 0.6666667, %v3284_v36  ;;  %v3571_v20 = vpack.c.bf16 %v11666_v58, %v11664_v14  ;;  %8316 = vmatpush3.bf16.msra.mxu0 %v11661_v25  ;;  %v3405_v50 = vadd.f32 %v15026_v31, %v14979_v28 }
 0xb71   : > { %v3386_v32 = vadd.f32 %v3370_v34, %v11552_v5  ;;  %8317 = vmatprep.subr.bf16.mxu0 %v11679_v22  ;;  %v3417_v6 = vmul.f32 0.01, %v3385_v39 }
 0xb72   : > { %v3415_v29 = vmul.f32 0.01, %v3383_v3  ;;  %v3384_v0 = vadd.f32 %v3368_v30, %v11557_v52  ;;  %v8247_v40 = vpop.f32.mrb[92].mxu1  ;;  %8269 = vmatprep.mubr.bf16.mxu0 %v3571_v20  ;;  %v11715_v3 = vld [vmem:[#allocation6 + $0x20] sm:$0xff]   ;;  %v15023_v20 = vld [vmem:[#allocation79_spill] sm:$0xff] }
 0xb73   : > { %v3418_v53 = vmul.f32 0.01, %v3386_v32  ;;  %v3305_v60 = vadd.f32 %v11565_v62, %v8247_v40  ;;  %v3296_v5 = vpop.f32.mrb[93].mxu1  ;;  %8270 = vmatmul.mubr.bf16.gmra.mrb[100].mxu0 %v3572_v48  ;;  %v11705_v2 = vadd.f32 %v3417_v6, %v3401_v18  ;;  %15022 = vst [vmem:[#allocation78_spill] sm:$0xff] %v11715_v3  ;;  %v3406_v32 = vadd.f32 %v15023_v20, %v14980_v35 }
 0xb74   : > { %v3416_v27 = vmul.f32 0.01, %v3384_v0  ;;  %v3297_v52 = vadd.f32 %v11565_v62, %v3296_v5  ;;  %v8248_v44 = vpop.f32.mrb[94].mxu1  ;;  %8318 = vmatpush3.bf16.msra.mxu0 %v11679_v22  ;;  %v11700_v16 = vadd.f32 %v3415_v29, %v3399_v54  ;;  %v15024_v29 = vld [vmem:[#allocation80_spill] sm:$0xff]  ;;  %v15025_v0 = vld [vmem:[#allocation81_spill] sm:$0xff]  ;;  %v11748_v5 = vld [vmem:[#allocation6 + $0x38] sm:$0xff]  }
 0xb75   : > { %v11694_v59 = vadd.f32 %v3418_v53, %v3402_v13  ;;  %v3373_v37 = vmul.f32 0.6666667, %v3305_v60  ;;  %v3308_v49 = vadd.f32 %v11565_v62, %v8248_v44  ;;  %v3299_v55 = vpop.f32.mrb[95].mxu1  ;;  %8319 = vmatprep.subr.bf16.mxu0 %v11697_v45  ;;  %15021 = vst [vmem:[#allocation48_spill] sm:$0xff] %v11705_v2  ;;  %v3404_v40 = vadd.f32 %v15025_v0, %v14982_v57  ;;  %v11730_v13 = vld [vmem:[#allocation6 + $0x28] sm:$0xff]   ;;  %v11744_v60 = vld [vmem:[#allocation6 + $0x30] sm:$0xff]  }
 0xb76   : > { %15019 = vst [vmem:[#allocation61_spill] sm:$0xff] %v11700_v16  ;;  %v11702_v61 = vadd.f32 %v3416_v27, %v3400_v17  ;;  %v3371_v26 = vmul.f32 0.6666667, %v3297_v52  ;;  %v3300_v33 = vadd.f32 %v11565_v62, %v3299_v55  ;;  %15028 = vst [vmem:[#allocation71_spill] sm:$0xff] %v11730_v13 }
 0xb77   : > { %15017 = vst [vmem:[#allocation55_spill] sm:$0xff] %v11694_v59  ;;  %v3389_v41 = vadd.f32 %v3373_v37, %v11579_v63  ;;  %v3374_v1 = vmul.f32 0.6666667, %v3308_v49  ;;  %v3574_v34 = vpack.c.bf16 %v11694_v59, %v11705_v2  ;;  %15032 = vst [vmem:[#allocation54_spill] sm:$0xff] %v11744_v60 }
 0xb78   : > { %15020 = vst [vmem:[#allocation73_spill] sm:$0xff] %v11702_v61  ;;  %v3387_v11 = vadd.f32 %v3371_v26, %v11583_v4  ;;  %v3372_v51 = vmul.f32 0.6666667, %v3300_v33  ;;  %v3573_v36 = vpack.c.bf16 %v11702_v61, %v11700_v16  ;;  %8320 = vmatpush3.bf16.msra.mxu0 %v11697_v45  ;;  %15033 = vst [vmem:[#allocation57_spill] sm:$0xff] %v11748_v5 }
 0xb79   : > { %v3390_v39 = vadd.f32 %v3374_v1, %v11587_v7  ;;  %8321 = vmatprep.subr.bf16.mxu0 %v11715_v3  ;;  %v3421_v4 = vmul.f32 0.01, %v3389_v41  ;;  %v3403_v7 = vadd.f32 %v15024_v29, %v14981_v38 }
 0xb7a   : > { %v3419_v30 = vmul.f32 0.01, %v3387_v11  ;;  %v3388_v63 = vadd.f32 %v3372_v51, %v11590_v24  ;;  %8273 = vmatprep.mubr.bf16.mxu0 %v3573_v36 }
 0xb7b   : > { %v3422_v48 = vmul.f32 0.01, %v3390_v39  ;;  %8274 = vmatmul.mubr.bf16.gmra.mrb[104].mxu0 %v3574_v34  ;;  %v11737_v38 = vadd.f32 %v3421_v4, %v3405_v50 }
 0xb7c   : > { %v3420_v6 = vmul.f32 0.01, %v3388_v63  ;;  %8322 = vmatpush3.bf16.msra.mxu0 %v11715_v3  ;;  %v11733_v35 = vadd.f32 %v3419_v30, %v3403_v7 }
 0xb7d   : > { %v11728_v24 = vadd.f32 %v3422_v48, %v3406_v32  ;;  %8323 = vmatprep.subr.bf16.mxu0 %v11730_v13  ;;  %15031 = vst [vmem:[#allocation41_spill] sm:$0xff] %v11737_v38 }
 0xb7e   : > { %15029 = vst [vmem:[#allocation35_spill] sm:$0xff] %v11733_v35  ;;  %v11735_v53 = vadd.f32 %v3420_v6, %v3404_v40 }
 0xb7f   : > { %15027 = vst [vmem:[#allocation50_spill] sm:$0xff] %v11728_v24  ;;  %v3576_v28 = vpack.c.bf16 %v11728_v24, %v11737_v38 }
 0xb80   : > { %15030 = vst [vmem:[#allocation46_spill] sm:$0xff] %v11735_v53  ;;  %v3575_v57 = vpack.c.bf16 %v11735_v53, %v11733_v35  ;;  %8324 = vmatpush3.bf16.msra.mxu0 %v11730_v13 }
 0xb81   : > { %8325 = vmatprep.subr.bf16.mxu0 %v11744_v60 }
 0xb82   : > { %8277 = vmatprep.mubr.bf16.mxu0 %v3575_v57 }
 0xb83   : > { %8278 = vmatmul.mubr.bf16.gmra.mrb[108].mxu0 %v3576_v28 }
 0xb84   : > { %8326 = vmatpush3.bf16.msra.mxu0 %v11744_v60 }
 0xb85   : > { %8327 = vmatprep.subr.bf16.mxu0 %v11748_v5 }
 0xb88   : > { %8328 = vmatpush3.bf16.msra.mxu0 %v11748_v5 }
 0xb89   : > { %8377 = vmatprep.subr.bf16.mxu0 %v11608_v9 }
 0xc3e   : > { %v8267_v43 = vpop.f32.mrb[96].mxu0 }
 0xc3f   : > { %v11754_v47 = vadd.f32 %v11565_v62, %v8267_v43  ;;  %v3611_v54 = vpop.f32.mrb[97].mxu0 }
 0xc40   : > { %v11757_v56 = vadd.f32 %v11565_v62, %v3611_v54  ;;  %v8268_v42 = vpop.f32.mrb[98].mxu0 }
 0xc41   : > { %v3676_v17 = vmul.f32 0.01, %v11754_v47  ;;  %v11761_v27 = vadd.f32 %v11565_v62, %v8268_v42  ;;  %v3614_v52 = vpop.f32.mrb[99].mxu0 }
 0xc42   : > { %v3674_v44 = vmul.f32 0.01, %v11757_v56  ;;  %v11765_v23 = vadd.f32 %v11565_v62, %v3614_v52 }
 0xc43   : > { %v3677_v15 = vmul.f32 0.01, %v11761_v27  ;;  %v3692_v37 = vadd.f32 %v3676_v17, %v11637_v21 }
 0xc44   : > { %v3675_v18 = vmul.f32 0.01, %v11765_v23  ;;  %v3690_v26 = vadd.f32 %v3674_v44, %v11632_v8 }
 0xc45   : > { %v3693_v49 = vadd.f32 %v3677_v15, %v11629_v12 }
 0xc46   : > { %v8271_v55 = vpop.f32.mrb[100].mxu0  ;;  %v3691_v33 = vadd.f32 %v3675_v18, %v11634_v10 }
 0xc47   : > { %v3707_v41 = vpack.c.bf16 %v3693_v49, %v3692_v37  ;;  %v11774_v1 = vadd.f32 %v11565_v62, %v8271_v55  ;;  %v3627_v11 = vpop.f32.mrb[101].mxu0 }
 0xc48   : > { %v11777_v51 = vadd.f32 %v11565_v62, %v3627_v11  ;;  %v8272_v36 = vpop.f32.mrb[102].mxu0  ;;  %v3706_v39 = vpack.c.bf16 %v3691_v33, %v3690_v26 }
 0xc49   : > { %15034 = vst [vmem:[#allocation60_spill] sm:$0xff] %v11774_v1  ;;  %v3680_v34 = vmul.f32 0.01, %v11774_v1  ;;  %v11781_v30 = vadd.f32 %v11565_v62, %v8272_v36  ;;  %v3630_v63 = vpop.f32.mrb[103].mxu0 }
 0xc4a   : > { %15035 = vst [vmem:[#allocation59_spill] sm:$0xff] %v11777_v51  ;;  %v3678_v4 = vmul.f32 0.01, %v11777_v51  ;;  %v11785_v20 = vadd.f32 %v11565_v62, %v3630_v63  ;;  %8297 = vmatprep.mubr.bf16.mxu1 %v3706_v39 }
 0xc4b   : > { %15036 = vst [vmem:[#allocation75_spill] sm:$0xff] %v11781_v30  ;;  %v3681_v32 = vmul.f32 0.01, %v11781_v30  ;;  %8298 = vmatmul.mubr.bf16.vlgmr.msra.gmra.mrb[96].mxu1 %v3707_v41  ;;  %v3696_v29 = vadd.f32 %v3680_v34, %v11669_v46 }
 0xc4c   : > { %15037 = vst [vmem:[#allocation37_spill] sm:$0xff] %v11785_v20  ;;  %v3679_v48 = vmul.f32 0.01, %v11785_v20  ;;  %8346 = vmatpush3.bf16.msra.mxu1 %v11608_v9  ;;  %v3694_v40 = vadd.f32 %v3678_v4, %v11664_v14 }
 0xc4d   : > { %v3697_v7 = vadd.f32 %v3681_v32, %v11658_v19  ;;  %8347 = vmatprep.subr.bf16.mxu1 %v11661_v25 }
 0xc4e   : > { %v8275_v0 = vpop.f32.mrb[104].mxu0  ;;  %v3695_v6 = vadd.f32 %v3679_v48, %v11666_v58 }
 0xc4f   : > { %v11796_v31 = vadd.f32 %v11565_v62, %v8275_v0  ;;  %v3643_v50 = vpop.f32.mrb[105].mxu0  ;;  %v3709_v57 = vpack.c.bf16 %v3697_v7, %v3696_v29 }
 0xc50   : > { %v11799_v28 = vadd.f32 %v11565_v62, %v3643_v50  ;;  %v8276_v43 = vpop.f32.mrb[106].mxu0  ;;  %v3708_v54 = vpack.c.bf16 %v3695_v6, %v3694_v40  ;;  %8348 = vmatpush3.bf16.msra.mxu1 %v11661_v25 }
 0xc51   : > { %15038 = vst [vmem:[#allocation40_spill] sm:$0xff] %v11796_v31  ;;  %v3684_v42 = vmul.f32 0.01, %v11796_v31  ;;  %v11804_v17 = vadd.f32 %v11565_v62, %v8276_v43  ;;  %v3646_v52 = vpop.f32.mrb[107].mxu0  ;;  %8349 = vmatprep.subr.bf16.mxu1 %v11679_v22 }
 0xc52   : > { %15039 = vst [vmem:[#allocation53_spill] sm:$0xff] %v11799_v28  ;;  %v3682_v44 = vmul.f32 0.01, %v11799_v28  ;;  %v11809_v15 = vadd.f32 %v11565_v62, %v3646_v52  ;;  %8301 = vmatprep.mubr.bf16.mxu1 %v3708_v54 }
 0xc53   : > { %15040 = vst [vmem:[#allocation43_spill] sm:$0xff] %v11804_v17  ;;  %v3685_v18 = vmul.f32 0.01, %v11804_v17  ;;  %8302 = vmatmul.mubr.bf16.gmra.mrb[100].mxu1 %v3709_v57  ;;  %v3700_v49 = vadd.f32 %v3684_v42, %v11705_v2 }
 0xc54   : > { %15041 = vst [vmem:[#allocation36_spill] sm:$0xff] %v11809_v15  ;;  %v3683_v37 = vmul.f32 0.01, %v11809_v15  ;;  %8350 = vmatpush3.bf16.msra.mxu1 %v11679_v22  ;;  %v3698_v33 = vadd.f32 %v3682_v44, %v11700_v16  ;;  %v7418_v44 = vld [vmem:[%s9404_s10 + $0x108] sm:$0xff]  }
 0xc55   : > { %v3701_v55 = vadd.f32 %v3685_v18, %v11694_v59  ;;  %8351 = vmatprep.subr.bf16.mxu1 %v11697_v45  ;;  %v7417_v18 = vld [vmem:[%s9404_s10 + $0x100] sm:$0xff]  }
 0xc56   : > { %v8279_v26 = vpop.f32.mrb[108].mxu0  ;;  %v3699_v41 = vadd.f32 %v3683_v37, %v11702_v61  ;;  %v7105_v37 = vunpack.c.l.bf16 %v7418_v44 }
 0xc57   : > { %v11820_v11 = vadd.f32 %v11565_v62, %v8279_v26  ;;  %v3659_v36 = vpop.f32.mrb[109].mxu0  ;;  %v3711_v39 = vpack.c.bf16 %v3701_v55, %v3700_v49  ;;  %v7426_v49 = vld [vmem:[%s9410_s18 + $0x108] sm:$0xff]   ;;  %v7106_v55 = vunpack.c.h.bf16 %v7418_v44  ;;  %v7101_v26 = vunpack.c.l.bf16 %v7417_v18 }
 0xc58   : > { %v11823_v34 = vadd.f32 %v11565_v62, %v3659_v36  ;;  %v8280_v63 = vpop.f32.mrb[110].mxu0  ;;  %v3710_v4 = vpack.c.bf16 %v3699_v41, %v3698_v33  ;;  %8352 = vmatpush3.bf16.msra.mxu1 %v11697_v45  ;;  %v7425_v33 = vld [vmem:[%s9410_s18 + $0x100] sm:$0xff]   ;;  %v7420_v41 = vld [vmem:[%s9404_s10 + $0x118] sm:$0xff]   ;;  %v7102_v36 = vunpack.c.h.bf16 %v7417_v18 }
 0xc59   : > { %15042 = vst [vmem:[#allocation47_spill] sm:$0xff] %v11820_v11  ;;  %v3688_v32 = vmul.f32 0.01, %v11820_v11  ;;  %v11828_v48 = vadd.f32 %v11565_v62, %v8280_v63  ;;  %v3662_v29 = vpop.f32.mrb[111].mxu0  ;;  %8353 = vmatprep.subr.bf16.mxu1 %v11715_v3  ;;  %v11855_v63 = vmul.f32 0.1, %v7105_v37  ;;  %v7134_v44 = vunpack.c.h.bf16 %v7425_v33 }
 0xc5a   : > { %15043 = vst [vmem:[#allocation44_spill] sm:$0xff] %v11823_v34  ;;  %v3686_v7 = vmul.f32 0.01, %v11823_v34  ;;  %v11833_v0 = vadd.f32 %v11565_v62, %v3662_v29  ;;  %8305 = vmatprep.mubr.bf16.mxu1 %v3710_v4  ;;  %v7137_v4 = vunpack.c.l.bf16 %v7426_v49  ;;  %v7113_v29 = vunpack.c.l.bf16 %v7420_v41  ;;  %v7429_v45 = vld [vmem:[%s9410_s18 + $0x120] sm:$0xff]   ;;  %v7432_v34 = vld [vmem:[%s9410_s18 + $0x138] sm:$0xff]  }
 0xc5b   : > { %15044 = vst [vmem:[#allocation64_spill] sm:$0xff] %v11828_v48  ;;  %v3689_v40 = vmul.f32 0.01, %v11828_v48  ;;  %8306 = vmatmul.mubr.bf16.gmra.mrb[104].mxu1 %v3711_v39  ;;  %v3704_v50 = vadd.f32 %v3688_v32, %v11737_v38  ;;  %v7419_v39 = vld [vmem:[%s9404_s10 + $0x110] sm:$0xff]   ;;  %15046 = vst [vmem:[#allocation45_spill] sm:$0xff] %v11855_v63  ;;  %v7133_v32 = vunpack.c.l.bf16 %v7425_v33  ;;  %v7421_v33 = vld [vmem:[%s9404_s10 + $0x120] sm:$0xff]   ;;  %v7150_v15 = vunpack.c.h.bf16 %v7429_v45 }
 0xc5c   : > { %15045 = vst [vmem:[#allocation76_spill] sm:$0xff] %v11833_v0  ;;  %v3687_v6 = vmul.f32 0.01, %v11833_v0  ;;  %8354 = vmatpush3.bf16.msra.mxu1 %v11715_v3  ;;  %v3702_v43 = vadd.f32 %v3686_v7, %v11733_v35  ;;  %v11857_v7 = vmul.f32 0.1, %v7106_v55  ;;  %v7110_v18 = vunpack.c.h.bf16 %v7419_v39  ;;  %v7424_v35 = vld [vmem:[%s9404_s10 + $0x138] sm:$0xff]  }
 0xc5d   : > { %v3705_v57 = vadd.f32 %v3689_v40, %v11728_v24  ;;  %8355 = vmatprep.subr.bf16.mxu1 %v11730_v13  ;;  %v11859_v40 = vmul.f32 0.1, %v7101_v26  ;;  %v11868_v37 = vmul.f32 0.028867513, %v7137_v4  ;;  %v11870_v55 = vmul.f32 0.028867513, %v7133_v32 }
 0xc5e   : > { %v3703_v54 = vadd.f32 %v3687_v6, %v11735_v53  ;;  %15047 = vst [vmem:[#allocation56_spill] sm:$0xff] %v11857_v7  ;;  %v7109_v6 = vunpack.c.l.bf16 %v7419_v39  ;;  %v11872_v26 = vmul.f32 0.1, %v7113_v29  ;;  %v7422_v39 = vld [vmem:[%s9404_s10 + $0x128] sm:$0xff]   ;;  %v7117_v38 = vunpack.c.l.bf16 %v7421_v33 }
 0xc5f   : > { %v3713_v42 = vpack.c.bf16 %v3705_v57, %v3704_v50  ;;  %15048 = vst [vmem:[#allocation66_spill] sm:$0xff] %v11859_v40  ;;  %v7428_v50 = vld [vmem:[%s9410_s18 + $0x118] sm:$0xff]   ;;  %v7138_v57 = vunpack.c.h.bf16 %v7426_v49  ;;  %v11875_v49 = vmul.f32 0.5, %v11857_v7  ;;  %v11889_v7 = vmul.f32 0.1, %v7110_v18 }
 0xc60   : > { %v3712_v52 = vpack.c.bf16 %v3703_v54, %v3702_v43  ;;  %8356 = vmatpush3.bf16.msra.mxu1 %v11730_v13  ;;  %v11862_v43 = vmul.f32 0.1, %v7102_v36  ;;  %v7427_v54 = vld [vmem:[%s9410_s18 + $0x110] sm:$0xff]   ;;  %15050 = vst [vmem:[#allocation69_spill] sm:$0xff] %v11872_v26  ;;  %v11878_v36 = vmul.f32 0.5, %v11859_v40  ;;  %v7122_v0 = vunpack.c.h.bf16 %v7422_v39 }
 0xc61   : > { %8357 = vmatprep.subr.bf16.mxu1 %v11744_v60  ;;  %v3540_v4 = vmul.f32 0.028867513, %v7138_v57  ;;  %v3538_v13 = vmul.f32 0.028867513, %v7134_v44  ;;  %15053 = vst [vmem:[#allocation49_spill] sm:$0xff] %v11889_v7  ;;  %v7142_v53 = vunpack.c.h.bf16 %v7427_v54  ;;  %v7423_v40 = vld [vmem:[%s9404_s10 + $0x130] sm:$0xff]   ;;  %v7121_v57 = vunpack.c.l.bf16 %v7422_v39 }
 0xc62   : > { %8309 = vmatprep.mubr.bf16.mxu1 %v3712_v52  ;;  %15049 = vst [vmem:[#allocation39_spill] sm:$0xff] %v11862_v43  ;;  %v11866_v52 = vmul.f32 0.5, %v11855_v63  ;;  %v7141_v63 = vunpack.c.l.bf16 %v7427_v54  ;;  %v11885_v32 = vmul.f32 0.5, %v11862_v43  ;;  %v7125_v54 = vunpack.c.l.bf16 %v7423_v40 }
 0xc63   : > { %8310 = vmatmul.mubr.bf16.gmra.mrb[108].mxu1 %v3713_v42  ;;  %v7114_v42 = vunpack.c.h.bf16 %v7420_v41  ;;  %v11880_v41 = vmul.f32 0.1, %v7109_v6  ;;  %v3494_v6 = vmul.f32 0.5, %v11872_v26  ;;  %v7129_v22 = vunpack.c.l.bf16 %v7424_v35 }
 0xc64   : > { %8358 = vmatpush3.bf16.msra.mxu1 %v11744_v60  ;;  %v7146_v60 = vunpack.c.h.bf16 %v7428_v50  ;;  %v3541_v3 = vmul.f32 0.028867513, %v7141_v63  ;;  %v3493_v25 = vmul.f32 0.5, %v11889_v7  ;;  %v3542_v26 = vmul.f32 0.028867513, %v7142_v53 }
 0xc65   : > { %8359 = vmatprep.subr.bf16.mxu1 %v11748_v5  ;;  %15051 = vst [vmem:[#allocation77_spill] sm:$0xff] %v11880_v41  ;;  %v11887_v29 = vmul.f32 0.1, %v7114_v42  ;;  %v3492_v43 = vmul.f32 0.5, %v11880_v41  ;;  %v7118_v42 = vunpack.c.h.bf16 %v7421_v33  ;;  %v7130_v48 = vunpack.c.h.bf16 %v7424_v35 }
 0xc66   : > { %v3544_v18 = vmul.f32 0.028867513, %v7146_v60  ;;  %v11901_v11 = vmul.f32 0.1, %v7117_v38  ;;  %v7149_v41 = vunpack.c.l.bf16 %v7429_v45  ;;  %v11903_v63 = vmul.f32 0.1, %v7121_v57 }
 0xc67   : > { %15052 = vst [vmem:[#allocation63_spill] sm:$0xff] %v11887_v29  ;;  %v3495_v44 = vmul.f32 0.5, %v11887_v29  ;;  %v11905_v39 = vmul.f32 0.1, %v7118_v42  ;;  %v11907_v29 = vmul.f32 0.1, %v7122_v0  ;;  %v7162_v57 = vunpack.c.h.bf16 %v7432_v34 }
 0xc68   : > { %8360 = vmatpush3.bf16.msra.mxu1 %v11748_v5  ;;  %v7145_v5 = vunpack.c.l.bf16 %v7428_v50  ;;  %v7430_v50 = vld [vmem:[%s9410_s18 + $0x128] sm:$0xff]   ;;  %15054 = vst [vmem:[#allocation70_spill] sm:$0xff] %v11901_v11  ;;  %15055 = vst [vmem:[#allocation33_spill] sm:$0xff] %v11903_v63  ;;  %v11909_v17 = vmul.f32 0.1, %v7125_v54  ;;  %v3496_v28 = vmul.f32 0.5, %v11901_v11 }
 0xc69   : > { %8409 = vmatprep.subr.bf16.mxu1 %v11608_v9  ;;  %v7431_v9 = vld [vmem:[%s9410_s18 + $0x130] sm:$0xff]   ;;  %v7153_v33 = vunpack.c.l.bf16 %v7430_v50  ;;  %15056 = vst [vmem:[#allocation38_spill] sm:$0xff] %v11905_v39  ;;  %15057 = vst [vmem:[#allocation58_spill] sm:$0xff] %v11907_v29  ;;  %v7154_v60 = vunpack.c.h.bf16 %v7430_v50  ;;  %v11911_v53 = vmul.f32 0.1, %v7129_v22  ;;  %v3498_v45 = vmul.f32 0.5, %v11903_v63 }
 0xc6a   : > { %v3543_v24 = vmul.f32 0.028867513, %v7145_v5  ;;  %v7126_v5 = vunpack.c.h.bf16 %v7423_v40  ;;  %15058 = vst [vmem:[#allocation79_spill] sm:$0xff] %v11909_v17  ;;  %v7157_v7 = vunpack.c.l.bf16 %v7431_v9  ;;  %v7161_v40 = vunpack.c.l.bf16 %v7432_v34 }
 0xc6b   : > { %15059 = vst [vmem:[#allocation80_spill] sm:$0xff] %v11911_v53  ;;  %v7158_v38 = vunpack.c.h.bf16 %v7431_v9  ;;  %v11915_v62 = vmul.f32 0.1, %v7130_v48  ;;  %v3545_v42 = vmul.f32 0.028867513, %v7149_v41  ;;  %v3497_v50 = vmul.f32 0.5, %v11905_v39 }
 0xc6c   : > { %v11913_v35 = vmul.f32 0.1, %v7126_v5  ;;  %v3547_v0 = vmul.f32 0.028867513, %v7153_v33  ;;  %v3546_v54 = vmul.f32 0.028867513, %v7150_v15  ;;  %v3555_v33 = vadd.f32 %v11868_v37, %v11866_v52 }
 0xc6d   : > { %15061 = vst [vmem:[#allocation82_spill] sm:$0xff] %v11915_v62  ;;  %v3499_v31 = vmul.f32 0.5, %v11907_v29  ;;  %v3548_v22 = vmul.f32 0.028867513, %v7154_v60  ;;  %v3500_v61 = vmul.f32 0.5, %v11909_v17  ;;  %v3502_v9 = vmul.f32 0.5, %v11911_v53 }
 0xc6e   : > { %15060 = vst [vmem:[#allocation81_spill] sm:$0xff] %v11913_v35  ;;  %v3549_v5 = vmul.f32 0.028867513, %v7157_v7  ;;  %v3551_v48 = vmul.f32 0.028867513, %v7161_v40  ;;  %v3501_v34 = vmul.f32 0.5, %v11913_v35  ;;  %v3556_v15 = vadd.f32 %v3540_v4, %v11875_v49 }
 0xc6f   : > { %v3550_v20 = vmul.f32 0.028867513, %v7158_v38  ;;  %v3503_v41 = vmul.f32 0.5, %v11915_v62  ;;  %v3552_v11 = vmul.f32 0.028867513, %v7162_v57  ;;  %v3553_v60 = vadd.f32 %v11870_v55, %v11878_v36 }
 0xc70   : > { %v3554_v17 = vadd.f32 %v3538_v13, %v11885_v32  ;;  %v3557_v7 = vadd.f32 %v3541_v3, %v3492_v43  ;;  %v3558_v63 = vadd.f32 %v3542_v26, %v3493_v25  ;;  %v3559_v53 = vadd.f32 %v3543_v24, %v3494_v6 }
 0xc71   : > { %v3560_v40 = vadd.f32 %v3544_v18, %v3495_v44  ;;  %v3561_v39 = vadd.f32 %v3545_v42, %v3496_v28  ;;  %v3562_v35 = vadd.f32 %v3546_v54, %v3497_v50  ;;  %v3563_v38 = vadd.f32 %v3547_v0, %v3498_v45  ;;  %v15062_v50 = vld [vmem:[#allocation60_spill] sm:$0xff] }
 0xc72   : > { %v3564_v29 = vadd.f32 %v3548_v22, %v3499_v31  ;;  %v3565_v62 = vadd.f32 %v3549_v5, %v3500_v61  ;;  %v3566_v57 = vadd.f32 %v3550_v20, %v3501_v34  ;;  %v3567_v30 = vadd.f32 %v3551_v48, %v3502_v9  ;;  %v15063_v5 = vld [vmem:[#allocation59_spill] sm:$0xff]  ;;  %v15065_v34 = vld [vmem:[#allocation37_spill] sm:$0xff] }
 0xc73   : > { %v3568_v51 = vadd.f32 %v3552_v11, %v3503_v41  ;;  %v3813_v52 = vmul.f32 1.5, %v3555_v33  ;;  %v3814_v37 = vmul.f32 1.5, %v3556_v15  ;;  %v3811_v49 = vmul.f32 1.5, %v3553_v60  ;;  %v15066_v15 = vld [vmem:[#allocation73_spill] sm:$0xff] }
 0xc74   : > { %v3812_v4 = vmul.f32 1.5, %v3554_v17  ;;  %v3815_v1 = vmul.f32 1.5, %v3557_v7  ;;  %v3816_v55 = vmul.f32 1.5, %v3558_v63  ;;  %v3817_v36 = vmul.f32 1.5, %v3559_v53  ;;  %v15067_v7 = vld [vmem:[#allocation40_spill] sm:$0xff] }
 0xc75   : > { %v3818_v13 = vmul.f32 1.5, %v3560_v40  ;;  %v3819_v3 = vmul.f32 1.5, %v3561_v39  ;;  %v3820_v25 = vmul.f32 1.5, %v3562_v35  ;;  %v3821_v24 = vmul.f32 1.5, %v3563_v38 }
 0xc76   : > { %v3822_v43 = vmul.f32 1.5, %v3564_v29  ;;  %v11931_v28 = vmul.f32 1.5, %v3565_v62  ;;  %v11933_v26 = vmul.f32 1.5, %v3566_v57  ;;  %v11935_v61 = vmul.f32 1.5, %v3567_v30  ;;  %v15068_v57 = vld [vmem:[#allocation53_spill] sm:$0xff] }
 0xc77   : > { %v11937_v20 = vmul.f32 1.5, %v3568_v51  ;;  %v11940_v31 = vadd.f32 %v3813_v52, %v11637_v21  ;;  %v11943_v17 = vadd.f32 %v3814_v37, %v11629_v12  ;;  %v11946_v11 = vadd.f32 %v3811_v49, %v11632_v8  ;;  %v15069_v37 = vld [vmem:[#allocation42_spill] sm:$0xff] }
 0xc78   : > { %v11949_v32 = vadd.f32 %v3812_v4, %v11634_v10  ;;  %v11952_v62 = vadd.f32 %v3815_v1, %v11664_v14  ;;  %v11955_v30 = vadd.f32 %v3816_v55, %v11666_v58  ;;  %v11958_v51 = vadd.f32 %v3817_v36, %v11669_v46  ;;  %v15070_v36 = vld [vmem:[#allocation43_spill] sm:$0xff] }
 0xc79   : > { %v11961_v29 = vadd.f32 %v3818_v13, %v11658_v19  ;;  %v3845_v6 = vmul.f32 0.25, %v11754_v47  ;;  %v11965_v44 = vadd.f32 %v3819_v3, %v11700_v16  ;;  %v11968_v18 = vadd.f32 %v3821_v24, %v11705_v2  ;;  %v15072_v19 = vld [vmem:[#allocation47_spill] sm:$0xff] }
 0xc7a   : > { %v11971_v1 = vadd.f32 %v3822_v43, %v11694_v59  ;;  %v4030_v63 = vmul.f32 0.16666667, %v11754_v47  ;;  %v3843_v39 = vmul.f32 0.25, %v11757_v56  ;;  %v4028_v53 = vmul.f32 0.16666667, %v11757_v56  ;;  %v15064_v56 = vld [vmem:[#allocation75_spill] sm:$0xff] }
 0xc7b   : > { %v3846_v35 = vmul.f32 0.25, %v11761_v27  ;;  %v4031_v42 = vmul.f32 0.16666667, %v11761_v27  ;;  %v3844_v45 = vmul.f32 0.25, %v11765_v23  ;;  %v4029_v0 = vmul.f32 0.16666667, %v11765_v23 }
 0xc7c   : > { %v11981_v54 = vmul.f32 0.25, %v15062_v50  ;;  %v11984_v22 = vmul.f32 0.16666667, %v15062_v50  ;;  %v11987_v47 = vmul.f32 0.25, %v15063_v5  ;;  %v11990_v9 = vmul.f32 0.16666667, %v15063_v5 }
 0xc7d   : > { %v11993_v48 = vmul.f32 0.25, %v15064_v56  ;;  %v11996_v27 = vmul.f32 0.16666667, %v15064_v56  ;;  %v11999_v23 = vmul.f32 0.25, %v15065_v34  ;;  %v12002_v41 = vmul.f32 0.16666667, %v15065_v34 }
 0xc7e   : > { %v12005_v60 = vadd.f32 %v3820_v25, %v15066_v15  ;;  %v12008_v40 = vmul.f32 0.25, %v15067_v7  ;;  %v12011_v38 = vmul.f32 0.16666667, %v15067_v7  ;;  %v12014_v52 = vmul.f32 0.25, %v15068_v57  ;;  %v15071_v43 = vld [vmem:[#allocation36_spill] sm:$0xff] }
 0xc7f   : > { %v12018_v55 = vmul.f32 0.16666667, %v15068_v57  ;;  %v12021_v13 = vmul.f32 0.25, %v15070_v36  ;;  %v12024_v3 = vmul.f32 0.16666667, %v15070_v36  ;;  %v12028_v50 = vmul.f32 0.25, %v15071_v43 }
 0xc80   : > { %v12032_v7 = vmul.f32 0.16666667, %v15071_v43 }
 0xd1e   : > { %v8299_v33 = vpop.f32.mrb[96].mxu1 }
 0xd1f   : > { %v3757_v49 = vadd.f32 %v15069_v37, %v8299_v33  ;;  %v3748_v4 = vpop.f32.mrb[97].mxu1 }
 0xd20   : > { %v3749_v25 = vadd.f32 %v15069_v37, %v3748_v4  ;;  %v8300_v24 = vpop.f32.mrb[98].mxu1 }
 0xd21   : > { %v3861_v5 = vmul.f32 0.25, %v3757_v49  ;;  %v4046_v56 = vmul.f32 0.16666667, %v3757_v49  ;;  %v3760_v34 = vadd.f32 %v15069_v37, %v8300_v24  ;;  %v3751_v33 = vpop.f32.mrb[99].mxu1  ;;  %v12040_v24 = vmul.f32 0.25, %v15072_v19 }
 0xd22   : > { %v3859_v57 = vmul.f32 0.25, %v3749_v25  ;;  %v4044_v2 = vmul.f32 0.16666667, %v3749_v25  ;;  %v3752_v15 = vadd.f32 %v15069_v37, %v3751_v33  ;;  %v12045_v25 = vmul.f32 0.16666667, %v15072_v19 }
 0xd23   : > { %v3877_v36 = vadd.f32 %v3861_v5, %v3845_v6  ;;  %v12035_v16 = vadd.f32 %v4046_v56, %v4030_v63  ;;  %v3862_v4 = vmul.f32 0.25, %v3760_v34  ;;  %v4047_v59 = vmul.f32 0.16666667, %v3760_v34 }
 0xd24   : > { %v3875_v46 = vadd.f32 %v3859_v57, %v3843_v39  ;;  %v12037_v58 = vadd.f32 %v4044_v2, %v4028_v53  ;;  %v3860_v14 = vmul.f32 0.25, %v3752_v15  ;;  %v4045_v49 = vmul.f32 0.16666667, %v3752_v15  ;;  %v15073_v39 = vld [vmem:[#allocation44_spill] sm:$0xff] }
 0xd25   : > { %v3893_v21 = vmul.f32 0.01, %v3877_v36  ;;  %v3878_v43 = vadd.f32 %v3862_v4, %v3846_v35  ;;  %v12042_v10 = vadd.f32 %v4047_v59, %v4031_v42  ;;  %v12050_v2 = vmul.f32 0.25, %v15073_v39 }
 0xd26   : > { %v3891_v6 = vmul.f32 0.01, %v3875_v46  ;;  %v3876_v63 = vadd.f32 %v3860_v14, %v3844_v45  ;;  %v12047_v5 = vadd.f32 %v4045_v49, %v4029_v0  ;;  %v8303_v56 = vpop.f32.mrb[100].mxu1  ;;  %v12053_v53 = vmul.f32 0.16666667, %v15073_v39 }
 0xd27   : > { %v3894_v15 = vmul.f32 0.01, %v3878_v43  ;;  %v3773_v34 = vadd.f32 %v15069_v37, %v8303_v56  ;;  %v3764_v35 = vpop.f32.mrb[101].mxu1  ;;  %v3909_v59 = vadd.f32 %v3893_v21, %v11940_v31  ;;  %v12064_v43 = vld [vmem:[%s14622_s9] ss:$0 sm:$0xff] }
 0xd28   : > { %v3892_v42 = vmul.f32 0.01, %v3876_v63  ;;  %v3765_v19 = vadd.f32 %v15069_v37, %v3764_v35  ;;  %v8304_v46 = vpop.f32.mrb[102].mxu1  ;;  %v3907_v14 = vadd.f32 %v3891_v6, %v11946_v11 }
 0xd29   : > { %v3910_v45 = vadd.f32 %v3894_v15, %v11943_v17  ;;  %v3865_v0 = vmul.f32 0.25, %v3773_v34  ;;  %v4050_v33 = vmul.f32 0.16666667, %v3773_v34  ;;  %v3776_v57 = vadd.f32 %v15069_v37, %v8304_v46  ;;  %v3767_v36 = vpop.f32.mrb[103].mxu1 }
 0xd2a   : > { %v3863_v4 = vmul.f32 0.25, %v3765_v19  ;;  %v4048_v49 = vmul.f32 0.16666667, %v3765_v19  ;;  %v3768_v21 = vadd.f32 %v12064_v43, %v3767_v36  ;;  %v3908_v31 = vadd.f32 %v3892_v42, %v11949_v32  ;;  %v15074_v32 = vld [vmem:[#allocation64_spill] sm:$0xff] }
 0xd2b   : > { %v3924_v63 = vpack.c.bf16 %v3910_v45, %v3909_v59  ;;  %v3881_v11 = vadd.f32 %v3865_v0, %v11981_v54  ;;  %v12070_v17 = vadd.f32 %v4050_v33, %v11984_v22  ;;  %v3866_v6 = vmul.f32 0.25, %v3776_v57 }
 0xd2c   : > { %v3879_v37 = vadd.f32 %v3863_v4, %v11987_v47  ;;  %v12074_v56 = vadd.f32 %v4048_v49, %v11990_v9  ;;  %v4051_v39 = vmul.f32 0.16666667, %v3776_v57  ;;  %v3864_v15 = vmul.f32 0.25, %v3768_v21 }
 0xd2d   : > { %v3897_v34 = vmul.f32 0.01, %v3881_v11  ;;  %v3882_v35 = vadd.f32 %v3866_v6, %v11993_v48  ;;  %v4049_v19 = vmul.f32 0.16666667, %v3768_v21  ;;  %v3923_v46 = vpack.c.bf16 %v3908_v31, %v3907_v14  ;;  %v15075_v11 = vld [vmem:[#allocation34_spill] sm:$0xff] }
 0xd2e   : > { %v12078_v59 = vmul.f32 0.25, %v15074_v32  ;;  %v3895_v54 = vmul.f32 0.01, %v3879_v37  ;;  %v12081_v22 = vadd.f32 %v4051_v39, %v11996_v27  ;;  %v3880_v42 = vadd.f32 %v3864_v15, %v11999_v23  ;;  %v8307_v47 = vpop.f32.mrb[104].mxu1  ;;  %v15076_v15 = vld [vmem:[#allocation72_spill] sm:$0xff] }
 0xd2f   : > { %v12085_v9 = vmul.f32 0.16666667, %v15074_v32  ;;  %v3898_v45 = vmul.f32 0.01, %v3882_v35  ;;  %v12088_v0 = vadd.f32 %v4049_v19, %v12002_v41  ;;  %v3789_v48 = vadd.f32 %v12064_v43, %v8307_v47  ;;  %8329 = vmatprep.mubr.bf16.mxu0 %v3923_v46  ;;  %v3780_v14 = vpop.f32.mrb[105].mxu1 }
 0xd30   : > { %v3896_v33 = vmul.f32 0.01, %v3880_v42  ;;  %v3781_v57 = vadd.f32 %v12064_v43, %v3780_v14  ;;  %8330 = vmatmul.mubr.bf16.vlgmr.msra.gmra.mrb[112].mxu0 %v3924_v63  ;;  %v8308_v27 = vpop.f32.mrb[106].mxu1  ;;  %v3911_v36 = vadd.f32 %v3895_v54, %v11952_v62  ;;  %v3913_v23 = vadd.f32 %v3897_v34, %v11958_v51  ;;  %v15078_v14 = vld [vmem:[#allocation76_spill] sm:$0xff] }
 0xd31   : > { %v3869_v4 = vmul.f32 0.25, %v3789_v48  ;;  %v4054_v49 = vmul.f32 0.16666667, %v3789_v48  ;;  %v3792_v21 = vadd.f32 %v12064_v43, %v8308_v27  ;;  %v3783_v31 = vpop.f32.mrb[107].mxu1  ;;  %v3914_v41 = vadd.f32 %v3898_v45, %v11961_v29  ;;  %8378 = vmatpush3.bf16.msra.mxu0 %v15075_v11  ;;  %v15077_v48 = vld [vmem:[#allocation68_spill] sm:$0xff] }
 0xd32   : > { %v3867_v6 = vmul.f32 0.25, %v3781_v57  ;;  %v4052_v37 = vmul.f32 0.16666667, %v3781_v57  ;;  %v3784_v39 = vadd.f32 %v12064_v43, %v3783_v31  ;;  %v3912_v63 = vadd.f32 %v3896_v33, %v11955_v30  ;;  %8379 = vmatprep.subr.bf16.mxu0 %v15076_v15 }
 0xd33   : > { %v3885_v62 = vadd.f32 %v3869_v4, %v12008_v40  ;;  %v12102_v51 = vadd.f32 %v4054_v49, %v12011_v38  ;;  %v3870_v34 = vmul.f32 0.25, %v3792_v21  ;;  %v4055_v35 = vmul.f32 0.16666667, %v3792_v21 }
 0xd34   : > { %v3883_v19 = vadd.f32 %v3867_v6, %v12014_v52  ;;  %v12106_v29 = vadd.f32 %v4052_v37, %v12018_v55  ;;  %v3868_v46 = vmul.f32 0.25, %v3784_v39  ;;  %v4053_v32 = vmul.f32 0.16666667, %v3784_v39 }
 0xd35   : > { %v3901_v54 = vmul.f32 0.01, %v3885_v62  ;;  %v3886_v42 = vadd.f32 %v3870_v34, %v12021_v13  ;;  %v12110_v30 = vadd.f32 %v4055_v35, %v12024_v3  ;;  %v3925_v47 = vpack.c.bf16 %v3912_v63, %v3911_v36  ;;  %8380 = vmatpush3.bf16.msra.mxu0 %v15076_v15  ;;  %v15079_v15 = vld [vmem:[#allocation52_spill] sm:$0xff] }
 0xd36   : > { %v3899_v40 = vmul.f32 0.01, %v3883_v19  ;;  %v3884_v38 = vadd.f32 %v3868_v46, %v12028_v50  ;;  %v12115_v45 = vadd.f32 %v4053_v32, %v12032_v7  ;;  %v8311_v52 = vpop.f32.mrb[108].mxu1  ;;  %v3926_v55 = vpack.c.bf16 %v3914_v41, %v3913_v23  ;;  %8381 = vmatprep.subr.bf16.mxu0 %v15077_v48 }
 0xd37   : > { %v3856_v33 = vmul.f32 0.25, %v15078_v14  ;;  %v4041_v13 = vmul.f32 0.16666667, %v15078_v14  ;;  %v3902_v57 = vmul.f32 0.01, %v3886_v42  ;;  %v3805_v3 = vadd.f32 %v12064_v43, %v8311_v52  ;;  %8333 = vmatprep.mubr.bf16.mxu0 %v3925_v47  ;;  %v3796_v27 = vpop.f32.mrb[109].mxu1 }
 0xd38   : > { %v3900_v36 = vmul.f32 0.01, %v3884_v38  ;;  %v3797_v4 = vadd.f32 %v12064_v43, %v3796_v27  ;;  %8334 = vmatmul.mubr.bf16.gmra.mrb[116].mxu0 %v3926_v55  ;;  %v8312_v50 = vpop.f32.mrb[110].mxu1  ;;  %v3915_v7 = vadd.f32 %v3899_v40, %v11965_v44  ;;  %v3917_v23 = vadd.f32 %v3901_v54, %v11968_v18  ;;  %v15081_v38 = vld [vmem:[#allocation41_spill] sm:$0xff]  ;;  %v15082_v55 = vld [vmem:[#allocation50_spill] sm:$0xff] }
 0xd39   : > { %v3873_v49 = vmul.f32 0.25, %v3805_v3  ;;  %v4058_v21 = vmul.f32 0.16666667, %v3805_v3  ;;  %v3808_v31 = vadd.f32 %v12064_v43, %v8312_v50  ;;  %v3799_v41 = vpop.f32.mrb[111].mxu1  ;;  %v3918_v11 = vadd.f32 %v3902_v57, %v11971_v1  ;;  %8382 = vmatpush3.bf16.msra.mxu0 %v15077_v48  ;;  %v15083_v48 = vld [vmem:[#allocation35_spill] sm:$0xff]  ;;  %v15084_v57 = vld [vmem:[#allocation46_spill] sm:$0xff] }
 0xd3a   : > { %v3871_v6 = vmul.f32 0.25, %v3797_v4  ;;  %v4056_v37 = vmul.f32 0.16666667, %v3797_v4  ;;  %v3800_v39 = vadd.f32 %v12064_v43, %v3799_v41  ;;  %v3916_v63 = vadd.f32 %v3900_v36, %v12005_v60  ;;  %8383 = vmatprep.subr.bf16.mxu0 %v15079_v15  ;;  %v15085_v4 = vld [vmem:[#allocation71_spill] sm:$0xff] }
 0xd3b   : > { %v3889_v44 = vadd.f32 %v3873_v49, %v12040_v24  ;;  %v12132_v18 = vadd.f32 %v4058_v21, %v12045_v25  ;;  %v3874_v62 = vmul.f32 0.25, %v3808_v31  ;;  %v4059_v34 = vmul.f32 0.16666667, %v3808_v31 }
 0xd3c   : > { %v3887_v35 = vadd.f32 %v3871_v6, %v12050_v2  ;;  %v12136_v1 = vadd.f32 %v4056_v37, %v12053_v53  ;;  %v3872_v19 = vmul.f32 0.25, %v3800_v39  ;;  %v4057_v46 = vmul.f32 0.16666667, %v3800_v39  ;;  %v15080_v2 = vld [vmem:[#allocation78_spill] sm:$0xff] }
 0xd3d   : > { %v3905_v32 = vmul.f32 0.01, %v3889_v44  ;;  %v3890_v54 = vadd.f32 %v3874_v62, %v12078_v59  ;;  %v12140_v60 = vadd.f32 %v4059_v34, %v12085_v9  ;;  %v3927_v42 = vpack.c.bf16 %v3916_v63, %v3915_v7  ;;  %8384 = vmatpush3.bf16.msra.mxu0 %v15079_v15 }
 0xd3e   : > { %v3903_v24 = vmul.f32 0.01, %v3887_v35  ;;  %v3888_v25 = vadd.f32 %v3872_v19, %v3856_v33  ;;  %v12143_v47 = vadd.f32 %v4057_v46, %v4041_v13  ;;  %v3928_v40 = vpack.c.bf16 %v3918_v11, %v3917_v23  ;;  %8385 = vmatprep.subr.bf16.mxu0 %v15080_v2 }
 0xd3f   : > { %v3906_v53 = vmul.f32 0.01, %v3890_v54  ;;  %8337 = vmatprep.mubr.bf16.mxu0 %v3927_v42  ;;  %v3841_v52 = vadd.f32 %v11935_v61, %v15081_v38  ;;  %v3842_v59 = vadd.f32 %v11937_v20, %v15082_v55  ;;  %v3839_v14 = vadd.f32 %v11931_v28, %v15083_v48  ;;  %v15086_v20 = vld [vmem:[#allocation54_spill] sm:$0xff]  ;;  %v15087_v28 = vld [vmem:[#allocation57_spill] sm:$0xff]  ;;  %v15089_v54 = vld [vmem:[#allocation56_spill] sm:$0xff] }
 0xd40   : > { %v3904_v9 = vmul.f32 0.01, %v3888_v25  ;;  %8338 = vmatmul.mubr.bf16.gmra.mrb[120].mxu0 %v3928_v40  ;;  %v3840_v33 = vadd.f32 %v11933_v26, %v15084_v57  ;;  %v12161_v26 = vld [vmem:[#allocation6] sm:$0xff]   ;;  %v4111_v42 = vadd.f32 %v15089_v54, %v11629_v12 }
 0xd41   : > { %v3921_v13 = vadd.f32 %v3905_v32, %v3841_v52  ;;  %v3922_v3 = vadd.f32 %v3906_v53, %v3842_v59  ;;  %8386 = vmatpush3.bf16.msra.mxu0 %v15080_v2  ;;  %v3919_v27 = vadd.f32 %v3903_v24, %v3839_v14  ;;  %15088 = vst [vmem:[#allocation60_spill] sm:$0xff] %v12161_v26  ;;  %v15091_v53 = vld [vmem:[#allocation74_spill] sm:$0xff]  ;;  %v15094_v14 = vld [vmem:[#allocation45_spill] sm:$0xff] }
 0xd42   : > { %v3920_v36 = vadd.f32 %v3904_v9, %v3840_v33  ;;  %8387 = vmatprep.subr.bf16.mxu0 %v15085_v4 }
 0xd43   : > { %v3930_v61 = vpack.c.bf16 %v3922_v3, %v3921_v13 }
 0xd44   : > { %v3929_v50 = vpack.c.bf16 %v3920_v36, %v3919_v27 }
 0xd45   : > { %8388 = vmatpush3.bf16.msra.mxu0 %v15085_v4 }
 0xd46   : > { %8341 = vmatprep.mubr.bf16.mxu0 %v3929_v50  ;;  %8389 = vmatprep.subr.bf16.mxu0 %v15086_v20 }
 0xd48   : > { %8342 = vmatmul.mubr.bf16.gmra.mrb[124].mxu0 %v3930_v61 }
 0xd49   : > { %8390 = vmatpush3.bf16.msra.mxu0 %v15086_v20 }
 0xd4a   : > { %8391 = vmatprep.subr.bf16.mxu0 %v15087_v28 }
 0xd4d   : > { %8392 = vmatpush3.bf16.msra.mxu0 %v15087_v28 }
 0xd4e   : > { %8441 = vmatprep.subr.bf16.mxu0 %v12161_v26 }
 0xe03   : > { %v8331_v7 = vpop.f32.mrb[112].mxu0 }
 0xe04   : > { %v3974_v23 = vadd.f32 %v12064_v43, %v8331_v7  ;;  %v3965_v49 = vpop.f32.mrb[113].mxu0 }
 0xe05   : > { %v3966_v21 = vadd.f32 %v12064_v43, %v3965_v49  ;;  %v8332_v31 = vpop.f32.mrb[114].mxu0 }
 0xe06   : > { %v4078_v41 = vmul.f32 0.6666667, %v3974_v23  ;;  %v3977_v11 = vadd.f32 %v12064_v43, %v8332_v31  ;;  %v3968_v6 = vpop.f32.mrb[115].mxu0 }
 0xe07   : > { %v4076_v37 = vmul.f32 0.6666667, %v3966_v21  ;;  %v3969_v39 = vadd.f32 %v12064_v43, %v3968_v6 }
 0xe08   : > { %v4094_v63 = vadd.f32 %v4078_v41, %v12035_v16  ;;  %v4079_v15 = vmul.f32 0.6666667, %v3977_v11  ;;  %v15090_v16 = vld [vmem:[#allocation66_spill] sm:$0xff] }
 0xe09   : > { %v4092_v44 = vadd.f32 %v4076_v37, %v12037_v58  ;;  %v4077_v62 = vmul.f32 0.6666667, %v3969_v39  ;;  %v4108_v2 = vadd.f32 %v15090_v16, %v11632_v8  ;;  %v15092_v58 = vld [vmem:[#allocation39_spill] sm:$0xff]  ;;  %v15097_v39 = vld [vmem:[#allocation65_spill] sm:$0xff] }
 0xe0a   : > { %v4095_v34 = vadd.f32 %v4079_v15, %v12042_v10  ;;  %v4126_v32 = vmul.f32 0.01, %v4094_v63  ;;  %v4109_v52 = vadd.f32 %v15092_v58, %v15091_v53  ;;  %v12214_v58 = vld [vmem:[#allocation6 + $0x8] sm:$0xff]  }
 0xe0b   : > { %v4124_v35 = vmul.f32 0.01, %v4092_v44  ;;  %v4093_v19 = vadd.f32 %v4077_v62, %v12047_v5  ;;  %v8335_v46 = vpop.f32.mrb[116].mxu0  ;;  %v15093_v5 = vld [vmem:[#allocation32_spill] sm:$0xff]  ;;  %v15099_v62 = vld [vmem:[#allocation62_spill] sm:$0xff]  ;;  %15106 = vst [vmem:[#allocation40_spill] sm:$0xff] %v12214_v58 }
 0xe0c   : > { %v4127_v24 = vmul.f32 0.01, %v4095_v34  ;;  %v3990_v25 = vadd.f32 %v12064_v43, %v8335_v46  ;;  %v3981_v40 = vpop.f32.mrb[117].mxu0  ;;  %v4110_v33 = vadd.f32 %v15094_v14, %v15093_v5  ;;  %v15100_v34 = vld [vmem:[#allocation77_spill] sm:$0xff] }
 0xe0d   : > { %v4125_v59 = vmul.f32 0.01, %v4093_v19  ;;  %v3982_v10 = vadd.f32 %v12064_v43, %v3981_v40  ;;  %v8336_v9 = vpop.f32.mrb[118].mxu0  ;;  %v12185_v36 = vadd.f32 %v4124_v35, %v4108_v2  ;;  %v15101_v35 = vld [vmem:[#allocation67_spill] sm:$0xff]  ;;  %v15102_v19 = vld [vmem:[#allocation49_spill] sm:$0xff] }
 0xe0e   : > { %v12182_v13 = vadd.f32 %v4127_v24, %v4111_v42  ;;  %v4082_v12 = vmul.f32 0.6666667, %v3990_v25  ;;  %v3993_v3 = vadd.f32 %v12064_v43, %v8336_v9  ;;  %v3984_v27 = vpop.f32.mrb[119].mxu0  ;;  %v12190_v50 = vadd.f32 %v4126_v32, %v4110_v33  ;;  %v15103_v42 = vld [vmem:[#allocation51_spill] sm:$0xff]  ;;  %v15104_v24 = vld [vmem:[#allocation69_spill] sm:$0xff] }
 0xe0f   : > { %v12187_v4 = vadd.f32 %v4125_v59, %v4109_v52  ;;  %v4080_v8 = vmul.f32 0.6666667, %v3982_v10  ;;  %v3985_v61 = vadd.f32 %v12064_v43, %v3984_v27  ;;  %v4113_v46 = vadd.f32 %v15102_v19, %v15101_v35 }
 0xe10   : > { %15096 = vst [vmem:[#allocation75_spill] sm:$0xff] %v12190_v50  ;;  %v4098_v20 = vadd.f32 %v4082_v12, %v12070_v17  ;;  %v4083_v28 = vmul.f32 0.6666667, %v3993_v3  ;;  %v4287_v31 = vpack.c.bf16 %v12182_v13, %v12190_v50  ;;  %v15098_v17 = vld [vmem:[#allocation63_spill] sm:$0xff]  ;;  %v4114_v25 = vadd.f32 %v15104_v24, %v15103_v42 }
 0xe11   : > { %15095 = vst [vmem:[#allocation59_spill] sm:$0xff] %v12187_v4  ;;  %v4096_v7 = vadd.f32 %v4080_v8, %v12074_v56  ;;  %v4081_v23 = vmul.f32 0.6666667, %v3985_v61  ;;  %v4286_v49 = vpack.c.bf16 %v12187_v4, %v12185_v36  ;;  %v4115_v63 = vadd.f32 %v15098_v17, %v15097_v39  ;;  %v15115_v39 = vld [vmem:[#allocation73_spill] sm:$0xff]  ;;  %v15116_v17 = vld [vmem:[#allocation38_spill] sm:$0xff] }
 0xe12   : > { %v4099_v21 = vadd.f32 %v4083_v28, %v12081_v22  ;;  %v4130_v37 = vmul.f32 0.01, %v4098_v20  ;;  %v4112_v22 = vadd.f32 %v15100_v34, %v15099_v62  ;;  %v12232_v20 = vld [vmem:[#allocation6 + $0x10] sm:$0xff]   ;;  %v15118_v62 = vld [vmem:[#allocation33_spill] sm:$0xff] }
 0xe13   : > { %v4128_v41 = vmul.f32 0.01, %v4096_v7  ;;  %v4097_v11 = vadd.f32 %v4081_v23, %v12088_v0  ;;  %v8339_v6 = vpop.f32.mrb[120].mxu0  ;;  %8361 = vmatprep.mubr.bf16.mxu1 %v4286_v49  ;;  %15110 = vst [vmem:[#allocation36_spill] sm:$0xff] %v12232_v20  ;;  %v15111_v23 = vld [vmem:[#allocation55_spill] sm:$0xff]  ;;  %v15112_v49 = vld [vmem:[#allocation58_spill] sm:$0xff] }
 0xe14   : > { %v4131_v15 = vmul.f32 0.01, %v4099_v21  ;;  %v4006_v56 = vadd.f32 %v12064_v43, %v8339_v6  ;;  %v3997_v44 = vpop.f32.mrb[121].mxu0  ;;  %8362 = vmatmul.mubr.bf16.vlgmr.msra.gmra.mrb[112].mxu1 %v4287_v31  ;;  %v12222_v5 = vadd.f32 %v4130_v37, %v4114_v25  ;;  %v4119_v21 = vadd.f32 %v15112_v49, %v15111_v23  ;;  %v15114_v6 = vld [vmem:[#allocation70_spill] sm:$0xff]  ;;  %v15128_v23 = vld [vmem:[#allocation80_spill] sm:$0xff] }
 0xe15   : > { %v4129_v32 = vmul.f32 0.01, %v4097_v11  ;;  %v3998_v0 = vadd.f32 %v12064_v43, %v3997_v44  ;;  %v8340_v54 = vpop.f32.mrb[122].mxu0  ;;  %8410 = vmatpush3.bf16.msra.mxu1 %v12161_v26  ;;  %v12217_v52 = vadd.f32 %v4128_v41, %v4112_v22  ;;  %v15113_v11 = vld [vmem:[#allocation61_spill] sm:$0xff]  ;;  %v15117_v44 = vld [vmem:[#allocation48_spill] sm:$0xff]  ;;  %v4122_v49 = vadd.f32 %v15128_v23, %v15081_v38 }
 0xe16   : > { %v12211_v40 = vadd.f32 %v4131_v15, %v4115_v63  ;;  %v4086_v16 = vmul.f32 0.6666667, %v4006_v56  ;;  %v4009_v2 = vadd.f32 %v12064_v43, %v8340_v54  ;;  %v4000_v53 = vpop.f32.mrb[123].mxu0  ;;  %8411 = vmatprep.subr.bf16.mxu1 %v12214_v58  ;;  %15109 = vst [vmem:[#allocation43_spill] sm:$0xff] %v12222_v5  ;;  %v4116_v37 = vadd.f32 %v15114_v6, %v15113_v11 }
 0xe17   : > { %15107 = vst [vmem:[#allocation53_spill] sm:$0xff] %v12217_v52  ;;  %v12219_v59 = vadd.f32 %v4129_v32, %v4113_v46  ;;  %v4084_v10 = vmul.f32 0.6666667, %v3998_v0  ;;  %v4001_v9 = vadd.f32 %v12064_v43, %v4000_v53  ;;  %v4117_v63 = vadd.f32 %v15116_v17, %v15115_v39  ;;  %v12250_v32 = vld [vmem:[#allocation6 + $0x18] sm:$0xff]  }
 0xe18   : > { %15105 = vst [vmem:[#allocation37_spill] sm:$0xff] %v12211_v40  ;;  %v4102_v14 = vadd.f32 %v4086_v16, %v12102_v51  ;;  %v4087_v33 = vmul.f32 0.6666667, %v4009_v2  ;;  %v4289_v61 = vpack.c.bf16 %v12211_v40, %v12222_v5  ;;  %v4118_v34 = vadd.f32 %v15118_v62, %v15117_v44  ;;  %15120 = vst [vmem:[#allocation44_spill] sm:$0xff] %v12250_v32 }
 0xe19   : > { %15108 = vst [vmem:[#allocation42_spill] sm:$0xff] %v12219_v59  ;;  %v4100_v12 = vadd.f32 %v4084_v10, %v12106_v29  ;;  %v4085_v3 = vmul.f32 0.6666667, %v4001_v9  ;;  %v4288_v27 = vpack.c.bf16 %v12219_v59, %v12217_v52  ;;  %8412 = vmatpush3.bf16.msra.mxu1 %v12214_v58 }
 0xe1a   : > { %v4103_v8 = vadd.f32 %v4087_v33, %v12110_v30  ;;  %8413 = vmatprep.subr.bf16.mxu1 %v12232_v20  ;;  %v4134_v29 = vmul.f32 0.01, %v4102_v14 }
 0xe1b   : > { %v4132_v28 = vmul.f32 0.01, %v4100_v12  ;;  %v4101_v51 = vadd.f32 %v4085_v3, %v12115_v45  ;;  %v8343_v7 = vpop.f32.mrb[124].mxu0  ;;  %8365 = vmatprep.mubr.bf16.mxu1 %v4288_v27  ;;  %v12268_v12 = vld [vmem:[#allocation6 + $0x20] sm:$0xff]   ;;  %v15125_v27 = vld [vmem:[#allocation82_spill] sm:$0xff] }
 0xe1c   : > { %v4135_v31 = vmul.f32 0.01, %v4103_v8  ;;  %v4022_v41 = vadd.f32 %v12064_v43, %v8343_v7  ;;  %v4013_v30 = vpop.f32.mrb[125].mxu0  ;;  %8366 = vmatmul.mubr.bf16.gmra.mrb[116].mxu1 %v4289_v61  ;;  %v12258_v25 = vadd.f32 %v4134_v29, %v4118_v34  ;;  %15124 = vst [vmem:[#allocation68_spill] sm:$0xff] %v12268_v12  ;;  %v4123_v8 = vadd.f32 %v15125_v27, %v15082_v55 }
 0xe1d   : > { %v4133_v15 = vmul.f32 0.01, %v4101_v51  ;;  %v4014_v45 = vadd.f32 %v12064_v43, %v4013_v30  ;;  %v8344_v56 = vpop.f32.mrb[126].mxu0  ;;  %8414 = vmatpush3.bf16.msra.mxu1 %v12232_v20  ;;  %v12253_v0 = vadd.f32 %v4132_v28, %v4116_v37  ;;  %v15126_v28 = vld [vmem:[#allocation79_spill] sm:$0xff]  ;;  %v15127_v51 = vld [vmem:[#allocation81_spill] sm:$0xff] }
 0xe1e   : > { %v12247_v22 = vadd.f32 %v4135_v31, %v4119_v21  ;;  %v4090_v35 = vmul.f32 0.6666667, %v4022_v41  ;;  %v4025_v19 = vadd.f32 %v12064_v43, %v8344_v56  ;;  %v4016_v46 = vpop.f32.mrb[127].mxu0  ;;  %8415 = vmatprep.subr.bf16.mxu1 %v12250_v32  ;;  %15123 = vst [vmem:[#allocation72_spill] sm:$0xff] %v12258_v25  ;;  %v4121_v7 = vadd.f32 %v15127_v51, %v15084_v57  ;;  %v12283_v21 = vld [vmem:[#allocation6 + $0x28] sm:$0xff]   ;;  %v12297_v41 = vld [vmem:[#allocation6 + $0x30] sm:$0xff]  }
 0xe1f   : > { %15121 = vst [vmem:[#allocation64_spill] sm:$0xff] %v12253_v0  ;;  %v12255_v54 = vadd.f32 %v4133_v15, %v4117_v63  ;;  %v4088_v42 = vmul.f32 0.6666667, %v4014_v45  ;;  %v4017_v24 = vadd.f32 %v12064_v43, %v4016_v46  ;;  %15130 = vst [vmem:[#allocation52_spill] sm:$0xff] %v12283_v21  ;;  %v12301_v30 = vld [vmem:[#allocation6 + $0x38] sm:$0xff]  }
 0xe20   : > { %15119 = vst [vmem:[#allocation47_spill] sm:$0xff] %v12247_v22  ;;  %v4106_v16 = vadd.f32 %v4090_v35, %v12132_v18  ;;  %v4091_v2 = vmul.f32 0.6666667, %v4025_v19  ;;  %v4291_v33 = vpack.c.bf16 %v12247_v22, %v12258_v25  ;;  %15134 = vst [vmem:[#allocation35_spill] sm:$0xff] %v12297_v41 }
 0xe21   : > { %15122 = vst [vmem:[#allocation34_spill] sm:$0xff] %v12255_v54  ;;  %v4104_v53 = vadd.f32 %v4088_v42, %v12136_v1  ;;  %v4089_v10 = vmul.f32 0.6666667, %v4017_v24  ;;  %v4290_v9 = vpack.c.bf16 %v12255_v54, %v12253_v0  ;;  %8416 = vmatpush3.bf16.msra.mxu1 %v12250_v32  ;;  %15135 = vst [vmem:[#allocation46_spill] sm:$0xff] %v12301_v30 }
 0xe22   : > { %v4107_v14 = vadd.f32 %v4091_v2, %v12140_v60  ;;  %8417 = vmatprep.subr.bf16.mxu1 %v12268_v12  ;;  %v4138_v1 = vmul.f32 0.01, %v4106_v16  ;;  %v4120_v60 = vadd.f32 %v15126_v28, %v15083_v48 }
 0xe23   : > { %v4136_v3 = vmul.f32 0.01, %v4104_v53  ;;  %v4105_v18 = vadd.f32 %v4089_v10, %v12143_v47  ;;  %8369 = vmatprep.mubr.bf16.mxu1 %v4290_v9 }
 0xe24   : > { %v4139_v61 = vmul.f32 0.01, %v4107_v14  ;;  %8370 = vmatmul.mubr.bf16.gmra.mrb[120].mxu1 %v4291_v33  ;;  %v12290_v48 = vadd.f32 %v4138_v1, %v4122_v49 }
 0xe25   : > { %v4137_v29 = vmul.f32 0.01, %v4105_v18  ;;  %8418 = vmatpush3.bf16.msra.mxu1 %v12268_v12  ;;  %v12286_v55 = vadd.f32 %v4136_v3, %v4120_v60 }
 0xe26   : > { %v12281_v47 = vadd.f32 %v4139_v61, %v4123_v8  ;;  %8419 = vmatprep.subr.bf16.mxu1 %v12283_v21  ;;  %15133 = vst [vmem:[#allocation50_spill] sm:$0xff] %v12290_v48 }
 0xe27   : > { %15131 = vst [vmem:[#allocation78_spill] sm:$0xff] %v12286_v55  ;;  %v12288_v31 = vadd.f32 %v4137_v29, %v4121_v7 }
 0xe28   : > { %15129 = vst [vmem:[#allocation76_spill] sm:$0xff] %v12281_v47  ;;  %v4293_v38 = vpack.c.bf16 %v12281_v47, %v12290_v48 }
 0xe29   : > { %15132 = vst [vmem:[#allocation41_spill] sm:$0xff] %v12288_v31  ;;  %v4292_v57 = vpack.c.bf16 %v12288_v31, %v12286_v55  ;;  %8420 = vmatpush3.bf16.msra.mxu1 %v12283_v21 }
 0xe2a   : > { %8421 = vmatprep.subr.bf16.mxu1 %v12297_v41 }
 0xe2b   : > { %8373 = vmatprep.mubr.bf16.mxu1 %v4292_v57 }
 0xe2c   : > { %8374 = vmatmul.mubr.bf16.gmra.mrb[124].mxu1 %v4293_v38 }
 0xe2d   : > { %8422 = vmatpush3.bf16.msra.mxu1 %v12297_v41 }
 0xe2e   : > { %8423 = vmatprep.subr.bf16.mxu1 %v12301_v30 }
 0xe31   : > { %8424 = vmatpush3.bf16.msra.mxu1 %v12301_v30 }
 0xe32   : > { %8473 = vmatprep.subr.bf16.mxu1 %v12161_v26 }
 0xee7   : > { %v8363_v11 = vpop.f32.mrb[112].mxu1 }
 0xee8   : > { %v12307_v6 = vadd.f32 %v12064_v43, %v8363_v11  ;;  %v4328_v37 = vpop.f32.mrb[113].mxu1 }
 0xee9   : > { %v12310_v39 = vadd.f32 %v12064_v43, %v4328_v37  ;;  %v8364_v17 = vpop.f32.mrb[114].mxu1 }
 0xeea   : > { %v4393_v63 = vmul.f32 0.01, %v12307_v6  ;;  %v12314_v15 = vadd.f32 %v12064_v43, %v8364_v17  ;;  %v4331_v45 = vpop.f32.mrb[115].mxu1 }
 0xeeb   : > { %v4391_v56 = vmul.f32 0.01, %v12310_v39  ;;  %v12318_v44 = vadd.f32 %v12064_v43, %v4331_v45 }
 0xeec   : > { %v4394_v62 = vmul.f32 0.01, %v12314_v15  ;;  %v4409_v35 = vadd.f32 %v4393_v63, %v12190_v50 }
 0xeed   : > { %v4392_v34 = vmul.f32 0.01, %v12318_v44  ;;  %v4407_v42 = vadd.f32 %v4391_v56, %v12185_v36 }
 0xeee   : > { %v4410_v19 = vadd.f32 %v4394_v62, %v12182_v13 }
 0xeef   : > { %v8367_v46 = vpop.f32.mrb[116].mxu1  ;;  %v4408_v24 = vadd.f32 %v4392_v34, %v12187_v4 }
 0xef0   : > { %v4424_v16 = vpack.c.bf16 %v4410_v19, %v4409_v35  ;;  %v12327_v2 = vadd.f32 %v12064_v43, %v8367_v46  ;;  %v4344_v53 = vpop.f32.mrb[117].mxu1 }
 0xef1   : > { %v12330_v10 = vadd.f32 %v12064_v43, %v4344_v53  ;;  %v8368_v9 = vpop.f32.mrb[118].mxu1  ;;  %v4423_v14 = vpack.c.bf16 %v4408_v24, %v4407_v42 }
 0xef2   : > { %15136 = vst [vmem:[#allocation71_spill] sm:$0xff] %v12327_v2  ;;  %v4397_v33 = vmul.f32 0.01, %v12327_v2  ;;  %v12334_v3 = vadd.f32 %v12064_v43, %v8368_v9  ;;  %v4347_v18 = vpop.f32.mrb[119].mxu1 }
 0xef3   : > { %15137 = vst [vmem:[#allocation54_spill] sm:$0xff] %v12330_v10  ;;  %v4395_v1 = vmul.f32 0.01, %v12330_v10  ;;  %v12338_v27 = vadd.f32 %v12064_v43, %v4347_v18  ;;  %8393 = vmatprep.mubr.bf16.mxu0 %v4423_v14 }
 0xef4   : > { %15138 = vst [vmem:[#allocation57_spill] sm:$0xff] %v12334_v3  ;;  %v4398_v8 = vmul.f32 0.01, %v12334_v3  ;;  %8394 = vmatmul.mubr.bf16.vlgmr.msra.gmra.mrb[128].mxu0 %v4424_v16  ;;  %v4413_v28 = vadd.f32 %v4397_v33, %v12222_v5 }
 0xef5   : > { %15139 = vst [vmem:[#allocation56_spill] sm:$0xff] %v12338_v27  ;;  %v4396_v61 = vmul.f32 0.01, %v12338_v27  ;;  %8442 = vmatpush3.bf16.msra.mxu0 %v12161_v26  ;;  %v4411_v7 = vadd.f32 %v4395_v1, %v12217_v52 }
 0xef6   : > { %v4414_v60 = vadd.f32 %v4398_v8, %v12211_v40  ;;  %8443 = vmatprep.subr.bf16.mxu0 %v12214_v58 }
 0xef7   : > { %v8371_v51 = vpop.f32.mrb[120].mxu1  ;;  %v4412_v29 = vadd.f32 %v4396_v61, %v12219_v59 }
 0xef8   : > { %v12349_v23 = vadd.f32 %v12064_v43, %v8371_v51  ;;  %v4360_v49 = vpop.f32.mrb[121].mxu1  ;;  %v4426_v57 = vpack.c.bf16 %v4414_v60, %v4413_v28 }
 0xef9   : > { %v12352_v38 = vadd.f32 %v12064_v43, %v4360_v49  ;;  %v8372_v11 = vpop.f32.mrb[122].mxu1  ;;  %v4425_v37 = vpack.c.bf16 %v4412_v29, %v4411_v7  ;;  %8444 = vmatpush3.bf16.msra.mxu0 %v12214_v58  ;;  %v7447_v58 = vld [vmem:[%s9410_s18 + $0x170] sm:$0xff]  }
 0xefa   : > { %15140 = vst [vmem:[#allocation66_spill] sm:$0xff] %v12349_v23  ;;  %v4401_v17 = vmul.f32 0.01, %v12349_v23  ;;  %v12357_v63 = vadd.f32 %v12064_v43, %v8372_v11  ;;  %v4363_v45 = vpop.f32.mrb[123].mxu1  ;;  %8445 = vmatprep.subr.bf16.mxu0 %v12232_v20 }
 0xefb   : > { %15141 = vst [vmem:[#allocation74_spill] sm:$0xff] %v12352_v38  ;;  %v4399_v56 = vmul.f32 0.01, %v12352_v38  ;;  %v12362_v62 = vadd.f32 %v12064_v43, %v4363_v45  ;;  %8397 = vmatprep.mubr.bf16.mxu0 %v4425_v37  ;;  %v7434_v45 = vld [vmem:[%s9404_s10 + $0x148] sm:$0xff]  }
 0xefc   : > { %15142 = vst [vmem:[#allocation39_spill] sm:$0xff] %v12357_v63  ;;  %v4402_v34 = vmul.f32 0.01, %v12357_v63  ;;  %8398 = vmatmul.mubr.bf16.gmra.mrb[132].mxu0 %v4426_v57  ;;  %v4417_v19 = vadd.f32 %v4401_v17, %v12258_v25 }
 0xefd   : > { %15143 = vst [vmem:[#allocation32_spill] sm:$0xff] %v12362_v62  ;;  %v4400_v35 = vmul.f32 0.01, %v12362_v62  ;;  %8446 = vmatpush3.bf16.msra.mxu0 %v12232_v20  ;;  %v4415_v24 = vadd.f32 %v4399_v56, %v12253_v0  ;;  %v7433_v56 = vld [vmem:[%s9404_s10 + $0x140] sm:$0xff]  }
 0xefe   : > { %v4418_v46 = vadd.f32 %v4402_v34, %v12247_v22  ;;  %8447 = vmatprep.subr.bf16.mxu0 %v12250_v32  ;;  %v7169_v34 = vunpack.c.l.bf16 %v7434_v45 }
 0xeff   : > { %v8375_v42 = vpop.f32.mrb[124].mxu1  ;;  %v4416_v16 = vadd.f32 %v4400_v35, %v12255_v54  ;;  %v7442_v35 = vld [vmem:[%s9410_s18 + $0x148] sm:$0xff]  }
 0xf00   : > { %v12373_v53 = vadd.f32 %v12064_v43, %v8375_v42  ;;  %v4376_v9 = vpop.f32.mrb[125].mxu1  ;;  %v4428_v14 = vpack.c.bf16 %v4418_v46, %v4417_v19  ;;  %v7170_v19 = vunpack.c.h.bf16 %v7434_v45  ;;  %v7165_v46 = vunpack.c.l.bf16 %v7433_v56  ;;  %v7441_v42 = vld [vmem:[%s9410_s18 + $0x140] sm:$0xff]  }
 0xf01   : > { %v12376_v33 = vadd.f32 %v12064_v43, %v4376_v9  ;;  %v8376_v18 = vpop.f32.mrb[126].mxu1  ;;  %v4427_v1 = vpack.c.bf16 %v4416_v16, %v4415_v24  ;;  %8448 = vmatpush3.bf16.msra.mxu0 %v12250_v32  ;;  %v7436_v24 = vld [vmem:[%s9404_s10 + $0x158] sm:$0xff]   ;;  %v7166_v16 = vunpack.c.h.bf16 %v7433_v56  ;;  %v7435_v9 = vld [vmem:[%s9404_s10 + $0x150] sm:$0xff]  }
 0xf02   : > { %15144 = vst [vmem:[#allocation45_spill] sm:$0xff] %v12373_v53  ;;  %v4405_v8 = vmul.f32 0.01, %v12373_v53  ;;  %v12381_v61 = vadd.f32 %v12064_v43, %v8376_v18  ;;  %v4379_v28 = vpop.f32.mrb[127].mxu1  ;;  %8449 = vmatprep.subr.bf16.mxu0 %v12268_v12  ;;  %v7201_v18 = vunpack.c.l.bf16 %v7442_v35  ;;  %v7174_v45 = vunpack.c.h.bf16 %v7435_v9 }
 0xf03   : > { %15145 = vst [vmem:[#allocation65_spill] sm:$0xff] %v12376_v33  ;;  %v4403_v60 = vmul.f32 0.01, %v12376_v33  ;;  %v12386_v51 = vadd.f32 %v12064_v43, %v4379_v28  ;;  %8401 = vmatprep.mubr.bf16.mxu0 %v4427_v1  ;;  %v7197_v1 = vunpack.c.l.bf16 %v7441_v42  ;;  %v12410_v28 = vmul.f32 0.1, %v7170_v19 }
 0xf04   : > { %15146 = vst [vmem:[#allocation63_spill] sm:$0xff] %v12381_v61  ;;  %v4406_v7 = vmul.f32 0.01, %v12381_v61  ;;  %8402 = vmatmul.mubr.bf16.gmra.mrb[136].mxu0 %v4428_v14  ;;  %v4421_v49 = vadd.f32 %v4405_v8, %v12290_v48  ;;  %v12408_v14 = vmul.f32 0.1, %v7169_v34  ;;  %v7177_v8 = vunpack.c.l.bf16 %v7436_v24  ;;  %v7448_v61 = vld [vmem:[%s9410_s18 + $0x178] sm:$0xff]  }
 0xf05   : > { %15147 = vst [vmem:[#allocation62_spill] sm:$0xff] %v12386_v51  ;;  %v4404_v29 = vmul.f32 0.01, %v12386_v51  ;;  %8450 = vmatpush3.bf16.msra.mxu0 %v12268_v12  ;;  %v4419_v43 = vadd.f32 %v4403_v60, %v12286_v55  ;;  %15149 = vst [vmem:[#allocation67_spill] sm:$0xff] %v12410_v28  ;;  %v12412_v60 = vmul.f32 0.1, %v7165_v46 }
 0xf06   : > { %v4422_v57 = vadd.f32 %v4406_v7, %v12281_v47  ;;  %8451 = vmatprep.subr.bf16.mxu0 %v12283_v21  ;;  %15148 = vst [vmem:[#allocation77_spill] sm:$0xff] %v12408_v14  ;;  %v7173_v7 = vunpack.c.l.bf16 %v7435_v9  ;;  %v12421_v56 = vmul.f32 0.028867513, %v7201_v18  ;;  %v12423_v34 = vmul.f32 0.028867513, %v7197_v1  ;;  %v7438_v9 = vld [vmem:[%s9404_s10 + $0x168] sm:$0xff]  }
 0xf07   : > { %v4420_v11 = vadd.f32 %v4404_v29, %v12288_v31  ;;  %15150 = vst [vmem:[#allocation49_spill] sm:$0xff] %v12412_v60  ;;  %v7444_v29 = vld [vmem:[%s9410_s18 + $0x158] sm:$0xff]   ;;  %v12425_v19 = vmul.f32 0.1, %v7177_v8  ;;  %v7445_v12 = vld [vmem:[%s9410_s18 + $0x160] sm:$0xff]   ;;  %v7186_v32 = vunpack.c.h.bf16 %v7438_v9 }
 0xf08   : > { %v4430_v37 = vpack.c.bf16 %v4422_v57, %v4421_v49  ;;  %v7202_v49 = vunpack.c.h.bf16 %v7442_v35  ;;  %v12415_v57 = vmul.f32 0.1, %v7166_v16  ;;  %v7209_v46 = vunpack.c.l.bf16 %v7444_v29  ;;  %v7440_v31 = vld [vmem:[%s9404_s10 + $0x178] sm:$0xff]  }
 0xf09   : > { %v4429_v17 = vpack.c.bf16 %v4420_v11, %v4419_v43  ;;  %8452 = vmatpush3.bf16.msra.mxu0 %v12283_v21  ;;  %v7443_v43 = vld [vmem:[%s9410_s18 + $0x150] sm:$0xff]   ;;  %v7178_v11 = vunpack.c.h.bf16 %v7436_v24  ;;  %15152 = vst [vmem:[#allocation69_spill] sm:$0xff] %v12425_v19  ;;  %v12428_v35 = vmul.f32 0.5, %v12410_v28  ;;  %v12431_v16 = vmul.f32 0.5, %v12412_v60 }
 0xf0a   : > { %8453 = vmatprep.subr.bf16.mxu0 %v12297_v41  ;;  %15151 = vst [vmem:[#allocation51_spill] sm:$0xff] %v12415_v57  ;;  %v12433_v24 = vmul.f32 0.1, %v7173_v7  ;;  %v4257_v18 = vmul.f32 0.028867513, %v7202_v49  ;;  %v12438_v1 = vmul.f32 0.5, %v12415_v57  ;;  %v7206_v21 = vunpack.c.h.bf16 %v7443_v43 }
 0xf0b   : > { %8405 = vmatprep.mubr.bf16.mxu0 %v4429_v17  ;;  %v7198_v17 = vunpack.c.h.bf16 %v7441_v42  ;;  %v7437_v42 = vld [vmem:[%s9404_s10 + $0x160] sm:$0xff]   ;;  %v12440_v8 = vmul.f32 0.1, %v7178_v11  ;;  %v12442_v28 = vmul.f32 0.1, %v7174_v45  ;;  %v7439_v60 = vld [vmem:[%s9404_s10 + $0x170] sm:$0xff]   ;;  %v7185_v49 = vunpack.c.l.bf16 %v7438_v9 }
 0xf0c   : > { %8406 = vmatmul.mubr.bf16.gmra.mrb[140].mxu0 %v4430_v37  ;;  %v12419_v37 = vmul.f32 0.5, %v12408_v14  ;;  %15153 = vst [vmem:[#allocation55_spill] sm:$0xff] %v12433_v24  ;;  %v7205_v14 = vunpack.c.l.bf16 %v7443_v43  ;;  %v4211_v7 = vmul.f32 0.5, %v12425_v19  ;;  %v4260_v55 = vmul.f32 0.028867513, %v7209_v46 }
 0xf0d   : > { %8454 = vmatpush3.bf16.msra.mxu0 %v12297_v41  ;;  %15154 = vst [vmem:[#allocation58_spill] sm:$0xff] %v12440_v8  ;;  %v4255_v41 = vmul.f32 0.028867513, %v7198_v17  ;;  %15155 = vst [vmem:[#allocation61_spill] sm:$0xff] %v12442_v28  ;;  %v7181_v47 = vunpack.c.l.bf16 %v7437_v42  ;;  %v4209_v57 = vmul.f32 0.5, %v12433_v24  ;;  %v7182_v11 = vunpack.c.h.bf16 %v7437_v42 }
 0xf0e   : > { %8455 = vmatprep.subr.bf16.mxu0 %v12301_v30  ;;  %v4258_v48 = vmul.f32 0.028867513, %v7205_v14  ;;  %v4212_v17 = vmul.f32 0.5, %v12440_v8  ;;  %v7189_v43 = vunpack.c.l.bf16 %v7439_v60  ;;  %v7193_v51 = vunpack.c.l.bf16 %v7440_v31 }
 0xf0f   : > { %v4210_v20 = vmul.f32 0.5, %v12442_v28  ;;  %v4259_v19 = vmul.f32 0.028867513, %v7206_v21  ;;  %v7190_v46 = vunpack.c.h.bf16 %v7439_v60  ;;  %v12454_v33 = vmul.f32 0.1, %v7181_v47 }
 0xf10   : > { %v7213_v24 = vunpack.c.l.bf16 %v7445_v12  ;;  %v12456_v14 = vmul.f32 0.1, %v7185_v49  ;;  %v12458_v9 = vmul.f32 0.1, %v7182_v11  ;;  %v7214_v53 = vunpack.c.h.bf16 %v7445_v12 }
 0xf11   : > { %8456 = vmatpush3.bf16.msra.mxu0 %v12301_v30  ;;  %v7210_v30 = vunpack.c.h.bf16 %v7444_v29  ;;  %v7446_v29 = vld [vmem:[%s9410_s18 + $0x168] sm:$0xff]   ;;  %15156 = vst [vmem:[#allocation70_spill] sm:$0xff] %v12454_v33  ;;  %v12460_v8 = vmul.f32 0.1, %v7186_v32  ;;  %v12462_v62 = vmul.f32 0.1, %v7189_v43  ;;  %v7221_v28 = vunpack.c.l.bf16 %v7447_v58 }
 0xf12   : > { %8505 = vmatprep.subr.bf16.mxu0 %v12161_v26  ;;  %v7194_v26 = vunpack.c.h.bf16 %v7440_v31  ;;  %15157 = vst [vmem:[#allocation73_spill] sm:$0xff] %v12456_v14  ;;  %v7217_v42 = vunpack.c.l.bf16 %v7446_v29  ;;  %15158 = vst [vmem:[#allocation38_spill] sm:$0xff] %v12458_v9  ;;  %v12464_v21 = vmul.f32 0.1, %v7193_v51  ;;  %v7225_v60 = vunpack.c.l.bf16 %v7448_v61 }
 0xf13   : > { %v4261_v45 = vmul.f32 0.028867513, %v7210_v30  ;;  %15159 = vst [vmem:[#allocation48_spill] sm:$0xff] %v12460_v8  ;;  %v7218_v30 = vunpack.c.h.bf16 %v7446_v29  ;;  %15160 = vst [vmem:[#allocation33_spill] sm:$0xff] %v12462_v62  ;;  %v12466_v31 = vmul.f32 0.1, %v7190_v46  ;;  %v7222_v47 = vunpack.c.h.bf16 %v7447_v58 }
 0xf14   : > { %15161 = vst [vmem:[#allocation82_spill] sm:$0xff] %v12464_v21  ;;  %v12468_v63 = vmul.f32 0.1, %v7194_v26  ;;  %v7226_v49 = vunpack.c.h.bf16 %v7448_v61  ;;  %v4213_v38 = vmul.f32 0.5, %v12454_v33  ;;  %v4262_v11 = vmul.f32 0.028867513, %v7213_v24 }
 0xf15   : > { %15162 = vst [vmem:[#allocation79_spill] sm:$0xff] %v12466_v31  ;;  %v4215_v12 = vmul.f32 0.5, %v12456_v14  ;;  %v4264_v32 = vmul.f32 0.028867513, %v7217_v42  ;;  %v4214_v29 = vmul.f32 0.5, %v12458_v9  ;;  %v4216_v23 = vmul.f32 0.5, %v12460_v8 }
 0xf16   : > { %15163 = vst [vmem:[#allocation81_spill] sm:$0xff] %v12468_v63  ;;  %v4263_v43 = vmul.f32 0.028867513, %v7214_v53  ;;  %v4265_v51 = vmul.f32 0.028867513, %v7218_v30  ;;  %v4217_v54 = vmul.f32 0.5, %v12462_v62  ;;  %v4272_v42 = vadd.f32 %v12421_v56, %v12419_v37 }
 0xf17   : > { %v4266_v46 = vmul.f32 0.028867513, %v7221_v28  ;;  %v4219_v58 = vmul.f32 0.5, %v12464_v21  ;;  %v4268_v26 = vmul.f32 0.028867513, %v7225_v60  ;;  %v4218_v61 = vmul.f32 0.5, %v12466_v31 }
 0xf18   : > { %v4267_v27 = vmul.f32 0.028867513, %v7222_v47  ;;  %v4220_v24 = vmul.f32 0.5, %v12468_v63  ;;  %v4269_v33 = vmul.f32 0.028867513, %v7226_v49  ;;  %v4273_v53 = vadd.f32 %v4257_v18, %v12428_v35 }
 0xf19   : > { %v4270_v30 = vadd.f32 %v12423_v34, %v12431_v16  ;;  %v4271_v62 = vadd.f32 %v4255_v41, %v12438_v1  ;;  %v4274_v28 = vadd.f32 %v4258_v48, %v4209_v57  ;;  %v4275_v14 = vadd.f32 %v4259_v19, %v4210_v20 }
 0xf1a   : > { %v4276_v21 = vadd.f32 %v4260_v55, %v4211_v7  ;;  %v4277_v60 = vadd.f32 %v4261_v45, %v4212_v17  ;;  %v4278_v9 = vadd.f32 %v4262_v11, %v4213_v38  ;;  %v4279_v31 = vadd.f32 %v4263_v43, %v4214_v29  ;;  %v15164_v29 = vld [vmem:[#allocation71_spill] sm:$0xff] }
 0xf1b   : > { %v4280_v47 = vadd.f32 %v4264_v32, %v4215_v12  ;;  %v4281_v8 = vadd.f32 %v4265_v51, %v4216_v23  ;;  %v4282_v63 = vadd.f32 %v4266_v46, %v4217_v54  ;;  %v4283_v49 = vadd.f32 %v4267_v27, %v4218_v61  ;;  %v15165_v46 = vld [vmem:[#allocation54_spill] sm:$0xff]  ;;  %v15167_v61 = vld [vmem:[#allocation56_spill] sm:$0xff] }
 0xf1c   : > { %v4284_v3 = vadd.f32 %v4268_v26, %v4219_v58  ;;  %v4285_v10 = vadd.f32 %v4269_v33, %v4220_v24  ;;  %v4530_v37 = vmul.f32 1.5, %v4272_v42  ;;  %v4531_v56 = vmul.f32 1.5, %v4273_v53  ;;  %v15168_v53 = vld [vmem:[#allocation34_spill] sm:$0xff] }
 0xf1d   : > { %v4528_v35 = vmul.f32 1.5, %v4270_v30  ;;  %v4529_v18 = vmul.f32 1.5, %v4271_v62  ;;  %v4532_v2 = vmul.f32 1.5, %v4274_v28  ;;  %v4533_v34 = vmul.f32 1.5, %v4275_v14  ;;  %v15169_v28 = vld [vmem:[#allocation66_spill] sm:$0xff] }
 0xf1e   : > { %v4534_v16 = vmul.f32 1.5, %v4276_v21  ;;  %v4535_v41 = vmul.f32 1.5, %v4277_v60  ;;  %v4536_v48 = vmul.f32 1.5, %v4278_v9  ;;  %v4537_v20 = vmul.f32 1.5, %v4279_v31 }
 0xf1f   : > { %v4538_v55 = vmul.f32 1.5, %v4280_v47  ;;  %v4539_v57 = vmul.f32 1.5, %v4281_v8  ;;  %v12484_v38 = vmul.f32 1.5, %v4282_v63  ;;  %v12486_v19 = vmul.f32 1.5, %v4283_v49  ;;  %v15170_v49 = vld [vmem:[#allocation74_spill] sm:$0xff] }
 0xf20   : > { %v12488_v54 = vmul.f32 1.5, %v4284_v3  ;;  %v12490_v27 = vmul.f32 1.5, %v4285_v10  ;;  %v12493_v23 = vadd.f32 %v4530_v37, %v12190_v50  ;;  %v12496_v62 = vadd.f32 %v4531_v56, %v12182_v13  ;;  %v12572_v56 = vld [vmem:[%s14622_s9] ss:$0 sm:$0xff] }
 0xf21   : > { %v12499_v33 = vadd.f32 %v4528_v35, %v12185_v36  ;;  %v12502_v1 = vadd.f32 %v4529_v18, %v12187_v4  ;;  %v12505_v63 = vadd.f32 %v4532_v2, %v12217_v52  ;;  %v12508_v3 = vadd.f32 %v4533_v34, %v12219_v59 }
 0xf22   : > { %v12511_v10 = vadd.f32 %v4534_v16, %v12222_v5  ;;  %v12514_v8 = vadd.f32 %v4535_v41, %v12211_v40  ;;  %v4562_v7 = vmul.f32 0.25, %v12307_v6  ;;  %v12518_v17 = vadd.f32 %v4536_v48, %v12253_v0  ;;  %v15171_v16 = vld [vmem:[#allocation39_spill] sm:$0xff]  ;;  %v15173_v40 = vld [vmem:[#allocation45_spill] sm:$0xff] }
 0xf23   : > { %v12521_v45 = vadd.f32 %v4538_v55, %v12258_v25  ;;  %v12524_v2 = vadd.f32 %v4539_v57, %v12247_v22  ;;  %v4747_v14 = vmul.f32 0.16666667, %v12307_v6  ;;  %v4560_v9 = vmul.f32 0.25, %v12310_v39  ;;  %v15172_v57 = vld [vmem:[#allocation32_spill] sm:$0xff] }
 0xf24   : > { %v4745_v21 = vmul.f32 0.16666667, %v12310_v39  ;;  %v4563_v31 = vmul.f32 0.25, %v12314_v15  ;;  %v4748_v11 = vmul.f32 0.16666667, %v12314_v15  ;;  %v4561_v12 = vmul.f32 0.25, %v12318_v44 }
 0xf25   : > { %v4746_v32 = vmul.f32 0.16666667, %v12318_v44  ;;  %v12534_v43 = vmul.f32 0.25, %v15164_v29  ;;  %v12537_v51 = vmul.f32 0.16666667, %v15164_v29  ;;  %v12540_v6 = vmul.f32 0.25, %v15165_v46 }
 0xf26   : > { %v12543_v58 = vmul.f32 0.16666667, %v15165_v46  ;;  %v15166_v39 = vld [vmem:[#allocation57_spill] sm:$0xff]  ;;  %v12552_v44 = vmul.f32 0.25, %v15167_v61  ;;  %v12555_v24 = vmul.f32 0.16666667, %v15167_v61  ;;  %v12558_v30 = vadd.f32 %v4537_v20, %v15168_v53 }
 0xf27   : > { %v12546_v26 = vmul.f32 0.25, %v15166_v39  ;;  %v12549_v15 = vmul.f32 0.16666667, %v15166_v39  ;;  %v12561_v60 = vmul.f32 0.25, %v15169_v28  ;;  %v12564_v47 = vmul.f32 0.16666667, %v15169_v28 }
 0xf28   : > { %v12567_v37 = vmul.f32 0.25, %v15170_v49  ;;  %v12576_v34 = vmul.f32 0.16666667, %v15170_v49  ;;  %v12579_v41 = vmul.f32 0.25, %v15171_v16  ;;  %v12582_v48 = vmul.f32 0.16666667, %v15171_v16 }
 0xf29   : > { %v12586_v29 = vmul.f32 0.25, %v15172_v57  ;;  %v12590_v28 = vmul.f32 0.16666667, %v15172_v57 }
 0xfc7   : > { %v8395_v42 = vpop.f32.mrb[128].mxu0 }
 0xfc8   : > { %v4474_v35 = vadd.f32 %v12572_v56, %v8395_v42  ;;  %v4465_v18 = vpop.f32.mrb[129].mxu0 }
 0xfc9   : > { %v4466_v20 = vadd.f32 %v12572_v56, %v4465_v18  ;;  %v8396_v55 = vpop.f32.mrb[130].mxu0 }
 0xfca   : > { %v4578_v46 = vmul.f32 0.25, %v4474_v35  ;;  %v4763_v39 = vmul.f32 0.16666667, %v4474_v35  ;;  %v4477_v61 = vadd.f32 %v12572_v56, %v8396_v55  ;;  %v4468_v42 = vpop.f32.mrb[131].mxu0  ;;  %v12598_v55 = vmul.f32 0.25, %v15173_v40 }
 0xfcb   : > { %v4576_v49 = vmul.f32 0.25, %v4466_v20  ;;  %v4761_v25 = vmul.f32 0.16666667, %v4466_v20  ;;  %v4469_v53 = vadd.f32 %v12572_v56, %v4468_v42  ;;  %v12603_v20 = vmul.f32 0.16666667, %v15173_v40 }
 0xfcc   : > { %v4594_v16 = vadd.f32 %v4578_v46, %v4562_v7  ;;  %v12593_v0 = vadd.f32 %v4763_v39, %v4747_v14  ;;  %v4579_v18 = vmul.f32 0.25, %v4477_v61  ;;  %v4764_v22 = vmul.f32 0.16666667, %v4477_v61 }
 0xfcd   : > { %v4592_v5 = vadd.f32 %v4576_v49, %v4560_v9  ;;  %v12595_v59 = vadd.f32 %v4761_v25, %v4745_v21  ;;  %v4577_v52 = vmul.f32 0.25, %v4469_v53  ;;  %v4762_v35 = vmul.f32 0.16666667, %v4469_v53  ;;  %v15174_v9 = vld [vmem:[#allocation65_spill] sm:$0xff] }
 0xfce   : > { %v4610_v50 = vmul.f32 0.01, %v4594_v16  ;;  %v4595_v57 = vadd.f32 %v4579_v18, %v4563_v31  ;;  %v12600_v4 = vadd.f32 %v4764_v22, %v4748_v11  ;;  %v12608_v25 = vmul.f32 0.25, %v15174_v9 }
 0xfcf   : > { %v4608_v7 = vmul.f32 0.01, %v4592_v5  ;;  %v4593_v14 = vadd.f32 %v4577_v52, %v4561_v12  ;;  %v12605_v46 = vadd.f32 %v4762_v35, %v4746_v32  ;;  %v8399_v39 = vpop.f32.mrb[132].mxu0  ;;  %v12611_v21 = vmul.f32 0.16666667, %v15174_v9 }
 0xfd0   : > { %v4611_v53 = vmul.f32 0.01, %v4595_v57  ;;  %v4490_v61 = vadd.f32 %v12572_v56, %v8399_v39  ;;  %v4481_v31 = vpop.f32.mrb[133].mxu0  ;;  %v4626_v22 = vadd.f32 %v4610_v50, %v12493_v23 }
 0xfd1   : > { %v4609_v11 = vmul.f32 0.01, %v4593_v14  ;;  %v4482_v40 = vadd.f32 %v12572_v56, %v4481_v31  ;;  %v8400_v5 = vpop.f32.mrb[134].mxu0  ;;  %v4624_v52 = vadd.f32 %v4608_v7, %v12499_v33 }
 0xfd2   : > { %v4627_v12 = vadd.f32 %v4611_v53, %v12496_v62  ;;  %v4582_v32 = vmul.f32 0.25, %v4490_v61  ;;  %v4767_v42 = vmul.f32 0.16666667, %v4490_v61  ;;  %v4493_v49 = vadd.f32 %v12572_v56, %v8400_v5  ;;  %v4484_v16 = vpop.f32.mrb[135].mxu0 }
 0xfd3   : > { %v4580_v18 = vmul.f32 0.25, %v4482_v40  ;;  %v4765_v35 = vmul.f32 0.16666667, %v4482_v40  ;;  %v4485_v57 = vadd.f32 %v12572_v56, %v4484_v16  ;;  %v4625_v39 = vadd.f32 %v4609_v11, %v12502_v1  ;;  %v15175_v1 = vld [vmem:[#allocation63_spill] sm:$0xff] }
 0xfd4   : > { %v4641_v50 = vpack.c.bf16 %v4627_v12, %v4626_v22  ;;  %v4598_v23 = vadd.f32 %v4582_v32, %v12534_v43  ;;  %v12623_v14 = vadd.f32 %v4767_v42, %v12537_v51  ;;  %v4583_v33 = vmul.f32 0.25, %v4493_v49 }
 0xfd5   : > { %v4596_v62 = vadd.f32 %v4580_v18, %v12540_v6  ;;  %v12627_v7 = vadd.f32 %v4765_v35, %v12543_v58  ;;  %v4768_v9 = vmul.f32 0.16666667, %v4493_v49  ;;  %v4581_v53 = vmul.f32 0.25, %v4485_v57 }
 0xfd6   : > { %v4614_v61 = vmul.f32 0.01, %v4598_v23  ;;  %v4599_v31 = vadd.f32 %v4583_v33, %v12546_v26  ;;  %v4766_v40 = vmul.f32 0.16666667, %v4485_v57  ;;  %v4640_v5 = vpack.c.bf16 %v4625_v39, %v4624_v52  ;;  %v15176_v23 = vld [vmem:[#allocation60_spill] sm:$0xff] }
 0xfd7   : > { %v12631_v22 = vmul.f32 0.25, %v15175_v1  ;;  %v4612_v43 = vmul.f32 0.01, %v4596_v62  ;;  %v12634_v51 = vadd.f32 %v4768_v9, %v12549_v15  ;;  %v4597_v11 = vadd.f32 %v4581_v53, %v12552_v44  ;;  %v8403_v6 = vpop.f32.mrb[136].mxu0  ;;  %v15177_v53 = vld [vmem:[#allocation40_spill] sm:$0xff] }
 0xfd8   : > { %v12638_v58 = vmul.f32 0.16666667, %v15175_v1  ;;  %v4615_v12 = vmul.f32 0.01, %v4599_v31  ;;  %v12641_v32 = vadd.f32 %v4766_v40, %v12555_v24  ;;  %v4506_v26 = vadd.f32 %v12572_v56, %v8403_v6  ;;  %8425 = vmatprep.mubr.bf16.mxu1 %v4640_v5  ;;  %v4497_v52 = vpop.f32.mrb[137].mxu0 }
 0xfd9   : > { %v4613_v42 = vmul.f32 0.01, %v4597_v11  ;;  %v4498_v49 = vadd.f32 %v12572_v56, %v4497_v52  ;;  %8426 = vmatmul.mubr.bf16.vlgmr.msra.gmra.mrb[128].mxu1 %v4641_v50  ;;  %v8404_v15 = vpop.f32.mrb[138].mxu0  ;;  %v4628_v16 = vadd.f32 %v4612_v43, %v12505_v63  ;;  %v4630_v44 = vadd.f32 %v4614_v61, %v12511_v10  ;;  %v15179_v52 = vld [vmem:[#allocation62_spill] sm:$0xff] }
 0xfda   : > { %v4586_v18 = vmul.f32 0.25, %v4506_v26  ;;  %v4771_v35 = vmul.f32 0.16666667, %v4506_v26  ;;  %v4509_v57 = vadd.f32 %v12572_v56, %v8404_v15  ;;  %v4500_v39 = vpop.f32.mrb[139].mxu0  ;;  %v4631_v24 = vadd.f32 %v4615_v12, %v12514_v8  ;;  %8474 = vmatpush3.bf16.msra.mxu1 %v15176_v23  ;;  %v15178_v26 = vld [vmem:[#allocation36_spill] sm:$0xff] }
 0xfdb   : > { %v4584_v33 = vmul.f32 0.25, %v4498_v49  ;;  %v4769_v62 = vmul.f32 0.16666667, %v4498_v49  ;;  %v4501_v9 = vadd.f32 %v12572_v56, %v4500_v39  ;;  %v4629_v50 = vadd.f32 %v4613_v42, %v12508_v3  ;;  %8475 = vmatprep.subr.bf16.mxu1 %v15177_v53 }
 0xfdc   : > { %v4602_v63 = vadd.f32 %v4586_v18, %v12561_v60  ;;  %v12655_v10 = vadd.f32 %v4771_v35, %v12564_v47  ;;  %v4587_v61 = vmul.f32 0.25, %v4509_v57  ;;  %v4772_v31 = vmul.f32 0.16666667, %v4509_v57 }
 0xfdd   : > { %v4600_v40 = vadd.f32 %v4584_v33, %v12567_v37  ;;  %v12659_v8 = vadd.f32 %v4769_v62, %v12576_v34  ;;  %v4585_v5 = vmul.f32 0.25, %v4501_v9  ;;  %v4770_v1 = vmul.f32 0.16666667, %v4501_v9 }
 0xfde   : > { %v4618_v43 = vmul.f32 0.01, %v4602_v63  ;;  %v4603_v11 = vadd.f32 %v4587_v61, %v12579_v41  ;;  %v12663_v3 = vadd.f32 %v4772_v31, %v12582_v48  ;;  %v4642_v6 = vpack.c.bf16 %v4629_v50, %v4628_v16  ;;  %8476 = vmatpush3.bf16.msra.mxu1 %v15177_v53  ;;  %v15180_v53 = vld [vmem:[#allocation44_spill] sm:$0xff] }
 0xfdf   : > { %v4616_v60 = vmul.f32 0.01, %v4600_v40  ;;  %v4601_v47 = vadd.f32 %v4585_v5, %v12586_v29  ;;  %v12668_v12 = vadd.f32 %v4770_v1, %v12590_v28  ;;  %v8407_v37 = vpop.f32.mrb[140].mxu0  ;;  %v4643_v34 = vpack.c.bf16 %v4631_v24, %v4630_v44  ;;  %8477 = vmatprep.subr.bf16.mxu1 %v15178_v26 }
 0xfe0   : > { %v4573_v42 = vmul.f32 0.25, %v15179_v52  ;;  %v4758_v41 = vmul.f32 0.16666667, %v15179_v52  ;;  %v4619_v49 = vmul.f32 0.01, %v4603_v11  ;;  %v4522_v48 = vadd.f32 %v12572_v56, %v8407_v37  ;;  %8429 = vmatprep.mubr.bf16.mxu1 %v4642_v6  ;;  %v4513_v15 = vpop.f32.mrb[141].mxu0 }
 0xfe1   : > { %v4617_v16 = vmul.f32 0.01, %v4601_v47  ;;  %v4514_v18 = vadd.f32 %v12572_v56, %v4513_v15  ;;  %8430 = vmatmul.mubr.bf16.gmra.mrb[132].mxu1 %v4643_v34  ;;  %v8408_v29 = vpop.f32.mrb[142].mxu0  ;;  %v4632_v28 = vadd.f32 %v4616_v60, %v12518_v17  ;;  %v4634_v44 = vadd.f32 %v4618_v43, %v12521_v45  ;;  %v15182_v47 = vld [vmem:[#allocation50_spill] sm:$0xff]  ;;  %v15183_v34 = vld [vmem:[#allocation76_spill] sm:$0xff] }
 0xfe2   : > { %v4590_v35 = vmul.f32 0.25, %v4522_v48  ;;  %v4775_v57 = vmul.f32 0.16666667, %v4522_v48  ;;  %v4525_v39 = vadd.f32 %v12572_v56, %v8408_v29  ;;  %v4516_v24 = vpop.f32.mrb[143].mxu0  ;;  %v4635_v23 = vadd.f32 %v4619_v49, %v12524_v2  ;;  %8478 = vmatpush3.bf16.msra.mxu1 %v15178_v26  ;;  %v15184_v26 = vld [vmem:[#allocation78_spill] sm:$0xff]  ;;  %v15185_v49 = vld [vmem:[#allocation41_spill] sm:$0xff] }
 0xfe3   : > { %v4588_v33 = vmul.f32 0.25, %v4514_v18  ;;  %v4773_v62 = vmul.f32 0.16666667, %v4514_v18  ;;  %v4517_v9 = vadd.f32 %v12572_v56, %v4516_v24  ;;  %v4633_v50 = vadd.f32 %v4617_v16, %v12558_v30  ;;  %8479 = vmatprep.subr.bf16.mxu1 %v15180_v53  ;;  %v15186_v18 = vld [vmem:[#allocation52_spill] sm:$0xff] }
 0xfe4   : > { %v4606_v17 = vadd.f32 %v4590_v35, %v12598_v55  ;;  %v12685_v45 = vadd.f32 %v4775_v57, %v12603_v20  ;;  %v4591_v63 = vmul.f32 0.25, %v4525_v39  ;;  %v4776_v61 = vmul.f32 0.16666667, %v4525_v39 }
 0xfe5   : > { %v4604_v31 = vadd.f32 %v4588_v33, %v12608_v25  ;;  %v12689_v2 = vadd.f32 %v4773_v62, %v12611_v21  ;;  %v4589_v40 = vmul.f32 0.25, %v4517_v9  ;;  %v4774_v5 = vmul.f32 0.16666667, %v4517_v9  ;;  %v15181_v25 = vld [vmem:[#allocation68_spill] sm:$0xff] }
 0xfe6   : > { %v4622_v1 = vmul.f32 0.01, %v4606_v17  ;;  %v4607_v43 = vadd.f32 %v4591_v63, %v12631_v22  ;;  %v12693_v30 = vadd.f32 %v4776_v61, %v12638_v58  ;;  %v4644_v11 = vpack.c.bf16 %v4633_v50, %v4632_v28  ;;  %8480 = vmatpush3.bf16.msra.mxu1 %v15180_v53 }
 0xfe7   : > { %v4620_v55 = vmul.f32 0.01, %v4604_v31  ;;  %v4605_v20 = vadd.f32 %v4589_v40, %v4573_v42  ;;  %v12696_v6 = vadd.f32 %v4774_v5, %v4758_v41  ;;  %v4645_v60 = vpack.c.bf16 %v4635_v23, %v4634_v44  ;;  %8481 = vmatprep.subr.bf16.mxu1 %v15181_v25 }
 0xfe8   : > { %v4623_v21 = vmul.f32 0.01, %v4607_v43  ;;  %8433 = vmatprep.mubr.bf16.mxu1 %v4644_v11  ;;  %v4558_v37 = vadd.f32 %v12488_v54, %v15182_v47  ;;  %v4559_v22 = vadd.f32 %v12490_v27, %v15183_v34  ;;  %v4556_v52 = vadd.f32 %v12484_v38, %v15184_v26  ;;  %v15187_v27 = vld [vmem:[#allocation35_spill] sm:$0xff]  ;;  %v15188_v38 = vld [vmem:[#allocation46_spill] sm:$0xff] }
 0xfe9   : > { %v4621_v58 = vmul.f32 0.01, %v4605_v20  ;;  %8434 = vmatmul.mubr.bf16.gmra.mrb[136].mxu1 %v4645_v60  ;;  %v4557_v42 = vadd.f32 %v12486_v19, %v15185_v49  ;;  %v12714_v19 = vld [vmem:[#allocation6] sm:$0xff]   ;;  %v15190_v43 = vld [vmem:[#allocation67_spill] sm:$0xff] }
 0xfea   : > { %v4638_v41 = vadd.f32 %v4622_v1, %v4558_v37  ;;  %v4639_v48 = vadd.f32 %v4623_v21, %v4559_v22  ;;  %8482 = vmatpush3.bf16.msra.mxu1 %v15181_v25  ;;  %v4636_v15 = vadd.f32 %v4620_v55, %v4556_v52  ;;  %15189 = vst [vmem:[#allocation80_spill] sm:$0xff] %v12714_v19  ;;  %v15192_v21 = vld [vmem:[#allocation59_spill] sm:$0xff]  ;;  %v15195_v52 = vld [vmem:[#allocation77_spill] sm:$0xff] }
 0xfeb   : > { %v4637_v16 = vadd.f32 %v4621_v58, %v4557_v42  ;;  %8483 = vmatprep.subr.bf16.mxu1 %v15186_v18  ;;  %v4828_v11 = vadd.f32 %v15190_v43, %v12182_v13 }
 0xfec   : > { %v4647_v54 = vpack.c.bf16 %v4639_v48, %v4638_v41 }
 0xfed   : > { %v4646_v29 = vpack.c.bf16 %v4637_v16, %v4636_v15 }
 0xfee   : > { %8484 = vmatpush3.bf16.msra.mxu1 %v15186_v18 }
 0xfef   : > { %8437 = vmatprep.mubr.bf16.mxu1 %v4646_v29  ;;  %8485 = vmatprep.subr.bf16.mxu1 %v15187_v27 }
 0xff1   : > { %8438 = vmatmul.mubr.bf16.gmra.mrb[140].mxu1 %v4647_v54 }
 0xff2   : > { %8486 = vmatpush3.bf16.msra.mxu1 %v15187_v27 }
 0xff3   : > { %8487 = vmatprep.subr.bf16.mxu1 %v15188_v38 }
 0xff6   : > { %8488 = vmatpush3.bf16.msra.mxu1 %v15188_v38 }
 0xff7   : > { %8537 = vmatprep.subr.bf16.mxu1 %v12714_v19 }
0x10ac   : > { %v8427_v28 = vpop.f32.mrb[128].mxu1 }
0x10ad   : > { %v4691_v44 = vadd.f32 %v12572_v56, %v8427_v28  ;;  %v4682_v35 = vpop.f32.mrb[129].mxu1 }
0x10ae   : > { %v4683_v57 = vadd.f32 %v12572_v56, %v4682_v35  ;;  %v8428_v39 = vpop.f32.mrb[130].mxu1 }
0x10af   : > { %v4795_v24 = vmul.f32 0.6666667, %v4691_v44  ;;  %v4694_v23 = vadd.f32 %v12572_v56, %v8428_v39  ;;  %v4685_v33 = vpop.f32.mrb[131].mxu1 }
0x10b0   : > { %v4793_v62 = vmul.f32 0.6666667, %v4683_v57  ;;  %v4686_v9 = vadd.f32 %v12572_v56, %v4685_v33 }
0x10b1   : > { %v4811_v50 = vadd.f32 %v4795_v24, %v12593_v0  ;;  %v4796_v53 = vmul.f32 0.6666667, %v4694_v23  ;;  %v15191_v0 = vld [vmem:[#allocation49_spill] sm:$0xff] }
0x10b2   : > { %v4809_v17 = vadd.f32 %v4793_v62, %v12595_v59  ;;  %v4794_v63 = vmul.f32 0.6666667, %v4686_v9  ;;  %v4825_v25 = vadd.f32 %v15191_v0, %v12185_v36  ;;  %v15193_v59 = vld [vmem:[#allocation51_spill] sm:$0xff]  ;;  %v15198_v9 = vld [vmem:[#allocation37_spill] sm:$0xff] }
0x10b3   : > { %v4812_v61 = vadd.f32 %v4796_v53, %v12600_v4  ;;  %v4843_v1 = vmul.f32 0.01, %v4811_v50  ;;  %v4826_v37 = vadd.f32 %v15193_v59, %v15192_v21  ;;  %v12767_v59 = vld [vmem:[#allocation6 + $0x8] sm:$0xff]  }
0x10b4   : > { %v4841_v31 = vmul.f32 0.01, %v4809_v17  ;;  %v4810_v40 = vadd.f32 %v4794_v63, %v12605_v46  ;;  %v8431_v5 = vpop.f32.mrb[132].mxu1  ;;  %v15194_v46 = vld [vmem:[#allocation75_spill] sm:$0xff]  ;;  %v15200_v63 = vld [vmem:[#allocation53_spill] sm:$0xff]  ;;  %15207 = vst [vmem:[#allocation56_spill] sm:$0xff] %v12767_v59 }
0x10b5   : > { %v4844_v55 = vmul.f32 0.01, %v4812_v61  ;;  %v4707_v20 = vadd.f32 %v12572_v56, %v8431_v5  ;;  %v4698_v60 = vpop.f32.mrb[133].mxu1  ;;  %v4827_v42 = vadd.f32 %v15195_v52, %v15194_v46  ;;  %v15201_v61 = vld [vmem:[#allocation55_spill] sm:$0xff] }
0x10b6   : > { %v4842_v22 = vmul.f32 0.01, %v4810_v40  ;;  %v4699_v4 = vadd.f32 %v12572_v56, %v4698_v60  ;;  %v8432_v58 = vpop.f32.mrb[134].mxu1  ;;  %v12738_v16 = vadd.f32 %v4841_v31, %v4825_v25  ;;  %v15202_v31 = vld [vmem:[#allocation42_spill] sm:$0xff]  ;;  %v15203_v40 = vld [vmem:[#allocation61_spill] sm:$0xff] }
0x10b7   : > { %v12735_v41 = vadd.f32 %v4844_v55, %v4828_v11  ;;  %v4799_v13 = vmul.f32 0.6666667, %v4707_v20  ;;  %v4710_v48 = vadd.f32 %v12572_v56, %v8432_v58  ;;  %v4701_v15 = vpop.f32.mrb[135].mxu1  ;;  %v12743_v29 = vadd.f32 %v4843_v1, %v4827_v42  ;;  %v15204_v11 = vld [vmem:[#allocation43_spill] sm:$0xff]  ;;  %v15205_v55 = vld [vmem:[#allocation69_spill] sm:$0xff] }
0x10b8   : > { %v12740_v18 = vadd.f32 %v4842_v22, %v4826_v37  ;;  %v4797_v36 = vmul.f32 0.6666667, %v4699_v4  ;;  %v4702_v54 = vadd.f32 %v12572_v56, %v4701_v15  ;;  %v4830_v5 = vadd.f32 %v15203_v40, %v15202_v31 }
0x10b9   : > { %15197 = vst [vmem:[#allocation54_spill] sm:$0xff] %v12743_v29  ;;  %v4815_v27 = vadd.f32 %v4799_v13, %v12623_v14  ;;  %v4800_v38 = vmul.f32 0.6666667, %v4710_v48  ;;  %v5004_v39 = vpack.c.bf16 %v12735_v41, %v12743_v29  ;;  %v15199_v14 = vld [vmem:[#allocation58_spill] sm:$0xff]  ;;  %v4831_v20 = vadd.f32 %v15205_v55, %v15204_v11 }
0x10ba   : > { %15196 = vst [vmem:[#allocation71_spill] sm:$0xff] %v12740_v18  ;;  %v4813_v28 = vadd.f32 %v4797_v36, %v12627_v7  ;;  %v4798_v44 = vmul.f32 0.6666667, %v4702_v54  ;;  %v5003_v35 = vpack.c.bf16 %v12740_v18, %v12738_v16  ;;  %v4832_v50 = vadd.f32 %v15199_v14, %v15198_v9  ;;  %v15216_v9 = vld [vmem:[#allocation34_spill] sm:$0xff] }
0x10bb   : > { %v4816_v57 = vadd.f32 %v4800_v38, %v12634_v51  ;;  %v4847_v62 = vmul.f32 0.01, %v4815_v27  ;;  %v4829_v51 = vadd.f32 %v15201_v61, %v15200_v63  ;;  %v12785_v27 = vld [vmem:[#allocation6 + $0x10] sm:$0xff]   ;;  %v15219_v63 = vld [vmem:[#allocation73_spill] sm:$0xff] }
0x10bc   : > { %v4845_v24 = vmul.f32 0.01, %v4813_v28  ;;  %v4814_v23 = vadd.f32 %v4798_v44, %v12641_v32  ;;  %v8435_v33 = vpop.f32.mrb[136].mxu1  ;;  %8457 = vmatprep.mubr.bf16.mxu0 %v5003_v35  ;;  %15211 = vst [vmem:[#allocation32_spill] sm:$0xff] %v12785_v27  ;;  %v15212_v44 = vld [vmem:[#allocation47_spill] sm:$0xff]  ;;  %v15213_v35 = vld [vmem:[#allocation48_spill] sm:$0xff] }
0x10bd   : > { %v4848_v53 = vmul.f32 0.01, %v4816_v57  ;;  %v4723_v7 = vadd.f32 %v12572_v56, %v8435_v33  ;;  %v4714_v17 = vpop.f32.mrb[137].mxu1  ;;  %8458 = vmatmul.mubr.bf16.vlgmr.msra.gmra.mrb[144].mxu0 %v5004_v39  ;;  %v12775_v46 = vadd.f32 %v4847_v62, %v4831_v20  ;;  %v4836_v57 = vadd.f32 %v15213_v35, %v15212_v44  ;;  %v15215_v33 = vld [vmem:[#allocation70_spill] sm:$0xff] }
0x10be   : > { %v4846_v1 = vmul.f32 0.01, %v4814_v23  ;;  %v4715_v32 = vadd.f32 %v12572_v56, %v4714_v17  ;;  %v8436_v43 = vpop.f32.mrb[138].mxu1  ;;  %8506 = vmatpush3.bf16.msra.mxu0 %v12714_v19  ;;  %v12770_v37 = vadd.f32 %v4845_v24, %v4829_v51  ;;  %v15214_v23 = vld [vmem:[#allocation64_spill] sm:$0xff]  ;;  %v15217_v14 = vld [vmem:[#allocation38_spill] sm:$0xff] }
0x10bf   : > { %v12764_v60 = vadd.f32 %v4848_v53, %v4832_v50  ;;  %v4803_v0 = vmul.f32 0.6666667, %v4723_v7  ;;  %v4726_v25 = vadd.f32 %v12572_v56, %v8436_v43  ;;  %v4717_v21 = vpop.f32.mrb[139].mxu1  ;;  %8507 = vmatprep.subr.bf16.mxu0 %v12767_v59  ;;  %15210 = vst [vmem:[#allocation39_spill] sm:$0xff] %v12775_v46  ;;  %v4833_v62 = vadd.f32 %v15215_v33, %v15214_v23  ;;  %v15218_v17 = vld [vmem:[#allocation72_spill] sm:$0xff]  ;;  %v15229_v44 = vld [vmem:[#allocation82_spill] sm:$0xff] }
0x10c0   : > { %15208 = vst [vmem:[#allocation66_spill] sm:$0xff] %v12770_v37  ;;  %v12772_v22 = vadd.f32 %v4846_v1, %v4830_v5  ;;  %v4801_v4 = vmul.f32 0.6666667, %v4715_v32  ;;  %v4718_v58 = vadd.f32 %v12572_v56, %v4717_v21  ;;  %v4834_v50 = vadd.f32 %v15217_v14, %v15216_v9  ;;  %v12803_v1 = vld [vmem:[#allocation6 + $0x18] sm:$0xff]  }
0x10c1   : > { %15206 = vst [vmem:[#allocation57_spill] sm:$0xff] %v12764_v60  ;;  %v4819_v52 = vadd.f32 %v4803_v0, %v12655_v10  ;;  %v4804_v42 = vmul.f32 0.6666667, %v4726_v25  ;;  %v5006_v54 = vpack.c.bf16 %v12764_v60, %v12775_v46  ;;  %v4835_v61 = vadd.f32 %v15219_v63, %v15218_v17  ;;  %15221 = vst [vmem:[#allocation65_spill] sm:$0xff] %v12803_v1 }
0x10c2   : > { %15209 = vst [vmem:[#allocation74_spill] sm:$0xff] %v12772_v22  ;;  %v4817_v13 = vadd.f32 %v4801_v4, %v12659_v8  ;;  %v4802_v48 = vmul.f32 0.6666667, %v4718_v58  ;;  %v5005_v15 = vpack.c.bf16 %v12772_v22, %v12770_v37  ;;  %8508 = vmatpush3.bf16.msra.mxu0 %v12767_v59  ;;  %v4839_v35 = vadd.f32 %v15229_v44, %v15182_v47 }
0x10c3   : > { %v4820_v36 = vadd.f32 %v4804_v42, %v12663_v3  ;;  %8509 = vmatprep.subr.bf16.mxu0 %v12785_v27  ;;  %v4851_v8 = vmul.f32 0.01, %v4819_v52 }
0x10c4   : > { %v4849_v38 = vmul.f32 0.01, %v4817_v13  ;;  %v4818_v10 = vadd.f32 %v4802_v48, %v12668_v12  ;;  %v8439_v28 = vpop.f32.mrb[140].mxu1  ;;  %8461 = vmatprep.mubr.bf16.mxu0 %v5005_v15  ;;  %v12821_v13 = vld [vmem:[#allocation6 + $0x20] sm:$0xff]   ;;  %v15226_v15 = vld [vmem:[#allocation81_spill] sm:$0xff] }
0x10c5   : > { %v4852_v39 = vmul.f32 0.01, %v4820_v36  ;;  %v4739_v24 = vadd.f32 %v12572_v56, %v8439_v28  ;;  %v4730_v3 = vpop.f32.mrb[141].mxu1  ;;  %8462 = vmatmul.mubr.bf16.gmra.mrb[148].mxu0 %v5006_v54  ;;  %v12811_v20 = vadd.f32 %v4851_v8, %v4835_v61  ;;  %15225 = vst [vmem:[#allocation36_spill] sm:$0xff] %v12821_v13  ;;  %v4840_v36 = vadd.f32 %v15226_v15, %v15183_v34 }
0x10c6   : > { %v4850_v53 = vmul.f32 0.01, %v4818_v10  ;;  %v4731_v12 = vadd.f32 %v12572_v56, %v4730_v3  ;;  %v8440_v7 = vpop.f32.mrb[142].mxu1  ;;  %8510 = vmatpush3.bf16.msra.mxu0 %v12785_v27  ;;  %v12806_v32 = vadd.f32 %v4849_v38, %v4833_v62  ;;  %v15227_v38 = vld [vmem:[#allocation33_spill] sm:$0xff]  ;;  %v15228_v10 = vld [vmem:[#allocation79_spill] sm:$0xff] }
0x10c7   : > { %v12800_v51 = vadd.f32 %v4852_v39, %v4836_v57  ;;  %v4807_v31 = vmul.f32 0.6666667, %v4739_v24  ;;  %v4742_v40 = vadd.f32 %v12572_v56, %v8440_v7  ;;  %v4733_v5 = vpop.f32.mrb[143].mxu1  ;;  %8511 = vmatprep.subr.bf16.mxu0 %v12803_v1  ;;  %15224 = vst [vmem:[#allocation40_spill] sm:$0xff] %v12811_v20  ;;  %v4838_v28 = vadd.f32 %v15228_v10, %v15185_v49  ;;  %v12836_v57 = vld [vmem:[#allocation6 + $0x28] sm:$0xff]   ;;  %v12850_v24 = vld [vmem:[#allocation6 + $0x30] sm:$0xff]  }
0x10c8   : > { %15222 = vst [vmem:[#allocation63_spill] sm:$0xff] %v12806_v32  ;;  %v12808_v43 = vadd.f32 %v4850_v53, %v4834_v50  ;;  %v4805_v11 = vmul.f32 0.6666667, %v4731_v12  ;;  %v4734_v55 = vadd.f32 %v12572_v56, %v4733_v5  ;;  %15231 = vst [vmem:[#allocation44_spill] sm:$0xff] %v12836_v57  ;;  %v12854_v3 = vld [vmem:[#allocation6 + $0x38] sm:$0xff]  }
0x10c9   : > { %15220 = vst [vmem:[#allocation45_spill] sm:$0xff] %v12800_v51  ;;  %v4823_v0 = vadd.f32 %v4807_v31, %v12685_v45  ;;  %v4808_v25 = vmul.f32 0.6666667, %v4742_v40  ;;  %v5008_v42 = vpack.c.bf16 %v12800_v51, %v12811_v20  ;;  %15235 = vst [vmem:[#allocation78_spill] sm:$0xff] %v12850_v24 }
0x10ca   : > { %15223 = vst [vmem:[#allocation60_spill] sm:$0xff] %v12808_v43  ;;  %v4821_v21 = vadd.f32 %v4805_v11, %v12689_v2  ;;  %v4806_v4 = vmul.f32 0.6666667, %v4734_v55  ;;  %v5007_v58 = vpack.c.bf16 %v12808_v43, %v12806_v32  ;;  %8512 = vmatpush3.bf16.msra.mxu0 %v12803_v1  ;;  %15236 = vst [vmem:[#allocation41_spill] sm:$0xff] %v12854_v3 }
0x10cb   : > { %v4824_v52 = vadd.f32 %v4808_v25, %v12693_v30  ;;  %8513 = vmatprep.subr.bf16.mxu0 %v12821_v13  ;;  %v4855_v2 = vmul.f32 0.01, %v4823_v0  ;;  %v4837_v30 = vadd.f32 %v15227_v38, %v15184_v26 }
0x10cc   : > { %v4853_v48 = vmul.f32 0.01, %v4821_v21  ;;  %v4822_v45 = vadd.f32 %v4806_v4, %v12696_v6  ;;  %8465 = vmatprep.mubr.bf16.mxu0 %v5007_v58 }
0x10cd   : > { %v4856_v54 = vmul.f32 0.01, %v4824_v52  ;;  %8466 = vmatmul.mubr.bf16.gmra.mrb[152].mxu0 %v5008_v42  ;;  %v12843_v26 = vadd.f32 %v4855_v2, %v4839_v35 }
0x10ce   : > { %v4854_v8 = vmul.f32 0.01, %v4822_v45  ;;  %8514 = vmatpush3.bf16.msra.mxu0 %v12821_v13  ;;  %v12839_v34 = vadd.f32 %v4853_v48, %v4837_v30 }
0x10cf   : > { %v12834_v6 = vadd.f32 %v4856_v54, %v4840_v36  ;;  %8515 = vmatprep.subr.bf16.mxu0 %v12836_v57  ;;  %15234 = vst [vmem:[#allocation76_spill] sm:$0xff] %v12843_v26 }
0x10d0   : > { %15232 = vst [vmem:[#allocation68_spill] sm:$0xff] %v12839_v34  ;;  %v12841_v39 = vadd.f32 %v4854_v8, %v4838_v28 }
0x10d1   : > { %15230 = vst [vmem:[#allocation62_spill] sm:$0xff] %v12834_v6  ;;  %v5010_v47 = vpack.c.bf16 %v12834_v6, %v12843_v26 }
0x10d2   : > { %15233 = vst [vmem:[#allocation50_spill] sm:$0xff] %v12841_v39  ;;  %v5009_v49 = vpack.c.bf16 %v12841_v39, %v12839_v34  ;;  %8516 = vmatpush3.bf16.msra.mxu0 %v12836_v57 }
0x10d3   : > { %8517 = vmatprep.subr.bf16.mxu0 %v12850_v24 }
0x10d4   : > { %8469 = vmatprep.mubr.bf16.mxu0 %v5009_v49 }
0x10d5   : > { %8470 = vmatmul.mubr.bf16.gmra.mrb[156].mxu0 %v5010_v47 }
0x10d6   : > { %8518 = vmatpush3.bf16.msra.mxu0 %v12850_v24 }
0x10d7   : > { %8519 = vmatprep.subr.bf16.mxu0 %v12854_v3 }
0x10da   : > { %8520 = vmatpush3.bf16.msra.mxu0 %v12854_v3 }
0x10db   : > { %8569 = vmatprep.subr.bf16.mxu0 %v12714_v19 }
0x1190   : > { %v8459_v23 = vpop.f32.mrb[144].mxu0 }
0x1191   : > { %v12860_v33 = vadd.f32 %v12572_v56, %v8459_v23  ;;  %v5045_v62 = vpop.f32.mrb[145].mxu0 }
0x1192   : > { %v12863_v9 = vadd.f32 %v12572_v56, %v5045_v62  ;;  %v8460_v14 = vpop.f32.mrb[146].mxu0 }
0x1193   : > { %v5110_v50 = vmul.f32 0.01, %v12860_v33  ;;  %v12867_v53 = vadd.f32 %v12572_v56, %v8460_v14  ;;  %v5048_v12 = vpop.f32.mrb[147].mxu0 }
0x1194   : > { %v5108_v7 = vmul.f32 0.01, %v12863_v9  ;;  %v12871_v17 = vadd.f32 %v12572_v56, %v5048_v12 }
0x1195   : > { %v5111_v63 = vmul.f32 0.01, %v12867_v53  ;;  %v5126_v31 = vadd.f32 %v5110_v50, %v12743_v29 }
0x1196   : > { %v5109_v61 = vmul.f32 0.01, %v12871_v17  ;;  %v5124_v11 = vadd.f32 %v5108_v7, %v12738_v16 }
0x1197   : > { %v5127_v40 = vadd.f32 %v5111_v63, %v12735_v41 }
0x1198   : > { %v8463_v5 = vpop.f32.mrb[148].mxu0  ;;  %v5125_v55 = vadd.f32 %v5109_v61, %v12740_v18 }
0x1199   : > { %v5141_v0 = vpack.c.bf16 %v5127_v40, %v5126_v31  ;;  %v12880_v25 = vadd.f32 %v12572_v56, %v8463_v5  ;;  %v5061_v21 = vpop.f32.mrb[149].mxu0 }
0x119a   : > { %v12883_v4 = vadd.f32 %v12572_v56, %v5061_v21  ;;  %v8464_v58 = vpop.f32.mrb[150].mxu0  ;;  %v5140_v52 = vpack.c.bf16 %v5125_v55, %v5124_v11 }
0x119b   : > { %15237 = vst [vmem:[#allocation52_spill] sm:$0xff] %v12880_v25  ;;  %v5114_v42 = vmul.f32 0.01, %v12880_v25  ;;  %v12887_v48 = vadd.f32 %v12572_v56, %v8464_v58  ;;  %v5064_v45 = vpop.f32.mrb[151].mxu0 }
0x119c   : > { %15238 = vst [vmem:[#allocation35_spill] sm:$0xff] %v12883_v4  ;;  %v5112_v2 = vmul.f32 0.01, %v12883_v4  ;;  %v12891_v15 = vadd.f32 %v12572_v56, %v5064_v45  ;;  %8489 = vmatprep.mubr.bf16.mxu1 %v5140_v52 }
0x119d   : > { %15239 = vst [vmem:[#allocation46_spill] sm:$0xff] %v12887_v48  ;;  %v5115_v36 = vmul.f32 0.01, %v12887_v48  ;;  %8490 = vmatmul.mubr.bf16.vlgmr.msra.gmra.mrb[144].mxu1 %v5141_v0  ;;  %v5130_v38 = vadd.f32 %v5114_v42, %v12775_v46 }
0x119e   : > { %15240 = vst [vmem:[#allocation67_spill] sm:$0xff] %v12891_v15  ;;  %v5113_v54 = vmul.f32 0.01, %v12891_v15  ;;  %8538 = vmatpush3.bf16.msra.mxu1 %v12714_v19  ;;  %v5128_v28 = vadd.f32 %v5112_v2, %v12770_v37 }
0x119f   : > { %v5131_v30 = vadd.f32 %v5115_v36, %v12764_v60  ;;  %8539 = vmatprep.subr.bf16.mxu1 %v12767_v59 }
0x11a0   : > { %v8467_v10 = vpop.f32.mrb[152].mxu0  ;;  %v5129_v8 = vadd.f32 %v5113_v54, %v12772_v22 }
0x11a1   : > { %v12902_v44 = vadd.f32 %v12572_v56, %v8467_v10  ;;  %v5077_v35 = vpop.f32.mrb[153].mxu0  ;;  %v5143_v49 = vpack.c.bf16 %v5131_v30, %v5130_v38 }
0x11a2   : > { %v12905_v47 = vadd.f32 %v12572_v56, %v5077_v35  ;;  %v8468_v23 = vpop.f32.mrb[154].mxu0  ;;  %v5142_v62 = vpack.c.bf16 %v5129_v8, %v5128_v28  ;;  %8540 = vmatpush3.bf16.msra.mxu1 %v12767_v59  ;;  %v7463_v59 = vld [vmem:[%s9410_s18 + $0x1b0] sm:$0xff]  }
0x11a3   : > { %15241 = vst [vmem:[#allocation49_spill] sm:$0xff] %v12902_v44  ;;  %v5118_v14 = vmul.f32 0.01, %v12902_v44  ;;  %v12910_v50 = vadd.f32 %v12572_v56, %v8468_v23  ;;  %v5080_v12 = vpop.f32.mrb[155].mxu0  ;;  %8541 = vmatprep.subr.bf16.mxu1 %v12785_v27 }
0x11a4   : > { %15242 = vst [vmem:[#allocation59_spill] sm:$0xff] %v12905_v47  ;;  %v5116_v7 = vmul.f32 0.01, %v12905_v47  ;;  %v12915_v63 = vadd.f32 %v12572_v56, %v5080_v12  ;;  %8493 = vmatprep.mubr.bf16.mxu1 %v5142_v62  ;;  %v7450_v12 = vld [vmem:[%s9404_s10 + $0x188] sm:$0xff]  }
0x11a5   : > { %15243 = vst [vmem:[#allocation51_spill] sm:$0xff] %v12910_v50  ;;  %v5119_v61 = vmul.f32 0.01, %v12910_v50  ;;  %8494 = vmatmul.mubr.bf16.gmra.mrb[148].mxu1 %v5143_v49  ;;  %v5134_v40 = vadd.f32 %v5118_v14, %v12811_v20 }
0x11a6   : > { %15244 = vst [vmem:[#allocation75_spill] sm:$0xff] %v12915_v63  ;;  %v5117_v31 = vmul.f32 0.01, %v12915_v63  ;;  %8542 = vmatpush3.bf16.msra.mxu1 %v12785_v27  ;;  %v5132_v55 = vadd.f32 %v5116_v7, %v12806_v32  ;;  %v7449_v7 = vld [vmem:[%s9404_s10 + $0x180] sm:$0xff]  }
0x11a7   : > { %v5135_v5 = vadd.f32 %v5119_v61, %v12800_v51  ;;  %8543 = vmatprep.subr.bf16.mxu1 %v12803_v1  ;;  %v7233_v61 = vunpack.c.l.bf16 %v7450_v12 }
0x11a8   : > { %v8471_v11 = vpop.f32.mrb[156].mxu0  ;;  %v5133_v0 = vadd.f32 %v5117_v31, %v12808_v43  ;;  %v7458_v31 = vld [vmem:[%s9410_s18 + $0x188] sm:$0xff]  }
0x11a9   : > { %v12926_v21 = vadd.f32 %v12572_v56, %v8471_v11  ;;  %v5093_v58 = vpop.f32.mrb[157].mxu0  ;;  %v5145_v52 = vpack.c.bf16 %v5135_v5, %v5134_v40  ;;  %v7234_v40 = vunpack.c.h.bf16 %v7450_v12  ;;  %v7229_v5 = vunpack.c.l.bf16 %v7449_v7  ;;  %v7457_v11 = vld [vmem:[%s9410_s18 + $0x180] sm:$0xff]  }
0x11aa   : > { %v12929_v42 = vadd.f32 %v12572_v56, %v5093_v58  ;;  %v8472_v45 = vpop.f32.mrb[158].mxu0  ;;  %v5144_v2 = vpack.c.bf16 %v5133_v0, %v5132_v55  ;;  %8544 = vmatpush3.bf16.msra.mxu1 %v12803_v1  ;;  %v7452_v55 = vld [vmem:[%s9404_s10 + $0x198] sm:$0xff]   ;;  %v7230_v0 = vunpack.c.h.bf16 %v7449_v7  ;;  %v7451_v58 = vld [vmem:[%s9404_s10 + $0x190] sm:$0xff]  }
0x11ab   : > { %15245 = vst [vmem:[#allocation77_spill] sm:$0xff] %v12926_v21  ;;  %v5122_v36 = vmul.f32 0.01, %v12926_v21  ;;  %v12934_v54 = vadd.f32 %v12572_v56, %v8472_v45  ;;  %v5096_v38 = vpop.f32.mrb[159].mxu0  ;;  %8545 = vmatprep.subr.bf16.mxu1 %v12821_v13  ;;  %v7265_v45 = vunpack.c.l.bf16 %v7458_v31  ;;  %v7238_v12 = vunpack.c.h.bf16 %v7451_v58 }
0x11ac   : > { %15246 = vst [vmem:[#allocation37_spill] sm:$0xff] %v12929_v42  ;;  %v5120_v30 = vmul.f32 0.01, %v12929_v42  ;;  %v12939_v10 = vadd.f32 %v12572_v56, %v5096_v38  ;;  %8497 = vmatprep.mubr.bf16.mxu1 %v5144_v2  ;;  %v7261_v2 = vunpack.c.l.bf16 %v7457_v11  ;;  %v12963_v38 = vmul.f32 0.1, %v7234_v40 }
0x11ad   : > { %15247 = vst [vmem:[#allocation58_spill] sm:$0xff] %v12934_v54  ;;  %v5123_v28 = vmul.f32 0.01, %v12934_v54  ;;  %8498 = vmatmul.mubr.bf16.gmra.mrb[152].mxu1 %v5145_v52  ;;  %v5138_v35 = vadd.f32 %v5122_v36, %v12843_v26  ;;  %v12961_v52 = vmul.f32 0.1, %v7233_v61  ;;  %v7241_v36 = vunpack.c.l.bf16 %v7452_v55  ;;  %v7464_v54 = vld [vmem:[%s9410_s18 + $0x1b8] sm:$0xff]  }
0x11ae   : > { %15248 = vst [vmem:[#allocation53_spill] sm:$0xff] %v12939_v10  ;;  %v5121_v8 = vmul.f32 0.01, %v12939_v10  ;;  %8546 = vmatpush3.bf16.msra.mxu1 %v12821_v13  ;;  %v5136_v56 = vadd.f32 %v5120_v30, %v12839_v34  ;;  %15250 = vst [vmem:[#allocation42_spill] sm:$0xff] %v12963_v38  ;;  %v12965_v30 = vmul.f32 0.1, %v7229_v5 }
0x11af   : > { %v5139_v49 = vadd.f32 %v5123_v28, %v12834_v6  ;;  %8547 = vmatprep.subr.bf16.mxu1 %v12836_v57  ;;  %15249 = vst [vmem:[#allocation55_spill] sm:$0xff] %v12961_v52  ;;  %v7237_v28 = vunpack.c.l.bf16 %v7451_v58  ;;  %v12974_v7 = vmul.f32 0.028867513, %v7265_v45  ;;  %v12976_v61 = vmul.f32 0.028867513, %v7261_v2  ;;  %v7454_v58 = vld [vmem:[%s9404_s10 + $0x1a8] sm:$0xff]  }
0x11b0   : > { %v5137_v23 = vadd.f32 %v5121_v8, %v12841_v39  ;;  %15251 = vst [vmem:[#allocation61_spill] sm:$0xff] %v12965_v30  ;;  %v7460_v8 = vld [vmem:[%s9410_s18 + $0x198] sm:$0xff]   ;;  %v12978_v40 = vmul.f32 0.1, %v7241_v36  ;;  %v7461_v13 = vld [vmem:[%s9410_s18 + $0x1a0] sm:$0xff]   ;;  %v7250_v1 = vunpack.c.h.bf16 %v7454_v58 }
0x11b1   : > { %v5147_v62 = vpack.c.bf16 %v5139_v49, %v5138_v35  ;;  %v7266_v35 = vunpack.c.h.bf16 %v7458_v31  ;;  %v12968_v49 = vmul.f32 0.1, %v7230_v0  ;;  %v7273_v5 = vunpack.c.l.bf16 %v7460_v8  ;;  %v7456_v39 = vld [vmem:[%s9404_s10 + $0x1b8] sm:$0xff]  }
0x11b2   : > { %v5146_v14 = vpack.c.bf16 %v5137_v23, %v5136_v56  ;;  %8548 = vmatpush3.bf16.msra.mxu1 %v12836_v57  ;;  %v7459_v56 = vld [vmem:[%s9410_s18 + $0x190] sm:$0xff]   ;;  %v7242_v23 = vunpack.c.h.bf16 %v7452_v55  ;;  %15253 = vst [vmem:[#allocation69_spill] sm:$0xff] %v12978_v40  ;;  %v12981_v31 = vmul.f32 0.5, %v12963_v38  ;;  %v12984_v0 = vmul.f32 0.5, %v12965_v30 }
0x11b3   : > { %8549 = vmatprep.subr.bf16.mxu1 %v12850_v24  ;;  %15252 = vst [vmem:[#allocation43_spill] sm:$0xff] %v12968_v49  ;;  %v12986_v55 = vmul.f32 0.1, %v7237_v28  ;;  %v4974_v45 = vmul.f32 0.028867513, %v7266_v35  ;;  %v12991_v2 = vmul.f32 0.5, %v12968_v49  ;;  %v7270_v57 = vunpack.c.h.bf16 %v7459_v56 }
0x11b4   : > { %8501 = vmatprep.mubr.bf16.mxu1 %v5146_v14  ;;  %v7262_v14 = vunpack.c.h.bf16 %v7457_v11  ;;  %v7453_v11 = vld [vmem:[%s9404_s10 + $0x1a0] sm:$0xff]   ;;  %v12993_v36 = vmul.f32 0.1, %v7242_v23  ;;  %v12995_v38 = vmul.f32 0.1, %v7238_v12  ;;  %v7455_v30 = vld [vmem:[%s9404_s10 + $0x1b0] sm:$0xff]   ;;  %v7249_v35 = vunpack.c.l.bf16 %v7454_v58 }
0x11b5   : > { %8502 = vmatmul.mubr.bf16.gmra.mrb[156].mxu1 %v5147_v62  ;;  %v12972_v62 = vmul.f32 0.5, %v12961_v52  ;;  %15254 = vst [vmem:[#allocation47_spill] sm:$0xff] %v12986_v55  ;;  %v7269_v52 = vunpack.c.l.bf16 %v7459_v56  ;;  %v4928_v28 = vmul.f32 0.5, %v12978_v40  ;;  %v4977_v34 = vmul.f32 0.028867513, %v7273_v5 }
0x11b6   : > { %8550 = vmatpush3.bf16.msra.mxu1 %v12850_v24  ;;  %15255 = vst [vmem:[#allocation48_spill] sm:$0xff] %v12993_v36  ;;  %v4972_v24 = vmul.f32 0.028867513, %v7262_v14  ;;  %15256 = vst [vmem:[#allocation64_spill] sm:$0xff] %v12995_v38  ;;  %v7245_v6 = vunpack.c.l.bf16 %v7453_v11  ;;  %v4926_v49 = vmul.f32 0.5, %v12986_v55  ;;  %v7246_v23 = vunpack.c.h.bf16 %v7453_v11 }
0x11b7   : > { %8551 = vmatprep.subr.bf16.mxu1 %v12854_v3  ;;  %v4975_v26 = vmul.f32 0.028867513, %v7269_v52  ;;  %v4929_v14 = vmul.f32 0.5, %v12993_v36  ;;  %v7253_v56 = vunpack.c.l.bf16 %v7455_v30  ;;  %v7257_v10 = vunpack.c.l.bf16 %v7456_v39 }
0x11b8   : > { %v4927_v27 = vmul.f32 0.5, %v12995_v38  ;;  %v4976_v40 = vmul.f32 0.028867513, %v7270_v57  ;;  %v7254_v5 = vunpack.c.h.bf16 %v7455_v30  ;;  %v13007_v42 = vmul.f32 0.1, %v7245_v6 }
0x11b9   : > { %v7277_v55 = vunpack.c.l.bf16 %v7461_v13  ;;  %v13009_v52 = vmul.f32 0.1, %v7249_v35  ;;  %v13011_v58 = vmul.f32 0.1, %v7246_v23  ;;  %v7278_v21 = vunpack.c.h.bf16 %v7461_v13 }
0x11ba   : > { %8552 = vmatpush3.bf16.msra.mxu1 %v12854_v3  ;;  %v7274_v3 = vunpack.c.h.bf16 %v7460_v8  ;;  %v7462_v8 = vld [vmem:[%s9410_s18 + $0x1a8] sm:$0xff]   ;;  %15257 = vst [vmem:[#allocation70_spill] sm:$0xff] %v13007_v42  ;;  %v13013_v36 = vmul.f32 0.1, %v7250_v1  ;;  %v13015_v63 = vmul.f32 0.1, %v7253_v56  ;;  %v7285_v38 = vunpack.c.l.bf16 %v7463_v59 }
0x11bb   : > { %8601 = vmatprep.subr.bf16.mxu1 %v12714_v19  ;;  %v7258_v19 = vunpack.c.h.bf16 %v7456_v39  ;;  %15258 = vst [vmem:[#allocation34_spill] sm:$0xff] %v13009_v52  ;;  %v7281_v11 = vunpack.c.l.bf16 %v7462_v8  ;;  %15259 = vst [vmem:[#allocation38_spill] sm:$0xff] %v13011_v58  ;;  %v13017_v57 = vmul.f32 0.1, %v7257_v10  ;;  %v7289_v30 = vunpack.c.l.bf16 %v7464_v54 }
0x11bc   : > { %v4978_v12 = vmul.f32 0.028867513, %v7274_v3  ;;  %15260 = vst [vmem:[#allocation72_spill] sm:$0xff] %v13013_v36  ;;  %v7282_v3 = vunpack.c.h.bf16 %v7462_v8  ;;  %15261 = vst [vmem:[#allocation73_spill] sm:$0xff] %v13015_v63  ;;  %v13019_v39 = vmul.f32 0.1, %v7254_v5  ;;  %v7286_v6 = vunpack.c.h.bf16 %v7463_v59 }
0x11bd   : > { %15262 = vst [vmem:[#allocation81_spill] sm:$0xff] %v13017_v57  ;;  %v13021_v50 = vmul.f32 0.1, %v7258_v19  ;;  %v7290_v35 = vunpack.c.h.bf16 %v7464_v54  ;;  %v4930_v47 = vmul.f32 0.5, %v13007_v42  ;;  %v4979_v23 = vmul.f32 0.028867513, %v7277_v55 }
0x11be   : > { %15263 = vst [vmem:[#allocation33_spill] sm:$0xff] %v13019_v39  ;;  %v4932_v13 = vmul.f32 0.5, %v13009_v52  ;;  %v4981_v1 = vmul.f32 0.028867513, %v7281_v11  ;;  %v4931_v8 = vmul.f32 0.5, %v13011_v58  ;;  %v4933_v44 = vmul.f32 0.5, %v13013_v36 }
0x11bf   : > { %15264 = vst [vmem:[#allocation79_spill] sm:$0xff] %v13021_v50  ;;  %v4980_v56 = vmul.f32 0.028867513, %v7278_v21  ;;  %v4982_v10 = vmul.f32 0.028867513, %v7282_v3  ;;  %v4934_v43 = vmul.f32 0.5, %v13015_v63  ;;  %v4989_v11 = vadd.f32 %v12974_v7, %v12972_v62 }
0x11c0   : > { %v4983_v5 = vmul.f32 0.028867513, %v7285_v38  ;;  %v4936_v59 = vmul.f32 0.5, %v13017_v57  ;;  %v4985_v19 = vmul.f32 0.028867513, %v7289_v30  ;;  %v4935_v54 = vmul.f32 0.5, %v13019_v39 }
0x11c1   : > { %v4984_v15 = vmul.f32 0.028867513, %v7286_v6  ;;  %v4937_v55 = vmul.f32 0.5, %v13021_v50  ;;  %v4986_v42 = vmul.f32 0.028867513, %v7290_v35  ;;  %v4990_v21 = vadd.f32 %v4974_v45, %v12981_v31 }
0x11c2   : > { %v4987_v3 = vadd.f32 %v12976_v61, %v12984_v0  ;;  %v4988_v63 = vadd.f32 %v4972_v24, %v12991_v2  ;;  %v4991_v38 = vadd.f32 %v4975_v26, %v4926_v49  ;;  %v4992_v52 = vadd.f32 %v4976_v40, %v4927_v27 }
0x11c3   : > { %v4993_v57 = vadd.f32 %v4977_v34, %v4928_v28  ;;  %v4994_v30 = vadd.f32 %v4978_v12, %v4929_v14  ;;  %v4995_v58 = vadd.f32 %v4979_v23, %v4930_v47  ;;  %v4996_v39 = vadd.f32 %v4980_v56, %v4931_v8  ;;  %v15265_v8 = vld [vmem:[#allocation52_spill] sm:$0xff] }
0x11c4   : > { %v4997_v6 = vadd.f32 %v4981_v1, %v4932_v13  ;;  %v4998_v36 = vadd.f32 %v4982_v10, %v4933_v44  ;;  %v4999_v50 = vadd.f32 %v4983_v5, %v4934_v43  ;;  %v5000_v35 = vadd.f32 %v4984_v15, %v4935_v54  ;;  %v15266_v5 = vld [vmem:[#allocation35_spill] sm:$0xff] }
0x11c5   : > { %v5001_v48 = vadd.f32 %v4985_v19, %v4936_v59  ;;  %v5002_v4 = vadd.f32 %v4986_v42, %v4937_v55  ;;  %v5247_v62 = vmul.f32 1.5, %v4989_v11  ;;  %v5248_v7 = vmul.f32 1.5, %v4990_v21  ;;  %v15268_v54 = vld [vmem:[#allocation67_spill] sm:$0xff]  ;;  %v15269_v21 = vld [vmem:[#allocation60_spill] sm:$0xff] }
0x11c6   : > { %v5245_v31 = vmul.f32 1.5, %v4987_v3  ;;  %v5246_v45 = vmul.f32 1.5, %v4988_v63  ;;  %v5249_v25 = vmul.f32 1.5, %v4991_v38  ;;  %v5250_v61 = vmul.f32 1.5, %v4992_v52  ;;  %v15270_v38 = vld [vmem:[#allocation49_spill] sm:$0xff] }
0x11c7   : > { %v5251_v0 = vmul.f32 1.5, %v4993_v57  ;;  %v5252_v24 = vmul.f32 1.5, %v4994_v30  ;;  %v5253_v26 = vmul.f32 1.5, %v4995_v58  ;;  %v5254_v27 = vmul.f32 1.5, %v4996_v39 }
0x11c8   : > { %v5255_v34 = vmul.f32 1.5, %v4997_v6  ;;  %v5256_v49 = vmul.f32 1.5, %v4998_v36  ;;  %v13037_v47 = vmul.f32 1.5, %v4999_v50  ;;  %v13039_v40 = vmul.f32 1.5, %v5000_v35  ;;  %v15271_v35 = vld [vmem:[#allocation59_spill] sm:$0xff] }
0x11c9   : > { %v13041_v43 = vmul.f32 1.5, %v5001_v48  ;;  %v13043_v15 = vmul.f32 1.5, %v5002_v4  ;;  %v13046_v44 = vadd.f32 %v5247_v62, %v12743_v29  ;;  %v13049_v63 = vadd.f32 %v5248_v7, %v12735_v41  ;;  %v13125_v7 = vld [vmem:[%s14622_s9] ss:$0 sm:$0xff] }
0x11ca   : > { %v13052_v42 = vadd.f32 %v5245_v31, %v12738_v16  ;;  %v13055_v2 = vadd.f32 %v5246_v45, %v12740_v18  ;;  %v13058_v50 = vadd.f32 %v5249_v25, %v12770_v37  ;;  %v13061_v48 = vadd.f32 %v5250_v61, %v12772_v22 }
0x11cb   : > { %v13064_v4 = vadd.f32 %v5251_v0, %v12775_v46  ;;  %v13067_v36 = vadd.f32 %v5252_v24, %v12764_v60  ;;  %v5279_v28 = vmul.f32 0.25, %v12860_v33  ;;  %v13071_v14 = vadd.f32 %v5253_v26, %v12806_v32  ;;  %v15272_v0 = vld [vmem:[#allocation51_spill] sm:$0xff]  ;;  %v15274_v60 = vld [vmem:[#allocation77_spill] sm:$0xff] }
0x11cc   : > { %v13074_v12 = vadd.f32 %v5255_v34, %v12811_v20  ;;  %v13077_v25 = vadd.f32 %v5256_v49, %v12800_v51  ;;  %v5464_v52 = vmul.f32 0.16666667, %v12860_v33  ;;  %v5277_v58 = vmul.f32 0.25, %v12863_v9  ;;  %v15273_v49 = vld [vmem:[#allocation75_spill] sm:$0xff] }
0x11cd   : > { %v5462_v57 = vmul.f32 0.16666667, %v12863_v9  ;;  %v5280_v39 = vmul.f32 0.25, %v12867_v53  ;;  %v5465_v23 = vmul.f32 0.16666667, %v12867_v53  ;;  %v5278_v13 = vmul.f32 0.25, %v12871_v17 }
0x11ce   : > { %v5463_v1 = vmul.f32 0.16666667, %v12871_v17  ;;  %v13087_v56 = vmul.f32 0.25, %v15265_v8  ;;  %v13090_v10 = vmul.f32 0.16666667, %v15265_v8  ;;  %v13093_v33 = vmul.f32 0.25, %v15266_v5 }
0x11cf   : > { %v13096_v59 = vmul.f32 0.16666667, %v15266_v5  ;;  %v15267_v9 = vld [vmem:[#allocation46_spill] sm:$0xff]  ;;  %v13105_v17 = vmul.f32 0.25, %v15268_v54  ;;  %v13108_v55 = vmul.f32 0.16666667, %v15268_v54  ;;  %v13111_v3 = vadd.f32 %v5254_v27, %v15269_v21 }
0x11d0   : > { %v13099_v19 = vmul.f32 0.25, %v15267_v9  ;;  %v13102_v53 = vmul.f32 0.16666667, %v15267_v9  ;;  %v13114_v30 = vmul.f32 0.25, %v15270_v38  ;;  %v13117_v6 = vmul.f32 0.16666667, %v15270_v38 }
0x11d1   : > { %v13120_v62 = vmul.f32 0.25, %v15271_v35  ;;  %v13129_v61 = vmul.f32 0.16666667, %v15271_v35  ;;  %v13132_v24 = vmul.f32 0.25, %v15272_v0  ;;  %v13135_v26 = vmul.f32 0.16666667, %v15272_v0 }
0x11d2   : > { %v13139_v8 = vmul.f32 0.25, %v15273_v49  ;;  %v13143_v38 = vmul.f32 0.16666667, %v15273_v49 }
0x1270   : > { %v8491_v11 = vpop.f32.mrb[144].mxu1 }
0x1271   : > { %v5191_v31 = vadd.f32 %v13125_v7, %v8491_v11  ;;  %v5182_v45 = vpop.f32.mrb[145].mxu1 }
0x1272   : > { %v5183_v27 = vadd.f32 %v13125_v7, %v5182_v45  ;;  %v8492_v34 = vpop.f32.mrb[146].mxu1 }
0x1273   : > { %v5295_v5 = vmul.f32 0.25, %v5191_v31  ;;  %v5480_v9 = vmul.f32 0.16666667, %v5191_v31  ;;  %v5194_v54 = vadd.f32 %v13125_v7, %v8492_v34  ;;  %v5185_v11 = vpop.f32.mrb[147].mxu1  ;;  %v13151_v34 = vmul.f32 0.25, %v15274_v60 }
0x1274   : > { %v5293_v35 = vmul.f32 0.25, %v5183_v27  ;;  %v5478_v20 = vmul.f32 0.16666667, %v5183_v27  ;;  %v5186_v21 = vadd.f32 %v13125_v7, %v5185_v11  ;;  %v13156_v27 = vmul.f32 0.16666667, %v15274_v60 }
0x1275   : > { %v5311_v0 = vadd.f32 %v5295_v5, %v5279_v28  ;;  %v13146_v32 = vadd.f32 %v5480_v9, %v5464_v52  ;;  %v5296_v45 = vmul.f32 0.25, %v5194_v54  ;;  %v5481_v51 = vmul.f32 0.16666667, %v5194_v54 }
0x1276   : > { %v5309_v46 = vadd.f32 %v5293_v35, %v5277_v58  ;;  %v13148_v22 = vadd.f32 %v5478_v20, %v5462_v57  ;;  %v5294_v37 = vmul.f32 0.25, %v5186_v21  ;;  %v5479_v31 = vmul.f32 0.16666667, %v5186_v21  ;;  %v15275_v58 = vld [vmem:[#allocation37_spill] sm:$0xff] }
0x1277   : > { %v5327_v29 = vmul.f32 0.01, %v5311_v0  ;;  %v5312_v49 = vadd.f32 %v5296_v45, %v5280_v39  ;;  %v13153_v18 = vadd.f32 %v5481_v51, %v5465_v23  ;;  %v13161_v20 = vmul.f32 0.25, %v15275_v58 }
0x1278   : > { %v5325_v28 = vmul.f32 0.01, %v5309_v46  ;;  %v5310_v52 = vadd.f32 %v5294_v37, %v5278_v13  ;;  %v13158_v5 = vadd.f32 %v5479_v31, %v5463_v1  ;;  %v8495_v9 = vpop.f32.mrb[148].mxu1  ;;  %v13164_v57 = vmul.f32 0.16666667, %v15275_v58 }
0x1279   : > { %v5328_v21 = vmul.f32 0.01, %v5312_v49  ;;  %v5207_v54 = vadd.f32 %v13125_v7, %v8495_v9  ;;  %v5198_v39 = vpop.f32.mrb[149].mxu1  ;;  %v5343_v51 = vadd.f32 %v5327_v29, %v13046_v44 }
0x127a   : > { %v5326_v23 = vmul.f32 0.01, %v5310_v52  ;;  %v5199_v60 = vadd.f32 %v13125_v7, %v5198_v39  ;;  %v8496_v46 = vpop.f32.mrb[150].mxu1  ;;  %v5341_v37 = vadd.f32 %v5325_v28, %v13052_v42 }
0x127b   : > { %v5344_v13 = vadd.f32 %v5328_v21, %v13049_v63  ;;  %v5299_v1 = vmul.f32 0.25, %v5207_v54  ;;  %v5484_v11 = vmul.f32 0.16666667, %v5207_v54  ;;  %v5210_v35 = vadd.f32 %v13125_v7, %v8496_v46  ;;  %v5201_v0 = vpop.f32.mrb[151].mxu1 }
0x127c   : > { %v5297_v45 = vmul.f32 0.25, %v5199_v60  ;;  %v5482_v31 = vmul.f32 0.16666667, %v5199_v60  ;;  %v5202_v49 = vadd.f32 %v13125_v7, %v5201_v0  ;;  %v5342_v9 = vadd.f32 %v5326_v23, %v13055_v2  ;;  %v15276_v2 = vld [vmem:[#allocation58_spill] sm:$0xff] }
0x127d   : > { %v5358_v29 = vpack.c.bf16 %v5344_v13, %v5343_v51  ;;  %v5315_v44 = vadd.f32 %v5299_v1, %v13087_v56  ;;  %v13176_v52 = vadd.f32 %v5484_v11, %v13090_v10  ;;  %v5300_v42 = vmul.f32 0.25, %v5210_v35 }
0x127e   : > { %v5313_v63 = vadd.f32 %v5297_v45, %v13093_v33  ;;  %v13180_v28 = vadd.f32 %v5482_v31, %v13096_v59  ;;  %v5485_v58 = vmul.f32 0.16666667, %v5210_v35  ;;  %v5298_v21 = vmul.f32 0.25, %v5202_v49 }
0x127f   : > { %v5331_v54 = vmul.f32 0.01, %v5315_v44  ;;  %v5316_v39 = vadd.f32 %v5300_v42, %v13099_v19  ;;  %v5483_v60 = vmul.f32 0.16666667, %v5202_v49  ;;  %v5357_v46 = vpack.c.bf16 %v5342_v9, %v5341_v37  ;;  %v15277_v44 = vld [vmem:[#allocation80_spill] sm:$0xff] }
0x1280   : > { %v13184_v51 = vmul.f32 0.25, %v15276_v2  ;;  %v5329_v56 = vmul.f32 0.01, %v5313_v63  ;;  %v13187_v10 = vadd.f32 %v5485_v58, %v13102_v53  ;;  %v5314_v23 = vadd.f32 %v5298_v21, %v13105_v17  ;;  %v8499_v33 = vpop.f32.mrb[152].mxu1  ;;  %v15278_v21 = vld [vmem:[#allocation56_spill] sm:$0xff] }
0x1281   : > { %v13191_v59 = vmul.f32 0.16666667, %v15276_v2  ;;  %v5332_v13 = vmul.f32 0.01, %v5316_v39  ;;  %v13194_v1 = vadd.f32 %v5483_v60, %v13108_v55  ;;  %v5223_v19 = vadd.f32 %v13125_v7, %v8499_v33  ;;  %8521 = vmatprep.mubr.bf16.mxu0 %v5357_v46  ;;  %v5214_v37 = vpop.f32.mrb[153].mxu1 }
0x1282   : > { %v5330_v11 = vmul.f32 0.01, %v5314_v23  ;;  %v5215_v35 = vadd.f32 %v13125_v7, %v5214_v37  ;;  %8522 = vmatmul.mubr.bf16.vlgmr.msra.gmra.mrb[160].mxu0 %v5358_v29  ;;  %v8500_v53 = vpop.f32.mrb[154].mxu1  ;;  %v5345_v0 = vadd.f32 %v5329_v56, %v13058_v50  ;;  %v5347_v17 = vadd.f32 %v5331_v54, %v13064_v4  ;;  %v15280_v37 = vld [vmem:[#allocation53_spill] sm:$0xff] }
0x1283   : > { %v5303_v45 = vmul.f32 0.25, %v5223_v19  ;;  %v5488_v31 = vmul.f32 0.16666667, %v5223_v19  ;;  %v5226_v49 = vadd.f32 %v13125_v7, %v8500_v53  ;;  %v5217_v9 = vpop.f32.mrb[155].mxu1  ;;  %v5348_v55 = vadd.f32 %v5332_v13, %v13067_v36  ;;  %8570 = vmatpush3.bf16.msra.mxu0 %v15277_v44  ;;  %v15279_v19 = vld [vmem:[#allocation32_spill] sm:$0xff] }
0x1284   : > { %v5301_v42 = vmul.f32 0.25, %v5215_v35  ;;  %v5486_v63 = vmul.f32 0.16666667, %v5215_v35  ;;  %v5218_v58 = vadd.f32 %v13125_v7, %v5217_v9  ;;  %v5346_v29 = vadd.f32 %v5330_v11, %v13061_v48  ;;  %8571 = vmatprep.subr.bf16.mxu0 %v15278_v21 }
0x1285   : > { %v5319_v50 = vadd.f32 %v5303_v45, %v13114_v30  ;;  %v13208_v4 = vadd.f32 %v5488_v31, %v13117_v6  ;;  %v5304_v54 = vmul.f32 0.25, %v5226_v49  ;;  %v5489_v39 = vmul.f32 0.16666667, %v5226_v49 }
0x1286   : > { %v5317_v60 = vadd.f32 %v5301_v42, %v13120_v62  ;;  %v13212_v36 = vadd.f32 %v5486_v63, %v13129_v61  ;;  %v5302_v46 = vmul.f32 0.25, %v5218_v58  ;;  %v5487_v2 = vmul.f32 0.16666667, %v5218_v58 }
0x1287   : > { %v5335_v56 = vmul.f32 0.01, %v5319_v50  ;;  %v5320_v23 = vadd.f32 %v5304_v54, %v13132_v24  ;;  %v13216_v48 = vadd.f32 %v5489_v39, %v13135_v26  ;;  %v5359_v33 = vpack.c.bf16 %v5346_v29, %v5345_v0  ;;  %8572 = vmatpush3.bf16.msra.mxu0 %v15278_v21  ;;  %v15281_v21 = vld [vmem:[#allocation65_spill] sm:$0xff] }
0x1288   : > { %v5333_v30 = vmul.f32 0.01, %v5317_v60  ;;  %v5318_v6 = vadd.f32 %v5302_v46, %v13139_v8  ;;  %v13221_v13 = vadd.f32 %v5487_v2, %v13143_v38  ;;  %v8503_v62 = vpop.f32.mrb[156].mxu1  ;;  %v5360_v61 = vpack.c.bf16 %v5348_v55, %v5347_v17  ;;  %8573 = vmatprep.subr.bf16.mxu0 %v15279_v19 }
0x1289   : > { %v5290_v11 = vmul.f32 0.25, %v15280_v37  ;;  %v5475_v24 = vmul.f32 0.16666667, %v15280_v37  ;;  %v5336_v35 = vmul.f32 0.01, %v5320_v23  ;;  %v5239_v26 = vadd.f32 %v13125_v7, %v8503_v62  ;;  %8525 = vmatprep.mubr.bf16.mxu0 %v5359_v33  ;;  %v5230_v53 = vpop.f32.mrb[157].mxu1 }
0x128a   : > { %v5334_v0 = vmul.f32 0.01, %v5318_v6  ;;  %v5231_v45 = vadd.f32 %v13125_v7, %v5230_v53  ;;  %8526 = vmatmul.mubr.bf16.gmra.mrb[164].mxu0 %v5360_v61  ;;  %v8504_v8 = vpop.f32.mrb[158].mxu1  ;;  %v5349_v38 = vadd.f32 %v5333_v30, %v13071_v14  ;;  %v5351_v17 = vadd.f32 %v5335_v56, %v13074_v12  ;;  %v15283_v6 = vld [vmem:[#allocation76_spill] sm:$0xff]  ;;  %v15284_v61 = vld [vmem:[#allocation62_spill] sm:$0xff] }
0x128b   : > { %v5307_v31 = vmul.f32 0.25, %v5239_v26  ;;  %v5492_v49 = vmul.f32 0.16666667, %v5239_v26  ;;  %v5242_v9 = vadd.f32 %v13125_v7, %v8504_v8  ;;  %v5233_v55 = vpop.f32.mrb[159].mxu1  ;;  %v5352_v44 = vadd.f32 %v5336_v35, %v13077_v25  ;;  %8574 = vmatpush3.bf16.msra.mxu0 %v15279_v19  ;;  %v15285_v19 = vld [vmem:[#allocation68_spill] sm:$0xff]  ;;  %v15286_v35 = vld [vmem:[#allocation50_spill] sm:$0xff] }
0x128c   : > { %v5305_v42 = vmul.f32 0.25, %v5231_v45  ;;  %v5490_v63 = vmul.f32 0.16666667, %v5231_v45  ;;  %v5234_v58 = vadd.f32 %v13125_v7, %v5233_v55  ;;  %v5350_v29 = vadd.f32 %v5334_v0, %v13111_v3  ;;  %8575 = vmatprep.subr.bf16.mxu0 %v15281_v21  ;;  %v15287_v45 = vld [vmem:[#allocation44_spill] sm:$0xff] }
0x128d   : > { %v5323_v14 = vadd.f32 %v5307_v31, %v13151_v34  ;;  %v13238_v12 = vadd.f32 %v5492_v49, %v13156_v27  ;;  %v5308_v50 = vmul.f32 0.25, %v5242_v9  ;;  %v5493_v54 = vmul.f32 0.16666667, %v5242_v9 }
0x128e   : > { %v5321_v39 = vadd.f32 %v5305_v42, %v13161_v20  ;;  %v13242_v25 = vadd.f32 %v5490_v63, %v13164_v57  ;;  %v5306_v60 = vmul.f32 0.25, %v5234_v58  ;;  %v5491_v46 = vmul.f32 0.16666667, %v5234_v58  ;;  %v15282_v20 = vld [vmem:[#allocation36_spill] sm:$0xff] }
0x128f   : > { %v5339_v2 = vmul.f32 0.01, %v5323_v14  ;;  %v5324_v56 = vadd.f32 %v5308_v50, %v13184_v51  ;;  %v13246_v3 = vadd.f32 %v5493_v54, %v13191_v59  ;;  %v5361_v23 = vpack.c.bf16 %v5350_v29, %v5349_v38  ;;  %8576 = vmatpush3.bf16.msra.mxu0 %v15281_v21 }
0x1290   : > { %v5337_v34 = vmul.f32 0.01, %v5321_v39  ;;  %v5322_v27 = vadd.f32 %v5306_v60, %v5290_v11  ;;  %v13249_v33 = vadd.f32 %v5491_v46, %v5475_v24  ;;  %v5362_v30 = vpack.c.bf16 %v5352_v44, %v5351_v17  ;;  %8577 = vmatprep.subr.bf16.mxu0 %v15282_v20 }
0x1291   : > { %v5340_v57 = vmul.f32 0.01, %v5324_v56  ;;  %8529 = vmatprep.mubr.bf16.mxu0 %v5361_v23  ;;  %v5275_v62 = vadd.f32 %v13041_v43, %v15283_v6  ;;  %v5276_v51 = vadd.f32 %v13043_v15, %v15284_v61  ;;  %v5273_v37 = vadd.f32 %v13037_v47, %v15285_v19  ;;  %v15288_v15 = vld [vmem:[#allocation78_spill] sm:$0xff]  ;;  %v15289_v47 = vld [vmem:[#allocation41_spill] sm:$0xff] }
0x1292   : > { %v5338_v59 = vmul.f32 0.01, %v5322_v27  ;;  %8530 = vmatmul.mubr.bf16.gmra.mrb[168].mxu0 %v5362_v30  ;;  %v5274_v11 = vadd.f32 %v13039_v40, %v15286_v35 }
0x1293   : > { %v5355_v24 = vadd.f32 %v5339_v2, %v5275_v62  ;;  %v5356_v26 = vadd.f32 %v5340_v57, %v5276_v51  ;;  %8578 = vmatpush3.bf16.msra.mxu0 %v15282_v20  ;;  %v5353_v53 = vadd.f32 %v5337_v34, %v5273_v37  ;;  %v15290_v2 = vld [vmem:[#allocation42_spill] sm:$0xff]  ;;  %v15292_v20 = vld [vmem:[#allocation71_spill] sm:$0xff] }
0x1294   : > { %v5354_v0 = vadd.f32 %v5338_v59, %v5274_v11  ;;  %8579 = vmatprep.subr.bf16.mxu0 %v15287_v45  ;;  %v5545_v56 = vadd.f32 %v15290_v2, %v12735_v41  ;;  %v15295_v59 = vld [vmem:[#allocation55_spill] sm:$0xff]  ;;  %v8859_v2 = vld [vmem:[#allocation6] sm:$0xff]  }
0x1295   : > { %v5364_v43 = vpack.c.bf16 %v5356_v26, %v5355_v24 }
0x1296   : > { %v5363_v8 = vpack.c.bf16 %v5354_v0, %v5353_v53 }
0x1297   : > { %8580 = vmatpush3.bf16.msra.mxu0 %v15287_v45 }
0x1298   : > { %8533 = vmatprep.mubr.bf16.mxu0 %v5363_v8  ;;  %8581 = vmatprep.subr.bf16.mxu0 %v15288_v15 }
0x129a   : > { %8534 = vmatmul.mubr.bf16.gmra.mrb[172].mxu0 %v5364_v43 }
0x129b   : > { %8582 = vmatpush3.bf16.msra.mxu0 %v15288_v15 }
0x129c   : > { %8583 = vmatprep.subr.bf16.mxu0 %v15289_v47 }
0x129f   : > { %8584 = vmatpush3.bf16.msra.mxu0 %v15289_v47 }
0x1355   : > { %v8523_v40 = vpop.f32.mrb[160].mxu0 }
0x1356   : > { %v5408_v38 = vadd.f32 %v13125_v7, %v8523_v40  ;;  %v5399_v17 = vpop.f32.mrb[161].mxu0 }
0x1357   : > { %v5400_v31 = vadd.f32 %v13125_v7, %v5399_v17  ;;  %v8524_v49 = vpop.f32.mrb[162].mxu0 }
0x1358   : > { %v5512_v9 = vmul.f32 0.6666667, %v5408_v38  ;;  %v5411_v55 = vadd.f32 %v13125_v7, %v8524_v49  ;;  %v5402_v44 = vpop.f32.mrb[163].mxu0 }
0x1359   : > { %v5510_v42 = vmul.f32 0.6666667, %v5400_v31  ;;  %v5403_v63 = vadd.f32 %v13125_v7, %v5402_v44 }
0x135a   : > { %v5528_v58 = vadd.f32 %v5512_v9, %v13146_v32  ;;  %v5513_v29 = vmul.f32 0.6666667, %v5411_v55  ;;  %v15291_v32 = vld [vmem:[#allocation61_spill] sm:$0xff] }
0x135b   : > { %v5526_v21 = vadd.f32 %v5510_v42, %v13148_v22  ;;  %v5511_v14 = vmul.f32 0.6666667, %v5403_v63  ;;  %v5542_v30 = vadd.f32 %v15291_v32, %v12738_v16  ;;  %v15293_v22 = vld [vmem:[#allocation43_spill] sm:$0xff]  ;;  %v15298_v42 = vld [vmem:[#allocation57_spill] sm:$0xff] }
0x135c   : > { %v5529_v50 = vadd.f32 %v5513_v29, %v13153_v18  ;;  %v5560_v46 = vmul.f32 0.01, %v5528_v58  ;;  %v5543_v57 = vadd.f32 %v15293_v22, %v15292_v20  ;;  %v8860_v22 = vld [vmem:[#allocation6 + $0x8] sm:$0xff]  }
0x135d   : > { %v5558_v54 = vmul.f32 0.01, %v5526_v21  ;;  %v5527_v39 = vadd.f32 %v5511_v14, %v13158_v5  ;;  %v8527_v60 = vpop.f32.mrb[164].mxu0  ;;  %v15294_v5 = vld [vmem:[#allocation54_spill] sm:$0xff]  ;;  %v15301_v14 = vld [vmem:[#allocation47_spill] sm:$0xff] }
0x135e   : > { %v5561_v23 = vmul.f32 0.01, %v5529_v50  ;;  %v5424_v34 = vadd.f32 %v13125_v7, %v8527_v60  ;;  %v5415_v27 = vpop.f32.mrb[165].mxu0  ;;  %v5544_v37 = vadd.f32 %v15295_v59, %v15294_v5  ;;  %v15300_v21 = vld [vmem:[#allocation66_spill] sm:$0xff] }
0x135f   : > { %v5559_v62 = vmul.f32 0.01, %v5527_v39  ;;  %v5416_v18 = vadd.f32 %v13125_v7, %v5415_v27  ;;  %v8528_v51 = vpop.f32.mrb[166].mxu0  ;;  %v13288_v53 = vadd.f32 %v5558_v54, %v5542_v30  ;;  %v15302_v50 = vld [vmem:[#allocation74_spill] sm:$0xff]  ;;  %v15303_v54 = vld [vmem:[#allocation64_spill] sm:$0xff] }
0x1360   : > { %v13285_v11 = vadd.f32 %v5561_v23, %v5545_v56  ;;  %v5516_v41 = vmul.f32 0.6666667, %v5424_v34  ;;  %v5427_v24 = vadd.f32 %v13125_v7, %v8528_v51  ;;  %v5418_v26 = vpop.f32.mrb[167].mxu0  ;;  %v13293_v43 = vadd.f32 %v5560_v46, %v5544_v37  ;;  %v15304_v56 = vld [vmem:[#allocation39_spill] sm:$0xff]  ;;  %v15305_v23 = vld [vmem:[#allocation69_spill] sm:$0xff] }
0x1361   : > { %v13290_v0 = vadd.f32 %v5559_v62, %v5543_v57  ;;  %v5514_v16 = vmul.f32 0.6666667, %v5416_v18  ;;  %v5419_v45 = vadd.f32 %v13125_v7, %v5418_v26  ;;  %v5547_v39 = vadd.f32 %v15303_v54, %v15302_v50 }
0x1362   : > { %15296 = vst [vmem:[#allocation82_spill] sm:$0xff] %v13285_v11  ;;  %v5532_v8 = vadd.f32 %v5516_v41, %v13176_v52  ;;  %v5517_v15 = vmul.f32 0.6666667, %v5427_v24  ;;  %v5721_v31 = vpack.c.bf16 %v13285_v11, %v13293_v43  ;;  %v15299_v52 = vld [vmem:[#allocation48_spill] sm:$0xff]  ;;  %v5548_v34 = vadd.f32 %v15305_v23, %v15304_v56 }
0x1363   : > { %15297 = vst [vmem:[#allocation52_spill] sm:$0xff] %v13290_v0  ;;  %v5530_v47 = vadd.f32 %v5514_v16, %v13180_v28  ;;  %v5515_v40 = vmul.f32 0.6666667, %v5419_v45  ;;  %v5720_v38 = vpack.c.bf16 %v13290_v0, %v13288_v53  ;;  %v5549_v63 = vadd.f32 %v15299_v52, %v15298_v42  ;;  %v15314_v42 = vld [vmem:[#allocation60_spill] sm:$0xff]  ;;  %v15315_v52 = vld [vmem:[#allocation38_spill] sm:$0xff] }
0x1364   : > { %v5533_v17 = vadd.f32 %v5517_v15, %v13187_v10  ;;  %v5564_v44 = vmul.f32 0.01, %v5532_v8  ;;  %v5546_v10 = vadd.f32 %v15301_v14, %v15300_v21  ;;  %v8861_v8 = vld [vmem:[#allocation6 + $0x10] sm:$0xff]  }
0x1365   : > { %v5562_v49 = vmul.f32 0.01, %v5530_v47  ;;  %v5531_v9 = vadd.f32 %v5515_v40, %v13194_v1  ;;  %v8531_v55 = vpop.f32.mrb[168].mxu0  ;;  %8553 = vmatprep.mubr.bf16.mxu1 %v5720_v38  ;;  %v15310_v38 = vld [vmem:[#allocation45_spill] sm:$0xff]  ;;  %v15317_v21 = vld [vmem:[#allocation34_spill] sm:$0xff] }
0x1366   : > { %v5565_v58 = vmul.f32 0.01, %v5533_v17  ;;  %v5440_v28 = vadd.f32 %v13125_v7, %v8531_v55  ;;  %v5431_v29 = vpop.f32.mrb[169].mxu0  ;;  %8554 = vmatmul.mubr.bf16.vlgmr.msra.gmra.mrb[160].mxu1 %v5721_v31  ;;  %v13321_v5 = vadd.f32 %v5564_v44, %v5548_v34  ;;  %v15313_v55 = vld [vmem:[#allocation70_spill] sm:$0xff] }
0x1367   : > { %v5563_v60 = vmul.f32 0.01, %v5531_v9  ;;  %v5432_v1 = vadd.f32 %v13125_v7, %v5431_v29  ;;  %v8532_v46 = vpop.f32.mrb[170].mxu0  ;;  %8602 = vmatpush3.bf16.msra.mxu1 %v8859_v2  ;;  %v13316_v57 = vadd.f32 %v5562_v49, %v5546_v10  ;;  %v15316_v29 = vld [vmem:[#allocation40_spill] sm:$0xff] }
0x1368   : > { %v13313_v27 = vadd.f32 %v5565_v58, %v5549_v63  ;;  %v5520_v32 = vmul.f32 0.6666667, %v5440_v28  ;;  %v5443_v30 = vadd.f32 %v13125_v7, %v8532_v46  ;;  %v5434_v20 = vpop.f32.mrb[171].mxu0  ;;  %8603 = vmatprep.subr.bf16.mxu1 %v8860_v22  ;;  %15309 = vst [vmem:[#allocation49_spill] sm:$0xff] %v13321_v5  ;;  %v5551_v63 = vadd.f32 %v15315_v52, %v15314_v42 }
0x1369   : > { %15307 = vst [vmem:[#allocation46_spill] sm:$0xff] %v13316_v57  ;;  %v13318_v62 = vadd.f32 %v5563_v60, %v5547_v39  ;;  %v5518_v18 = vmul.f32 0.6666667, %v5432_v1  ;;  %v5435_v51 = vadd.f32 %v13125_v7, %v5434_v20  ;;  %v5552_v14 = vadd.f32 %v15317_v21, %v15316_v29  ;;  %v8862_v60 = vld [vmem:[#allocation6 + $0x18] sm:$0xff]  }
0x136a   : > { %15306 = vst [vmem:[#allocation35_spill] sm:$0xff] %v13313_v27  ;;  %v5536_v59 = vadd.f32 %v5520_v32, %v13208_v4  ;;  %v5521_v37 = vmul.f32 0.6666667, %v5443_v30  ;;  %v5723_v45 = vpack.c.bf16 %v13313_v27, %v13321_v5 }
0x136b   : > { %15308 = vst [vmem:[#allocation67_spill] sm:$0xff] %v13318_v62  ;;  %v5534_v41 = vadd.f32 %v5518_v18, %v13212_v36  ;;  %v5519_v24 = vmul.f32 0.6666667, %v5435_v51  ;;  %v5722_v26 = vpack.c.bf16 %v13318_v62, %v13316_v57  ;;  %8604 = vmatpush3.bf16.msra.mxu1 %v8860_v22  ;;  %v15311_v36 = vld [vmem:[#allocation72_spill] sm:$0xff] }
0x136c   : > { %v5537_v16 = vadd.f32 %v5521_v37, %v13216_v48  ;;  %8605 = vmatprep.subr.bf16.mxu1 %v8861_v8  ;;  %v5568_v4 = vmul.f32 0.01, %v5536_v59  ;;  %v5553_v17 = vadd.f32 %v15311_v36, %v15310_v38  ;;  %v15312_v48 = vld [vmem:[#allocation63_spill] sm:$0xff]  ;;  %v8863_v59 = vld [vmem:[#allocation6 + $0x20] sm:$0xff]  }
0x136d   : > { %v5566_v15 = vmul.f32 0.01, %v5534_v41  ;;  %v5535_v47 = vadd.f32 %v5519_v24, %v13221_v13  ;;  %v8535_v40 = vpop.f32.mrb[172].mxu0  ;;  %8557 = vmatprep.mubr.bf16.mxu1 %v5722_v26  ;;  %v5550_v44 = vadd.f32 %v15313_v55, %v15312_v48  ;;  %v15322_v24 = vld [vmem:[#allocation79_spill] sm:$0xff] }
0x136e   : > { %v5569_v31 = vmul.f32 0.01, %v5537_v16  ;;  %v5456_v49 = vadd.f32 %v13125_v7, %v8535_v40  ;;  %v5447_v9 = vpop.f32.mrb[173].mxu0  ;;  %8558 = vmatmul.mubr.bf16.gmra.mrb[164].mxu1 %v5723_v45  ;;  %v13349_v23 = vadd.f32 %v5568_v4, %v5552_v14  ;;  %v15323_v16 = vld [vmem:[#allocation73_spill] sm:$0xff] }
0x136f   : > { %v5567_v58 = vmul.f32 0.01, %v5535_v47  ;;  %v5448_v13 = vadd.f32 %v13125_v7, %v5447_v9  ;;  %v8536_v28 = vpop.f32.mrb[174].mxu0  ;;  %8606 = vmatpush3.bf16.msra.mxu1 %v8861_v8  ;;  %v13344_v1 = vadd.f32 %v5566_v15, %v5550_v44  ;;  %v5554_v45 = vadd.f32 %v15323_v16, %v15285_v19  ;;  %v15325_v47 = vld [vmem:[#allocation81_spill] sm:$0xff] }
0x1370   : > { %v13341_v10 = vadd.f32 %v5569_v31, %v5553_v17  ;;  %v5524_v50 = vmul.f32 0.6666667, %v5456_v49  ;;  %v5459_v54 = vadd.f32 %v13125_v7, %v8536_v28  ;;  %v5450_v39 = vpop.f32.mrb[175].mxu0  ;;  %8607 = vmatprep.subr.bf16.mxu1 %v8862_v60  ;;  %15321 = vst [vmem:[#allocation77_spill] sm:$0xff] %v13349_v23  ;;  %v5556_v40 = vadd.f32 %v15325_v47, %v15283_v6  ;;  %v8865_v17 = vld [vmem:[#allocation6 + $0x30] sm:$0xff]   ;;  %v8866_v6 = vld [vmem:[#allocation6 + $0x38] sm:$0xff]  }
0x1371   : > { %15319 = vst [vmem:[#allocation51_spill] sm:$0xff] %v13344_v1  ;;  %v13346_v46 = vadd.f32 %v5567_v58, %v5551_v63  ;;  %v5522_v2 = vmul.f32 0.6666667, %v5448_v13  ;;  %v5451_v56 = vadd.f32 %v13125_v7, %v5450_v39 }
0x1372   : > { %15318 = vst [vmem:[#allocation59_spill] sm:$0xff] %v13341_v10  ;;  %v5540_v34 = vadd.f32 %v5524_v50, %v13238_v12  ;;  %v5525_v32 = vmul.f32 0.6666667, %v5459_v54  ;;  %v5725_v51 = vpack.c.bf16 %v13341_v10, %v13349_v23 }
0x1373   : > { %15320 = vst [vmem:[#allocation75_spill] sm:$0xff] %v13346_v46  ;;  %v5538_v30 = vadd.f32 %v5522_v2, %v13242_v25  ;;  %v5523_v20 = vmul.f32 0.6666667, %v5451_v56  ;;  %v5724_v22 = vpack.c.bf16 %v13346_v46, %v13344_v1  ;;  %8608 = vmatpush3.bf16.msra.mxu1 %v8862_v60  ;;  %v5557_v25 = vadd.f32 %v15322_v24, %v15284_v61 }
0x1374   : > { %v5541_v18 = vadd.f32 %v5525_v32, %v13246_v3  ;;  %8609 = vmatprep.subr.bf16.mxu1 %v8863_v59  ;;  %v5572_v12 = vmul.f32 0.01, %v5540_v34  ;;  %v15324_v3 = vld [vmem:[#allocation33_spill] sm:$0xff] }
0x1375   : > { %v5570_v37 = vmul.f32 0.01, %v5538_v30  ;;  %v5539_v41 = vadd.f32 %v5523_v20, %v13249_v33  ;;  %8561 = vmatprep.mubr.bf16.mxu1 %v5724_v22  ;;  %v5555_v8 = vadd.f32 %v15324_v3, %v15286_v35  ;;  %v8864_v33 = vld [vmem:[#allocation6 + $0x28] sm:$0xff]  }
0x1376   : > { %v5573_v26 = vmul.f32 0.01, %v5541_v18  ;;  %8562 = vmatmul.mubr.bf16.gmra.mrb[168].mxu1 %v5725_v51  ;;  %v13373_v36 = vadd.f32 %v5572_v12, %v5556_v40 }
0x1377   : > { %v5571_v15 = vmul.f32 0.01, %v5539_v41  ;;  %8610 = vmatpush3.bf16.msra.mxu1 %v8863_v59  ;;  %v13369_v38 = vadd.f32 %v5570_v37, %v5554_v45 }
0x1378   : > { %v13367_v4 = vadd.f32 %v5573_v26, %v5557_v25  ;;  %8611 = vmatprep.subr.bf16.mxu1 %v8864_v33  ;;  %15329 = vst [vmem:[#allocation56_spill] sm:$0xff] %v13373_v36 }
0x1379   : > { %15327 = vst [vmem:[#allocation58_spill] sm:$0xff] %v13369_v38  ;;  %v13371_v61 = vadd.f32 %v5571_v15, %v5555_v8 }
0x137a   : > { %15326 = vst [vmem:[#allocation37_spill] sm:$0xff] %v13367_v4  ;;  %v5727_v35 = vpack.c.bf16 %v13367_v4, %v13373_v36 }
0x137b   : > { %15328 = vst [vmem:[#allocation80_spill] sm:$0xff] %v13371_v61  ;;  %v5726_v19 = vpack.c.bf16 %v13371_v61, %v13369_v38  ;;  %8612 = vmatpush3.bf16.msra.mxu1 %v8864_v33 }
0x137c   : > { %8613 = vmatprep.subr.bf16.mxu1 %v8865_v17 }
0x137d   : > { %8565 = vmatprep.mubr.bf16.mxu1 %v5726_v19 }
0x137e   : > { %8566 = vmatmul.mubr.bf16.gmra.mrb[172].mxu1 %v5727_v35 }
0x137f   : > { %8614 = vmatpush3.bf16.msra.mxu1 %v8865_v17 }
0x1380   : > { %8615 = vmatprep.subr.bf16.mxu1 %v8866_v6 }
0x1383   : > { %8616 = vmatpush3.bf16.msra.mxu1 %v8866_v6 }
0x1439   : > { %v8555_v31 = vpop.f32.mrb[160].mxu1 }
0x143a   : > { %v13380_v49 = vadd.f32 %v13125_v7, %v8555_v31  ;;  %v5762_v9 = vpop.f32.mrb[161].mxu1 }
0x143b   : > { %v13383_v48 = vadd.f32 %v13125_v7, %v5762_v9  ;;  %v8556_v55 = vpop.f32.mrb[162].mxu1 }
0x143c   : > { %15330 = vst [vmem:[#allocation32_spill] sm:$0xff] %v13380_v49  ;;  %v5827_v44 = vmul.f32 0.01, %v13380_v49  ;;  %v13387_v42 = vadd.f32 %v13125_v7, %v8556_v55  ;;  %v5765_v52 = vpop.f32.mrb[163].mxu1 }
0x143d   : > { %15331 = vst [vmem:[#allocation53_spill] sm:$0xff] %v13383_v48  ;;  %v5825_v63 = vmul.f32 0.01, %v13383_v48  ;;  %v13391_v58 = vadd.f32 %v13125_v7, %v5765_v52 }
0x143e   : > { %15332 = vst [vmem:[#allocation65_spill] sm:$0xff] %v13387_v42  ;;  %v5828_v13 = vmul.f32 0.01, %v13387_v42  ;;  %v5843_v29 = vadd.f32 %v5827_v44, %v13293_v43 }
0x143f   : > { %15333 = vst [vmem:[#allocation36_spill] sm:$0xff] %v13391_v58  ;;  %v5826_v28 = vmul.f32 0.01, %v13391_v58  ;;  %v5841_v50 = vadd.f32 %v5825_v63, %v13288_v53 }
0x1440   : > { %v5844_v21 = vadd.f32 %v5828_v13, %v13285_v11 }
0x1441   : > { %v8559_v14 = vpop.f32.mrb[164].mxu1  ;;  %v5842_v54 = vadd.f32 %v5826_v28, %v13290_v0 }
0x1442   : > { %v5858_v39 = vpack.c.bf16 %v5844_v21, %v5843_v29  ;;  %v13400_v60 = vadd.f32 %v13125_v7, %v8559_v14  ;;  %v5778_v2 = vpop.f32.mrb[165].mxu1 }
0x1443   : > { %v13403_v56 = vadd.f32 %v13125_v7, %v5778_v2  ;;  %v8560_v34 = vpop.f32.mrb[166].mxu1  ;;  %v5857_v32 = vpack.c.bf16 %v5842_v54, %v5841_v50 }
0x1444   : > { %15334 = vst [vmem:[#allocation76_spill] sm:$0xff] %v13400_v60  ;;  %v5831_v30 = vmul.f32 0.01, %v13400_v60  ;;  %v13407_v20 = vadd.f32 %v13125_v7, %v8560_v34  ;;  %v5781_v22 = vpop.f32.mrb[167].mxu1 }
0x1445   : > { %15335 = vst [vmem:[#allocation62_spill] sm:$0xff] %v13403_v56  ;;  %v5829_v18 = vmul.f32 0.01, %v13403_v56  ;;  %v13411_v51 = vadd.f32 %v13125_v7, %v5781_v22  ;;  %8585 = vmatprep.mubr.bf16.mxu0 %v5857_v32 }
0x1446   : > { %15336 = vst [vmem:[#allocation68_spill] sm:$0xff] %v13407_v20  ;;  %v5832_v59 = vmul.f32 0.01, %v13407_v20  ;;  %8586 = vmatmul.mubr.bf16.vlgmr.msra.gmra.mrb[176].mxu0 %v5858_v39  ;;  %v5847_v41 = vadd.f32 %v5831_v30, %v13321_v5 }
0x1447   : > { %15337 = vst [vmem:[#allocation50_spill] sm:$0xff] %v13411_v51  ;;  %v5830_v37 = vmul.f32 0.01, %v13411_v51  ;;  %v5845_v25 = vadd.f32 %v5829_v18, %v13316_v57 }
0x1448   : > { %v5848_v12 = vadd.f32 %v5832_v59, %v13313_v27 }
0x1449   : > { %v8563_v24 = vpop.f32.mrb[168].mxu1  ;;  %v5846_v26 = vadd.f32 %v5830_v37, %v13318_v62 }
0x144a   : > { %v13420_v16 = vadd.f32 %v13125_v7, %v8563_v24  ;;  %v5794_v45 = vpop.f32.mrb[169].mxu1  ;;  %v5860_v3 = vpack.c.bf16 %v5848_v12, %v5847_v41  ;;  %v7466_v24 = vld [vmem:[%s9404_s10 + $0x1c8] sm:$0xff]  }
0x144b   : > { %v13423_v8 = vadd.f32 %v13125_v7, %v5794_v45  ;;  %v8564_v15 = vpop.f32.mrb[170].mxu1  ;;  %v5859_v47 = vpack.c.bf16 %v5846_v26, %v5845_v25  ;;  %v7465_v25 = vld [vmem:[%s9404_s10 + $0x1c0] sm:$0xff]   ;;  %v7297_v26 = vunpack.c.l.bf16 %v7466_v24  ;;  %v7474_v45 = vld [vmem:[%s9410_s18 + $0x1c8] sm:$0xff]  }
0x144c   : > { %15338 = vst [vmem:[#allocation44_spill] sm:$0xff] %v13420_v16  ;;  %v5835_v40 = vmul.f32 0.01, %v13420_v16  ;;  %v13427_v33 = vadd.f32 %v13125_v7, %v8564_v15  ;;  %v5797_v19 = vpop.f32.mrb[171].mxu1  ;;  %v7293_v15 = vunpack.c.l.bf16 %v7465_v25 }
0x144d   : > { %15339 = vst [vmem:[#allocation78_spill] sm:$0xff] %v13423_v8  ;;  %v5833_v35 = vmul.f32 0.01, %v13423_v8  ;;  %v13431_v17 = vadd.f32 %v13125_v7, %v5797_v19  ;;  %8589 = vmatprep.mubr.bf16.mxu0 %v5859_v47  ;;  %v7473_v47 = vld [vmem:[%s9410_s18 + $0x1c0] sm:$0xff]   ;;  %v7294_v19 = vunpack.c.h.bf16 %v7465_v25 }
0x144e   : > { %15340 = vst [vmem:[#allocation41_spill] sm:$0xff] %v13427_v33  ;;  %v5836_v6 = vmul.f32 0.01, %v13427_v33  ;;  %8590 = vmatmul.mubr.bf16.gmra.mrb[180].mxu0 %v5860_v3  ;;  %v5851_v9 = vadd.f32 %v5835_v40, %v13349_v23  ;;  %v7298_v3 = vunpack.c.h.bf16 %v7466_v24  ;;  %v7468_v40 = vld [vmem:[%s9404_s10 + $0x1d8] sm:$0xff]   ;;  %v7469_v25 = vld [vmem:[%s9404_s10 + $0x1e0] sm:$0xff]  }
0x144f   : > { %15341 = vst [vmem:[#allocation42_spill] sm:$0xff] %v13431_v17  ;;  %v5834_v31 = vmul.f32 0.01, %v13431_v17  ;;  %v5849_v52 = vadd.f32 %v5833_v35, %v13344_v1  ;;  %v7467_v35 = vld [vmem:[%s9404_s10 + $0x1d0] sm:$0xff]  }
0x1450   : > { %v5852_v55 = vadd.f32 %v5836_v6, %v13341_v10  ;;  %v13465_v6 = vmul.f32 0.1, %v7297_v26  ;;  %v7470_v26 = vld [vmem:[%s9404_s10 + $0x1e8] sm:$0xff]  }
0x1451   : > { %v8567_v44 = vpop.f32.mrb[172].mxu1  ;;  %v5850_v63 = vadd.f32 %v5834_v31, %v13346_v46  ;;  %v7329_v31 = vunpack.c.l.bf16 %v7474_v45 }
0x1452   : > { %v13440_v13 = vadd.f32 %v13125_v7, %v8567_v44  ;;  %v5810_v28 = vpop.f32.mrb[173].mxu1  ;;  %v5862_v29 = vpack.c.bf16 %v5852_v55, %v5851_v9  ;;  %15346 = vst [vmem:[#allocation55_spill] sm:$0xff] %v13465_v6  ;;  %v7325_v9 = vunpack.c.l.bf16 %v7473_v47  ;;  %v7305_v55 = vunpack.c.l.bf16 %v7468_v40 }
0x1453   : > { %v13443_v21 = vadd.f32 %v13125_v7, %v5810_v28  ;;  %v8568_v14 = vpop.f32.mrb[174].mxu1  ;;  %v5861_v50 = vpack.c.bf16 %v5850_v63, %v5849_v52  ;;  %v13467_v44 = vmul.f32 0.1, %v7298_v3  ;;  %v13469_v52 = vmul.f32 0.1, %v7293_v15  ;;  %v7476_v28 = vld [vmem:[%s9410_s18 + $0x1d8] sm:$0xff]  }
0x1454   : > { %15342 = vst [vmem:[#allocation61_spill] sm:$0xff] %v13440_v13  ;;  %v5839_v54 = vmul.f32 0.01, %v13440_v13  ;;  %v13447_v39 = vadd.f32 %v13125_v7, %v8568_v14  ;;  %v5813_v2 = vpop.f32.mrb[175].mxu1  ;;  %v7301_v63 = vunpack.c.l.bf16 %v7467_v35  ;;  %v13472_v14 = vmul.f32 0.1, %v7294_v19 }
0x1455   : > { %15343 = vst [vmem:[#allocation71_spill] sm:$0xff] %v13443_v21  ;;  %v5837_v34 = vmul.f32 0.01, %v13443_v21  ;;  %v13451_v32 = vadd.f32 %v13125_v7, %v5813_v2  ;;  %8593 = vmatprep.mubr.bf16.mxu0 %v5861_v50  ;;  %15347 = vst [vmem:[#allocation57_spill] sm:$0xff] %v13467_v44  ;;  %v7475_v50 = vld [vmem:[%s9410_s18 + $0x1d0] sm:$0xff]   ;;  %v13476_v2 = vmul.f32 0.5, %v13465_v6 }
0x1456   : > { %15344 = vst [vmem:[#allocation43_spill] sm:$0xff] %v13447_v39  ;;  %v5840_v30 = vmul.f32 0.01, %v13447_v39  ;;  %8594 = vmatmul.mubr.bf16.gmra.mrb[184].mxu0 %v5862_v29  ;;  %v5855_v18 = vadd.f32 %v5839_v54, %v13373_v36  ;;  %15348 = vst [vmem:[#allocation48_spill] sm:$0xff] %v13469_v52  ;;  %v7330_v29 = vunpack.c.h.bf16 %v7474_v45  ;;  %v7306_v54 = vunpack.c.h.bf16 %v7468_v40  ;;  %v7477_v6 = vld [vmem:[%s9410_s18 + $0x1e0] sm:$0xff]   ;;  %v7479_v36 = vld [vmem:[%s9410_s18 + $0x1f0] sm:$0xff]  }
0x1457   : > { %15345 = vst [vmem:[#allocation54_spill] sm:$0xff] %v13451_v32  ;;  %v5838_v22 = vmul.f32 0.01, %v13451_v32  ;;  %v5853_v37 = vadd.f32 %v5837_v34, %v13369_v38  ;;  %15349 = vst [vmem:[#allocation66_spill] sm:$0xff] %v13472_v14  ;;  %v7326_v34 = vunpack.c.h.bf16 %v7473_v47  ;;  %v7333_v24 = vunpack.c.l.bf16 %v7475_v50  ;;  %v7480_v39 = vld [vmem:[%s9410_s18 + $0x1f8] sm:$0xff]  }
0x1458   : > { %v5856_v59 = vadd.f32 %v5840_v30, %v13367_v4  ;;  %v7302_v30 = vunpack.c.h.bf16 %v7467_v35  ;;  %v5691_v45 = vmul.f32 0.028867513, %v7330_v29  ;;  %v13495_v3 = vmul.f32 0.5, %v13472_v14 }
0x1459   : > { %v5854_v41 = vadd.f32 %v5838_v22, %v13371_v61  ;;  %v13478_v22 = vmul.f32 0.028867513, %v7329_v31  ;;  %v13497_v15 = vmul.f32 0.1, %v7306_v54  ;;  %v7338_v47 = vunpack.c.h.bf16 %v7476_v28  ;;  %v7471_v31 = vld [vmem:[%s9404_s10 + $0x1f0] sm:$0xff]  }
0x145a   : > { %v5864_v7 = vpack.c.bf16 %v5856_v59, %v5855_v18  ;;  %v13480_v18 = vmul.f32 0.028867513, %v7325_v9  ;;  %v13482_v59 = vmul.f32 0.1, %v7305_v55  ;;  %v5689_v40 = vmul.f32 0.028867513, %v7326_v34 }
0x145b   : > { %v5863_v12 = vpack.c.bf16 %v5854_v41, %v5853_v37  ;;  %v7337_v37 = vunpack.c.l.bf16 %v7476_v28  ;;  %v13485_v41 = vmul.f32 0.5, %v13467_v44  ;;  %15352 = vst [vmem:[#allocation64_spill] sm:$0xff] %v13497_v15  ;;  %v13499_v19 = vmul.f32 0.1, %v7302_v30  ;;  %v7472_v9 = vld [vmem:[%s9404_s10 + $0x1f8] sm:$0xff]   ;;  %v7478_v28 = vld [vmem:[%s9410_s18 + $0x1e8] sm:$0xff]  }
0x145c   : > { %15350 = vst [vmem:[#allocation47_spill] sm:$0xff] %v13482_v59  ;;  %v7334_v35 = vunpack.c.h.bf16 %v7475_v50  ;;  %v5645_v55 = vmul.f32 0.5, %v13482_v59  ;;  %v7309_v44 = vunpack.c.l.bf16 %v7469_v25  ;;  %v7313_v29 = vunpack.c.l.bf16 %v7470_v26 }
0x145d   : > { %8597 = vmatprep.mubr.bf16.mxu0 %v5863_v12  ;;  %v13490_v12 = vmul.f32 0.1, %v7301_v63  ;;  %15353 = vst [vmem:[#allocation39_spill] sm:$0xff] %v13499_v19  ;;  %v5694_v63 = vmul.f32 0.028867513, %v7337_v37  ;;  %v7310_v54 = vunpack.c.h.bf16 %v7469_v25  ;;  %v7314_v61 = vunpack.c.h.bf16 %v7470_v26 }
0x145e   : > { %8598 = vmatmul.mubr.bf16.gmra.mrb[188].mxu0 %v5864_v7  ;;  %v13488_v7 = vmul.f32 0.5, %v13469_v52  ;;  %v5692_v52 = vmul.f32 0.028867513, %v7333_v24  ;;  %v5646_v34 = vmul.f32 0.5, %v13497_v15  ;;  %v5695_v30 = vmul.f32 0.028867513, %v7338_v47 }
0x145f   : > { %15351 = vst [vmem:[#allocation74_spill] sm:$0xff] %v13490_v12  ;;  %v5643_v14 = vmul.f32 0.5, %v13490_v12  ;;  %v7317_v50 = vunpack.c.l.bf16 %v7471_v31  ;;  %v7321_v38 = vunpack.c.l.bf16 %v7472_v9  ;;  %v5644_v4 = vmul.f32 0.5, %v13499_v19 }
0x1460   : > { %v5693_v59 = vmul.f32 0.028867513, %v7334_v35  ;;  %v7318_v37 = vunpack.c.h.bf16 %v7471_v31  ;;  %v7322_v32 = vunpack.c.h.bf16 %v7472_v9  ;;  %v13511_v21 = vmul.f32 0.1, %v7309_v44 }
0x1461   : > { %v7341_v12 = vunpack.c.l.bf16 %v7477_v6  ;;  %v13513_v24 = vmul.f32 0.1, %v7313_v29  ;;  %v7345_v25 = vunpack.c.l.bf16 %v7478_v28  ;;  %v13515_v26 = vmul.f32 0.1, %v7310_v54 }
0x1462   : > { %15354 = vst [vmem:[#allocation69_spill] sm:$0xff] %v13511_v21  ;;  %v7342_v13 = vunpack.c.h.bf16 %v7477_v6  ;;  %v13517_v15 = vmul.f32 0.1, %v7314_v61  ;;  %v7346_v47 = vunpack.c.h.bf16 %v7478_v28  ;;  %v13519_v17 = vmul.f32 0.1, %v7317_v50 }
0x1463   : > { %15355 = vst [vmem:[#allocation45_spill] sm:$0xff] %v13513_v24  ;;  %15356 = vst [vmem:[#allocation72_spill] sm:$0xff] %v13515_v26  ;;  %v7349_v19 = vunpack.c.l.bf16 %v7479_v36  ;;  %v13521_v35 = vmul.f32 0.1, %v7321_v38  ;;  %v7353_v31 = vunpack.c.l.bf16 %v7480_v39  ;;  %v13523_v9 = vmul.f32 0.1, %v7318_v37 }
0x1464   : > { %15357 = vst [vmem:[#allocation63_spill] sm:$0xff] %v13517_v15  ;;  %15358 = vst [vmem:[#allocation70_spill] sm:$0xff] %v13519_v17  ;;  %v7350_v44 = vunpack.c.h.bf16 %v7479_v36  ;;  %v13525_v33 = vmul.f32 0.1, %v7322_v32  ;;  %v7354_v29 = vunpack.c.h.bf16 %v7480_v39  ;;  %v5647_v8 = vmul.f32 0.5, %v13511_v21 }
0x1465   : > { %15359 = vst [vmem:[#allocation60_spill] sm:$0xff] %v13521_v35  ;;  %15360 = vst [vmem:[#allocation38_spill] sm:$0xff] %v13523_v9  ;;  %v5696_v54 = vmul.f32 0.028867513, %v7341_v12  ;;  %v5649_v6 = vmul.f32 0.5, %v13513_v24  ;;  %v5648_v28 = vmul.f32 0.5, %v13515_v26  ;;  %v5709_v26 = vadd.f32 %v5693_v59, %v5644_v4 }
0x1466   : > { %15361 = vst [vmem:[#allocation40_spill] sm:$0xff] %v13525_v33  ;;  %v5698_v61 = vmul.f32 0.028867513, %v7345_v25  ;;  %v5697_v50 = vmul.f32 0.028867513, %v7342_v13  ;;  %v5650_v16 = vmul.f32 0.5, %v13517_v15  ;;  %v5706_v25 = vadd.f32 %v13478_v22, %v13476_v2 }
0x1467   : > { %v5699_v38 = vmul.f32 0.028867513, %v7346_v47  ;;  %v5651_v46 = vmul.f32 0.5, %v13519_v17  ;;  %v5700_v37 = vmul.f32 0.028867513, %v7349_v19  ;;  %v5653_v36 = vmul.f32 0.5, %v13521_v35 }
0x1468   : > { %v5702_v32 = vmul.f32 0.028867513, %v7353_v31  ;;  %v5652_v39 = vmul.f32 0.5, %v13523_v9  ;;  %v5701_v51 = vmul.f32 0.028867513, %v7350_v44  ;;  %v5654_v12 = vmul.f32 0.5, %v13525_v33 }
0x1469   : > { %v5703_v21 = vmul.f32 0.028867513, %v7354_v29  ;;  %v5707_v13 = vadd.f32 %v5691_v45, %v13485_v41  ;;  %v5704_v47 = vadd.f32 %v13480_v18, %v13488_v7  ;;  %v5705_v17 = vadd.f32 %v5689_v40, %v13495_v3 }
0x146a   : > { %v5708_v19 = vadd.f32 %v5692_v52, %v5643_v14  ;;  %v5710_v35 = vadd.f32 %v5694_v63, %v5645_v55  ;;  %v5711_v31 = vadd.f32 %v5695_v30, %v5646_v34  ;;  %v5712_v15 = vadd.f32 %v5696_v54, %v5647_v8 }
0x146b   : > { %v5713_v9 = vadd.f32 %v5697_v50, %v5648_v28  ;;  %v5714_v44 = vadd.f32 %v5698_v61, %v5649_v6  ;;  %v5715_v24 = vadd.f32 %v5699_v38, %v5650_v16  ;;  %v5716_v33 = vadd.f32 %v5700_v37, %v5651_v46  ;;  %v15362_v28 = vld [vmem:[#allocation76_spill] sm:$0xff]  ;;  %v15363_v37 = vld [vmem:[#allocation62_spill] sm:$0xff] }
0x146c   : > { %v5717_v29 = vadd.f32 %v5701_v51, %v5652_v39  ;;  %v5718_v20 = vadd.f32 %v5702_v32, %v5653_v36  ;;  %v5719_v56 = vadd.f32 %v5703_v21, %v5654_v12  ;;  %v5964_v2 = vmul.f32 1.5, %v5706_v25  ;;  %v15364_v39 = vld [vmem:[#allocation68_spill] sm:$0xff] }
0x146d   : > { %v5965_v22 = vmul.f32 1.5, %v5707_v13  ;;  %v5962_v41 = vmul.f32 1.5, %v5704_v47  ;;  %v5963_v45 = vmul.f32 1.5, %v5705_v17  ;;  %v5966_v60 = vmul.f32 1.5, %v5708_v19  ;;  %v15365_v13 = vld [vmem:[#allocation50_spill] sm:$0xff] }
0x146e   : > { %v5967_v18 = vmul.f32 1.5, %v5709_v26  ;;  %v5968_v7 = vmul.f32 1.5, %v5710_v35  ;;  %v5969_v3 = vmul.f32 1.5, %v5711_v31  ;;  %v5970_v52 = vmul.f32 1.5, %v5712_v15 }
0x146f   : > { %v5971_v4 = vmul.f32 1.5, %v5713_v9  ;;  %v5972_v14 = vmul.f32 1.5, %v5714_v44  ;;  %v5973_v59 = vmul.f32 1.5, %v5715_v24  ;;  %v13541_v8 = vmul.f32 1.5, %v5716_v33  ;;  %v15366_v44 = vld [vmem:[#allocation75_spill] sm:$0xff] }
0x1470   : > { %v13543_v40 = vmul.f32 1.5, %v5717_v29  ;;  %v13545_v46 = vmul.f32 1.5, %v5718_v20  ;;  %v13547_v51 = vmul.f32 1.5, %v5719_v56  ;;  %v13550_v16 = vadd.f32 %v5964_v2, %v13293_v43  ;;  %v15367_v2 = vld [vmem:[#allocation44_spill] sm:$0xff] }
0x1471   : > { %v13553_v17 = vadd.f32 %v5965_v22, %v13285_v11  ;;  %v13556_v21 = vadd.f32 %v5962_v41, %v13288_v53  ;;  %v13559_v15 = vadd.f32 %v5963_v45, %v13290_v0  ;;  %v13562_v33 = vadd.f32 %v5966_v60, %v13316_v57  ;;  %v15368_v45 = vld [vmem:[#allocation78_spill] sm:$0xff] }
0x1472   : > { %v13565_v20 = vadd.f32 %v5967_v18, %v13318_v62  ;;  %v13568_v56 = vadd.f32 %v5968_v7, %v13321_v5  ;;  %v13571_v55 = vadd.f32 %v5969_v3, %v13313_v27  ;;  %v5996_v63 = vmul.f32 0.25, %v13380_v49  ;;  %v13629_v7 = vld [vmem:[%s14622_s9] ss:$0 sm:$0xff]  ;;  %v15371_v5 = vld [vmem:[#allocation61_spill] sm:$0xff] }
0x1473   : > { %v13575_v34 = vadd.f32 %v5970_v52, %v13344_v1  ;;  %v13578_v30 = vadd.f32 %v5972_v14, %v13349_v23  ;;  %v13581_v60 = vadd.f32 %v5973_v59, %v13341_v10  ;;  %v6181_v24 = vmul.f32 0.16666667, %v13380_v49  ;;  %v15369_v14 = vld [vmem:[#allocation41_spill] sm:$0xff] }
0x1474   : > { %v5994_v26 = vmul.f32 0.25, %v13383_v48  ;;  %v6179_v35 = vmul.f32 0.16666667, %v13383_v48  ;;  %v5997_v9 = vmul.f32 0.25, %v13387_v42  ;;  %v6182_v54 = vmul.f32 0.16666667, %v13387_v42 }
0x1475   : > { %v5995_v6 = vmul.f32 0.25, %v13391_v58  ;;  %v6180_v61 = vmul.f32 0.16666667, %v13391_v58  ;;  %v13591_v50 = vmul.f32 0.25, %v15362_v28  ;;  %v13594_v38 = vmul.f32 0.16666667, %v15362_v28 }
0x1476   : > { %v13597_v36 = vmul.f32 0.25, %v15363_v37  ;;  %v13600_v32 = vmul.f32 0.16666667, %v15363_v37  ;;  %v13603_v12 = vmul.f32 0.25, %v15364_v39  ;;  %v13606_v25 = vmul.f32 0.16666667, %v15364_v39 }
0x1477   : > { %v13609_v47 = vmul.f32 0.25, %v15365_v13  ;;  %v13612_v19 = vmul.f32 0.16666667, %v15365_v13  ;;  %v13615_v29 = vadd.f32 %v5971_v4, %v15366_v44  ;;  %v13618_v22 = vmul.f32 0.25, %v15367_v2  ;;  %v15370_v13 = vld [vmem:[#allocation42_spill] sm:$0xff] }
0x1478   : > { %v13621_v41 = vmul.f32 0.16666667, %v15367_v2  ;;  %v13624_v18 = vmul.f32 0.25, %v15368_v45  ;;  %v13633_v4 = vmul.f32 0.16666667, %v15368_v45  ;;  %v13636_v59 = vmul.f32 0.25, %v15369_v14 }
0x1479   : > { %v13639_v28 = vmul.f32 0.16666667, %v15369_v14  ;;  %v13643_v2 = vmul.f32 0.25, %v15370_v13  ;;  %v13647_v45 = vmul.f32 0.16666667, %v15370_v13 }
0x1519   : > { %v8587_v31 = vpop.f32.mrb[176].mxu0 }
0x151a   : > { %v5908_v3 = vadd.f32 %v13629_v7, %v8587_v31  ;;  %v5899_v52 = vpop.f32.mrb[177].mxu0 }
0x151b   : > { %v5900_v37 = vadd.f32 %v13629_v7, %v5899_v52  ;;  %v8588_v39 = vpop.f32.mrb[178].mxu0 }
0x151c   : > { %v6012_v42 = vmul.f32 0.25, %v5908_v3  ;;  %v6197_v49 = vmul.f32 0.16666667, %v5908_v3  ;;  %v5911_v31 = vadd.f32 %v13629_v7, %v8588_v39  ;;  %v5902_v58 = vpop.f32.mrb[179].mxu0  ;;  %v13655_v39 = vmul.f32 0.25, %v15371_v5 }
0x151d   : > { %v6010_v48 = vmul.f32 0.25, %v5900_v37  ;;  %v6195_v44 = vmul.f32 0.16666667, %v5900_v37  ;;  %v5903_v10 = vadd.f32 %v13629_v7, %v5902_v58  ;;  %v13660_v37 = vmul.f32 0.16666667, %v15371_v5 }
0x151e   : > { %v6028_v14 = vadd.f32 %v6012_v42, %v5996_v63  ;;  %v13650_v1 = vadd.f32 %v6197_v49, %v6181_v24  ;;  %v6013_v52 = vmul.f32 0.25, %v5911_v31  ;;  %v6198_v23 = vmul.f32 0.16666667, %v5911_v31 }
0x151f   : > { %v6026_v62 = vadd.f32 %v6010_v48, %v5994_v26  ;;  %v13652_v27 = vadd.f32 %v6195_v44, %v6179_v35  ;;  %v6011_v57 = vmul.f32 0.25, %v5903_v10  ;;  %v6196_v3 = vmul.f32 0.16666667, %v5903_v10  ;;  %v15372_v48 = vld [vmem:[#allocation71_spill] sm:$0xff] }
0x1520   : > { %v6044_v0 = vmul.f32 0.01, %v6028_v14  ;;  %v6029_v13 = vadd.f32 %v6013_v52, %v5997_v9  ;;  %v13657_v11 = vadd.f32 %v6198_v23, %v6182_v54  ;;  %v13665_v24 = vmul.f32 0.25, %v15372_v48 }
0x1521   : > { %v6042_v42 = vmul.f32 0.01, %v6026_v62  ;;  %v6027_v49 = vadd.f32 %v6011_v57, %v5995_v6  ;;  %v13662_v58 = vadd.f32 %v6196_v3, %v6180_v61  ;;  %v8591_v63 = vpop.f32.mrb[180].mxu0  ;;  %v13668_v10 = vmul.f32 0.16666667, %v15372_v48 }
0x1522   : > { %v6045_v26 = vmul.f32 0.01, %v6029_v13  ;;  %v5924_v35 = vadd.f32 %v13629_v7, %v8591_v63  ;;  %v5915_v9 = vpop.f32.mrb[181].mxu0  ;;  %v6060_v23 = vadd.f32 %v6044_v0, %v13550_v16 }
0x1523   : > { %v6043_v54 = vmul.f32 0.01, %v6027_v49  ;;  %v5916_v5 = vadd.f32 %v13629_v7, %v5915_v9  ;;  %v8592_v62 = vpop.f32.mrb[182].mxu0  ;;  %v6058_v57 = vadd.f32 %v6042_v42, %v13556_v21 }
0x1524   : > { %v6061_v6 = vadd.f32 %v6045_v26, %v13553_v17  ;;  %v6016_v61 = vmul.f32 0.25, %v5924_v35  ;;  %v6201_v44 = vmul.f32 0.16666667, %v5924_v35  ;;  %v5927_v31 = vadd.f32 %v13629_v7, %v8592_v62  ;;  %v5918_v14 = vpop.f32.mrb[183].mxu0 }
0x1525   : > { %v6014_v52 = vmul.f32 0.25, %v5916_v5  ;;  %v6199_v3 = vmul.f32 0.16666667, %v5916_v5  ;;  %v5919_v13 = vadd.f32 %v13629_v7, %v5918_v14  ;;  %v6059_v63 = vadd.f32 %v6043_v54, %v13559_v15  ;;  %v15373_v15 = vld [vmem:[#allocation43_spill] sm:$0xff] }
0x1526   : > { %v6075_v0 = vpack.c.bf16 %v6061_v6, %v6060_v23  ;;  %v6032_v16 = vadd.f32 %v6016_v61, %v13591_v50  ;;  %v13680_v49 = vadd.f32 %v6201_v44, %v13594_v38  ;;  %v6017_v21 = vmul.f32 0.25, %v5927_v31 }
0x1527   : > { %v6030_v17 = vadd.f32 %v6014_v52, %v13597_v36  ;;  %v13684_v42 = vadd.f32 %v6199_v3, %v13600_v32  ;;  %v6202_v48 = vmul.f32 0.16666667, %v5927_v31  ;;  %v6015_v26 = vmul.f32 0.25, %v5919_v13 }
0x1528   : > { %v6048_v35 = vmul.f32 0.01, %v6032_v16  ;;  %v6033_v9 = vadd.f32 %v6017_v21, %v13603_v12  ;;  %v6200_v5 = vmul.f32 0.16666667, %v5919_v13  ;;  %v6074_v62 = vpack.c.bf16 %v6059_v63, %v6058_v57 }
0x1529   : > { %v13688_v23 = vmul.f32 0.25, %v15373_v15  ;;  %v6046_v50 = vmul.f32 0.01, %v6030_v17  ;;  %v13691_v38 = vadd.f32 %v6202_v48, %v13606_v25  ;;  %v6031_v54 = vadd.f32 %v6015_v26, %v13609_v47  ;;  %v8595_v36 = vpop.f32.mrb[184].mxu0 }
0x152a   : > { %v13695_v32 = vmul.f32 0.16666667, %v15373_v15  ;;  %v6049_v6 = vmul.f32 0.01, %v6033_v9  ;;  %v13698_v61 = vadd.f32 %v6200_v5, %v13612_v19  ;;  %v5940_v12 = vadd.f32 %v13629_v7, %v8595_v36  ;;  %8617 = vmatprep.mubr.bf16.mxu1 %v6074_v62  ;;  %v5931_v57 = vpop.f32.mrb[185].mxu0 }
0x152b   : > { %v6047_v44 = vmul.f32 0.01, %v6031_v54  ;;  %v5932_v31 = vadd.f32 %v13629_v7, %v5931_v57  ;;  %8618 = vmatmul.mubr.bf16.vlgmr.msra.gmra.mrb[176].mxu1 %v6075_v0  ;;  %v8596_v25 = vpop.f32.mrb[186].mxu0  ;;  %v6062_v14 = vadd.f32 %v6046_v50, %v13562_v33  ;;  %v6064_v47 = vadd.f32 %v6048_v35, %v13568_v56 }
0x152c   : > { %v6020_v52 = vmul.f32 0.25, %v5940_v12  ;;  %v6205_v3 = vmul.f32 0.16666667, %v5940_v12  ;;  %v5943_v13 = vadd.f32 %v13629_v7, %v8596_v25  ;;  %v5934_v63 = vpop.f32.mrb[187].mxu0  ;;  %v6065_v19 = vadd.f32 %v6049_v6, %v13571_v55  ;;  %v15374_v6 = vld [vmem:[#allocation54_spill] sm:$0xff] }
0x152d   : > { %v6018_v16 = vmul.f32 0.25, %v5932_v31  ;;  %v6203_v21 = vmul.f32 0.16666667, %v5932_v31  ;;  %v5935_v17 = vadd.f32 %v13629_v7, %v5934_v63  ;;  %v6063_v48 = vadd.f32 %v6047_v44, %v13565_v20 }
0x152e   : > { %v6036_v0 = vadd.f32 %v6020_v52, %v13618_v22  ;;  %v13710_v26 = vadd.f32 %v6205_v3, %v13621_v41  ;;  %v6021_v33 = vmul.f32 0.25, %v5943_v13  ;;  %v6206_v56 = vmul.f32 0.16666667, %v5943_v13 }
0x152f   : > { %v6034_v35 = vadd.f32 %v6018_v16, %v13624_v18  ;;  %v13714_v9 = vadd.f32 %v6203_v21, %v13633_v4  ;;  %v6019_v5 = vmul.f32 0.25, %v5935_v17  ;;  %v6204_v55 = vmul.f32 0.16666667, %v5935_v17 }
0x1530   : > { %v6052_v62 = vmul.f32 0.01, %v6036_v0  ;;  %v6037_v15 = vadd.f32 %v6021_v33, %v13636_v59  ;;  %v13718_v50 = vadd.f32 %v6206_v56, %v13639_v28  ;;  %v6076_v20 = vpack.c.bf16 %v6063_v48, %v6062_v14 }
0x1531   : > { %v6050_v22 = vmul.f32 0.01, %v6034_v35  ;;  %v6035_v41 = vadd.f32 %v6019_v5, %v13643_v2  ;;  %v13722_v54 = vadd.f32 %v6204_v55, %v13647_v45  ;;  %v8599_v36 = vpop.f32.mrb[188].mxu0  ;;  %v6077_v18 = vpack.c.bf16 %v6065_v19, %v6064_v47 }
0x1532   : > { %v6007_v4 = vmul.f32 0.25, %v15374_v6  ;;  %v6192_v12 = vmul.f32 0.16666667, %v15374_v6  ;;  %v6053_v57 = vmul.f32 0.01, %v6037_v15  ;;  %v5956_v44 = vadd.f32 %v13629_v7, %v8599_v36  ;;  %8621 = vmatprep.mubr.bf16.mxu1 %v6076_v20  ;;  %v5947_v59 = vpop.f32.mrb[189].mxu0 }
0x1533   : > { %v6051_v28 = vmul.f32 0.01, %v6035_v41  ;;  %v5948_v31 = vadd.f32 %v13629_v7, %v5947_v59  ;;  %8622 = vmatmul.mubr.bf16.gmra.mrb[180].mxu1 %v6077_v18  ;;  %v8600_v25 = vpop.f32.mrb[190].mxu0  ;;  %v6066_v2 = vadd.f32 %v6050_v22, %v13575_v34  ;;  %v6068_v45 = vadd.f32 %v6052_v62, %v13578_v30  ;;  %v15376_v22 = vld [vmem:[#allocation37_spill] sm:$0xff]  ;;  %v15378_v18 = vld [vmem:[#allocation80_spill] sm:$0xff] }
0x1534   : > { %v6024_v14 = vmul.f32 0.25, %v5956_v44  ;;  %v6209_v47 = vmul.f32 0.16666667, %v5956_v44  ;;  %v5959_v52 = vadd.f32 %v13629_v7, %v8600_v25  ;;  %v5950_v3 = vpop.f32.mrb[191].mxu0  ;;  %v6069_v13 = vadd.f32 %v6053_v57, %v13581_v60 }
0x1535   : > { %v6022_v63 = vmul.f32 0.25, %v5948_v31  ;;  %v6207_v19 = vmul.f32 0.16666667, %v5948_v31  ;;  %v5951_v16 = vadd.f32 %v13629_v7, %v5950_v3  ;;  %v6067_v21 = vadd.f32 %v6051_v28, %v13615_v29 }
0x1536   : > { %v6040_v17 = vadd.f32 %v6024_v14, %v13655_v39  ;;  %v13736_v48 = vadd.f32 %v6209_v47, %v13660_v37  ;;  %v6025_v34 = vmul.f32 0.25, %v5959_v52  ;;  %v6210_v30 = vmul.f32 0.16666667, %v5959_v52 }
0x1537   : > { %v6038_v0 = vadd.f32 %v6022_v63, %v13665_v24  ;;  %v13740_v33 = vadd.f32 %v6207_v19, %v13668_v10  ;;  %v6023_v56 = vmul.f32 0.25, %v5951_v16  ;;  %v6208_v60 = vmul.f32 0.16666667, %v5951_v16  ;;  %v15375_v24 = vld [vmem:[#allocation56_spill] sm:$0xff]  ;;  %v15379_v19 = vld [vmem:[#allocation55_spill] sm:$0xff] }
0x1538   : > { %v6056_v35 = vmul.f32 0.01, %v6040_v17  ;;  %v6041_v5 = vadd.f32 %v6025_v34, %v13688_v23  ;;  %v13744_v55 = vadd.f32 %v6210_v30, %v13695_v32  ;;  %v6078_v29 = vpack.c.bf16 %v6067_v21, %v6066_v2  ;;  %v15377_v23 = vld [vmem:[#allocation58_spill] sm:$0xff]  ;;  %v15380_v34 = vld [vmem:[#allocation48_spill] sm:$0xff] }
0x1539   : > { %v6054_v39 = vmul.f32 0.01, %v6038_v0  ;;  %v6039_v62 = vadd.f32 %v6023_v56, %v6007_v4  ;;  %v13746_v37 = vadd.f32 %v6208_v60, %v6192_v12  ;;  %v6079_v15 = vpack.c.bf16 %v6069_v13, %v6068_v45 }
0x153a   : > { %v6057_v20 = vmul.f32 0.01, %v6041_v5  ;;  %8625 = vmatprep.mubr.bf16.mxu1 %v6078_v29  ;;  %v5992_v10 = vadd.f32 %v13545_v46, %v15375_v24  ;;  %v5993_v41 = vadd.f32 %v13547_v51, %v15376_v22  ;;  %v5990_v32 = vadd.f32 %v13541_v8, %v15377_v23  ;;  %v15382_v5 = vld [vmem:[#allocation57_spill] sm:$0xff] }
0x153b   : > { %v6055_v36 = vmul.f32 0.01, %v6039_v62  ;;  %8626 = vmatmul.mubr.bf16.gmra.mrb[184].mxu1 %v6079_v15  ;;  %v5991_v6 = vadd.f32 %v13543_v40, %v15378_v18  ;;  %v6261_v16 = vadd.f32 %v15379_v19, %v13293_v43  ;;  %v6259_v30 = vadd.f32 %v15380_v34, %v13288_v53  ;;  %v15383_v15 = vld [vmem:[#allocation52_spill] sm:$0xff]  ;;  %v15391_v34 = vld [vmem:[#allocation67_spill] sm:$0xff] }
0x153c   : > { %v6072_v4 = vadd.f32 %v6056_v35, %v5992_v10  ;;  %v6073_v12 = vadd.f32 %v6057_v20, %v5993_v41  ;;  %v6070_v57 = vadd.f32 %v6054_v39, %v5990_v32 }
0x153d   : > { %v6071_v44 = vadd.f32 %v6055_v36, %v5991_v6 }
0x153e   : > { %v6081_v59 = vpack.c.bf16 %v6073_v12, %v6072_v4 }
0x153f   : > { %v6080_v28 = vpack.c.bf16 %v6071_v44, %v6070_v57 }
0x1541   : > { %8629 = vmatprep.mubr.bf16.mxu1 %v6080_v28 }
0x1543   : > { %8630 = vmatmul.mubr.bf16.gmra.mrb[188].mxu1 %v6081_v59 }
0x15fe   : > { %v8619_v46 = vpop.f32.mrb[176].mxu1 }
0x15ff   : > { %v6125_v31 = vadd.f32 %v13629_v7, %v8619_v46  ;;  %v6116_v51 = vpop.f32.mrb[177].mxu1 }
0x1600   : > { %v6117_v25 = vadd.f32 %v13629_v7, %v6116_v51  ;;  %v8620_v2 = vpop.f32.mrb[178].mxu1  ;;  %v15386_v51 = vld [vmem:[#allocation47_spill] sm:$0xff] }
0x1601   : > { %v6229_v45 = vmul.f32 0.6666667, %v6125_v31  ;;  %v6128_v8 = vadd.f32 %v13629_v7, %v8620_v2  ;;  %v6119_v14 = vpop.f32.mrb[179].mxu1  ;;  %v15385_v31 = vld [vmem:[#allocation49_spill] sm:$0xff] }
0x1602   : > { %v6227_v40 = vmul.f32 0.6666667, %v6117_v25  ;;  %v6120_v47 = vadd.f32 %v13629_v7, %v6119_v14  ;;  %v6265_v25 = vadd.f32 %v15386_v51, %v15385_v31  ;;  %v15388_v14 = vld [vmem:[#allocation74_spill] sm:$0xff]  ;;  %v15397_v31 = vld [vmem:[#allocation59_spill] sm:$0xff] }
0x1603   : > { %v6245_v52 = vadd.f32 %v6229_v45, %v13650_v1  ;;  %v6230_v3 = vmul.f32 0.6666667, %v6128_v8  ;;  %v15381_v1 = vld [vmem:[#allocation82_spill] sm:$0xff]  ;;  %v15398_v51 = vld [vmem:[#allocation63_spill] sm:$0xff] }
0x1604   : > { %v6243_v13 = vadd.f32 %v6227_v40, %v13652_v27  ;;  %v6228_v63 = vmul.f32 0.6666667, %v6120_v47  ;;  %v6262_v29 = vadd.f32 %v15382_v5, %v15381_v1  ;;  %v15387_v8 = vld [vmem:[#allocation46_spill] sm:$0xff] }
0x1605   : > { %v6277_v21 = vmul.f32 0.01, %v6245_v52  ;;  %v6246_v17 = vadd.f32 %v6230_v3, %v13657_v11  ;;  %v15384_v11 = vld [vmem:[#allocation66_spill] sm:$0xff]  ;;  %v6263_v40 = vadd.f32 %v15388_v14, %v15387_v8  ;;  %v15399_v14 = vld [vmem:[#allocation75_spill] sm:$0xff] }
0x1606   : > { %v6275_v0 = vmul.f32 0.01, %v6243_v13  ;;  %v6244_v56 = vadd.f32 %v6228_v63, %v13662_v58  ;;  %v8623_v60 = vpop.f32.mrb[180].mxu1  ;;  %v6260_v20 = vadd.f32 %v15384_v11, %v15383_v15  ;;  %v15389_v13 = vld [vmem:[#allocation35_spill] sm:$0xff]  ;;  %v15390_v63 = vld [vmem:[#allocation64_spill] sm:$0xff] }
0x1607   : > { %v13768_v35 = vadd.f32 %v6277_v21, %v6261_v16  ;;  %v6278_v27 = vmul.f32 0.01, %v6246_v17  ;;  %v6141_v39 = vadd.f32 %v13629_v7, %v8623_v60  ;;  %v6132_v62 = vpop.f32.mrb[181].mxu1  ;;  %v6266_v19 = vadd.f32 %v15390_v63, %v15389_v13 }
0x1608   : > { %v13773_v43 = vadd.f32 %v6275_v0, %v6259_v30  ;;  %v6276_v10 = vmul.f32 0.01, %v6244_v56  ;;  %v6133_v53 = vadd.f32 %v13629_v7, %v6132_v62  ;;  %v8624_v41 = vpop.f32.mrb[182].mxu1 }
0x1609   : > { %6309 = vst [vmem:[#allocation2 + $0x10] sm:$0xff] %v13768_v35  ;;  %v13779_v58 = vadd.f32 %v6278_v27, %v6262_v29  ;;  %v6233_v36 = vmul.f32 0.6666667, %v6141_v39  ;;  %v6144_v32 = vadd.f32 %v13629_v7, %v8624_v41  ;;  %v6135_v6 = vpop.f32.mrb[183].mxu1  ;;  %v15394_v41 = vld [vmem:[#allocation45_spill] sm:$0xff]  ;;  %6329 = vst [vmem:[%s9412_s16 + $0x10] sm:$0xff] (!%p6829_p2), %v13768_v35 }
0x160a   : > { %6307 = vst [vmem:[#allocation2] sm:$0xff] %v13773_v43  ;;  %v13783_v4 = vadd.f32 %v6276_v10, %v6260_v20  ;;  %v6231_v12 = vmul.f32 0.6666667, %v6133_v53  ;;  %v6136_v57 = vadd.f32 %v13629_v7, %v6135_v6  ;;  %v15393_v53 = vld [vmem:[#allocation77_spill] sm:$0xff]  ;;  %6327 = vst [vmem:[%s9412_s16] sm:$0xff] (!%p6829_p2), %v13773_v43  ;;  %v15409_v35 = vld [vmem:[#allocation62_spill] sm:$0xff] (!%p6829_p2) }
0x160b   : > { %6310 = vst [vmem:[#allocation2 + $0x18] sm:$0xff] %v13779_v58  ;;  %v6249_v44 = vadd.f32 %v6233_v36, %v13680_v49  ;;  %v6234_v59 = vmul.f32 0.6666667, %v6144_v32  ;;  %v6269_v36 = vadd.f32 %v15394_v41, %v15393_v53  ;;  %6330 = vst [vmem:[%s9412_s16 + $0x18] sm:$0xff] (!%p6829_p2), %v13779_v58  ;;  %v15410_v43 = vld [vmem:[#allocation50_spill] sm:$0xff] (!%p6829_p2)  ;;  %v15411_v58 = vld [vmem:[#allocation76_spill] sm:$0xff] (!%p6829_p2) }
0x160c   : > { %6308 = vst [vmem:[#allocation2 + $0x8] sm:$0xff] %v13783_v4  ;;  %v6247_v28 = vadd.f32 %v6231_v12, %v13684_v42  ;;  %v6232_v46 = vmul.f32 0.6666667, %v6136_v57  ;;  %v15395_v12 = vld [vmem:[#allocation51_spill] sm:$0xff]  ;;  %v15396_v57 = vld [vmem:[#allocation69_spill] sm:$0xff]  ;;  %6328 = vst [vmem:[%s9412_s16 + $0x8] sm:$0xff] (!%p6829_p2), %v13783_v4 }
0x160d   : > { %v6281_v2 = vmul.f32 0.01, %v6249_v44  ;;  %v6250_v45 = vadd.f32 %v6234_v59, %v13691_v38  ;;  %v15392_v38 = vld [vmem:[#allocation39_spill] sm:$0xff]  ;;  %v6267_v44 = vadd.f32 %v15396_v57, %v15395_v12  ;;  %6347 = vst [vmem:[%s9414_s24 + $0x20] sm:$0xff] (!%p6829_p2), %v15409_v35  ;;  %6348 = vst [vmem:[%s9414_s24 + $0x28] sm:$0xff] (!%p6829_p2), %v15410_v43  ;;  %v15412_v4 = vld [vmem:[#allocation68_spill] sm:$0xff] (!%p6829_p2) }
0x160e   : > { %v6279_v47 = vmul.f32 0.01, %v6247_v28  ;;  %v6248_v52 = vadd.f32 %v6232_v46, %v13698_v61  ;;  %v8627_v3 = vpop.f32.mrb[184].mxu1  ;;  %v6264_v30 = vadd.f32 %v15392_v38, %v15391_v34  ;;  %6349 = vst [vmem:[%s9414_s24 + $0x30] sm:$0xff] (!%p6829_p2), %v15411_v58  ;;  %6350 = vst [vmem:[%s9414_s24 + $0x38] sm:$0xff] (!%p6829_p2), %v15412_v4  ;;  %v15420_v12 = vld [vmem:[#allocation43_spill] sm:$0xff] (!%p6829_p2) }
0x160f   : > { %v13796_v49 = vadd.f32 %v6281_v2, %v6265_v25  ;;  %v6282_v42 = vmul.f32 0.01, %v6250_v45  ;;  %v6157_v16 = vadd.f32 %v13629_v7, %v8627_v3  ;;  %v6148_v21 = vpop.f32.mrb[185].mxu1  ;;  %v6270_v25 = vadd.f32 %v15398_v51, %v15397_v31  ;;  %6358 = vst [vmem:[%s9414_s24 + $0x78] sm:$0xff] (!%p6829_p2), %v15420_v12 }
0x1610   : > { %v13801_v17 = vadd.f32 %v6279_v47, %v6263_v40  ;;  %v6280_v0 = vmul.f32 0.01, %v6248_v52  ;;  %v6149_v56 = vadd.f32 %v13629_v7, %v6148_v21  ;;  %v8628_v60 = vpop.f32.mrb[186].mxu1  ;;  %v15400_v40 = vld [vmem:[#allocation72_spill] sm:$0xff] }
0x1611   : > { %6313 = vst [vmem:[#allocation2 + $0x30] sm:$0xff] %v13796_v49  ;;  %v13807_v61 = vadd.f32 %v6282_v42, %v6266_v19  ;;  %v6237_v1 = vmul.f32 0.6666667, %v6157_v16  ;;  %v6160_v5 = vadd.f32 %v13629_v7, %v8628_v60  ;;  %v6151_v29 = vpop.f32.mrb[187].mxu1  ;;  %v6268_v47 = vadd.f32 %v15400_v40, %v15399_v14  ;;  %6333 = vst [vmem:[%s9412_s16 + $0x30] sm:$0xff] (!%p6829_p2), %v13796_v49  ;;  %v15413_v49 = vld [vmem:[#allocation78_spill] sm:$0xff] (!%p6829_p2) }
0x1612   : > { %6311 = vst [vmem:[#allocation2 + $0x20] sm:$0xff] %v13801_v17  ;;  %v13811_v27 = vadd.f32 %v6280_v0, %v6264_v30  ;;  %v6235_v39 = vmul.f32 0.6666667, %v6149_v56  ;;  %v6152_v62 = vadd.f32 %v13629_v7, %v6151_v29  ;;  %v15401_v56 = vld [vmem:[#allocation60_spill] sm:$0xff]  ;;  %v15402_v29 = vld [vmem:[#allocation70_spill] sm:$0xff]  ;;  %6331 = vst [vmem:[%s9412_s16 + $0x20] sm:$0xff] (!%p6829_p2), %v13801_v17 }
0x1613   : > { %6314 = vst [vmem:[#allocation2 + $0x38] sm:$0xff] %v13807_v61  ;;  %v6253_v15 = vadd.f32 %v6237_v1, %v13710_v26  ;;  %v6238_v11 = vmul.f32 0.6666667, %v6160_v5  ;;  %v6273_v60 = vadd.f32 %v15401_v56, %v15375_v24  ;;  %6334 = vst [vmem:[%s9412_s16 + $0x38] sm:$0xff] (!%p6829_p2), %v13807_v61  ;;  %v15414_v17 = vld [vmem:[#allocation42_spill] sm:$0xff] (!%p6829_p2)  ;;  %v15415_v61 = vld [vmem:[#allocation44_spill] sm:$0xff] (!%p6829_p2) }
0x1614   : > { %6312 = vst [vmem:[#allocation2 + $0x28] sm:$0xff] %v13811_v27  ;;  %v6251_v20 = vadd.f32 %v6235_v39, %v13714_v9  ;;  %v6236_v10 = vmul.f32 0.6666667, %v6152_v62  ;;  %v6271_v39 = vadd.f32 %v15402_v29, %v15377_v23  ;;  %6332 = vst [vmem:[%s9412_s16 + $0x28] sm:$0xff] (!%p6829_p2), %v13811_v27  ;;  %v15407_v23 = vld [vmem:[#allocation32_spill] sm:$0xff] (!%p6829_p2)  ;;  %v15416_v27 = vld [vmem:[#allocation41_spill] sm:$0xff] (!%p6829_p2) }
0x1615   : > { %v6285_v32 = vmul.f32 0.01, %v6253_v15  ;;  %v6254_v6 = vadd.f32 %v6238_v11, %v13718_v50  ;;  %6345 = vst [vmem:[%s9414_s24 + $0x10] sm:$0xff] (!%p6829_p2), %v15407_v23  ;;  %6351 = vst [vmem:[%s9414_s24 + $0x40] sm:$0xff] (!%p6829_p2), %v15413_v49 }
0x1616   : > { %v6283_v59 = vmul.f32 0.01, %v6251_v20  ;;  %v6252_v28 = vadd.f32 %v6236_v10, %v13722_v54  ;;  %v8631_v46 = vpop.f32.mrb[188].mxu1  ;;  %6352 = vst [vmem:[%s9414_s24 + $0x48] sm:$0xff] (!%p6829_p2), %v15414_v17  ;;  %6353 = vst [vmem:[%s9414_s24 + $0x50] sm:$0xff] (!%p6829_p2), %v15415_v61 }
0x1617   : > { %v6301_v26 = vadd.f32 %v6285_v32, %v6269_v36  ;;  %v6286_v2 = vmul.f32 0.01, %v6254_v6  ;;  %v6173_v9 = vadd.f32 %v13629_v7, %v8631_v46  ;;  %v6164_v45 = vpop.f32.mrb[189].mxu1  ;;  %6354 = vst [vmem:[%s9414_s24 + $0x58] sm:$0xff] (!%p6829_p2), %v15416_v27  ;;  %v15417_v36 = vld [vmem:[#allocation71_spill] sm:$0xff] (!%p6829_p2)  ;;  %v15418_v32 = vld [vmem:[#allocation54_spill] sm:$0xff] (!%p6829_p2) }
0x1618   : > { %v6299_v8 = vadd.f32 %v6283_v59, %v6267_v44  ;;  %v6284_v50 = vmul.f32 0.01, %v6252_v28  ;;  %v6165_v52 = vadd.f32 %v13629_v7, %v6164_v45  ;;  %v8632_v3 = vpop.f32.mrb[190].mxu1  ;;  %6355 = vst [vmem:[%s9414_s24 + $0x60] sm:$0xff] (!%p6829_p2), %v15417_v36  ;;  %6356 = vst [vmem:[%s9414_s24 + $0x68] sm:$0xff] (!%p6829_p2), %v15418_v32  ;;  %v15419_v6 = vld [vmem:[#allocation61_spill] sm:$0xff] (!%p6829_p2) }
0x1619   : > { %6317 = vst [vmem:[#allocation2 + $0x50] sm:$0xff] %v6301_v26  ;;  %v6302_v13 = vadd.f32 %v6286_v2, %v6270_v25  ;;  %v6241_v54 = vmul.f32 0.6666667, %v6173_v9  ;;  %v6176_v63 = vadd.f32 %v13629_v7, %v8632_v3  ;;  %v6167_v19 = vpop.f32.mrb[191].mxu1  ;;  %6337 = vst [vmem:[%s9412_s16 + $0x50] sm:$0xff] (!%p6829_p2), %v6301_v26 }
0x161a   : > { %6315 = vst [vmem:[#allocation2 + $0x40] sm:$0xff] %v6299_v8  ;;  %v6300_v42 = vadd.f32 %v6284_v50, %v6268_v47  ;;  %v6239_v16 = vmul.f32 0.6666667, %v6165_v52  ;;  %v6168_v21 = vadd.f32 %v13629_v7, %v6167_v19  ;;  %6335 = vst [vmem:[%s9412_s16 + $0x40] sm:$0xff] (!%p6829_p2), %v6299_v8 }
0x161b   : > { %6318 = vst [vmem:[#allocation2 + $0x58] sm:$0xff] %v6302_v13  ;;  %v6257_v34 = vadd.f32 %v6241_v54, %v13736_v48  ;;  %v6242_v38 = vmul.f32 0.6666667, %v6176_v63  ;;  %v15403_v48 = vld [vmem:[#allocation40_spill] sm:$0xff]  ;;  %6338 = vst [vmem:[%s9412_s16 + $0x58] sm:$0xff] (!%p6829_p2), %v6302_v13 }
0x161c   : > { %6316 = vst [vmem:[#allocation2 + $0x48] sm:$0xff] %v6300_v42  ;;  %v6255_v30 = vadd.f32 %v6239_v16, %v13740_v33  ;;  %v6240_v0 = vmul.f32 0.6666667, %v6168_v21  ;;  %v6274_v11 = vadd.f32 %v15403_v48, %v15376_v22  ;;  %v15404_v33 = vld [vmem:[#allocation38_spill] sm:$0xff]  ;;  %6336 = vst [vmem:[%s9412_s16 + $0x48] sm:$0xff] (!%p6829_p2), %v6300_v42  ;;  %v15406_v22 = vld [vmem:[#allocation36_spill] sm:$0xff] (!%p6829_p2) }
0x161d   : > { %v6289_v1 = vmul.f32 0.01, %v6257_v34  ;;  %v6258_v5 = vadd.f32 %v6242_v38, %v13744_v55  ;;  %v6272_v53 = vadd.f32 %v15404_v33, %v15378_v18  ;;  %6344 = vst [vmem:[%s9414_s24 + $0x8] sm:$0xff] (!%p6829_p2), %v15406_v22  ;;  %v15408_v18 = vld [vmem:[#allocation65_spill] sm:$0xff] (!%p6829_p2)  ;;  %6357 = vst [vmem:[%s9414_s24 + $0x70] sm:$0xff] (!%p6829_p2), %v15419_v6 }
0x161e   : > { %v6287_v62 = vmul.f32 0.01, %v6255_v30  ;;  %v6256_v7 = vadd.f32 %v6240_v0, %v13746_v37  ;;  %6326 = sbr.rel (%p6829_p2) target bundleno = 5669 (0x1625), region = 64  ;;  %v15405_v37 = vld [vmem:[#allocation53_spill] sm:$0xff] (!%p6829_p2)  ;;  %6346 = vst [vmem:[%s9414_s24 + $0x18] sm:$0xff] (!%p6829_p2), %v15408_v18 }
0x161f   : > { %v6305_v15 = vadd.f32 %v6289_v1, %v6273_v60  ;;  %v6290_v20 = vmul.f32 0.01, %v6258_v5  ;;  %6343 = vst [vmem:[%s9414_s24] sm:$0xff] (!%p6829_p2), %v15405_v37 }
0x1620   : > { %v6303_v10 = vadd.f32 %v6287_v62, %v6271_v39  ;;  %v6288_v41 = vmul.f32 0.01, %v6256_v7 }
0x1621   : > { %6321 = vst [vmem:[#allocation2 + $0x70] sm:$0xff] %v6305_v15  ;;  %v6306_v24 = vadd.f32 %v6290_v20, %v6274_v11  ;;  %6341 = vst [vmem:[%s9412_s16 + $0x70] sm:$0xff] (!%p6829_p2), %v6305_v15 }
0x1622   : > { %6319 = vst [vmem:[#allocation2 + $0x60] sm:$0xff] %v6303_v10  ;;  %v6304_v55 = vadd.f32 %v6288_v41, %v6272_v53  ;;  %6339 = vst [vmem:[%s9412_s16 + $0x60] sm:$0xff] (!%p6829_p2), %v6303_v10 }
0x1623   : > { %6322 = vst [vmem:[#allocation2 + $0x78] sm:$0xff] %v6306_v24  ;;  %6342 = vst [vmem:[%s9412_s16 + $0x78] sm:$0xff] (!%p6829_p2), %v6306_v24 }
0x1624   : > { %6320 = vst [vmem:[#allocation2 + $0x68] sm:$0xff] %v6304_v55  ;;  %6340 = vst [vmem:[%s9412_s16 + $0x68] sm:$0xff] (!%p6829_p2), %v6304_v55 }
0x1625 PF: > { %s15421_s27 = sld [smem:[#allocation25_spill]]  ;;  %s15422_s15 = sld [smem:[#allocation30_spill]] }
0x1626   : > { %s15423_s2 = sld [smem:[#allocation85_spill]]  ;;  %s6378_s11 = sshll.u32 %s9412_s16, 4  ;;  %s13910_s11 = int_to_ptr.vmem [resolvable:$true] %s6378_s11 }
0x1627   : > { %s6360_s5 = scalar_lea.sflag [#allocation5], %s9390_s28  ;;  %s8924_s12 = scalar_lea.vmem %s13910_s11, 2048 }
0x1628   : > { %p8925_p8 = scmp.ne.s32.totalorder %s13910_s11, %s8924_s12  ;;  %s9106_s13 = smov [#allocation10]  }
0x1629   : > { %s8928_s19 = sshll.u32 %s9106_s13, 4  ;;  %s8929_s19 = int_to_ptr.vmem [resolvable:$false] %s8928_s19 }
0x162a   : > { %s8930_s14 = scalar_lea.vmem %s8929_s19, 4096  ;;  %p8931_p7 = scmp.lt.s32.totalorder %s13910_s11, %s8929_s19 }
0x162b   : > { %s6841_s17 = sshll.u32 %s15421_s27, 11  ;;  %p15424_p9 = scmp.ne.s32.totalorder %s15422_s15, 0 }
0x162c   : > { %s13907_s0 = scalar_lea.hbm %s15423_s2, %s6841_s17  ;;  %p8932_p13 = scmp.lt.s32.totalorder %s8930_s14, %s8924_s12 }
0x162d   : > { %p8926_p4 = pnand %p8925_p8, %p15424_p9 }
0x162e   : > { %p8933_p6 = por %p8932_p13, %p8931_p7 }
0x162f   : > { %p8927_p3 = pneg %p8926_p4 }
0x1631   : > { %p8934_p12 = pnand %p8933_p6, %p8927_p3 }
0x1633   : > { %8937 = shalt.err (!%p8934_p12)
}
0x1634   : > { %s8938_s16 = scalar_lea.hbm %s13907_s0, 2048  ;;  %s8942_s10 = scalar_lea.hbm %s15423_s2, 4096 }
0x1635   : > { %p8939_p10 = scmp.ne.s32.totalorder %s13907_s0, %s8938_s16  ;;  %p8943_p0 = scmp.lt.u32.totalorder %s13907_s0, %s15423_s2 }
0x1636   : > { %p8944_p5 = scmp.lt.u32.totalorder %s8942_s10, %s8938_s16  ;;  %p8946_p8 = scmp.lt.u32.totalorder %s8938_s16, %s13907_s0 }
0x1637   : > { %p8940_p1 = pnand %p8939_p10, %p15424_p9 }
0x1638   : > { %p8945_p2 = por %p8944_p5, %p8943_p0 }
0x1639   : > { %p8941_p11 = pneg %p8940_p1 }
0x163a   : > { %p8947_p4 = por %p8946_p8, %p8945_p2 }
0x163c   : > { %p8948_p3 = pnand %p8947_p4, %p8941_p11 }
0x163e   : > { %8951 = shalt.err (!%p8948_p3)
}
0x163f   : > { %s9107_s20 = smov 128   ;;  %s9108_s12 = smov 8  }
0x1640   : > { %8657 = dma.vmem_to_hbm [thread:$0]  (%p15424_p9), %s13910_s11, 2048, %s13907_s0, %s6360_s5, %s9107_s20, %s9107_s20, %s9108_s12  }
0x1641   : > { %s15425_s14 = sld [smem:[#allocation86_spill]]  ;;  %s6394_s6 = sshll.u32 %s9414_s24, 4  ;;  %s13947_s6 = int_to_ptr.vmem [resolvable:$true] %s6394_s6 }
0x1642   : > { %s6365_s8 = scalar_lea.sflag [#allocation12], %s9390_s28  ;;  %s8952_s10 = scalar_lea.vmem %s13947_s6, 2048 }
0x1643   : > { %p8953_p7 = scmp.ne.s32.totalorder %s13947_s6, %s8952_s10  ;;  %s9109_s18 = smov [#allocation11]  }
0x1644   : > { %s8956_s0 = sshll.u32 %s9109_s18, 4  ;;  %s8957_s0 = int_to_ptr.vmem [resolvable:$false] %s8956_s0 }
0x1645   : > { %p8954_p13 = pnand %p8953_p7, %p15424_p9  ;;  %s8958_s27 = scalar_lea.vmem %s8957_s0, 4096 }
0x1646   : > { %p8959_p12 = scmp.lt.s32.totalorder %s13947_s6, %s8957_s0  ;;  %p8960_p10 = scmp.lt.s32.totalorder %s8958_s27, %s8952_s10 }
0x1647   : > { %s13944_s16 = scalar_lea.hbm %s15425_s14, %s6841_s17  ;;  %p8955_p6 = pneg %p8954_p13 }
0x1648   : > { %p8961_p1 = por %p8960_p10, %p8959_p12 }
0x164a   : > { %p8962_p11 = pnand %p8961_p1, %p8955_p6 }
0x164c   : > { %8965 = shalt.err (!%p8962_p11)
}
0x164d   : > { %s8966_s24 = scalar_lea.hbm %s13944_s16, 2048  ;;  %s8970_s5 = scalar_lea.hbm %s15425_s14, 4096 }
0x164e   : > { %p8967_p0 = scmp.ne.s32.totalorder %s13944_s16, %s8966_s24  ;;  %p8971_p8 = scmp.lt.u32.totalorder %s13944_s16, %s15425_s14 }
0x164f   : > { %p8972_p4 = scmp.lt.u32.totalorder %s8970_s5, %s8966_s24  ;;  %p8974_p7 = scmp.lt.u32.totalorder %s8966_s24, %s13944_s16 }
0x1650   : > { %p8968_p5 = pnand %p8967_p0, %p15424_p9 }
0x1651   : > { %p8973_p3 = por %p8972_p4, %p8971_p8 }
0x1652   : > { %p8969_p2 = pneg %p8968_p5 }
0x1653   : > { %p8975_p13 = por %p8974_p7, %p8973_p3 }
0x1655   : > { %p8976_p6 = pnand %p8975_p13, %p8969_p2 }
0x1657   : > { %8979 = shalt.err (!%p8976_p6)
}
0x1658   : > { %8658 = dma.vmem_to_hbm [thread:$0]  (%p15424_p9), %s13947_s6, 2048, %s13944_s16, %s6365_s8, %s9107_s20, %s9107_s20, %s9108_s12  }
0x1659 PF: > { %s15426_s19 = sld [smem:[#allocation24_spill]]  ;;  %s15427_s10 = sld [smem:[#allocation31_spill]] }
0x165a   : > { %p8674_p12 = scmp.ge.s32.totalorder %s9086_s7, 2 }
0x165f   : > { %s6409_s18 = sand.u32 1, %s15426_s19   ;;  %p15428_p10 = scmp.ne.s32.totalorder %s15427_s10, 0 }
0x1660   : > { %s6410_s0 = scalar_lea.sflag [#allocation5], %s6409_s18 }
0x1661   : > { %p8666_p1 = pnand %p8674_p12, %p15428_p10 }
0x1663   : > { %9037 = dma.done.wait (!%p8666_p1), %s6410_s0, 2048  }
0x1664   : > { %9039 = vsyncadd (!%p8666_p1), %s6410_s0, 4294965248  ;;  %s6419_s15 = scalar_lea.sflag [#allocation12], %s6409_s18 }
0x1665   : > { %9041 = dma.done.wait (!%p8666_p1), %s6419_s15, 2048  }
0x1666   : > { %9043 = vsyncadd (!%p8666_p1), %s6419_s15, 4294965248  ;;  %s27_s7 = sadd.s32 1, %s9086_s7   ;;  %s15429_s28 = sld [smem:[#allocation29_spill]] }
0x1667   : > { %p24_p11 = scmp.ge.s32.totalorder %s27_s7, 6   ;;  %s15430_s20 = sld [smem:[#allocation28_spill]] }
0x1668   : > { %s15431_s12 = sld [smem:[#allocation26_spill]]  ;;  %s15432_s16 = sld [smem:[#allocation27_spill]] }
0x1669   : > { %s15433_s21 = smov %s9050_s22  ;;  %s15434_s22 = smov %s9054_s23 }
0x166a   : > { %s15436_s24 = smov %s9062_s25  ;;  %s15437_s25 = smov %s9066_s26 }
0x166b   : > { %s15439_s27 = smov %s9078_s29  ;;  %26 = sbr.rel (!%p24_p11) target bundleno = 17 (0x11), region = 160 }
0x166c   : > { %s15435_s23 = smov %s15429_s28  ;;  %s15440_s28 = smov %s9082_s30 }
0x166d   : > { %s15438_s26 = smov %s15430_s20 }
0x166e   : > { %s15441_s29 = smov %s15431_s12  ;;  %s15442_s30 = smov %s15432_s16 }
0x1672   :  { %6424 = vsyncpa [#allocation4], 1 }
0x1673   :  { %6426 = vsyncpa [#allocation4 + $0x1], 1 }
0x1674   :  { %6427 = vsyncpa [#allocation7], 1 }
0x1675   :  { %6428 = vsyncpa [#allocation5], 1 }
0x1676   :  { %6430 = vsyncpa [#allocation5 + $0x1], 1 }
0x1677   :  { %6431 = vsyncpa [#allocation12], 1 }
0x1678   :  { %6433 = vsyncpa [#allocation12 + $0x1], 1 }

</bundles_post_ra>
